<compile_context>
chip_gen: v7x
topology: tpu7x:2x2x1
jax: 0.10.0
libtpu: 0.0.40
codegen_flags: <defaults>
</compile_context>

<pallas_src>
import numpy as np
import jax
import jax.numpy as jnp
from jax import lax
from jax.experimental import pallas as pl
from jax.experimental.pallas import tpu as pltpu


# ----------------------------------------------------------------------------
# Bounded-range sine (replaces jnp.sin inside the kernel).
#
# After omega folding, |z| <= ~55 rad for this architecture (first layer
# <= 30*(1 + 1/sqrt(2)) ~ 51 rad, hidden layers <= ~20 rad).  One Cody-Waite
# reduction step z -> r in [-pi/2, pi/2] plus an odd degree-7 minimax
# polynomial; sign flip restores sin(z) = (-1)^q * sin(z - q*pi).
# ----------------------------------------------------------------------------
_INV_PI = 0.3183098861837907
_PI_A = 3.1414794921875            # f32-exact leading bits of pi
_PI_B = 1.1315941810607910156e-4   # f32-exact next bits
_PI_C = 1.9841872589410058936e-9   # residual
_S7 = 2.6083159809786593541503e-06
_S5 = -0.0001981069071916863322258
_S3 = 0.00833307858556509017944336
_S1 = -0.166666597127914428710938


def _fast_sin(z):
    """Accurate sine for |z| up to a few hundred radians (f32)."""
    q = jnp.floor(z * _INV_PI + 0.5)           # nearest integer multiple of pi
    r = z - q * _PI_A                          # Cody-Waite 3-term reduction
    r = r - q * _PI_B
    r = r - q * _PI_C
    s = r * r
    u = _S7
    u = u * s + _S5
    u = u * s + _S3
    u = u * s + _S1
    p = r + r * (s * u)                        # sin(r) on [-pi/2, pi/2]
    parity = q - 2.0 * jnp.floor(q * 0.5)      # 0.0 or 1.0  -> (-1)**q
    return p * (1.0 - 2.0 * parity)


# ----------------------------------------------------------------------------
# Kernel
# ----------------------------------------------------------------------------
def make_siren_kernel(outermost_linear, n_layers, tc, n_chunks):
    """Fused kernel: chain of (W @ h + b) -> sin(.) layers, batch on lanes.

    The [*, tm] tile is processed in `n_chunks` sub-chunks of `tc` lanes so the
    live activations stay within the vector-register file.
    """

    def kernel(*refs):
        x_ref = refs[0]                                 # [in_features, tm]
        param_refs = refs[1:1 + 2 * n_layers]
        o_ref = refs[1 + 2 * n_layers]                  # [out_features, tm]

        # Weights/biases are KB-scale and resident (constant block index);
        # load them once per grid step.
        ws = [param_refs[2 * l][...] for l in range(n_layers)]
        bs = [param_refs[2 * l + 1][...] for l in range(n_layers)]

        def chunk(start):
            h = x_ref[:, pl.ds(start, tc)].astype(jnp.float32)     # [in_f, tc]
            for l in range(n_layers):
                # z = W @ h + b on the MXU (omega already folded into w, b)
                z = jnp.dot(ws[l], h, preferred_element_type=jnp.float32) + bs[l]
                if outermost_linear and l == n_layers - 1:
                    h = z                                           # final Linear
                else:
                    h = _fast_sin(z)
            o_ref[:, pl.ds(start, tc)] = h.astype(o_ref.dtype)      # lane-dense

        if n_chunks == 1:
            chunk(0)
        else:
            def body(c, carry):
                chunk(pl.multiple_of(c * tc, tc))
                return carry
            lax.fori_loop(0, n_chunks, body, 0, unroll=(n_chunks <= 8))

    return kernel


# ----------------------------------------------------------------------------
# Host-side wrapper
# ----------------------------------------------------------------------------
def _cdiv(a, b):
    return -(-a // b)


def _round_up(x, m):
    return _cdiv(x, m) * m


def _pick_tm(N, max_tm=4096, lane_chunk=512):
    """Pick the batch tile: big (amortize ~0.35us/step), even tile count for
    v7x's two TensorCores, small padded remainder."""
    if N <= lane_chunk:
        return max(128, _round_up(N, 128))
    if N <= 2 * lane_chunk:
        return _round_up(_cdiv(N, 2), 128)          # 2 tiles for small N
    n_tiles = max(2, _cdiv(N, max_tm))
    if n_tiles % 2:
        n_tiles += 1                                # keep tile count even
    return _round_up(_cdiv(N, n_tiles), lane_chunk)


def siren_forward(coords, folded_params, outermost_linear,
                  tm=None, max_tm=4096, lane_chunk=512):
    """Pallas-backed Siren.forward: returns (output, coords), like the torch
    module.  coords: [N, in_features]; batch rides the lane axis internally."""
    N, in_f = coords.shape
    n_layers = len(folded_params) // 2
    out_f = folded_params[-2].shape[0]

    if tm is None:
        tm = _pick_tm(N, max_tm=max_tm, lane_chunk=lane_chunk)
    tc = lane_chunk if (tm % lane_chunk == 0 and tm >= lane_chunk) else tm
    n_chunks = tm // tc

    n_tiles = _cdiv(N, tm)
    n_pad = n_tiles * tm

    x_t = coords.T                                  # [in_f, N] (layout plumbing)
    if n_pad != N:
        x_t = jnp.pad(x_t, ((0, 0), (0, n_pad - N)))

    kernel = make_siren_kernel(outermost_linear, n_layers, tc, n_chunks)

    # Advisory cost estimate for XLA scheduling around the custom call.
    dims = [in_f] + [w.shape[0] for w in folded_params[0::2]]
    n_sine_out = sum(dims[l + 1] for l in range(n_layers)
                     if not (outermost_linear and l == n_layers - 1))
    cost = pl.CostEstimate(
        flops=2 * n_pad * sum(dims[l] * dims[l + 1] for l in range(n_layers)),
        transcendentals=n_pad * n_sine_out,
        bytes_accessed=4 * n_pad * (in_f + out_f)
        + 4 * sum(int(np.prod(p.shape)) for p in folded_params),
    )

    def build_and_call(single_buffer_params):
        in_specs = [pl.BlockSpec((in_f, tm), lambda i: (0, i))]
        for p in folded_params:                     # resident weights/biases
            if single_buffer_params:
                in_specs.append(pl.BlockSpec(p.shape, lambda i: (0, 0),
                                             pipeline_mode=pl.Buffered(1)))
            else:
                in_specs.append(pl.BlockSpec(p.shape, lambda i: (0, 0)))
        out_specs = pl.BlockSpec((out_f, tm), lambda i: (0, i))
        return pl.pallas_call(
            kernel,
            out_shape=jax.ShapeDtypeStruct((out_f, n_pad), coords.dtype),
            grid_spec=pltpu.PrefetchScalarGridSpec(
                num_scalar_prefetch=0,
                grid=(n_tiles,),
                in_specs=in_specs,
                out_specs=out_specs,
            ),
            compiler_params=pltpu.CompilerParams(
                dimension_semantics=("parallel",)),
            cost_estimate=cost,
        )(x_t, *folded_params)

    try:
        out_t = build_and_call(True)
    except Exception:
        # Fallback if this JAX build rejects Buffered(1) on top-level specs.
        out_t = build_and_call(False)

    out = out_t[:, :N].T                            # [N, out_features]
    return out, coords


# ----------------------------------------------------------------------------
# Parameter init (torch-equivalent), omega folding, pure-JAX reference
# ----------------------------------------------------------------------------
def init_siren_params(key, in_features, hidden_features, hidden_layers, out_features,
                      outermost_linear, first_omega_0, hidden_omega_0):
    """Deterministic init mirroring the torch module's weight ranges.

    Weights (stored [out, in], torch layout):
      first layer  U(-1/in, 1/in);  others U(-sqrt(6/in)/omega, sqrt(6/in)/omega).
    Biases (stored [out, 1]): default nn.Linear init U(-1/sqrt(in), 1/sqrt(in)).
    Returns UNfolded params plus per-layer omegas.
    """
    dims = [in_features] + [hidden_features] * (hidden_layers + 1) + [out_features]
    n_layers = hidden_layers + 2
    params, omegas = [], []
    for l in range(n_layers):
        fan_in, fan_out = dims[l], dims[l + 1]
        key, kw, kb = jax.random.split(key, 3)
        if l == 0:
            w_bound = 1.0 / fan_in
        else:
            w_bound = float(np.sqrt(6.0 / fan_in) / hidden_omega_0)
        w = jax.random.uniform(kw, (fan_out, fan_in), jnp.float32, -w_bound, w_bound)
        b_bound = float(1.0 / np.sqrt(fan_in))
        b = jax.random.uniform(kb, (fan_out, 1), jnp.float32, -b_bound, b_bound)
        params += [w, b]
        omegas.append(float(first_omega_0) if l == 0 else float(hidden_omega_0))
    return params, omegas


def fold_omegas(params, omegas, outermost_linear):
    """One-time constant fold: sin(omega*(xW+b)) == sin(x*(omega W) + omega b)."""
    n_layers = len(params) // 2
    folded = []
    for l in range(n_layers):
        w, b = params[2 * l], params[2 * l + 1]
        if outermost_linear and l == n_layers - 1:
            folded += [w, b]
        else:
            folded += [omegas[l] * w, omegas[l] * b]
    return folded


def siren_reference(coords, params, omegas, outermost_linear):
    """Pure-JAX reference (torch semantics, unfolded params, jnp.sin)."""
    h = coords
    n_layers = len(params) // 2
    for l in range(n_layers):
        w, b = params[2 * l], params[2 * l + 1]        # [out,in], [out,1]
        z = h @ w.T + b.T
        if outermost_linear and l == n_layers - 1:
            h = z
        else:
            h = jnp.sin(omegas[l] * z)
    return h


if __name__ == "__main__":
    # Small Siren config: 2-D coords -> 32 hidden, 2 hidden layers -> 1 output,
    # outermost_linear=True (typical implicit-field setup).
    in_features, hidden_features, hidden_layers, out_features = 2, 32, 2, 1
    outermost_linear = True
    first_omega_0, hidden_omega_0 = 30.0, 30.0

    key = jax.random.PRNGKey(0)
    key, kc = jax.random.split(key)
    # N chosen so the auto tile picker gives 2 tiles of tm=1024 (both v7x cores
    # busy), 2 in-kernel lane chunks of 512, and a small padded remainder.
    N = 2000
    coords = jax.random.uniform(kc, (N, in_features), jnp.float32, -1.0, 1.0)

    params, omegas = init_siren_params(
        key, in_features, hidden_features, hidden_layers, out_features,
        outermost_linear, first_omega_0, hidden_omega_0)
    folded_params = fold_omegas(params, omegas, outermost_linear)

    out, coords_out = siren_forward(coords, folded_params, outermost_linear)
    jax.block_until_ready(out)

    ref = siren_reference(coords, params, omegas, outermost_linear)
    assert out.shape == (N, out_features)
    assert coords_out.shape == coords.shape
    max_err = float(jnp.max(jnp.abs(out - ref)))
    assert jnp.allclose(out, ref, atol=5e-4, rtol=5e-4), (
        f"mismatch vs reference (max abs err {max_err:.3e})")

    # TODO(synk): the torch forward also sets requires_grad on coords for later
    # gradient queries; autograd bookkeeping has no Pallas equivalent and is
    # handled by JAX transformations outside the kernel.
    print("KERNEL_OK")
</pallas_src>

<mosaic_0001>
module attributes {stable_mosaic.version = 11 : i64} {
  func.func @kernel(%arg0: i32, %arg1: memref<2x1024xf32, #tpu.memory_space<vmem>>, %arg2: memref<32x2xf32, #tpu.memory_space<vmem>>, %arg3: memref<32x1xf32, #tpu.memory_space<vmem>>, %arg4: memref<32x32xf32, #tpu.memory_space<vmem>>, %arg5: memref<32x1xf32, #tpu.memory_space<vmem>>, %arg6: memref<32x32xf32, #tpu.memory_space<vmem>>, %arg7: memref<32x1xf32, #tpu.memory_space<vmem>>, %arg8: memref<1x32xf32, #tpu.memory_space<vmem>>, %arg9: memref<1x1xf32, #tpu.memory_space<vmem>>, %arg10: memref<1x1024xf32, #tpu.memory_space<vmem>>) attributes {dimension_semantics = [#tpu.dimension_semantics<parallel>], iteration_bounds = array<i64: 2>, scalar_prefetch = 0 : i64, scratch_operands = 0 : i64, tpu.core_type = #tpu.core_type<tc>, window_params = [{transform_indices = @transform_0, window_bounds = array<i64: 2, 1024>}, {pipeline_mode = #tpu.pipeline_mode<synchronous>, transform_indices = @transform_1, window_bounds = array<i64: 32, 2>}, {pipeline_mode = #tpu.pipeline_mode<synchronous>, transform_indices = @transform_2, window_bounds = array<i64: 32, 1>}, {pipeline_mode = #tpu.pipeline_mode<synchronous>, transform_indices = @transform_3, window_bounds = array<i64: 32, 32>}, {pipeline_mode = #tpu.pipeline_mode<synchronous>, transform_indices = @transform_4, window_bounds = array<i64: 32, 1>}, {pipeline_mode = #tpu.pipeline_mode<synchronous>, transform_indices = @transform_5, window_bounds = array<i64: 32, 32>}, {pipeline_mode = #tpu.pipeline_mode<synchronous>, transform_indices = @transform_6, window_bounds = array<i64: 32, 1>}, {pipeline_mode = #tpu.pipeline_mode<synchronous>, transform_indices = @transform_7, window_bounds = array<i64: 1, 32>}, {pipeline_mode = #tpu.pipeline_mode<synchronous>, transform_indices = @transform_8, window_bounds = array<i64: 1, 1>}, {transform_indices = @transform_9, window_bounds = array<i64: 1, 1024>}]} {
    %c0 = arith.constant 0 : index
    %c0_0 = arith.constant 0 : index
    %0 = vector.load %arg2[%c0, %c0_0] : memref<32x2xf32, #tpu.memory_space<vmem>>, vector<32x2xf32>
    %c0_1 = arith.constant 0 : index
    %c0_2 = arith.constant 0 : index
    %1 = vector.load %arg4[%c0_1, %c0_2] : memref<32x32xf32, #tpu.memory_space<vmem>>, vector<32x32xf32>
    %c0_3 = arith.constant 0 : index
    %c0_4 = arith.constant 0 : index
    %2 = vector.load %arg6[%c0_3, %c0_4] : memref<32x32xf32, #tpu.memory_space<vmem>>, vector<32x32xf32>
    %c0_5 = arith.constant 0 : index
    %c0_6 = arith.constant 0 : index
    %3 = vector.load %arg8[%c0_5, %c0_6] : memref<1x32xf32, #tpu.memory_space<vmem>>, vector<1x32xf32>
    %c0_7 = arith.constant 0 : index
    %c0_8 = arith.constant 0 : index
    %4 = vector.load %arg3[%c0_7, %c0_8] : memref<32x1xf32, #tpu.memory_space<vmem>>, vector<32x1xf32>
    %c0_9 = arith.constant 0 : index
    %c0_10 = arith.constant 0 : index
    %5 = vector.load %arg5[%c0_9, %c0_10] : memref<32x1xf32, #tpu.memory_space<vmem>>, vector<32x1xf32>
    %c0_11 = arith.constant 0 : index
    %c0_12 = arith.constant 0 : index
    %6 = vector.load %arg7[%c0_11, %c0_12] : memref<32x1xf32, #tpu.memory_space<vmem>>, vector<32x1xf32>
    %c0_13 = arith.constant 0 : index
    %c0_14 = arith.constant 0 : index
    %7 = vector.load %arg9[%c0_13, %c0_14] : memref<1x1xf32, #tpu.memory_space<vmem>>, vector<1x1xf32>
    %c0_i32 = arith.constant 0 : i32
    %c512_i32 = arith.constant 512 : i32
    %8 = arith.muli %c0_i32, %c512_i32 : i32
    %9 = tpu.assume_multiple %8, 512 : i32
    %c0_15 = arith.constant 0 : index
    %10 = arith.index_cast %9 : i32 to index
    %11 = vector.load %arg1[%c0_15, %10] : memref<2x1024xf32, #tpu.memory_space<vmem>>, vector<2x512xf32>
    %cst = arith.constant dense<0.000000e+00> : vector<32x512xf32>
    %12 = tpu.matmul %0, %11, %cst {dimension_numbers = #tpu.dot_dimension_numbers<[1], [0], [0], [1], [0, 0, 1, 1], [], []>} : vector<32x2xf32>, vector<2x512xf32>, vector<32x512xf32> -> vector<32x512xf32>
    %13 = vector.broadcast %4 : vector<32x1xf32> to vector<32x512xf32>
    %14 = arith.addf %12, %13 : vector<32x512xf32>
    %cst_16 = arith.constant 0.318309873 : f32
    %15 = vector.broadcast %cst_16 : f32 to vector<32x512xf32>
    %16 = arith.mulf %14, %15 : vector<32x512xf32>
    %cst_17 = arith.constant 5.000000e-01 : f32
    %17 = vector.broadcast %cst_17 : f32 to vector<32x512xf32>
    %18 = arith.addf %16, %17 : vector<32x512xf32>
    %19 = math.floor %18 : vector<32x512xf32>
    %cst_18 = arith.constant 3.14147949 : f32
    %20 = vector.broadcast %cst_18 : f32 to vector<32x512xf32>
    %21 = arith.mulf %19, %20 : vector<32x512xf32>
    %22 = arith.subf %14, %21 : vector<32x512xf32>
    %cst_19 = arith.constant 1.13159418E-4 : f32
    %23 = vector.broadcast %cst_19 : f32 to vector<32x512xf32>
    %24 = arith.mulf %19, %23 : vector<32x512xf32>
    %25 = arith.subf %22, %24 : vector<32x512xf32>
    %cst_20 = arith.constant 1.98418726E-9 : f32
    %26 = vector.broadcast %cst_20 : f32 to vector<32x512xf32>
    %27 = arith.mulf %19, %26 : vector<32x512xf32>
    %28 = arith.subf %25, %27 : vector<32x512xf32>
    %29 = arith.mulf %28, %28 : vector<32x512xf32>
    %cst_21 = arith.constant 2.60831598E-6 : f32
    %30 = vector.broadcast %cst_21 : f32 to vector<32x512xf32>
    %31 = arith.mulf %30, %29 : vector<32x512xf32>
    %cst_22 = arith.constant -1.98106907E-4 : f32
    %32 = vector.broadcast %cst_22 : f32 to vector<32x512xf32>
    %33 = arith.addf %31, %32 : vector<32x512xf32>
    %34 = arith.mulf %33, %29 : vector<32x512xf32>
    %cst_23 = arith.constant 0.00833307859 : f32
    %35 = vector.broadcast %cst_23 : f32 to vector<32x512xf32>
    %36 = arith.addf %34, %35 : vector<32x512xf32>
    %37 = arith.mulf %36, %29 : vector<32x512xf32>
    %cst_24 = arith.constant -0.166666597 : f32
    %38 = vector.broadcast %cst_24 : f32 to vector<32x512xf32>
    %39 = arith.addf %37, %38 : vector<32x512xf32>
    %40 = arith.mulf %29, %39 : vector<32x512xf32>
    %41 = arith.mulf %28, %40 : vector<32x512xf32>
    %42 = arith.addf %28, %41 : vector<32x512xf32>
    %cst_25 = arith.constant 5.000000e-01 : f32
    %43 = vector.broadcast %cst_25 : f32 to vector<32x512xf32>
    %44 = arith.mulf %19, %43 : vector<32x512xf32>
    %45 = math.floor %44 : vector<32x512xf32>
    %cst_26 = arith.constant 2.000000e+00 : f32
    %46 = vector.broadcast %cst_26 : f32 to vector<32x512xf32>
    %47 = arith.mulf %46, %45 : vector<32x512xf32>
    %48 = arith.subf %19, %47 : vector<32x512xf32>
    %cst_27 = arith.constant 2.000000e+00 : f32
    %49 = vector.broadcast %cst_27 : f32 to vector<32x512xf32>
    %50 = arith.mulf %49, %48 : vector<32x512xf32>
    %cst_28 = arith.constant 1.000000e+00 : f32
    %51 = vector.broadcast %cst_28 : f32 to vector<32x512xf32>
    %52 = arith.subf %51, %50 : vector<32x512xf32>
    %53 = arith.mulf %42, %52 : vector<32x512xf32>
    %cst_29 = arith.constant dense<0.000000e+00> : vector<32x512xf32>
    %54 = tpu.matmul %1, %53, %cst_29 {dimension_numbers = #tpu.dot_dimension_numbers<[1], [0], [0], [1], [0, 0, 1, 1], [], []>} : vector<32x32xf32>, vector<32x512xf32>, vector<32x512xf32> -> vector<32x512xf32>
    %55 = vector.broadcast %5 : vector<32x1xf32> to vector<32x512xf32>
    %56 = arith.addf %54, %55 : vector<32x512xf32>
    %cst_30 = arith.constant 0.318309873 : f32
    %57 = vector.broadcast %cst_30 : f32 to vector<32x512xf32>
    %58 = arith.mulf %56, %57 : vector<32x512xf32>
    %cst_31 = arith.constant 5.000000e-01 : f32
    %59 = vector.broadcast %cst_31 : f32 to vector<32x512xf32>
    %60 = arith.addf %58, %59 : vector<32x512xf32>
    %61 = math.floor %60 : vector<32x512xf32>
    %cst_32 = arith.constant 3.14147949 : f32
    %62 = vector.broadcast %cst_32 : f32 to vector<32x512xf32>
    %63 = arith.mulf %61, %62 : vector<32x512xf32>
    %64 = arith.subf %56, %63 : vector<32x512xf32>
    %cst_33 = arith.constant 1.13159418E-4 : f32
    %65 = vector.broadcast %cst_33 : f32 to vector<32x512xf32>
    %66 = arith.mulf %61, %65 : vector<32x512xf32>
    %67 = arith.subf %64, %66 : vector<32x512xf32>
    %cst_34 = arith.constant 1.98418726E-9 : f32
    %68 = vector.broadcast %cst_34 : f32 to vector<32x512xf32>
    %69 = arith.mulf %61, %68 : vector<32x512xf32>
    %70 = arith.subf %67, %69 : vector<32x512xf32>
    %71 = arith.mulf %70, %70 : vector<32x512xf32>
    %cst_35 = arith.constant 2.60831598E-6 : f32
    %72 = vector.broadcast %cst_35 : f32 to vector<32x512xf32>
    %73 = arith.mulf %72, %71 : vector<32x512xf32>
    %cst_36 = arith.constant -1.98106907E-4 : f32
    %74 = vector.broadcast %cst_36 : f32 to vector<32x512xf32>
    %75 = arith.addf %73, %74 : vector<32x512xf32>
    %76 = arith.mulf %75, %71 : vector<32x512xf32>
    %cst_37 = arith.constant 0.00833307859 : f32
    %77 = vector.broadcast %cst_37 : f32 to vector<32x512xf32>
    %78 = arith.addf %76, %77 : vector<32x512xf32>
    %79 = arith.mulf %78, %71 : vector<32x512xf32>
    %cst_38 = arith.constant -0.166666597 : f32
    %80 = vector.broadcast %cst_38 : f32 to vector<32x512xf32>
    %81 = arith.addf %79, %80 : vector<32x512xf32>
    %82 = arith.mulf %71, %81 : vector<32x512xf32>
    %83 = arith.mulf %70, %82 : vector<32x512xf32>
    %84 = arith.addf %70, %83 : vector<32x512xf32>
    %cst_39 = arith.constant 5.000000e-01 : f32
    %85 = vector.broadcast %cst_39 : f32 to vector<32x512xf32>
    %86 = arith.mulf %61, %85 : vector<32x512xf32>
    %87 = math.floor %86 : vector<32x512xf32>
    %cst_40 = arith.constant 2.000000e+00 : f32
    %88 = vector.broadcast %cst_40 : f32 to vector<32x512xf32>
    %89 = arith.mulf %88, %87 : vector<32x512xf32>
    %90 = arith.subf %61, %89 : vector<32x512xf32>
    %cst_41 = arith.constant 2.000000e+00 : f32
    %91 = vector.broadcast %cst_41 : f32 to vector<32x512xf32>
    %92 = arith.mulf %91, %90 : vector<32x512xf32>
    %cst_42 = arith.constant 1.000000e+00 : f32
    %93 = vector.broadcast %cst_42 : f32 to vector<32x512xf32>
    %94 = arith.subf %93, %92 : vector<32x512xf32>
    %95 = arith.mulf %84, %94 : vector<32x512xf32>
    %cst_43 = arith.constant dense<0.000000e+00> : vector<32x512xf32>
    %96 = tpu.matmul %2, %95, %cst_43 {dimension_numbers = #tpu.dot_dimension_numbers<[1], [0], [0], [1], [0, 0, 1, 1], [], []>} : vector<32x32xf32>, vector<32x512xf32>, vector<32x512xf32> -> vector<32x512xf32>
    %97 = vector.broadcast %6 : vector<32x1xf32> to vector<32x512xf32>
    %98 = arith.addf %96, %97 : vector<32x512xf32>
    %cst_44 = arith.constant 0.318309873 : f32
    %99 = vector.broadcast %cst_44 : f32 to vector<32x512xf32>
    %100 = arith.mulf %98, %99 : vector<32x512xf32>
    %cst_45 = arith.constant 5.000000e-01 : f32
    %101 = vector.broadcast %cst_45 : f32 to vector<32x512xf32>
    %102 = arith.addf %100, %101 : vector<32x512xf32>
    %103 = math.floor %102 : vector<32x512xf32>
    %cst_46 = arith.constant 3.14147949 : f32
    %104 = vector.broadcast %cst_46 : f32 to vector<32x512xf32>
    %105 = arith.mulf %103, %104 : vector<32x512xf32>
    %106 = arith.subf %98, %105 : vector<32x512xf32>
    %cst_47 = arith.constant 1.13159418E-4 : f32
    %107 = vector.broadcast %cst_47 : f32 to vector<32x512xf32>
    %108 = arith.mulf %103, %107 : vector<32x512xf32>
    %109 = arith.subf %106, %108 : vector<32x512xf32>
    %cst_48 = arith.constant 1.98418726E-9 : f32
    %110 = vector.broadcast %cst_48 : f32 to vector<32x512xf32>
    %111 = arith.mulf %103, %110 : vector<32x512xf32>
    %112 = arith.subf %109, %111 : vector<32x512xf32>
    %113 = arith.mulf %112, %112 : vector<32x512xf32>
    %cst_49 = arith.constant 2.60831598E-6 : f32
    %114 = vector.broadcast %cst_49 : f32 to vector<32x512xf32>
    %115 = arith.mulf %114, %113 : vector<32x512xf32>
    %cst_50 = arith.constant -1.98106907E-4 : f32
    %116 = vector.broadcast %cst_50 : f32 to vector<32x512xf32>
    %117 = arith.addf %115, %116 : vector<32x512xf32>
    %118 = arith.mulf %117, %113 : vector<32x512xf32>
    %cst_51 = arith.constant 0.00833307859 : f32
    %119 = vector.broadcast %cst_51 : f32 to vector<32x512xf32>
    %120 = arith.addf %118, %119 : vector<32x512xf32>
    %121 = arith.mulf %120, %113 : vector<32x512xf32>
    %cst_52 = arith.constant -0.166666597 : f32
    %122 = vector.broadcast %cst_52 : f32 to vector<32x512xf32>
    %123 = arith.addf %121, %122 : vector<32x512xf32>
    %124 = arith.mulf %113, %123 : vector<32x512xf32>
    %125 = arith.mulf %112, %124 : vector<32x512xf32>
    %126 = arith.addf %112, %125 : vector<32x512xf32>
    %cst_53 = arith.constant 5.000000e-01 : f32
    %127 = vector.broadcast %cst_53 : f32 to vector<32x512xf32>
    %128 = arith.mulf %103, %127 : vector<32x512xf32>
    %129 = math.floor %128 : vector<32x512xf32>
    %cst_54 = arith.constant 2.000000e+00 : f32
    %130 = vector.broadcast %cst_54 : f32 to vector<32x512xf32>
    %131 = arith.mulf %130, %129 : vector<32x512xf32>
    %132 = arith.subf %103, %131 : vector<32x512xf32>
    %cst_55 = arith.constant 2.000000e+00 : f32
    %133 = vector.broadcast %cst_55 : f32 to vector<32x512xf32>
    %134 = arith.mulf %133, %132 : vector<32x512xf32>
    %cst_56 = arith.constant 1.000000e+00 : f32
    %135 = vector.broadcast %cst_56 : f32 to vector<32x512xf32>
    %136 = arith.subf %135, %134 : vector<32x512xf32>
    %137 = arith.mulf %126, %136 : vector<32x512xf32>
    %cst_57 = arith.constant dense<0.000000e+00> : vector<1x512xf32>
    %138 = tpu.matmul %3, %137, %cst_57 {dimension_numbers = #tpu.dot_dimension_numbers<[1], [0], [0], [1], [0, 0, 1, 1], [], []>} : vector<1x32xf32>, vector<32x512xf32>, vector<1x512xf32> -> vector<1x512xf32>
    %139 = vector.broadcast %7 : vector<1x1xf32> to vector<1x512xf32>
    %140 = arith.addf %138, %139 : vector<1x512xf32>
    %c0_58 = arith.constant 0 : index
    %141 = arith.index_cast %9 : i32 to index
    %142 = vector.load %arg10[%c0_58, %141] : memref<1x1024xf32, #tpu.memory_space<vmem>>, vector<1x512xf32>
    tpu.vector_store %arg10[%c0_58, %141], %140 {strides = array<i32>} : memref<1x1024xf32, #tpu.memory_space<vmem>>, vector<1x512xf32>,
    %c1_i32 = arith.constant 1 : i32
    %c512_i32_59 = arith.constant 512 : i32
    %143 = arith.muli %c1_i32, %c512_i32_59 : i32
    %144 = tpu.assume_multiple %143, 512 : i32
    %c0_60 = arith.constant 0 : index
    %145 = arith.index_cast %144 : i32 to index
    %146 = vector.load %arg1[%c0_60, %145] : memref<2x1024xf32, #tpu.memory_space<vmem>>, vector<2x512xf32>
    %cst_61 = arith.constant dense<0.000000e+00> : vector<32x512xf32>
    %147 = tpu.matmul %0, %146, %cst_61 {dimension_numbers = #tpu.dot_dimension_numbers<[1], [0], [0], [1], [0, 0, 1, 1], [], []>} : vector<32x2xf32>, vector<2x512xf32>, vector<32x512xf32> -> vector<32x512xf32>
    %148 = vector.broadcast %4 : vector<32x1xf32> to vector<32x512xf32>
    %149 = arith.addf %147, %148 : vector<32x512xf32>
    %cst_62 = arith.constant 0.318309873 : f32
    %150 = vector.broadcast %cst_62 : f32 to vector<32x512xf32>
    %151 = arith.mulf %149, %150 : vector<32x512xf32>
    %cst_63 = arith.constant 5.000000e-01 : f32
    %152 = vector.broadcast %cst_63 : f32 to vector<32x512xf32>
    %153 = arith.addf %151, %152 : vector<32x512xf32>
    %154 = math.floor %153 : vector<32x512xf32>
    %cst_64 = arith.constant 3.14147949 : f32
    %155 = vector.broadcast %cst_64 : f32 to vector<32x512xf32>
    %156 = arith.mulf %154, %155 : vector<32x512xf32>
    %157 = arith.subf %149, %156 : vector<32x512xf32>
    %cst_65 = arith.constant 1.13159418E-4 : f32
    %158 = vector.broadcast %cst_65 : f32 to vector<32x512xf32>
    %159 = arith.mulf %154, %158 : vector<32x512xf32>
    %160 = arith.subf %157, %159 : vector<32x512xf32>
    %cst_66 = arith.constant 1.98418726E-9 : f32
    %161 = vector.broadcast %cst_66 : f32 to vector<32x512xf32>
    %162 = arith.mulf %154, %161 : vector<32x512xf32>
    %163 = arith.subf %160, %162 : vector<32x512xf32>
    %164 = arith.mulf %163, %163 : vector<32x512xf32>
    %cst_67 = arith.constant 2.60831598E-6 : f32
    %165 = vector.broadcast %cst_67 : f32 to vector<32x512xf32>
    %166 = arith.mulf %165, %164 : vector<32x512xf32>
    %cst_68 = arith.constant -1.98106907E-4 : f32
    %167 = vector.broadcast %cst_68 : f32 to vector<32x512xf32>
    %168 = arith.addf %166, %167 : vector<32x512xf32>
    %169 = arith.mulf %168, %164 : vector<32x512xf32>
    %cst_69 = arith.constant 0.00833307859 : f32
    %170 = vector.broadcast %cst_69 : f32 to vector<32x512xf32>
    %171 = arith.addf %169, %170 : vector<32x512xf32>
    %172 = arith.mulf %171, %164 : vector<32x512xf32>
    %cst_70 = arith.constant -0.166666597 : f32
    %173 = vector.broadcast %cst_70 : f32 to vector<32x512xf32>
    %174 = arith.addf %172, %173 : vector<32x512xf32>
    %175 = arith.mulf %164, %174 : vector<32x512xf32>
    %176 = arith.mulf %163, %175 : vector<32x512xf32>
    %177 = arith.addf %163, %176 : vector<32x512xf32>
    %cst_71 = arith.constant 5.000000e-01 : f32
    %178 = vector.broadcast %cst_71 : f32 to vector<32x512xf32>
    %179 = arith.mulf %154, %178 : vector<32x512xf32>
    %180 = math.floor %179 : vector<32x512xf32>
    %cst_72 = arith.constant 2.000000e+00 : f32
    %181 = vector.broadcast %cst_72 : f32 to vector<32x512xf32>
    %182 = arith.mulf %181, %180 : vector<32x512xf32>
    %183 = arith.subf %154, %182 : vector<32x512xf32>
    %cst_73 = arith.constant 2.000000e+00 : f32
    %184 = vector.broadcast %cst_73 : f32 to vector<32x512xf32>
    %185 = arith.mulf %184, %183 : vector<32x512xf32>
    %cst_74 = arith.constant 1.000000e+00 : f32
    %186 = vector.broadcast %cst_74 : f32 to vector<32x512xf32>
    %187 = arith.subf %186, %185 : vector<32x512xf32>
    %188 = arith.mulf %177, %187 : vector<32x512xf32>
    %cst_75 = arith.constant dense<0.000000e+00> : vector<32x512xf32>
    %189 = tpu.matmul %1, %188, %cst_75 {dimension_numbers = #tpu.dot_dimension_numbers<[1], [0], [0], [1], [0, 0, 1, 1], [], []>} : vector<32x32xf32>, vector<32x512xf32>, vector<32x512xf32> -> vector<32x512xf32>
    %190 = vector.broadcast %5 : vector<32x1xf32> to vector<32x512xf32>
    %191 = arith.addf %189, %190 : vector<32x512xf32>
    %cst_76 = arith.constant 0.318309873 : f32
    %192 = vector.broadcast %cst_76 : f32 to vector<32x512xf32>
    %193 = arith.mulf %191, %192 : vector<32x512xf32>
    %cst_77 = arith.constant 5.000000e-01 : f32
    %194 = vector.broadcast %cst_77 : f32 to vector<32x512xf32>
    %195 = arith.addf %193, %194 : vector<32x512xf32>
    %196 = math.floor %195 : vector<32x512xf32>
    %cst_78 = arith.constant 3.14147949 : f32
    %197 = vector.broadcast %cst_78 : f32 to vector<32x512xf32>
    %198 = arith.mulf %196, %197 : vector<32x512xf32>
    %199 = arith.subf %191, %198 : vector<32x512xf32>
    %cst_79 = arith.constant 1.13159418E-4 : f32
    %200 = vector.broadcast %cst_79 : f32 to vector<32x512xf32>
    %201 = arith.mulf %196, %200 : vector<32x512xf32>
    %202 = arith.subf %199, %201 : vector<32x512xf32>
    %cst_80 = arith.constant 1.98418726E-9 : f32
    %203 = vector.broadcast %cst_80 : f32 to vector<32x512xf32>
    %204 = arith.mulf %196, %203 : vector<32x512xf32>
    %205 = arith.subf %202, %204 : vector<32x512xf32>
    %206 = arith.mulf %205, %205 : vector<32x512xf32>
    %cst_81 = arith.constant 2.60831598E-6 : f32
    %207 = vector.broadcast %cst_81 : f32 to vector<32x512xf32>
    %208 = arith.mulf %207, %206 : vector<32x512xf32>
    %cst_82 = arith.constant -1.98106907E-4 : f32
    %209 = vector.broadcast %cst_82 : f32 to vector<32x512xf32>
    %210 = arith.addf %208, %209 : vector<32x512xf32>
    %211 = arith.mulf %210, %206 : vector<32x512xf32>
    %cst_83 = arith.constant 0.00833307859 : f32
    %212 = vector.broadcast %cst_83 : f32 to vector<32x512xf32>
    %213 = arith.addf %211, %212 : vector<32x512xf32>
    %214 = arith.mulf %213, %206 : vector<32x512xf32>
    %cst_84 = arith.constant -0.166666597 : f32
    %215 = vector.broadcast %cst_84 : f32 to vector<32x512xf32>
    %216 = arith.addf %214, %215 : vector<32x512xf32>
    %217 = arith.mulf %206, %216 : vector<32x512xf32>
    %218 = arith.mulf %205, %217 : vector<32x512xf32>
    %219 = arith.addf %205, %218 : vector<32x512xf32>
    %cst_85 = arith.constant 5.000000e-01 : f32
    %220 = vector.broadcast %cst_85 : f32 to vector<32x512xf32>
    %221 = arith.mulf %196, %220 : vector<32x512xf32>
    %222 = math.floor %221 : vector<32x512xf32>
    %cst_86 = arith.constant 2.000000e+00 : f32
    %223 = vector.broadcast %cst_86 : f32 to vector<32x512xf32>
    %224 = arith.mulf %223, %222 : vector<32x512xf32>
    %225 = arith.subf %196, %224 : vector<32x512xf32>
    %cst_87 = arith.constant 2.000000e+00 : f32
    %226 = vector.broadcast %cst_87 : f32 to vector<32x512xf32>
    %227 = arith.mulf %226, %225 : vector<32x512xf32>
    %cst_88 = arith.constant 1.000000e+00 : f32
    %228 = vector.broadcast %cst_88 : f32 to vector<32x512xf32>
    %229 = arith.subf %228, %227 : vector<32x512xf32>
    %230 = arith.mulf %219, %229 : vector<32x512xf32>
    %cst_89 = arith.constant dense<0.000000e+00> : vector<32x512xf32>
    %231 = tpu.matmul %2, %230, %cst_89 {dimension_numbers = #tpu.dot_dimension_numbers<[1], [0], [0], [1], [0, 0, 1, 1], [], []>} : vector<32x32xf32>, vector<32x512xf32>, vector<32x512xf32> -> vector<32x512xf32>
    %232 = vector.broadcast %6 : vector<32x1xf32> to vector<32x512xf32>
    %233 = arith.addf %231, %232 : vector<32x512xf32>
    %cst_90 = arith.constant 0.318309873 : f32
    %234 = vector.broadcast %cst_90 : f32 to vector<32x512xf32>
    %235 = arith.mulf %233, %234 : vector<32x512xf32>
    %cst_91 = arith.constant 5.000000e-01 : f32
    %236 = vector.broadcast %cst_91 : f32 to vector<32x512xf32>
    %237 = arith.addf %235, %236 : vector<32x512xf32>
    %238 = math.floor %237 : vector<32x512xf32>
    %cst_92 = arith.constant 3.14147949 : f32
    %239 = vector.broadcast %cst_92 : f32 to vector<32x512xf32>
    %240 = arith.mulf %238, %239 : vector<32x512xf32>
    %241 = arith.subf %233, %240 : vector<32x512xf32>
    %cst_93 = arith.constant 1.13159418E-4 : f32
    %242 = vector.broadcast %cst_93 : f32 to vector<32x512xf32>
    %243 = arith.mulf %238, %242 : vector<32x512xf32>
    %244 = arith.subf %241, %243 : vector<32x512xf32>
    %cst_94 = arith.constant 1.98418726E-9 : f32
    %245 = vector.broadcast %cst_94 : f32 to vector<32x512xf32>
    %246 = arith.mulf %238, %245 : vector<32x512xf32>
    %247 = arith.subf %244, %246 : vector<32x512xf32>
    %248 = arith.mulf %247, %247 : vector<32x512xf32>
    %cst_95 = arith.constant 2.60831598E-6 : f32
    %249 = vector.broadcast %cst_95 : f32 to vector<32x512xf32>
    %250 = arith.mulf %249, %248 : vector<32x512xf32>
    %cst_96 = arith.constant -1.98106907E-4 : f32
    %251 = vector.broadcast %cst_96 : f32 to vector<32x512xf32>
    %252 = arith.addf %250, %251 : vector<32x512xf32>
    %253 = arith.mulf %252, %248 : vector<32x512xf32>
    %cst_97 = arith.constant 0.00833307859 : f32
    %254 = vector.broadcast %cst_97 : f32 to vector<32x512xf32>
    %255 = arith.addf %253, %254 : vector<32x512xf32>
    %256 = arith.mulf %255, %248 : vector<32x512xf32>
    %cst_98 = arith.constant -0.166666597 : f32
    %257 = vector.broadcast %cst_98 : f32 to vector<32x512xf32>
    %258 = arith.addf %256, %257 : vector<32x512xf32>
    %259 = arith.mulf %248, %258 : vector<32x512xf32>
    %260 = arith.mulf %247, %259 : vector<32x512xf32>
    %261 = arith.addf %247, %260 : vector<32x512xf32>
    %cst_99 = arith.constant 5.000000e-01 : f32
    %262 = vector.broadcast %cst_99 : f32 to vector<32x512xf32>
    %263 = arith.mulf %238, %262 : vector<32x512xf32>
    %264 = math.floor %263 : vector<32x512xf32>
    %cst_100 = arith.constant 2.000000e+00 : f32
    %265 = vector.broadcast %cst_100 : f32 to vector<32x512xf32>
    %266 = arith.mulf %265, %264 : vector<32x512xf32>
    %267 = arith.subf %238, %266 : vector<32x512xf32>
    %cst_101 = arith.constant 2.000000e+00 : f32
    %268 = vector.broadcast %cst_101 : f32 to vector<32x512xf32>
    %269 = arith.mulf %268, %267 : vector<32x512xf32>
    %cst_102 = arith.constant 1.000000e+00 : f32
    %270 = vector.broadcast %cst_102 : f32 to vector<32x512xf32>
    %271 = arith.subf %270, %269 : vector<32x512xf32>
    %272 = arith.mulf %261, %271 : vector<32x512xf32>
    %cst_103 = arith.constant dense<0.000000e+00> : vector<1x512xf32>
    %273 = tpu.matmul %3, %272, %cst_103 {dimension_numbers = #tpu.dot_dimension_numbers<[1], [0], [0], [1], [0, 0, 1, 1], [], []>} : vector<1x32xf32>, vector<32x512xf32>, vector<1x512xf32> -> vector<1x512xf32>
    %274 = vector.broadcast %7 : vector<1x1xf32> to vector<1x512xf32>
    %275 = arith.addf %273, %274 : vector<1x512xf32>
    %c0_104 = arith.constant 0 : index
    %276 = arith.index_cast %144 : i32 to index
    %277 = vector.load %arg10[%c0_104, %276] : memref<1x1024xf32, #tpu.memory_space<vmem>>, vector<1x512xf32>
    tpu.vector_store %arg10[%c0_104, %276], %275 {strides = array<i32>} : memref<1x1024xf32, #tpu.memory_space<vmem>>, vector<1x512xf32>,
    %c2_i32 = arith.constant 2 : i32
    return
  }
  func.func @transform_0(%arg0: i32) -> (i32, i32) {
    %c0_i32 = arith.constant 0 : i32
    %c0_i32_0 = arith.constant 0 : i32
    return %c0_i32, %arg0 : i32, i32
  }
  func.func @transform_1(%arg0: i32) -> (i32, i32) {
    %c0_i32 = arith.constant 0 : i32
    %c0_i32_0 = arith.constant 0 : i32
    %c0_i32_1 = arith.constant 0 : i32
    return %c0_i32, %c0_i32_0 : i32, i32
  }
  func.func @transform_2(%arg0: i32) -> (i32, i32) {
    %c0_i32 = arith.constant 0 : i32
    %c0_i32_0 = arith.constant 0 : i32
    %c0_i32_1 = arith.constant 0 : i32
    return %c0_i32, %c0_i32_0 : i32, i32
  }
  func.func @transform_3(%arg0: i32) -> (i32, i32) {
    %c0_i32 = arith.constant 0 : i32
    %c0_i32_0 = arith.constant 0 : i32
    %c0_i32_1 = arith.constant 0 : i32
    return %c0_i32, %c0_i32_0 : i32, i32
  }
  func.func @transform_4(%arg0: i32) -> (i32, i32) {
    %c0_i32 = arith.constant 0 : i32
    %c0_i32_0 = arith.constant 0 : i32
    %c0_i32_1 = arith.constant 0 : i32
    return %c0_i32, %c0_i32_0 : i32, i32
  }
  func.func @transform_5(%arg0: i32) -> (i32, i32) {
    %c0_i32 = arith.constant 0 : i32
    %c0_i32_0 = arith.constant 0 : i32
    %c0_i32_1 = arith.constant 0 : i32
    return %c0_i32, %c0_i32_0 : i32, i32
  }
  func.func @transform_6(%arg0: i32) -> (i32, i32) {
    %c0_i32 = arith.constant 0 : i32
    %c0_i32_0 = arith.constant 0 : i32
    %c0_i32_1 = arith.constant 0 : i32
    return %c0_i32, %c0_i32_0 : i32, i32
  }
  func.func @transform_7(%arg0: i32) -> (i32, i32) {
    %c0_i32 = arith.constant 0 : i32
    %c0_i32_0 = arith.constant 0 : i32
    %c0_i32_1 = arith.constant 0 : i32
    return %c0_i32, %c0_i32_0 : i32, i32
  }
  func.func @transform_8(%arg0: i32) -> (i32, i32) {
    %c0_i32 = arith.constant 0 : i32
    %c0_i32_0 = arith.constant 0 : i32
    %c0_i32_1 = arith.constant 0 : i32
    return %c0_i32, %c0_i32_0 : i32, i32
  }
  func.func @transform_9(%arg0: i32) -> (i32, i32) {
    %c0_i32 = arith.constant 0 : i32
    %c0_i32_0 = arith.constant 0 : i32
    return %c0_i32, %arg0 : i32, i32
  }
}

module attributes {stable_mosaic.version = 11 : i64} {
  func.func @kernel(%arg0: i32, %arg1: memref<2x1024xf32, #tpu.memory_space<vmem>>, %arg2: memref<32x2xf32, #tpu.memory_space<vmem>>, %arg3: memref<32x1xf32, #tpu.memory_space<vmem>>, %arg4: memref<32x32xf32, #tpu.memory_space<vmem>>, %arg5: memref<32x1xf32, #tpu.memory_space<vmem>>, %arg6: memref<32x32xf32, #tpu.memory_space<vmem>>, %arg7: memref<32x1xf32, #tpu.memory_space<vmem>>, %arg8: memref<1x32xf32, #tpu.memory_space<vmem>>, %arg9: memref<1x1xf32, #tpu.memory_space<vmem>>, %arg10: memref<1x1024xf32, #tpu.memory_space<vmem>>) attributes {dimension_semantics = [#tpu.dimension_semantics<parallel>], iteration_bounds = array<i64: 2>, scalar_prefetch = 0 : i64, scratch_operands = 0 : i64, tpu.core_type = #tpu.core_type<tc>, window_params = [{transform_indices = @transform_0, window_bounds = array<i64: 2, 1024>}, {pipeline_mode = #tpu.pipeline_mode<synchronous>, transform_indices = @transform_1, window_bounds = array<i64: 32, 2>}, {pipeline_mode = #tpu.pipeline_mode<synchronous>, transform_indices = @transform_2, window_bounds = array<i64: 32, 1>}, {pipeline_mode = #tpu.pipeline_mode<synchronous>, transform_indices = @transform_3, window_bounds = array<i64: 32, 32>}, {pipeline_mode = #tpu.pipeline_mode<synchronous>, transform_indices = @transform_4, window_bounds = array<i64: 32, 1>}, {pipeline_mode = #tpu.pipeline_mode<synchronous>, transform_indices = @transform_5, window_bounds = array<i64: 32, 32>}, {pipeline_mode = #tpu.pipeline_mode<synchronous>, transform_indices = @transform_6, window_bounds = array<i64: 32, 1>}, {pipeline_mode = #tpu.pipeline_mode<synchronous>, transform_indices = @transform_7, window_bounds = array<i64: 1, 32>}, {pipeline_mode = #tpu.pipeline_mode<synchronous>, transform_indices = @transform_8, window_bounds = array<i64: 1, 1>}, {transform_indices = @transform_9, window_bounds = array<i64: 1, 1024>}]} {
    %c0 = arith.constant 0 : index
    %c0_0 = arith.constant 0 : index
    %0 = vector.load %arg2[%c0, %c0_0] : memref<32x2xf32, #tpu.memory_space<vmem>>, vector<32x2xf32>
    %c0_1 = arith.constant 0 : index
    %c0_2 = arith.constant 0 : index
    %1 = vector.load %arg4[%c0_1, %c0_2] : memref<32x32xf32, #tpu.memory_space<vmem>>, vector<32x32xf32>
    %c0_3 = arith.constant 0 : index
    %c0_4 = arith.constant 0 : index
    %2 = vector.load %arg6[%c0_3, %c0_4] : memref<32x32xf32, #tpu.memory_space<vmem>>, vector<32x32xf32>
    %c0_5 = arith.constant 0 : index
    %c0_6 = arith.constant 0 : index
    %3 = vector.load %arg8[%c0_5, %c0_6] : memref<1x32xf32, #tpu.memory_space<vmem>>, vector<1x32xf32>
    %c0_7 = arith.constant 0 : index
    %c0_8 = arith.constant 0 : index
    %4 = vector.load %arg3[%c0_7, %c0_8] : memref<32x1xf32, #tpu.memory_space<vmem>>, vector<32x1xf32>
    %c0_9 = arith.constant 0 : index
    %c0_10 = arith.constant 0 : index
    %5 = vector.load %arg5[%c0_9, %c0_10] : memref<32x1xf32, #tpu.memory_space<vmem>>, vector<32x1xf32>
    %c0_11 = arith.constant 0 : index
    %c0_12 = arith.constant 0 : index
    %6 = vector.load %arg7[%c0_11, %c0_12] : memref<32x1xf32, #tpu.memory_space<vmem>>, vector<32x1xf32>
    %c0_13 = arith.constant 0 : index
    %c0_14 = arith.constant 0 : index
    %7 = vector.load %arg9[%c0_13, %c0_14] : memref<1x1xf32, #tpu.memory_space<vmem>>, vector<1x1xf32>
    %c0_i32 = arith.constant 0 : i32
    %c512_i32 = arith.constant 512 : i32
    %8 = arith.muli %c0_i32, %c512_i32 : i32
    %9 = tpu.assume_multiple %8, 512 : i32
    %c0_15 = arith.constant 0 : index
    %10 = arith.index_cast %9 : i32 to index
    %11 = vector.load %arg1[%c0_15, %10] : memref<2x1024xf32, #tpu.memory_space<vmem>>, vector<2x512xf32>
    %cst = arith.constant dense<0.000000e+00> : vector<32x512xf32>
    %12 = tpu.matmul %0, %11, %cst {dimension_numbers = #tpu.dot_dimension_numbers<[1], [0], [0], [1], [0, 0, 1, 1], [], []>} : vector<32x2xf32>, vector<2x512xf32>, vector<32x512xf32> -> vector<32x512xf32>
    %13 = vector.broadcast %4 : vector<32x1xf32> to vector<32x512xf32>
    %14 = arith.addf %12, %13 : vector<32x512xf32>
    %cst_16 = arith.constant 0.318309873 : f32
    %15 = vector.broadcast %cst_16 : f32 to vector<32x512xf32>
    %16 = arith.mulf %14, %15 : vector<32x512xf32>
    %cst_17 = arith.constant 5.000000e-01 : f32
    %17 = vector.broadcast %cst_17 : f32 to vector<32x512xf32>
    %18 = arith.addf %16, %17 : vector<32x512xf32>
    %19 = math.floor %18 : vector<32x512xf32>
    %cst_18 = arith.constant 3.14147949 : f32
    %20 = vector.broadcast %cst_18 : f32 to vector<32x512xf32>
    %21 = arith.mulf %19, %20 : vector<32x512xf32>
    %22 = arith.subf %14, %21 : vector<32x512xf32>
    %cst_19 = arith.constant 1.13159418E-4 : f32
    %23 = vector.broadcast %cst_19 : f32 to vector<32x512xf32>
    %24 = arith.mulf %19, %23 : vector<32x512xf32>
    %25 = arith.subf %22, %24 : vector<32x512xf32>
    %cst_20 = arith.constant 1.98418726E-9 : f32
    %26 = vector.broadcast %cst_20 : f32 to vector<32x512xf32>
    %27 = arith.mulf %19, %26 : vector<32x512xf32>
    %28 = arith.subf %25, %27 : vector<32x512xf32>
    %29 = arith.mulf %28, %28 : vector<32x512xf32>
    %cst_21 = arith.constant 2.60831598E-6 : f32
    %30 = vector.broadcast %cst_21 : f32 to vector<32x512xf32>
    %31 = arith.mulf %30, %29 : vector<32x512xf32>
    %cst_22 = arith.constant -1.98106907E-4 : f32
    %32 = vector.broadcast %cst_22 : f32 to vector<32x512xf32>
    %33 = arith.addf %31, %32 : vector<32x512xf32>
    %34 = arith.mulf %33, %29 : vector<32x512xf32>
    %cst_23 = arith.constant 0.00833307859 : f32
    %35 = vector.broadcast %cst_23 : f32 to vector<32x512xf32>
    %36 = arith.addf %34, %35 : vector<32x512xf32>
    %37 = arith.mulf %36, %29 : vector<32x512xf32>
    %cst_24 = arith.constant -0.166666597 : f32
    %38 = vector.broadcast %cst_24 : f32 to vector<32x512xf32>
    %39 = arith.addf %37, %38 : vector<32x512xf32>
    %40 = arith.mulf %29, %39 : vector<32x512xf32>
    %41 = arith.mulf %28, %40 : vector<32x512xf32>
    %42 = arith.addf %28, %41 : vector<32x512xf32>
    %cst_25 = arith.constant 5.000000e-01 : f32
    %43 = vector.broadcast %cst_25 : f32 to vector<32x512xf32>
    %44 = arith.mulf %19, %43 : vector<32x512xf32>
    %45 = math.floor %44 : vector<32x512xf32>
    %cst_26 = arith.constant 2.000000e+00 : f32
    %46 = vector.broadcast %cst_26 : f32 to vector<32x512xf32>
    %47 = arith.mulf %46, %45 : vector<32x512xf32>
    %48 = arith.subf %19, %47 : vector<32x512xf32>
    %cst_27 = arith.constant 2.000000e+00 : f32
    %49 = vector.broadcast %cst_27 : f32 to vector<32x512xf32>
    %50 = arith.mulf %49, %48 : vector<32x512xf32>
    %cst_28 = arith.constant 1.000000e+00 : f32
    %51 = vector.broadcast %cst_28 : f32 to vector<32x512xf32>
    %52 = arith.subf %51, %50 : vector<32x512xf32>
    %53 = arith.mulf %42, %52 : vector<32x512xf32>
    %cst_29 = arith.constant dense<0.000000e+00> : vector<32x512xf32>
    %54 = tpu.matmul %1, %53, %cst_29 {dimension_numbers = #tpu.dot_dimension_numbers<[1], [0], [0], [1], [0, 0, 1, 1], [], []>} : vector<32x32xf32>, vector<32x512xf32>, vector<32x512xf32> -> vector<32x512xf32>
    %55 = vector.broadcast %5 : vector<32x1xf32> to vector<32x512xf32>
    %56 = arith.addf %54, %55 : vector<32x512xf32>
    %cst_30 = arith.constant 0.318309873 : f32
    %57 = vector.broadcast %cst_30 : f32 to vector<32x512xf32>
    %58 = arith.mulf %56, %57 : vector<32x512xf32>
    %cst_31 = arith.constant 5.000000e-01 : f32
    %59 = vector.broadcast %cst_31 : f32 to vector<32x512xf32>
    %60 = arith.addf %58, %59 : vector<32x512xf32>
    %61 = math.floor %60 : vector<32x512xf32>
    %cst_32 = arith.constant 3.14147949 : f32
    %62 = vector.broadcast %cst_32 : f32 to vector<32x512xf32>
    %63 = arith.mulf %61, %62 : vector<32x512xf32>
    %64 = arith.subf %56, %63 : vector<32x512xf32>
    %cst_33 = arith.constant 1.13159418E-4 : f32
    %65 = vector.broadcast %cst_33 : f32 to vector<32x512xf32>
    %66 = arith.mulf %61, %65 : vector<32x512xf32>
    %67 = arith.subf %64, %66 : vector<32x512xf32>
    %cst_34 = arith.constant 1.98418726E-9 : f32
    %68 = vector.broadcast %cst_34 : f32 to vector<32x512xf32>
    %69 = arith.mulf %61, %68 : vector<32x512xf32>
    %70 = arith.subf %67, %69 : vector<32x512xf32>
    %71 = arith.mulf %70, %70 : vector<32x512xf32>
    %cst_35 = arith.constant 2.60831598E-6 : f32
    %72 = vector.broadcast %cst_35 : f32 to vector<32x512xf32>
    %73 = arith.mulf %72, %71 : vector<32x512xf32>
    %cst_36 = arith.constant -1.98106907E-4 : f32
    %74 = vector.broadcast %cst_36 : f32 to vector<32x512xf32>
    %75 = arith.addf %73, %74 : vector<32x512xf32>
    %76 = arith.mulf %75, %71 : vector<32x512xf32>
    %cst_37 = arith.constant 0.00833307859 : f32
    %77 = vector.broadcast %cst_37 : f32 to vector<32x512xf32>
    %78 = arith.addf %76, %77 : vector<32x512xf32>
    %79 = arith.mulf %78, %71 : vector<32x512xf32>
    %cst_38 = arith.constant -0.166666597 : f32
    %80 = vector.broadcast %cst_38 : f32 to vector<32x512xf32>
    %81 = arith.addf %79, %80 : vector<32x512xf32>
    %82 = arith.mulf %71, %81 : vector<32x512xf32>
    %83 = arith.mulf %70, %82 : vector<32x512xf32>
    %84 = arith.addf %70, %83 : vector<32x512xf32>
    %cst_39 = arith.constant 5.000000e-01 : f32
    %85 = vector.broadcast %cst_39 : f32 to vector<32x512xf32>
    %86 = arith.mulf %61, %85 : vector<32x512xf32>
    %87 = math.floor %86 : vector<32x512xf32>
    %cst_40 = arith.constant 2.000000e+00 : f32
    %88 = vector.broadcast %cst_40 : f32 to vector<32x512xf32>
    %89 = arith.mulf %88, %87 : vector<32x512xf32>
    %90 = arith.subf %61, %89 : vector<32x512xf32>
    %cst_41 = arith.constant 2.000000e+00 : f32
    %91 = vector.broadcast %cst_41 : f32 to vector<32x512xf32>
    %92 = arith.mulf %91, %90 : vector<32x512xf32>
    %cst_42 = arith.constant 1.000000e+00 : f32
    %93 = vector.broadcast %cst_42 : f32 to vector<32x512xf32>
    %94 = arith.subf %93, %92 : vector<32x512xf32>
    %95 = arith.mulf %84, %94 : vector<32x512xf32>
    %cst_43 = arith.constant dense<0.000000e+00> : vector<32x512xf32>
    %96 = tpu.matmul %2, %95, %cst_43 {dimension_numbers = #tpu.dot_dimension_numbers<[1], [0], [0], [1], [0, 0, 1, 1], [], []>} : vector<32x32xf32>, vector<32x512xf32>, vector<32x512xf32> -> vector<32x512xf32>
    %97 = vector.broadcast %6 : vector<32x1xf32> to vector<32x512xf32>
    %98 = arith.addf %96, %97 : vector<32x512xf32>
    %cst_44 = arith.constant 0.318309873 : f32
    %99 = vector.broadcast %cst_44 : f32 to vector<32x512xf32>
    %100 = arith.mulf %98, %99 : vector<32x512xf32>
    %cst_45 = arith.constant 5.000000e-01 : f32
    %101 = vector.broadcast %cst_45 : f32 to vector<32x512xf32>
    %102 = arith.addf %100, %101 : vector<32x512xf32>
    %103 = math.floor %102 : vector<32x512xf32>
    %cst_46 = arith.constant 3.14147949 : f32
    %104 = vector.broadcast %cst_46 : f32 to vector<32x512xf32>
    %105 = arith.mulf %103, %104 : vector<32x512xf32>
    %106 = arith.subf %98, %105 : vector<32x512xf32>
    %cst_47 = arith.constant 1.13159418E-4 : f32
    %107 = vector.broadcast %cst_47 : f32 to vector<32x512xf32>
    %108 = arith.mulf %103, %107 : vector<32x512xf32>
    %109 = arith.subf %106, %108 : vector<32x512xf32>
    %cst_48 = arith.constant 1.98418726E-9 : f32
    %110 = vector.broadcast %cst_48 : f32 to vector<32x512xf32>
    %111 = arith.mulf %103, %110 : vector<32x512xf32>
    %112 = arith.subf %109, %111 : vector<32x512xf32>
    %113 = arith.mulf %112, %112 : vector<32x512xf32>
    %cst_49 = arith.constant 2.60831598E-6 : f32
    %114 = vector.broadcast %cst_49 : f32 to vector<32x512xf32>
    %115 = arith.mulf %114, %113 : vector<32x512xf32>
    %cst_50 = arith.constant -1.98106907E-4 : f32
    %116 = vector.broadcast %cst_50 : f32 to vector<32x512xf32>
    %117 = arith.addf %115, %116 : vector<32x512xf32>
    %118 = arith.mulf %117, %113 : vector<32x512xf32>
    %cst_51 = arith.constant 0.00833307859 : f32
    %119 = vector.broadcast %cst_51 : f32 to vector<32x512xf32>
    %120 = arith.addf %118, %119 : vector<32x512xf32>
    %121 = arith.mulf %120, %113 : vector<32x512xf32>
    %cst_52 = arith.constant -0.166666597 : f32
    %122 = vector.broadcast %cst_52 : f32 to vector<32x512xf32>
    %123 = arith.addf %121, %122 : vector<32x512xf32>
    %124 = arith.mulf %113, %123 : vector<32x512xf32>
    %125 = arith.mulf %112, %124 : vector<32x512xf32>
    %126 = arith.addf %112, %125 : vector<32x512xf32>
    %cst_53 = arith.constant 5.000000e-01 : f32
    %127 = vector.broadcast %cst_53 : f32 to vector<32x512xf32>
    %128 = arith.mulf %103, %127 : vector<32x512xf32>
    %129 = math.floor %128 : vector<32x512xf32>
    %cst_54 = arith.constant 2.000000e+00 : f32
    %130 = vector.broadcast %cst_54 : f32 to vector<32x512xf32>
    %131 = arith.mulf %130, %129 : vector<32x512xf32>
    %132 = arith.subf %103, %131 : vector<32x512xf32>
    %cst_55 = arith.constant 2.000000e+00 : f32
    %133 = vector.broadcast %cst_55 : f32 to vector<32x512xf32>
    %134 = arith.mulf %133, %132 : vector<32x512xf32>
    %cst_56 = arith.constant 1.000000e+00 : f32
    %135 = vector.broadcast %cst_56 : f32 to vector<32x512xf32>
    %136 = arith.subf %135, %134 : vector<32x512xf32>
    %137 = arith.mulf %126, %136 : vector<32x512xf32>
    %cst_57 = arith.constant dense<0.000000e+00> : vector<1x512xf32>
    %138 = tpu.matmul %3, %137, %cst_57 {dimension_numbers = #tpu.dot_dimension_numbers<[1], [0], [0], [1], [0, 0, 1, 1], [], []>} : vector<1x32xf32>, vector<32x512xf32>, vector<1x512xf32> -> vector<1x512xf32>
    %139 = vector.broadcast %7 : vector<1x1xf32> to vector<1x512xf32>
    %140 = arith.addf %138, %139 : vector<1x512xf32>
    %c0_58 = arith.constant 0 : index
    %141 = arith.index_cast %9 : i32 to index
    %142 = vector.load %arg10[%c0_58, %141] : memref<1x1024xf32, #tpu.memory_space<vmem>>, vector<1x512xf32>
    tpu.vector_store %arg10[%c0_58, %141], %140 {strides = array<i32>} : memref<1x1024xf32, #tpu.memory_space<vmem>>, vector<1x512xf32>,
    %c1_i32 = arith.constant 1 : i32
    %c512_i32_59 = arith.constant 512 : i32
    %143 = arith.muli %c1_i32, %c512_i32_59 : i32
    %144 = tpu.assume_multiple %143, 512 : i32
    %c0_60 = arith.constant 0 : index
    %145 = arith.index_cast %144 : i32 to index
    %146 = vector.load %arg1[%c0_60, %145] : memref<2x1024xf32, #tpu.memory_space<vmem>>, vector<2x512xf32>
    %cst_61 = arith.constant dense<0.000000e+00> : vector<32x512xf32>
    %147 = tpu.matmul %0, %146, %cst_61 {dimension_numbers = #tpu.dot_dimension_numbers<[1], [0], [0], [1], [0, 0, 1, 1], [], []>} : vector<32x2xf32>, vector<2x512xf32>, vector<32x512xf32> -> vector<32x512xf32>
    %148 = vector.broadcast %4 : vector<32x1xf32> to vector<32x512xf32>
    %149 = arith.addf %147, %148 : vector<32x512xf32>
    %cst_62 = arith.constant 0.318309873 : f32
    %150 = vector.broadcast %cst_62 : f32 to vector<32x512xf32>
    %151 = arith.mulf %149, %150 : vector<32x512xf32>
    %cst_63 = arith.constant 5.000000e-01 : f32
    %152 = vector.broadcast %cst_63 : f32 to vector<32x512xf32>
    %153 = arith.addf %151, %152 : vector<32x512xf32>
    %154 = math.floor %153 : vector<32x512xf32>
    %cst_64 = arith.constant 3.14147949 : f32
    %155 = vector.broadcast %cst_64 : f32 to vector<32x512xf32>
    %156 = arith.mulf %154, %155 : vector<32x512xf32>
    %157 = arith.subf %149, %156 : vector<32x512xf32>
    %cst_65 = arith.constant 1.13159418E-4 : f32
    %158 = vector.broadcast %cst_65 : f32 to vector<32x512xf32>
    %159 = arith.mulf %154, %158 : vector<32x512xf32>
    %160 = arith.subf %157, %159 : vector<32x512xf32>
    %cst_66 = arith.constant 1.98418726E-9 : f32
    %161 = vector.broadcast %cst_66 : f32 to vector<32x512xf32>
    %162 = arith.mulf %154, %161 : vector<32x512xf32>
    %163 = arith.subf %160, %162 : vector<32x512xf32>
    %164 = arith.mulf %163, %163 : vector<32x512xf32>
    %cst_67 = arith.constant 2.60831598E-6 : f32
    %165 = vector.broadcast %cst_67 : f32 to vector<32x512xf32>
    %166 = arith.mulf %165, %164 : vector<32x512xf32>
    %cst_68 = arith.constant -1.98106907E-4 : f32
    %167 = vector.broadcast %cst_68 : f32 to vector<32x512xf32>
    %168 = arith.addf %166, %167 : vector<32x512xf32>
    %169 = arith.mulf %168, %164 : vector<32x512xf32>
    %cst_69 = arith.constant 0.00833307859 : f32
    %170 = vector.broadcast %cst_69 : f32 to vector<32x512xf32>
    %171 = arith.addf %169, %170 : vector<32x512xf32>
    %172 = arith.mulf %171, %164 : vector<32x512xf32>
    %cst_70 = arith.constant -0.166666597 : f32
    %173 = vector.broadcast %cst_70 : f32 to vector<32x512xf32>
    %174 = arith.addf %172, %173 : vector<32x512xf32>
    %175 = arith.mulf %164, %174 : vector<32x512xf32>
    %176 = arith.mulf %163, %175 : vector<32x512xf32>
    %177 = arith.addf %163, %176 : vector<32x512xf32>
    %cst_71 = arith.constant 5.000000e-01 : f32
    %178 = vector.broadcast %cst_71 : f32 to vector<32x512xf32>
    %179 = arith.mulf %154, %178 : vector<32x512xf32>
    %180 = math.floor %179 : vector<32x512xf32>
    %cst_72 = arith.constant 2.000000e+00 : f32
    %181 = vector.broadcast %cst_72 : f32 to vector<32x512xf32>
    %182 = arith.mulf %181, %180 : vector<32x512xf32>
    %183 = arith.subf %154, %182 : vector<32x512xf32>
    %cst_73 = arith.constant 2.000000e+00 : f32
    %184 = vector.broadcast %cst_73 : f32 to vector<32x512xf32>
    %185 = arith.mulf %184, %183 : vector<32x512xf32>
    %cst_74 = arith.constant 1.000000e+00 : f32
    %186 = vector.broadcast %cst_74 : f32 to vector<32x512xf32>
    %187 = arith.subf %186, %185 : vector<32x512xf32>
    %188 = arith.mulf %177, %187 : vector<32x512xf32>
    %cst_75 = arith.constant dense<0.000000e+00> : vector<32x512xf32>
    %189 = tpu.matmul %1, %188, %cst_75 {dimension_numbers = #tpu.dot_dimension_numbers<[1], [0], [0], [1], [0, 0, 1, 1], [], []>} : vector<32x32xf32>, vector<32x512xf32>, vector<32x512xf32> -> vector<32x512xf32>
    %190 = vector.broadcast %5 : vector<32x1xf32> to vector<32x512xf32>
    %191 = arith.addf %189, %190 : vector<32x512xf32>
    %cst_76 = arith.constant 0.318309873 : f32
    %192 = vector.broadcast %cst_76 : f32 to vector<32x512xf32>
    %193 = arith.mulf %191, %192 : vector<32x512xf32>
    %cst_77 = arith.constant 5.000000e-01 : f32
    %194 = vector.broadcast %cst_77 : f32 to vector<32x512xf32>
    %195 = arith.addf %193, %194 : vector<32x512xf32>
    %196 = math.floor %195 : vector<32x512xf32>
    %cst_78 = arith.constant 3.14147949 : f32
    %197 = vector.broadcast %cst_78 : f32 to vector<32x512xf32>
    %198 = arith.mulf %196, %197 : vector<32x512xf32>
    %199 = arith.subf %191, %198 : vector<32x512xf32>
    %cst_79 = arith.constant 1.13159418E-4 : f32
    %200 = vector.broadcast %cst_79 : f32 to vector<32x512xf32>
    %201 = arith.mulf %196, %200 : vector<32x512xf32>
    %202 = arith.subf %199, %201 : vector<32x512xf32>
    %cst_80 = arith.constant 1.98418726E-9 : f32
    %203 = vector.broadcast %cst_80 : f32 to vector<32x512xf32>
    %204 = arith.mulf %196, %203 : vector<32x512xf32>
    %205 = arith.subf %202, %204 : vector<32x512xf32>
    %206 = arith.mulf %205, %205 : vector<32x512xf32>
    %cst_81 = arith.constant 2.60831598E-6 : f32
    %207 = vector.broadcast %cst_81 : f32 to vector<32x512xf32>
    %208 = arith.mulf %207, %206 : vector<32x512xf32>
    %cst_82 = arith.constant -1.98106907E-4 : f32
    %209 = vector.broadcast %cst_82 : f32 to vector<32x512xf32>
    %210 = arith.addf %208, %209 : vector<32x512xf32>
    %211 = arith.mulf %210, %206 : vector<32x512xf32>
    %cst_83 = arith.constant 0.00833307859 : f32
    %212 = vector.broadcast %cst_83 : f32 to vector<32x512xf32>
    %213 = arith.addf %211, %212 : vector<32x512xf32>
    %214 = arith.mulf %213, %206 : vector<32x512xf32>
    %cst_84 = arith.constant -0.166666597 : f32
    %215 = vector.broadcast %cst_84 : f32 to vector<32x512xf32>
    %216 = arith.addf %214, %215 : vector<32x512xf32>
    %217 = arith.mulf %206, %216 : vector<32x512xf32>
    %218 = arith.mulf %205, %217 : vector<32x512xf32>
    %219 = arith.addf %205, %218 : vector<32x512xf32>
    %cst_85 = arith.constant 5.000000e-01 : f32
    %220 = vector.broadcast %cst_85 : f32 to vector<32x512xf32>
    %221 = arith.mulf %196, %220 : vector<32x512xf32>
    %222 = math.floor %221 : vector<32x512xf32>
    %cst_86 = arith.constant 2.000000e+00 : f32
    %223 = vector.broadcast %cst_86 : f32 to vector<32x512xf32>
    %224 = arith.mulf %223, %222 : vector<32x512xf32>
    %225 = arith.subf %196, %224 : vector<32x512xf32>
    %cst_87 = arith.constant 2.000000e+00 : f32
    %226 = vector.broadcast %cst_87 : f32 to vector<32x512xf32>
    %227 = arith.mulf %226, %225 : vector<32x512xf32>
    %cst_88 = arith.constant 1.000000e+00 : f32
    %228 = vector.broadcast %cst_88 : f32 to vector<32x512xf32>
    %229 = arith.subf %228, %227 : vector<32x512xf32>
    %230 = arith.mulf %219, %229 : vector<32x512xf32>
    %cst_89 = arith.constant dense<0.000000e+00> : vector<32x512xf32>
    %231 = tpu.matmul %2, %230, %cst_89 {dimension_numbers = #tpu.dot_dimension_numbers<[1], [0], [0], [1], [0, 0, 1, 1], [], []>} : vector<32x32xf32>, vector<32x512xf32>, vector<32x512xf32> -> vector<32x512xf32>
    %232 = vector.broadcast %6 : vector<32x1xf32> to vector<32x512xf32>
    %233 = arith.addf %231, %232 : vector<32x512xf32>
    %cst_90 = arith.constant 0.318309873 : f32
    %234 = vector.broadcast %cst_90 : f32 to vector<32x512xf32>
    %235 = arith.mulf %233, %234 : vector<32x512xf32>
    %cst_91 = arith.constant 5.000000e-01 : f32
    %236 = vector.broadcast %cst_91 : f32 to vector<32x512xf32>
    %237 = arith.addf %235, %236 : vector<32x512xf32>
    %238 = math.floor %237 : vector<32x512xf32>
    %cst_92 = arith.constant 3.14147949 : f32
    %239 = vector.broadcast %cst_92 : f32 to vector<32x512xf32>
    %240 = arith.mulf %238, %239 : vector<32x512xf32>
    %241 = arith.subf %233, %240 : vector<32x512xf32>
    %cst_93 = arith.constant 1.13159418E-4 : f32
    %242 = vector.broadcast %cst_93 : f32 to vector<32x512xf32>
    %243 = arith.mulf %238, %242 : vector<32x512xf32>
    %244 = arith.subf %241, %243 : vector<32x512xf32>
    %cst_94 = arith.constant 1.98418726E-9 : f32
    %245 = vector.broadcast %cst_94 : f32 to vector<32x512xf32>
    %246 = arith.mulf %238, %245 : vector<32x512xf32>
    %247 = arith.subf %244, %246 : vector<32x512xf32>
    %248 = arith.mulf %247, %247 : vector<32x512xf32>
    %cst_95 = arith.constant 2.60831598E-6 : f32
    %249 = vector.broadcast %cst_95 : f32 to vector<32x512xf32>
    %250 = arith.mulf %249, %248 : vector<32x512xf32>
    %cst_96 = arith.constant -1.98106907E-4 : f32
    %251 = vector.broadcast %cst_96 : f32 to vector<32x512xf32>
    %252 = arith.addf %250, %251 : vector<32x512xf32>
    %253 = arith.mulf %252, %248 : vector<32x512xf32>
    %cst_97 = arith.constant 0.00833307859 : f32
    %254 = vector.broadcast %cst_97 : f32 to vector<32x512xf32>
    %255 = arith.addf %253, %254 : vector<32x512xf32>
    %256 = arith.mulf %255, %248 : vector<32x512xf32>
    %cst_98 = arith.constant -0.166666597 : f32
    %257 = vector.broadcast %cst_98 : f32 to vector<32x512xf32>
    %258 = arith.addf %256, %257 : vector<32x512xf32>
    %259 = arith.mulf %248, %258 : vector<32x512xf32>
    %260 = arith.mulf %247, %259 : vector<32x512xf32>
    %261 = arith.addf %247, %260 : vector<32x512xf32>
    %cst_99 = arith.constant 5.000000e-01 : f32
    %262 = vector.broadcast %cst_99 : f32 to vector<32x512xf32>
    %263 = arith.mulf %238, %262 : vector<32x512xf32>
    %264 = math.floor %263 : vector<32x512xf32>
    %cst_100 = arith.constant 2.000000e+00 : f32
    %265 = vector.broadcast %cst_100 : f32 to vector<32x512xf32>
    %266 = arith.mulf %265, %264 : vector<32x512xf32>
    %267 = arith.subf %238, %266 : vector<32x512xf32>
    %cst_101 = arith.constant 2.000000e+00 : f32
    %268 = vector.broadcast %cst_101 : f32 to vector<32x512xf32>
    %269 = arith.mulf %268, %267 : vector<32x512xf32>
    %cst_102 = arith.constant 1.000000e+00 : f32
    %270 = vector.broadcast %cst_102 : f32 to vector<32x512xf32>
    %271 = arith.subf %270, %269 : vector<32x512xf32>
    %272 = arith.mulf %261, %271 : vector<32x512xf32>
    %cst_103 = arith.constant dense<0.000000e+00> : vector<1x512xf32>
    %273 = tpu.matmul %3, %272, %cst_103 {dimension_numbers = #tpu.dot_dimension_numbers<[1], [0], [0], [1], [0, 0, 1, 1], [], []>} : vector<1x32xf32>, vector<32x512xf32>, vector<1x512xf32> -> vector<1x512xf32>
    %274 = vector.broadcast %7 : vector<1x1xf32> to vector<1x512xf32>
    %275 = arith.addf %273, %274 : vector<1x512xf32>
    %c0_104 = arith.constant 0 : index
    %276 = arith.index_cast %144 : i32 to index
    %277 = vector.load %arg10[%c0_104, %276] : memref<1x1024xf32, #tpu.memory_space<vmem>>, vector<1x512xf32>
    tpu.vector_store %arg10[%c0_104, %276], %275 {strides = array<i32>} : memref<1x1024xf32, #tpu.memory_space<vmem>>, vector<1x512xf32>,
    %c2_i32 = arith.constant 2 : i32
    return
  }
  func.func @transform_0(%arg0: i32) -> (i32, i32) {
    %c0_i32 = arith.constant 0 : i32
    %c0_i32_0 = arith.constant 0 : i32
    return %c0_i32, %arg0 : i32, i32
  }
  func.func @transform_1(%arg0: i32) -> (i32, i32) {
    %c0_i32 = arith.constant 0 : i32
    %c0_i32_0 = arith.constant 0 : i32
    %c0_i32_1 = arith.constant 0 : i32
    return %c0_i32, %c0_i32_0 : i32, i32
  }
  func.func @transform_2(%arg0: i32) -> (i32, i32) {
    %c0_i32 = arith.constant 0 : i32
    %c0_i32_0 = arith.constant 0 : i32
    %c0_i32_1 = arith.constant 0 : i32
    return %c0_i32, %c0_i32_0 : i32, i32
  }
  func.func @transform_3(%arg0: i32) -> (i32, i32) {
    %c0_i32 = arith.constant 0 : i32
    %c0_i32_0 = arith.constant 0 : i32
    %c0_i32_1 = arith.constant 0 : i32
    return %c0_i32, %c0_i32_0 : i32, i32
  }
  func.func @transform_4(%arg0: i32) -> (i32, i32) {
    %c0_i32 = arith.constant 0 : i32
    %c0_i32_0 = arith.constant 0 : i32
    %c0_i32_1 = arith.constant 0 : i32
    return %c0_i32, %c0_i32_0 : i32, i32
  }
  func.func @transform_5(%arg0: i32) -> (i32, i32) {
    %c0_i32 = arith.constant 0 : i32
    %c0_i32_0 = arith.constant 0 : i32
    %c0_i32_1 = arith.constant 0 : i32
    return %c0_i32, %c0_i32_0 : i32, i32
  }
  func.func @transform_6(%arg0: i32) -> (i32, i32) {
    %c0_i32 = arith.constant 0 : i32
    %c0_i32_0 = arith.constant 0 : i32
    %c0_i32_1 = arith.constant 0 : i32
    return %c0_i32, %c0_i32_0 : i32, i32
  }
  func.func @transform_7(%arg0: i32) -> (i32, i32) {
    %c0_i32 = arith.constant 0 : i32
    %c0_i32_0 = arith.constant 0 : i32
    %c0_i32_1 = arith.constant 0 : i32
    return %c0_i32, %c0_i32_0 : i32, i32
  }
  func.func @transform_8(%arg0: i32) -> (i32, i32) {
    %c0_i32 = arith.constant 0 : i32
    %c0_i32_0 = arith.constant 0 : i32
    %c0_i32_1 = arith.constant 0 : i32
    return %c0_i32, %c0_i32_0 : i32, i32
  }
  func.func @transform_9(%arg0: i32) -> (i32, i32) {
    %c0_i32 = arith.constant 0 : i32
    %c0_i32_0 = arith.constant 0 : i32
    return %c0_i32, %arg0 : i32, i32
  }
}

</mosaic_0001>

<bundles_post_ra>
// kernel: tpu_custom_call.1
= control target key start
LH: loop header
LB: loop body
LE: loop exit
PB: predicated region body
PF: predicated region fallthrough
CT: control target
= control target key end

     0   :  { %s7563_s0 = inlined_call_operand.vmem [shape: f32[2,2048], index: 0, kind: input, shape index: {}]   ;;  %s7564_s1 = inlined_call_operand.vmem [shape: f32[32,2], index: 1, kind: input, shape index: {}]   ;;  %s7565_s2 = inlined_call_operand.vmem [shape: f32[32,1], index: 2, kind: input, shape index: {}]   ;;  %s7566_s3 = inlined_call_operand.vmem [shape: f32[32,32], index: 3, kind: input, shape index: {}]   ;;  %s7567_s4 = inlined_call_operand.vmem [shape: f32[32,1], index: 4, kind: input, shape index: {}]   ;;  %s7568_s5 = inlined_call_operand.vmem [shape: f32[32,32], index: 5, kind: input, shape index: {}]   ;;  %s7569_s6 = inlined_call_operand.vmem [shape: f32[32,1], index: 6, kind: input, shape index: {}]   ;;  %s7570_s7 = inlined_call_operand.vmem [shape: f32[1,32], index: 7, kind: input, shape index: {}]   ;;  %s7571_s8 = inlined_call_operand.<no memory space> [shape: f32[1,1], index: 8, kind: input, shape index: {}]   ;;  %s7572_s9 = inlined_call_operand.hbm [shape: f32[1,2048], index: 9, kind: output, shape index: {}]  }
   0x1   :  { %v14_v0 = vstv %s7571_s8 }
   0x2   :  { %15 = vst [vmem:[#allocation2] sm:$0x1] %v14_v0 }
   0x3   :  { %16 = vsyncpa [#allocation4], 0 }
   0x4   :  { %18 = vsyncpa [#allocation4 + $0x1], 0  ;;  %s4868_s11 = smov 0   ;;  %s4870_s12 = smov 0  }
   0x5   :  { %s4872_s13 = smov 0   ;;  %s4874_s14 = smov 0  }
   0x6 LB: > { %s4889_s8 = sadd.s32 4294967295, %s4808_s14   ;;  %s4515_s15 = sadd.s32 4294967294, %s4808_s14   ;;  %s4808_s14 = sphi %s4874_s14, %s7785_s14   ;;  %s4804_s13 = sphi %s4872_s13, %s7784_s13   ;;  %s4800_s12 = sphi %s4870_s12, %s7783_s12   ;;  %s4796_s11 = sphi %s4868_s11, %s7782_s11  }
   0x7   : > { %s4893_s16 = sadd.s32 1, %s4808_s14   ;;  %s225_s17 = sadd.s32 1, %s4804_s13 }
   0x8   : > { %s222_s18 = ssub.s32 %s4808_s14, %s4893_s16  ;;  %p235_p0 = scmp.ne.s32.totalorder %s4804_s13, %s4800_s12 }
   0x9   : > { %p223_p1 = scmp.eq.s32.totalorder %s222_s18, 0  ;;  %p236_p2 = scmp.eq.s32.totalorder %s4889_s8, 1 }
   0xa   : > { %p241_p3 = scmp.ne.s32.totalorder %s4800_s12, %s4796_s11  ;;  %p242_p4 = scmp.eq.s32.totalorder %s4515_s15, 1 }
   0xb   : > { %s4904_s19 = scalar_select %p223_p1, %s4804_s13, %s225_s17  }
   0xc   : > { %p4906_p5 = por %p236_p2, %p235_p0  ;;  %p4910_p6 = por %p242_p4, %p241_p3 }
   0xd   : > { %p4518_p7 = scmp.ge.s32.totalorder %s4808_s14, 1  ;;  %p293_p8 = scmp.lt.s32.totalorder %s4808_s14, 3 }
   0xf   : > { %p294_p9 = pnand %p4518_p7, %p293_p8 }
  0x11   : > { %297 = sbr.rel (%p294_p9) target bundleno = 2239 (0x8bf), region = 56 }
  0x18   : > { %s4520_s22 = sshll.u32 %s4889_s8, 3  ;;  %v7573_v1 = vlaneseq  ;;  %v4810_v2 = vmov 1983009808   ;;  %v7574_v5 = vmov 0.0   ;;  %v349_v6 = vld [vmem:[%s7565_s2] sm:$0xff]  ;;  %v4812_v8 = vmov 0  }
  0x19   : > { %p330_p10 = scmp.lt.s32.totalorder %s4520_s22, 15  ;;  %v386_v3 = vunpack.c.l.s4 %v4810_v2  ;;  %487 = vmatprep.mubr.f32.mxu0 %v7574_v5  ;;  %576 = vmatprep.mubr.f32.mxu1 %v7574_v5  ;;  %v351_v9 = vld [vmem:[%s7565_s2 + $0x10] sm:$0xff]  ;;  %v350_v11 = vld [vmem:[%s7565_s2 + $0x8] sm:$0xff]  ;;  %v352_v12 = vld [vmem:[%s7565_s2 + $0x18] sm:$0xff]  ;;  %vm414_vm0 = vcmask 1041408   ;;  %vm401_vm1 = vcmask 15360  }
  0x1a   : > { %v4918_v4 = vshrl.u32 %v7573_v1, 7  ;;  %4729 = vset.pattern.permute.xlu0 %v4812_v8  ;;  %4730 = vset.pattern.permute.xlu1 %v4812_v8  ;;  %v353_v16 = vld [vmem:[%s7567_s4] sm:$0xff]  ;;  %v354_v19 = vld [vmem:[%s7567_s4 + $0x8] sm:$0xff]  ;;  %v355_v22 = vld [vmem:[%s7567_s4 + $0x10] sm:$0xff]  ;;  %vm1037_vm2 = vcmask 261120   ;;  %s326_s23 = sand.u32 1, %s4800_s12  }
  0x1b   : > { %s7787_s22 = smov (!%p330_p10, %s4520_s22), 15  ;;  %v387_v7 = vunpack.c.0.s8 %v386_v3  ;;  %365 = vperm.xlu0 %4729, %v349_v6   ;;  %375 = vperm.xlu1 %4730, %v351_v9   ;;  %v336_v20 = vld [vmem:[%s7564_s1] sm:$0xff]  ;;  %v356_v23 = vld [vmem:[%s7567_s4 + $0x18] sm:$0xff]  ;;  %v337_v24 = vld [vmem:[%s7564_s1 + $0x8] sm:$0xff]  ;;  %s4519_s24 = sshll.u32 %s326_s23, 3 }
  0x1c   : > { %7674 = vst [vmem:[#allocation6_spill] sm:$0xff] %v4918_v4  ;;  %s4521_s27 = sshll.u32 %s7787_s22, 1  ;;  %v357_v25 = vld [vmem:[%s7569_s6] sm:$0xff]  ;;  %v358_v26 = vld [vmem:[%s7569_s6 + $0x8] sm:$0xff]  ;;  %v338_v27 = vld [vmem:[%s7564_s1 + $0x10] sm:$0xff]  ;;  %s6669_s25 = scalar_lea.vmem [#allocation3], %s4519_s24 }
  0x1d   : > { %v4929_v10 = vsub.s32 %v387_v7, %v4918_v4  ;;  %s4937_s15 = scalar_lea.vmem %s7563_s0, %s4521_s27  ;;  %v359_v28 = vld [vmem:[%s7569_s6 + $0x10] sm:$0xff]  ;;  %v360_v29 = vld [vmem:[%s7569_s6 + $0x18] sm:$0xff]  ;;  %v361_v31 = vld [vmem:[#allocation2] sm:$0x1]  ;;  %s4589_s17 = sshll.u32 %s4889_s8, 7 }
  0x1e   : > { %v362_v13 = vld [vmem:[%s4937_s15] sm:$0xff]  ;;  %v339_v30 = vld [vmem:[%s7564_s1 + $0x18] sm:$0xff]  ;;  %s4456_s18 = sshll.u32 %s6669_s25, 4  ;;  %s4442_s26 = scalar_lea.sflag [#allocation4], %s326_s23  ;;  %s7518_s18 = int_to_ptr.vmem [resolvable:$true] %s4456_s18 }
  0x1f   : > { %7675 = vst [vmem:[#allocation7_spill] sm:$0xff] %v4929_v10  ;;  %v391_v14 = vrot.slane %v362_v13, %v4929_v10  ;;  %v384_v15 = vcombine.high %v362_v13, %v362_v13  ;;  %370 = vperm.xlu0 %4729, %v350_v11   ;;  %380 = vperm.xlu1 %4730, %v352_v12   ;;  %s4746_s8 = scalar_lea.vmem %s7518_s18, 128  ;;  %s4814_s27 = smov [#allocation3]  }
  0x20   : > { %p4747_p11 = scmp.ne.s32.totalorder %s7518_s18, %s4746_s8  ;;  %s4750_s28 = sshll.u32 %s4814_s27, 4  ;;  %s4751_s28 = int_to_ptr.vmem [resolvable:$false] %s4750_s28 }
  0x21   : > { %v399_v17 = vcombine.high %v391_v14, %v391_v14  ;;  %v398_v18 = vrot.slane %v384_v15, %v4929_v10  ;;  %s4752_s29 = scalar_lea.vmem %s4751_s28, 256  ;;  %p4753_p0 = scmp.lt.s32.totalorder %s7518_s18, %s4751_s28 }
  0x22   : > { %p4748_p12 = pnand %p4747_p11, %p4906_p5  ;;  %p4754_p1 = scmp.lt.s32.totalorder %s4752_s29, %s4746_s8 }
  0x23   : > { %4522 = vmatprep.subr.msk.mxu0 %vm414_vm0, %v399_v17  ;;  %v400_v21 = vcombine.high %v398_v18, %v398_v18  ;;  %1019 = vperm.xlu0 %4729, %v353_v16  }
  0x24   : > { %4523 = vmatpush1.msk.msra.mxu0 %vm414_vm0, %v391_v14  ;;  %1024 = vperm.xlu1 %4730, %v354_v19   ;;  %p4749_p13 = pneg %p4748_p12  ;;  %p4755_p2 = por %p4754_p1, %p4753_p0 }
  0x25   : > { %4524 = vmatmul.mubr.msk.f32.vlgmr.msra.gmra.mrb[0].mxu0 %vm401_vm1, %v336_v20  ;;  %4528 = vmatprep.subr.msk.mxu1 %vm414_vm0, %v400_v21 }
  0x26   : > { %4529 = vmatpush1.msk.msra.mxu1 %vm414_vm0, %v398_v18  ;;  %493 = vmatprep.mubr.f32.mxu0 %v7574_v5  ;;  %p4756_p3 = pnand %p4755_p2, %p4749_p13 }
  0x27   : > { %4530 = vmatmul.mubr.msk.f32.vlgmr.msra.gmra.mrb[0].mxu1 %vm401_vm1, %v336_v20  ;;  %1029 = vperm.xlu0 %4729, %v355_v22  }
  0x28   : > { %582 = vmatprep.mubr.f32.mxu1 %v7574_v5  ;;  %1034 = vperm.xlu1 %4730, %v356_v23  }
  0x29   : > { %4525 = vmatmul.mubr.msk.f32.gmra.mrb[2].mxu0 %vm401_vm1, %v337_v24 }
  0x2a   : > { %499 = vmatprep.mubr.f32.mxu0 %v7574_v5 }
  0x2b   : > { %4531 = vmatmul.mubr.msk.f32.gmra.mrb[2].mxu1 %vm401_vm1, %v337_v24  ;;  %1646 = vperm.xlu0 %4729, %v357_v25  }
  0x2c   : > { %588 = vmatprep.mubr.f32.mxu1 %v7574_v5  ;;  %1651 = vperm.xlu1 %4730, %v358_v26  }
  0x2d   : > { %4526 = vmatmul.mubr.msk.f32.gmra.mrb[4].mxu0 %vm401_vm1, %v338_v27 }
  0x2e   : > { %505 = vmatprep.mubr.f32.mxu0 %v7574_v5 }
  0x2f   : > { %4532 = vmatmul.mubr.msk.f32.gmra.mrb[4].mxu1 %vm401_vm1, %v338_v27  ;;  %1656 = vperm.xlu0 %4729, %v359_v28  }
  0x30   : > { %594 = vmatprep.mubr.f32.mxu1 %v7574_v5  ;;  %1661 = vperm.xlu1 %4730, %v360_v29  }
  0x31   : > { %4527 = vmatmul.mubr.msk.f32.gmra.mrb[6].mxu0 %vm401_vm1, %v339_v30 }
  0x32   : > { %1114 = vmatprep.mubr.f32.mxu0 %v7574_v5 }
  0x33   : > { %4533 = vmatmul.mubr.msk.f32.gmra.mrb[6].mxu1 %vm401_vm1, %v339_v30  ;;  %2272 = vperm.xlu0 %4729, %v361_v31  }
  0x34   : > { %1203 = vmatprep.mubr.f32.mxu1 %v7574_v5 }
  0x9a   : > { %v5001_v32 = vpop.permute.xlu0 %365 }
  0x9b   : > { %7676 = vst [vmem:[#allocation8_spill] sm:$0xff] %v5001_v32 }
  0x9e   : > { %v5006_v41 = vpop.permute.xlu0 %370 }
  0x9f   : > { %7677 = vst [vmem:[#allocation9_spill] sm:$0xff] %v5006_v41 }
  0xf8   : > { %v489_v33 = vpop.f32.mrb[0].mxu0 }
  0xf9   : > { %v490_v34 = vadd.f32 %v489_v33, %v5001_v32  ;;  %v491_v35 = vpop.f32.mrb[1].mxu0 }
  0xfa   : > { %v492_v36 = vadd.f32 %v491_v35, %v5001_v32  ;;  %v578_v37 = vpop.f32.mrb[0].mxu1 }
  0xfb   : > { %v601_v38 = vmul.f32 0.31830987, %v490_v34  ;;  %v579_v39 = vadd.f32 %v578_v37, %v5001_v32  ;;  %v580_v40 = vpop.f32.mrb[1].mxu1 }
  0xfc   : > { %v602_v42 = vmul.f32 0.31830987, %v492_v36  ;;  %v581_v43 = vadd.f32 %v580_v40, %v5001_v32  ;;  %v495_v44 = vpop.f32.mrb[2].mxu0 }
  0xfd   : > { %v617_v45 = vadd.f32 0.5, %v601_v38  ;;  %v603_v46 = vmul.f32 0.31830987, %v579_v39  ;;  %v5010_v47 = vadd.f32 %v495_v44, %v5006_v41  ;;  %v497_v48 = vpop.f32.mrb[3].mxu0 }
  0xfe   : > { %v618_v49 = vadd.f32 0.5, %v602_v42  ;;  %v604_v50 = vmul.f32 0.31830987, %v581_v43  ;;  %v5013_v51 = vadd.f32 %v497_v48, %v5006_v41  ;;  %v584_v52 = vpop.f32.mrb[2].mxu1 }
  0xff   : > { %v5015_v53 = vfloor.f32 %v617_v45  ;;  %v619_v54 = vadd.f32 0.5, %v603_v46  ;;  %v586_v55 = vpop.f32.mrb[3].mxu1  ;;  %v605_v58 = vmul.f32 0.31830987, %v5010_v47  ;;  %v5021_v59 = vadd.f32 %v584_v52, %v5006_v41 }
 0x100   : > { %v5017_v56 = vfloor.f32 %v618_v49  ;;  %v620_v57 = vadd.f32 0.5, %v604_v50  ;;  %v5023_v60 = vpop.f32.mrb[4].mxu0  ;;  %v606_v0 = vmul.f32 0.31830987, %v5013_v51  ;;  %v5037_v8 = vadd.f32 %v586_v55, %v5006_v41 }
 0x101   : > { %v649_v61 = vmul.f32 3.1414795, %v5015_v53  ;;  %v681_v62 = vmul.f32 0.00011315942, %v5015_v53  ;;  %v5027_v63 = vfloor.f32 %v619_v54  ;;  %v5030_v2 = vpop.f32.mrb[5].mxu0  ;;  %v713_v12 = vmul.f32 1.9841873e-09, %v5015_v53 }
 0x102   : > { %v650_v3 = vmul.f32 3.1414795, %v5017_v56  ;;  %v682_v6 = vmul.f32 0.00011315942, %v5017_v56  ;;  %v5034_v7 = vfloor.f32 %v620_v57  ;;  %v5039_v9 = vpop.f32.mrb[4].mxu1  ;;  %v621_v23 = vadd.f32 0.5, %v605_v58 }
 0x103   : > { %v665_v11 = vsub.f32 %v490_v34, %v649_v61  ;;  %v651_v13 = vmul.f32 3.1414795, %v5027_v63  ;;  %v683_v14 = vmul.f32 0.00011315942, %v5027_v63  ;;  %v5044_v15 = vpop.f32.mrb[5].mxu1  ;;  %v715_v17 = vmul.f32 1.9841873e-09, %v5027_v63 }
 0x104   : > { %v666_v16 = vsub.f32 %v492_v36, %v650_v3  ;;  %v652_v18 = vmul.f32 3.1414795, %v5034_v7  ;;  %v684_v19 = vmul.f32 0.00011315942, %v5034_v7  ;;  %v5049_v20 = vpop.f32.mrb[6].mxu0  ;;  %v622_v24 = vadd.f32 0.5, %v606_v0 }
 0x105   : > { %v697_v21 = vsub.f32 %v665_v11, %v681_v62  ;;  %v667_v22 = vsub.f32 %v579_v39, %v651_v13  ;;  %v5051_v25 = vpop.f32.mrb[7].mxu0  ;;  %v607_v28 = vmul.f32 0.31830987, %v5021_v59  ;;  %v608_v29 = vmul.f32 0.31830987, %v5037_v8 }
 0x106   : > { %v698_v26 = vsub.f32 %v666_v16, %v682_v6  ;;  %v668_v27 = vsub.f32 %v581_v43, %v652_v18  ;;  %v5055_v30 = vpop.f32.mrb[6].mxu1  ;;  %v5059_v34 = vfloor.f32 %v621_v23  ;;  %v5061_v35 = vfloor.f32 %v622_v24 }
 0x107   : > { %v5057_v31 = vsub.f32 %v697_v21, %v713_v12  ;;  %v699_v33 = vsub.f32 %v667_v22, %v683_v14  ;;  %v5063_v36 = vpop.f32.mrb[7].mxu1  ;;  %v714_v37 = vmul.f32 1.9841873e-09, %v5017_v56  ;;  %v716_v39 = vmul.f32 1.9841873e-09, %v5034_v7  ;;  %v5096_v14 = vpop.permute.xlu1 %375 }
 0x108   : > { %v700_v38 = vsub.f32 %v668_v27, %v684_v19  ;;  %v623_v40 = vadd.f32 0.5, %v607_v28  ;;  %v653_v44 = vmul.f32 3.1414795, %v5059_v34  ;;  %v685_v45 = vmul.f32 0.00011315942, %v5059_v34  ;;  %7678 = vst [vmem:[#allocation10_spill] sm:$0xff] %v5096_v14 }
 0x109   : > { %v745_v42 = vmul.f32 %v5057_v31, %v5057_v31  ;;  %v5069_v43 = vsub.f32 %v699_v33, %v715_v17  ;;  %v5073_v46 = vsub.f32 %v698_v26, %v714_v37  ;;  %v654_v49 = vmul.f32 3.1414795, %v5061_v35 }
 0x10a   : > { %v5075_v48 = vsub.f32 %v700_v38, %v716_v39  ;;  %v624_v50 = vadd.f32 0.5, %v608_v29  ;;  %v669_v55 = vsub.f32 %v5010_v47, %v653_v44  ;;  %v686_v57 = vmul.f32 0.00011315942, %v5061_v35 }
 0x10b   : > { %v761_v52 = vmul.f32 2.608316e-06, %v745_v42  ;;  %v747_v54 = vmul.f32 %v5069_v43, %v5069_v43  ;;  %v717_v58 = vmul.f32 1.9841873e-09, %v5059_v34  ;;  %v670_v61 = vsub.f32 %v5013_v51, %v654_v49 }
 0x10c   : > { %v701_v3 = vsub.f32 %v669_v55, %v685_v45  ;;  %v5084_v6 = vfloor.f32 %v623_v40  ;;  %v5088_v11 = vmul.f32 %v5073_v46, %v5073_v46  ;;  %v5092_v12 = vmul.f32 %v5075_v48, %v5075_v48 }
 0x10d   : > { %v777_v62 = vadd.f32 -0.0001981069, %v761_v52  ;;  %v763_v0 = vmul.f32 2.608316e-06, %v747_v54  ;;  %v702_v47 = vsub.f32 %v670_v61, %v686_v57  ;;  %v5094_v13 = vfloor.f32 %v624_v50 }
 0x10e   : > { %v5098_v17 = vsub.f32 %v701_v3, %v717_v58  ;;  %v655_v18 = vmul.f32 3.1414795, %v5084_v6  ;;  %v718_v19 = vmul.f32 1.9841873e-09, %v5061_v35  ;;  %v687_v21 = vmul.f32 0.00011315942, %v5084_v6 }
 0x10f   : > { %v793_v16 = vmul.f32 %v777_v62, %v745_v42  ;;  %v779_v51 = vadd.f32 -0.0001981069, %v763_v0  ;;  %v656_v22 = vmul.f32 3.1414795, %v5094_v13  ;;  %v502_v23 = vadd.f32 %v5023_v60, %v5096_v14 }
 0x110   : > { %v5108_v27 = vmul.f32 %v5098_v17, %v5098_v17  ;;  %v671_v28 = vsub.f32 %v5021_v59, %v655_v18  ;;  %v5111_v29 = vsub.f32 %v702_v47, %v718_v19  ;;  %v719_v33 = vmul.f32 1.9841873e-09, %v5084_v6 }
 0x111   : > { %v809_v24 = vadd.f32 0.008333079, %v793_v16  ;;  %v795_v26 = vmul.f32 %v779_v51, %v747_v54  ;;  %v672_v37 = vsub.f32 %v5037_v8, %v656_v22  ;;  %v688_v38 = vmul.f32 0.00011315942, %v5094_v13 }
 0x112   : > { %v765_v60 = vmul.f32 2.608316e-06, %v5108_v27  ;;  %v703_v44 = vsub.f32 %v671_v28, %v687_v21  ;;  %v720_v49 = vmul.f32 1.9841873e-09, %v5094_v13  ;;  %v609_v50 = vmul.f32 0.31830987, %v502_v23 }
 0x113   : > { %v825_v39 = vmul.f32 %v809_v24, %v745_v42  ;;  %v811_v40 = vadd.f32 0.008333079, %v795_v26  ;;  %v704_v45 = vsub.f32 %v672_v37, %v688_v38  ;;  %v504_v59 = vadd.f32 %v5030_v2, %v5096_v14 }
 0x114   : > { %v781_v57 = vadd.f32 -0.0001981069, %v765_v60  ;;  %v5120_v58 = vsub.f32 %v703_v44, %v719_v33  ;;  %v625_v61 = vadd.f32 0.5, %v609_v50  ;;  %v5126_v0 = vadd.f32 %v5039_v9, %v5096_v14 }
 0x115   : > { %v841_v52 = vadd.f32 -0.1666666, %v825_v39  ;;  %v827_v55 = vmul.f32 %v811_v40, %v747_v54  ;;  %v5122_v8 = vsub.f32 %v704_v45, %v720_v49  ;;  %v610_v62 = vmul.f32 0.31830987, %v504_v59 }
 0x116   : > { %v797_v47 = vmul.f32 %v781_v57, %v5108_v27  ;;  %v5131_v16 = vmul.f32 %v5111_v29, %v5111_v29  ;;  %v751_v2 = vmul.f32 %v5120_v58, %v5120_v58  ;;  %v5136_v18 = vmul.f32 2.608316e-06, %v5088_v11 }
 0x117   : > { %v843_v3 = vadd.f32 -0.1666666, %v827_v55  ;;  %v857_v51 = vmul.f32 %v841_v52, %v745_v42  ;;  %v5138_v19 = vfloor.f32 %v625_v61  ;;  %v626_v21 = vadd.f32 0.5, %v610_v62  ;;  %v5164_v61 = vpop.permute.xlu1 %380 }
 0x118   : > { %v813_v9 = vadd.f32 0.008333079, %v797_v47  ;;  %v767_v24 = vmul.f32 2.608316e-06, %v751_v2  ;;  %v5142_v26 = vmul.f32 %v5122_v8, %v5122_v8  ;;  %v611_v42 = vmul.f32 0.31830987, %v5126_v0 }
 0x119   : > { %v859_v22 = vmul.f32 %v843_v3, %v747_v54  ;;  %v657_v28 = vmul.f32 3.1414795, %v5138_v19  ;;  %v689_v33 = vmul.f32 0.00011315942, %v5138_v19  ;;  %v5146_v37 = vfloor.f32 %v626_v21  ;;  %7679 = vst [vmem:[#allocation11_spill] sm:$0xff] %v5164_v61 }
 0x11a   : > { %v5150_v38 = vmul.f32 2.608316e-06, %v5092_v12  ;;  %v829_v39 = vmul.f32 %v813_v9, %v5108_v27  ;;  %v5154_v54 = vmul.f32 2.608316e-06, %v5131_v16  ;;  %v783_v40 = vadd.f32 -0.0001981069, %v767_v24 }
 0x11b   : > { %v873_v60 = vmul.f32 %v857_v51, %v5057_v31  ;;  %v673_v44 = vsub.f32 %v502_v23, %v657_v28  ;;  %v658_v45 = vmul.f32 3.1414795, %v5146_v37  ;;  %v690_v49 = vmul.f32 0.00011315942, %v5146_v37 }
 0x11c   : > { %v875_v50 = vmul.f32 %v859_v22, %v5069_v43  ;;  %v799_v52 = vmul.f32 %v783_v40, %v751_v2  ;;  %v5161_v55 = vmul.f32 2.608316e-06, %v5142_v26  ;;  %v721_v57 = vmul.f32 1.9841873e-09, %v5138_v19 }
 0x11d   : > { %v705_v62 = vsub.f32 %v673_v44, %v689_v33  ;;  %v674_v3 = vsub.f32 %v504_v59, %v658_v45  ;;  %v627_v47 = vadd.f32 0.5, %v611_v42  ;;  %v593_v23 = vadd.f32 %v5044_v15, %v5096_v14 }
 0x11e   : > { %v845_v51 = vadd.f32 -0.1666666, %v829_v39  ;;  %v815_v21 = vadd.f32 0.008333079, %v799_v52  ;;  %v508_v9 = vadd.f32 %v5049_v20, %v5164_v61  ;;  %v510_v22 = vadd.f32 %v5051_v25, %v5164_v61 }
 0x11f   : > { %v5172_v24 = vsub.f32 %v705_v62, %v721_v57  ;;  %v706_v28 = vsub.f32 %v674_v3, %v690_v49  ;;  %v5174_v40 = vfloor.f32 %v627_v47  ;;  %v612_v1 = vmul.f32 0.31830987, %v593_v23 }
 0x120   : > { %v831_v33 = vmul.f32 %v815_v21, %v751_v2  ;;  %v722_v59 = vmul.f32 1.9841873e-09, %v5146_v37  ;;  %v613_v42 = vmul.f32 0.31830987, %v508_v9  ;;  %v614_v44 = vmul.f32 0.31830987, %v510_v22 }
 0x121   : > { %v5178_v15 = vadd.f32 %v873_v60, %v5057_v31  ;;  %v5181_v39 = vadd.f32 %v875_v50, %v5069_v43  ;;  %v753_v20 = vmul.f32 %v5172_v24, %v5172_v24  ;;  %v659_v25 = vmul.f32 3.1414795, %v5174_v40 }
 0x122   : > { %v861_v45 = vmul.f32 %v845_v51, %v5108_v27  ;;  %v847_v49 = vadd.f32 -0.1666666, %v831_v33  ;;  %v5187_v52 = vsub.f32 %v706_v28, %v722_v59  ;;  %v628_v57 = vadd.f32 0.5, %v612_v1 }
 0x123   : > { %v769_v62 = vmul.f32 2.608316e-06, %v753_v20  ;;  %v675_v3 = vsub.f32 %v5126_v0, %v659_v25  ;;  %v691_v31 = vmul.f32 0.00011315942, %v5174_v40  ;;  %v629_v60 = vadd.f32 0.5, %v613_v42 }
 0x124   : > { %v863_v47 = vmul.f32 %v847_v49, %v751_v2  ;;  %v723_v43 = vmul.f32 1.9841873e-09, %v5174_v40  ;;  %v5192_v50 = vfloor.f32 %v628_v57  ;;  %v630_v21 = vadd.f32 0.5, %v614_v44 }
 0x125   : > { %v785_v5 = vadd.f32 -0.0001981069, %v769_v62  ;;  %v707_v14 = vsub.f32 %v675_v3, %v691_v31  ;;  %v5194_v41 = vfloor.f32 %v629_v60  ;;  %v597_v27 = vadd.f32 %v5055_v30, %v5164_v61 }
 0x126   : > { %v877_v1 = vmul.f32 %v861_v45, %v5098_v17  ;;  %v879_v0 = vmul.f32 %v863_v47, %v5120_v58  ;;  %v5202_v51 = vmul.f32 %v5187_v52, %v5187_v52  ;;  %v660_v2 = vmul.f32 3.1414795, %v5192_v50 }
 0x127   : > { %v801_v28 = vmul.f32 %v785_v5, %v753_v20  ;;  %v5205_v33 = vsub.f32 %v707_v14, %v723_v43  ;;  %v692_v59 = vmul.f32 0.00011315942, %v5192_v50  ;;  %v661_v42 = vmul.f32 3.1414795, %v5194_v41 }
 0x128   : > { %v676_v44 = vsub.f32 %v593_v23, %v660_v2  ;;  %v724_v30 = vmul.f32 1.9841873e-09, %v5192_v50  ;;  %v693_v25 = vmul.f32 0.00011315942, %v5194_v41  ;;  %v5211_v45 = vfloor.f32 %v630_v21 }
 0x129   : > { %7680 = vst [vmem:[#allocation12_spill] sm:$0xff] %v5205_v33  ;;  %v817_v49 = vadd.f32 0.008333079, %v801_v28  ;;  %v5215_v57 = vmul.f32 %v5205_v33, %v5205_v33  ;;  %v677_v62 = vsub.f32 %v508_v9, %v661_v42  ;;  %v615_v5 = vmul.f32 0.31830987, %v597_v27 }
 0x12a   : > { %v708_v14 = vsub.f32 %v676_v44, %v692_v59  ;;  %v725_v3 = vmul.f32 1.9841873e-09, %v5194_v41  ;;  %v662_v31 = vmul.f32 3.1414795, %v5211_v45  ;;  %v694_v23 = vmul.f32 0.00011315942, %v5211_v45 }
 0x12b   : > { %v833_v60 = vmul.f32 %v817_v49, %v753_v20  ;;  %v771_v47 = vmul.f32 2.608316e-06, %v5215_v57  ;;  %v709_v43 = vsub.f32 %v677_v62, %v693_v25  ;;  %v631_v21 = vadd.f32 0.5, %v615_v5 }
 0x12c   : > { %v5221_v2 = vsub.f32 %v708_v14, %v724_v30  ;;  %v678_v28 = vsub.f32 %v510_v22, %v662_v31  ;;  %v726_v32 = vmul.f32 1.9841873e-09, %v5211_v45  ;;  %v599_v9 = vadd.f32 %v5063_v36, %v5164_v61 }
 0x12d   : > { %v849_v59 = vadd.f32 -0.1666666, %v833_v60  ;;  %v787_v42 = vadd.f32 -0.0001981069, %v771_v47  ;;  %v5226_v44 = vsub.f32 %v709_v43, %v725_v3  ;;  %v5228_v4 = vfloor.f32 %v631_v21 }
 0x12e   : > { %7681 = vst [vmem:[#allocation13_spill] sm:$0xff] %v5221_v2  ;;  %v710_v10 = vsub.f32 %v678_v28, %v694_v23  ;;  %v616_v49 = vmul.f32 0.31830987, %v599_v9  ;;  %v778_v33 = vadd.f32 -0.0001981069, %v5136_v18  ;;  %v5237_v5 = vadd.f32 %v877_v1, %v5098_v17 }
 0x12f   : > { %7682 = vst [vmem:[#allocation14_spill] sm:$0xff] %v5228_v4  ;;  %v782_v25 = vadd.f32 -0.0001981069, %v5154_v54  ;;  %v865_v30 = vmul.f32 %v849_v59, %v753_v20  ;;  %v803_v22 = vmul.f32 %v787_v42, %v5215_v57  ;;  %v757_v62 = vmul.f32 %v5226_v44, %v5226_v44 }
 0x130   : > { %v663_v36 = vmul.f32 3.1414795, %v5228_v4  ;;  %v5240_v14 = vmul.f32 2.608316e-06, %v5202_v51  ;;  %v5244_v3 = vmul.f32 %v5221_v2, %v5221_v2  ;;  %v5246_v18 = vsub.f32 %v710_v10, %v726_v32 }
 0x131   : > { %v881_v54 = vmul.f32 %v865_v30, %v5172_v24  ;;  %v773_v20 = vmul.f32 2.608316e-06, %v757_v62  ;;  %v695_v23 = vmul.f32 0.00011315942, %v5228_v4  ;;  %v819_v60 = vadd.f32 0.008333079, %v803_v22 }
 0x132   : > { %v679_v31 = vsub.f32 %v597_v27, %v663_v36  ;;  %v632_v47 = vadd.f32 0.5, %v616_v49  ;;  %v794_v17 = vmul.f32 %v778_v33, %v5088_v11  ;;  %v798_v1 = vmul.f32 %v782_v25, %v5131_v16 }
 0x133   : > { %v5253_v43 = vadd.f32 %v879_v0, %v5120_v58  ;;  %v789_v21 = vadd.f32 -0.0001981069, %v773_v20  ;;  %v727_v10 = vmul.f32 1.9841873e-09, %v5228_v4  ;;  %v5257_v32 = vmul.f32 2.608316e-06, %v5244_v3 }
 0x134   : > { %v711_v28 = vsub.f32 %v679_v31, %v695_v23  ;;  %v5259_v59 = vfloor.f32 %v632_v47  ;;  %v810_v27 = vadd.f32 0.008333079, %v794_v17  ;;  %v814_v42 = vadd.f32 0.008333079, %v798_v1 }
 0x135   : > { %v805_v30 = vmul.f32 %v789_v21, %v757_v62  ;;  %v5263_v33 = vmul.f32 %v5246_v18, %v5246_v18  ;;  %v906_v58 = vmul.f32 0.5, %v5017_v56  ;;  %v5269_v0 = vadd.f32 %v881_v54, %v5172_v24 }
 0x136   : > { %v5265_v49 = vsub.f32 %v711_v28, %v727_v10  ;;  %v835_v25 = vmul.f32 %v819_v60, %v5215_v57  ;;  %v664_v22 = vmul.f32 3.1414795, %v5259_v59  ;;  %v826_v36 = vmul.f32 %v810_v27, %v5088_v11 }
 0x137   : > { %7684 = vst [vmem:[#allocation16_spill] sm:$0xff] %v5269_v0  ;;  %v821_v20 = vadd.f32 0.008333079, %v805_v30  ;;  %v696_v23 = vmul.f32 0.00011315942, %v5259_v59  ;;  %v830_v47 = vmul.f32 %v814_v42, %v5131_v16  ;;  %v910_v24 = vmul.f32 0.5, %v5061_v35 }
 0x138   : > { %7683 = vst [vmem:[#allocation15_spill] sm:$0xff] %v5265_v49  ;;  %v5276_v31 = vmul.f32 %v5265_v49, %v5265_v49  ;;  %v680_v17 = vsub.f32 %v599_v9, %v664_v22  ;;  %v842_v1 = vadd.f32 -0.1666666, %v826_v36  ;;  %v922_v54 = vfloor.f32 %v906_v58 }
 0x139   : > { %v837_v21 = vmul.f32 %v821_v20, %v757_v62  ;;  %v728_v28 = vmul.f32 1.9841873e-09, %v5259_v59  ;;  %v846_v10 = vadd.f32 -0.1666666, %v830_v47  ;;  %v926_v61 = vfloor.f32 %v910_v24 }
 0x13a   : > { %v775_v60 = vmul.f32 2.608316e-06, %v5276_v31  ;;  %v712_v27 = vsub.f32 %v680_v17, %v696_v23  ;;  %v858_v30 = vmul.f32 %v842_v1, %v5088_v11  ;;  %v938_v49 = vmul.f32 2.0, %v922_v54 }
 0x13b   : > { %v851_v2 = vadd.f32 -0.1666666, %v835_v25  ;;  %v853_v4 = vadd.f32 -0.1666666, %v837_v21  ;;  %v862_v9 = vmul.f32 %v846_v10, %v5131_v16  ;;  %v942_v22 = vmul.f32 2.0, %v926_v61 }
 0x13c   : > { %v791_v0 = vadd.f32 -0.0001981069, %v775_v60  ;;  %v5285_v42 = vsub.f32 %v712_v27, %v728_v28  ;;  %v874_v58 = vmul.f32 %v858_v30, %v5073_v46  ;;  %v954_v36 = vsub.f32 %v5017_v56, %v938_v49 }
 0x13d   : > { %v869_v20 = vmul.f32 %v853_v4, %v757_v62  ;;  %v878_v23 = vmul.f32 %v862_v9, %v5111_v29  ;;  %v905_v11 = vmul.f32 0.5, %v5015_v53  ;;  %v5293_v25 = vmul.f32 2.608316e-06, %v5263_v33 }
 0x13e   : > { %v807_v47 = vmul.f32 %v791_v0, %v5276_v31  ;;  %v5297_v16 = vmul.f32 %v5285_v42, %v5285_v42  ;;  %v958_v17 = vsub.f32 %v5061_v35, %v942_v22  ;;  %v970_v1 = vmul.f32 2.0, %v954_v36 }
 0x13f   : > { %v5301_v61 = vmul.f32 %v851_v2, %v5215_v57  ;;  %v890_v56 = vadd.f32 %v874_v58, %v5073_v46  ;;  %v909_v62 = vmul.f32 0.5, %v5059_v34  ;;  %v885_v49 = vmul.f32 %v869_v20, %v5226_v44 }
 0x140   : > { %v823_v4 = vadd.f32 0.008333079, %v807_v47  ;;  %v894_v0 = vadd.f32 %v878_v23, %v5111_v29  ;;  %v974_v24 = vmul.f32 2.0, %v958_v17  ;;  %v921_v54 = vfloor.f32 %v905_v11 }
 0x141   : > { %v986_v60 = vsub.f32 1.0, %v970_v1  ;;  %v925_v28 = vfloor.f32 %v909_v62  ;;  %v780_v35 = vadd.f32 -0.0001981069, %v5150_v38  ;;  %v5310_v57 = vmul.f32 2.608316e-06, %v5297_v16 }
 0x142   : > { %v839_v21 = vmul.f32 %v823_v4, %v5276_v31  ;;  %v990_v2 = vsub.f32 1.0, %v974_v24  ;;  %v937_v10 = vmul.f32 2.0, %v921_v54  ;;  %v784_v46 = vadd.f32 -0.0001981069, %v5161_v55 }
 0x143   : > { %v1002_v27 = vmul.f32 %v986_v60, %v890_v56  ;;  %v941_v30 = vmul.f32 2.0, %v925_v28  ;;  %v796_v9 = vmul.f32 %v780_v35, %v5092_v12  ;;  %v908_v29 = vmul.f32 0.5, %v5034_v7 }
 0x144   : > { %v1006_v58 = vmul.f32 %v990_v2, %v894_v0  ;;  %v953_v22 = vsub.f32 %v5015_v53, %v937_v10  ;;  %v800_v36 = vmul.f32 %v784_v46, %v5142_v26  ;;  %v912_v38 = vmul.f32 0.5, %v5094_v13 }
 0x145   : > { %v855_v20 = vadd.f32 -0.1666666, %v839_v21  ;;  %v957_v47 = vsub.f32 %v5059_v34, %v941_v30  ;;  %v812_v23 = vadd.f32 0.008333079, %v796_v9  ;;  %v924_v11 = vfloor.f32 %v908_v29 }
 0x146   : > { %v4590_v17 = vpack.c.bf16 %v1006_v58, %v1002_v27  ;;  %v969_v55 = vmul.f32 2.0, %v953_v22  ;;  %v816_v1 = vadd.f32 0.008333079, %v800_v36  ;;  %v928_v4 = vfloor.f32 %v912_v38 }
 0x147   : > { %v5320_v56 = vadd.f32 %v885_v49, %v5226_v44  ;;  %v973_v62 = vmul.f32 2.0, %v957_v47  ;;  %v828_v0 = vmul.f32 %v812_v23, %v5092_v12  ;;  %v940_v53 = vmul.f32 2.0, %v924_v11 }
 0x148   : > { %4591 = vmatprep.subr.bf16.mxu0 %v4590_v17  ;;  %v985_v24 = vsub.f32 1.0, %v969_v55  ;;  %v832_v54 = vmul.f32 %v816_v1, %v5142_v26  ;;  %v944_v21 = vmul.f32 2.0, %v928_v4  ;;  %v907_v34 = vmul.f32 0.5, %v5027_v63 }
 0x149   : > { %v5326_v60 = vmul.f32 %v855_v20, %v5276_v31  ;;  %v989_v28 = vsub.f32 1.0, %v973_v62  ;;  %v844_v35 = vadd.f32 -0.1666666, %v828_v0  ;;  %v956_v2 = vsub.f32 %v5034_v7, %v940_v53 }
 0x14a   : > { %v1001_v44 = vmul.f32 %v985_v24, %v5178_v15  ;;  %v848_v49 = vadd.f32 -0.1666666, %v832_v54  ;;  %v960_v10 = vsub.f32 %v5094_v13, %v944_v21  ;;  %v911_v46 = vmul.f32 0.5, %v5084_v6 }
 0x14b   : > { %v1005_v27 = vmul.f32 %v989_v28, %v5237_v5  ;;  %v860_v30 = vmul.f32 %v844_v35, %v5092_v12  ;;  %v972_v9 = vmul.f32 2.0, %v956_v2  ;;  %v923_v29 = vfloor.f32 %v907_v34 }
 0x14c   : > { %v864_v31 = vmul.f32 %v848_v49, %v5142_v26  ;;  %v976_v58 = vmul.f32 2.0, %v960_v10  ;;  %v927_v22 = vfloor.f32 %v911_v46  ;;  %v786_v36 = vadd.f32 -0.0001981069, %v5240_v14 }
 0x14d   : > { %v4592_v7 = vpack.c.bf16 %v1005_v27, %v1001_v44  ;;  %v876_v15 = vmul.f32 %v860_v30, %v5075_v48  ;;  %v988_v38 = vsub.f32 1.0, %v972_v9  ;;  %v939_v20 = vmul.f32 2.0, %v923_v29 }
 0x14e   : > { %v880_v13 = vmul.f32 %v864_v31, %v5122_v8  ;;  %v992_v47 = vsub.f32 1.0, %v976_v58  ;;  %v943_v23 = vmul.f32 2.0, %v927_v22  ;;  %v790_v5 = vadd.f32 -0.0001981069, %v5293_v25 }
 0x14f   : > { %4593 = vmatpush1.bf16.msra.mxu0 %v4592_v7  ;;  %v892_v12 = vadd.f32 %v876_v15, %v5075_v48  ;;  %v955_v26 = vsub.f32 %v5027_v63, %v939_v20  ;;  %v802_v11 = vmul.f32 %v786_v36, %v5202_v51  ;;  %v914_v14 = vmul.f32 0.5, %v5146_v37 }
 0x150   : > { %v896_v17 = vadd.f32 %v880_v13, %v5122_v8  ;;  %v959_v55 = vsub.f32 %v5084_v6, %v943_v23  ;;  %v806_v1 = vmul.f32 %v790_v5, %v5263_v33  ;;  %v918_v4 = vmul.f32 0.5, %v5211_v45 }
 0x151   : > { %v1004_v62 = vmul.f32 %v988_v38, %v892_v12  ;;  %v971_v0 = vmul.f32 2.0, %v955_v26  ;;  %v818_v25 = vadd.f32 0.008333079, %v802_v11  ;;  %v930_v53 = vfloor.f32 %v914_v14 }
 0x152   : > { %v1008_v24 = vmul.f32 %v992_v47, %v896_v17  ;;  %v975_v48 = vmul.f32 2.0, %v959_v55  ;;  %v822_v54 = vadd.f32 0.008333079, %v806_v1  ;;  %v934_v63 = vfloor.f32 %v918_v4 }
 0x153   : > { %v987_v21 = vsub.f32 1.0, %v971_v0  ;;  %v834_v34 = vmul.f32 %v818_v25, %v5202_v51  ;;  %v946_v28 = vmul.f32 2.0, %v930_v53  ;;  %v913_v8 = vmul.f32 0.5, %v5138_v19 }
 0x154   : > { %v4598_v35 = vpack.c.bf16 %v1008_v24, %v1004_v62  ;;  %v991_v6 = vsub.f32 1.0, %v975_v48  ;;  %v838_v2 = vmul.f32 %v822_v54, %v5263_v33  ;;  %v950_v44 = vmul.f32 2.0, %v934_v63  ;;  %v7685_v54 = vld [vmem:[#allocation16_spill] sm:$0xff] }
 0x155   : > { %v1003_v49 = vmul.f32 %v987_v21, %v5181_v39  ;;  %v850_v10 = vadd.f32 -0.1666666, %v834_v34  ;;  %v962_v46 = vsub.f32 %v5146_v37, %v946_v28  ;;  %v917_v27 = vmul.f32 0.5, %v5194_v41 }
 0x156   : > { %4599 = vmatprep.subr.bf16.mxu1 %v4598_v35  ;;  %v1007_v30 = vmul.f32 %v991_v6, %v5253_v43  ;;  %v854_v9 = vadd.f32 -0.1666666, %v838_v2  ;;  %v966_v29 = vsub.f32 %v5211_v45, %v950_v44  ;;  %v929_v31 = vfloor.f32 %v913_v8  ;;  %v7686_v6 = vld [vmem:[#allocation14_spill] sm:$0xff] }
 0x157   : > { %v866_v58 = vmul.f32 %v850_v10, %v5202_v51  ;;  %v978_v22 = vmul.f32 2.0, %v962_v46  ;;  %v933_v36 = vfloor.f32 %v917_v27  ;;  %v788_v7 = vadd.f32 -0.0001981069, %v5257_v32 }
 0x158   : > { %v4600_v15 = vpack.c.bf16 %v1007_v30, %v1003_v49  ;;  %v870_v39 = vmul.f32 %v854_v9, %v5263_v33  ;;  %v982_v38 = vmul.f32 2.0, %v966_v29  ;;  %v945_v37 = vmul.f32 2.0, %v929_v31  ;;  %v7687_v29 = vld [vmem:[#allocation12_spill] sm:$0xff] }
 0x159   : > { %v882_v20 = vmul.f32 %v866_v58, %v5187_v52  ;;  %v994_v13 = vsub.f32 1.0, %v978_v22  ;;  %v949_v47 = vmul.f32 2.0, %v933_v36  ;;  %v792_v43 = vadd.f32 -0.0001981069, %v5310_v57  ;;  %v7689_v36 = vld [vmem:[#allocation15_spill] sm:$0xff] }
 0x15a   : > { %4601 = vmatpush1.bf16.msra.mxu1 %v4600_v15  ;;  %v886_v45 = vmul.f32 %v870_v39, %v5246_v18  ;;  %v998_v23 = vsub.f32 1.0, %v982_v38  ;;  %v961_v51 = vsub.f32 %v5138_v19, %v945_v37  ;;  %v804_v5 = vmul.f32 %v788_v7, %v5244_v3 }
 0x15b   : > { %v898_v32 = vadd.f32 %v882_v20, %v5187_v52  ;;  %v965_v33 = vsub.f32 %v5194_v41, %v949_v47  ;;  %v808_v12 = vmul.f32 %v792_v43, %v5297_v16  ;;  %v916_v26 = vmul.f32 0.5, %v5192_v50 }
 0x15c   : > { %v902_v11 = vadd.f32 %v886_v45, %v5246_v18  ;;  %v977_v14 = vmul.f32 2.0, %v961_v51  ;;  %v820_v57 = vadd.f32 0.008333079, %v804_v5  ;;  %v920_v17 = vmul.f32 0.5, %v5259_v59 }
 0x15d   : > { %v1010_v55 = vmul.f32 %v994_v13, %v898_v32  ;;  %v981_v1 = vmul.f32 2.0, %v965_v33  ;;  %v824_v4 = vadd.f32 0.008333079, %v808_v12  ;;  %v932_v19 = vfloor.f32 %v916_v26  ;;  %v342_v26 = vld [vmem:[%s7566_s3 + $0x10] sm:$0xff] }
 0x15e   : > { %v1014_v62 = vmul.f32 %v998_v23, %v902_v11  ;;  %v993_v0 = vsub.f32 1.0, %v977_v14  ;;  %v836_v52 = vmul.f32 %v820_v57, %v5244_v3  ;;  %v936_v25 = vfloor.f32 %v920_v17  ;;  %v343_v14 = vld [vmem:[%s7566_s3 + $0x18] sm:$0xff]  ;;  %v5419_v57 = vpop.permute.xlu0 %1019 }
 0x15f   : > { %v997_v41 = vsub.f32 1.0, %v981_v1  ;;  %v840_v53 = vmul.f32 %v824_v4, %v5297_v16  ;;  %v948_v24 = vmul.f32 2.0, %v932_v19  ;;  %v915_v48 = vmul.f32 0.5, %v5174_v40  ;;  %7691 = vst [vmem:[#allocation16_spill] sm:$0xff] %v5419_v57 }
 0x160   : > { %v4594_v18 = vpack.c.bf16 %v1014_v62, %v1010_v55  ;;  %v1009_v63 = vmul.f32 %v993_v0, %v7685_v54  ;;  %v852_v21 = vadd.f32 -0.1666666, %v836_v52  ;;  %v952_v34 = vmul.f32 2.0, %v936_v25  ;;  %v5423_v62 = vpop.permute.xlu1 %1024 }
 0x161   : > { %v1013_v28 = vmul.f32 %v997_v41, %v5320_v56  ;;  %v856_v8 = vadd.f32 -0.1666666, %v840_v53  ;;  %v964_v35 = vsub.f32 %v5192_v50, %v948_v24  ;;  %v919_v2 = vmul.f32 0.5, %v7686_v6  ;;  %v7688_v56 = vld [vmem:[#allocation13_spill] sm:$0xff]  ;;  %7692 = vst [vmem:[#allocation14_spill] sm:$0xff] %v5423_v62 }
 0x162   : > { %4595 = vmatprep.subr.bf16.mxu0 %v4594_v18  ;;  %v868_v44 = vmul.f32 %v852_v21, %v5244_v3  ;;  %v968_v49 = vsub.f32 %v5259_v59, %v952_v34  ;;  %v931_v10 = vfloor.f32 %v915_v48  ;;  %v883_v31 = vmul.f32 %v5301_v61, %v7687_v29 }
 0x163   : > { %v4596_v46 = vpack.c.bf16 %v1013_v28, %v1009_v63  ;;  %v872_v27 = vmul.f32 %v856_v8, %v5297_v16  ;;  %v980_v30 = vmul.f32 2.0, %v964_v35  ;;  %v935_v9 = vfloor.f32 %v919_v2  ;;  %v340_v16 = vld [vmem:[%s7566_s3] sm:$0xff]  ;;  %v5433_v2 = vpop.permute.xlu0 %1029 }
 0x164   : > { %v884_v58 = vmul.f32 %v868_v44, %v7688_v56  ;;  %v984_v22 = vmul.f32 2.0, %v968_v49  ;;  %v947_v50 = vmul.f32 2.0, %v931_v10  ;;  %v887_v7 = vmul.f32 %v5326_v60, %v7689_v36  ;;  %7693 = vst [vmem:[#allocation12_spill] sm:$0xff] %v5433_v2 }
 0x165   : > { %4597 = vmatpush1.bf16.msra.mxu0 %v4596_v46  ;;  %v888_v3 = vmul.f32 %v872_v27, %v5285_v42  ;;  %v951_v59 = vmul.f32 2.0, %v935_v9  ;;  %v996_v38 = vsub.f32 1.0, %v980_v30  ;;  %v899_v60 = vadd.f32 %v883_v31, %v7687_v29 }
 0x166   : > { %v900_v15 = vadd.f32 %v884_v58, %v7688_v56  ;;  %v963_v61 = vsub.f32 %v5174_v40, %v947_v50  ;;  %v1000_v37 = vsub.f32 1.0, %v984_v22  ;;  %v903_v47 = vadd.f32 %v887_v7, %v7689_v36  ;;  %v341_v40 = vld [vmem:[%s7566_s3 + $0x8] sm:$0xff] }
 0x167   : > { %v904_v39 = vadd.f32 %v888_v3, %v5285_v42  ;;  %v967_v20 = vsub.f32 %v7686_v6, %v951_v59  ;;  %v7690_v51 = vmov 0.0  }
 0x168   : > { %v979_v13 = vmul.f32 2.0, %v963_v61  ;;  %4534 = vmatmul.mubr.msk.f32.vlgmr.msra.gmra.mrb[8].mxu0 %vm1037_vm2, %v340_v16  ;;  %v1012_v43 = vmul.f32 %v996_v38, %v900_v15 }
 0x169   : > { %v1016_v45 = vmul.f32 %v1000_v37, %v904_v39  ;;  %v983_v23 = vmul.f32 2.0, %v967_v20  ;;  %1120 = vmatprep.mubr.f32.mxu0 %v7690_v51 }
 0x16a   : > { %v995_v5 = vsub.f32 1.0, %v979_v13 }
 0x16b   : > { %v4602_v42 = vpack.c.bf16 %v1016_v45, %v1012_v43  ;;  %v999_v32 = vsub.f32 1.0, %v983_v23 }
 0x16c   : > { %4535 = vmatmul.mubr.msk.f32.gmra.mrb[10].mxu0 %vm1037_vm2, %v341_v40  ;;  %v1011_v33 = vmul.f32 %v995_v5, %v899_v60 }
 0x16d   : > { %4603 = vmatprep.subr.bf16.mxu1 %v4602_v42  ;;  %v1015_v12 = vmul.f32 %v999_v32, %v903_v47  ;;  %1126 = vmatprep.mubr.f32.mxu0 %v7690_v51 }
 0x16f   : > { %v4604_v11 = vpack.c.bf16 %v1015_v12, %v1011_v33 }
 0x170   : > { %4536 = vmatmul.mubr.msk.f32.gmra.mrb[12].mxu0 %vm1037_vm2, %v342_v26 }
 0x171   : > { %4605 = vmatpush1.bf16.msra.mxu1 %v4604_v11  ;;  %1132 = vmatprep.mubr.f32.mxu0 %v7690_v51 }
 0x174   : > { %4538 = vmatmul.mubr.msk.f32.vlgmr.msra.gmra.mrb[8].mxu1 %vm1037_vm2, %v340_v16  ;;  %4537 = vmatmul.mubr.msk.f32.gmra.mrb[14].mxu0 %vm1037_vm2, %v343_v14 }
 0x175   : > { %1209 = vmatprep.mubr.f32.mxu1 %v7690_v51  ;;  %1740 = vmatprep.mubr.f32.mxu0 %v7690_v51 }
 0x178   : > { %4539 = vmatmul.mubr.msk.f32.gmra.mrb[10].mxu1 %vm1037_vm2, %v341_v40 }
 0x179   : > { %1215 = vmatprep.mubr.f32.mxu1 %v7690_v51 }
 0x17c   : > { %4540 = vmatmul.mubr.msk.f32.gmra.mrb[12].mxu1 %vm1037_vm2, %v342_v26 }
 0x17d   : > { %1221 = vmatprep.mubr.f32.mxu1 %v7690_v51 }
 0x180   : > { %4541 = vmatmul.mubr.msk.f32.gmra.mrb[14].mxu1 %vm1037_vm2, %v343_v14 }
 0x181   : > { %1829 = vmatprep.mubr.f32.mxu1 %v7690_v51 }
 0x23b   : > { %v1116_v17 = vpop.f32.mrb[8].mxu0 }
 0x23c   : > { %v1117_v55 = vadd.f32 %v1116_v17, %v5419_v57  ;;  %v1118_v1 = vpop.f32.mrb[9].mxu0 }
 0x23d   : > { %v1119_v4 = vadd.f32 %v1118_v1, %v5419_v57 }
 0x23e   : > { %v1228_v19 = vmul.f32 0.31830987, %v1117_v55 }
 0x23f   : > { %v1229_v0 = vmul.f32 0.31830987, %v1119_v4  ;;  %v1122_v52 = vpop.f32.mrb[10].mxu0 }
 0x240   : > { %v1244_v25 = vadd.f32 0.5, %v1228_v19  ;;  %v1123_v41 = vadd.f32 %v1122_v52, %v5423_v62  ;;  %v1124_v53 = vpop.f32.mrb[11].mxu0 }
 0x241   : > { %v1245_v24 = vadd.f32 0.5, %v1229_v0  ;;  %v1125_v48 = vadd.f32 %v1124_v53, %v5423_v62 }
 0x242   : > { %v5427_v18 = vfloor.f32 %v1244_v25  ;;  %v1232_v54 = vmul.f32 0.31830987, %v1123_v41 }
 0x243   : > { %v5429_v63 = vfloor.f32 %v1245_v24  ;;  %v1233_v21 = vmul.f32 0.31830987, %v1125_v48  ;;  %v1128_v34 = vpop.f32.mrb[12].mxu0 }
 0x244   : > { %v1276_v28 = vmul.f32 3.1414795, %v5427_v18  ;;  %v1248_v8 = vadd.f32 0.5, %v1232_v54  ;;  %v1308_v49 = vmul.f32 0.00011315942, %v5427_v18  ;;  %v1340_v10 = vmul.f32 1.9841873e-09, %v5427_v18 }
 0x245   : > { %v1277_v35 = vmul.f32 3.1414795, %v5429_v63  ;;  %v1249_v6 = vadd.f32 0.5, %v1233_v21  ;;  %v1130_v27 = vpop.f32.mrb[13].mxu0  ;;  %v1309_v9 = vmul.f32 0.00011315942, %v5429_v63  ;;  %v5448_v3 = vadd.f32 %v1128_v34, %v5433_v2 }
 0x246   : > { %v1292_v44 = vsub.f32 %v1117_v55, %v1276_v28  ;;  %v5437_v46 = vfloor.f32 %v1248_v8  ;;  %v1341_v29 = vmul.f32 1.9841873e-09, %v5429_v63  ;;  %v5455_v39 = vmul.f32 0.5, %v5429_v63 }
 0x247   : > { %v1293_v30 = vsub.f32 %v1119_v4, %v1277_v35  ;;  %v1205_v31 = vpop.f32.mrb[8].mxu1  ;;  %v5441_v56 = vfloor.f32 %v1249_v6  ;;  %v5443_v58 = vpop.f32.mrb[14].mxu0  ;;  %v5485_v25 = vadd.f32 %v1130_v27, %v5433_v2  ;;  %v5495_v21 = vmul.f32 0.5, %v5427_v18 }
 0x248   : > { %v1324_v22 = vsub.f32 %v1292_v44, %v1308_v49  ;;  %v1206_v50 = vadd.f32 %v1205_v31, %v5419_v57  ;;  %v1207_v36 = vpop.f32.mrb[9].mxu1  ;;  %v1280_v7 = vmul.f32 3.1414795, %v5437_v46  ;;  %v5450_v59 = vpop.f32.mrb[15].mxu0  ;;  %v1312_v60 = vmul.f32 0.00011315942, %v5437_v46 }
 0x249   : > { %v1325_v16 = vsub.f32 %v1293_v30, %v1309_v9  ;;  %v1208_v15 = vadd.f32 %v1207_v36, %v5419_v57  ;;  %v1281_v61 = vmul.f32 3.1414795, %v5441_v56  ;;  %v1344_v47 = vmul.f32 1.9841873e-09, %v5437_v46 }
 0x24a   : > { %v5457_v38 = vsub.f32 %v1324_v22, %v1340_v10  ;;  %v1230_v37 = vmul.f32 0.31830987, %v1206_v50  ;;  %v1296_v20 = vsub.f32 %v1123_v41, %v1280_v7  ;;  %v1313_v45 = vmul.f32 0.00011315942, %v5441_v56 }
 0x24b   : > { %v1231_v13 = vmul.f32 0.31830987, %v1208_v15  ;;  %v1297_v43 = vsub.f32 %v1125_v48, %v1281_v61  ;;  %v1211_v23 = vpop.f32.mrb[10].mxu1  ;;  %v5469_v12 = vsub.f32 %v1325_v16, %v1341_v29  ;;  %v1345_v4 = vmul.f32 1.9841873e-09, %v5441_v56 }
 0x24c   : > { %v5464_v40 = vmul.f32 %v5457_v38, %v5457_v38  ;;  %v1246_v42 = vadd.f32 0.5, %v1230_v37  ;;  %v1328_v5 = vsub.f32 %v1296_v20, %v1312_v60  ;;  %v5467_v32 = vadd.f32 %v1211_v23, %v5423_v62  ;;  %v1213_v33 = vpop.f32.mrb[11].mxu1 }
 0x24d   : > { %v1247_v26 = vadd.f32 0.5, %v1231_v13  ;;  %v1329_v11 = vsub.f32 %v1297_v43, %v1313_v45  ;;  %v5472_v14 = vadd.f32 %v1213_v33, %v5423_v62  ;;  %v5499_v34 = vmul.f32 %v5469_v12, %v5469_v12 }
 0x24e   : > { %v1388_v17 = vmul.f32 2.608316e-06, %v5464_v40  ;;  %v5475_v55 = vfloor.f32 %v1246_v42  ;;  %v5477_v1 = vsub.f32 %v1328_v5, %v1344_v47  ;;  %v1234_v0 = vmul.f32 0.31830987, %v5467_v32 }
 0x24f   : > { %v5480_v19 = vfloor.f32 %v1247_v26  ;;  %v1235_v52 = vmul.f32 0.31830987, %v5472_v14  ;;  %v5487_v41 = vpop.f32.mrb[12].mxu1  ;;  %v5503_v35 = vsub.f32 %v1329_v11, %v1345_v4  ;;  %v1236_v16 = vmul.f32 0.31830987, %v5448_v3 }
 0x250   : > { %v1404_v53 = vadd.f32 -0.0001981069, %v1388_v17  ;;  %v1278_v24 = vmul.f32 3.1414795, %v5475_v55  ;;  %v1376_v48 = vmul.f32 %v5477_v1, %v5477_v1  ;;  %v5492_v54 = vpop.f32.mrb[13].mxu1  ;;  %v1310_v28 = vmul.f32 0.00011315942, %v5475_v55 }
 0x251   : > { %v1279_v8 = vmul.f32 3.1414795, %v5480_v19  ;;  %v1342_v49 = vmul.f32 1.9841873e-09, %v5475_v55  ;;  %v1311_v30 = vmul.f32 0.00011315942, %v5480_v19  ;;  %v1250_v9 = vadd.f32 0.5, %v1234_v0 }
 0x252   : > { %v1420_v6 = vmul.f32 %v1404_v53, %v5464_v40  ;;  %v1294_v44 = vsub.f32 %v1206_v50, %v1278_v24  ;;  %v1392_v10 = vmul.f32 2.608316e-06, %v1376_v48  ;;  %v1251_v29 = vadd.f32 0.5, %v1235_v52 }
 0x253   : > { %v1295_v27 = vsub.f32 %v1208_v15, %v1279_v8  ;;  %v5508_v31 = vpop.f32.mrb[14].mxu1  ;;  %v1343_v37 = vmul.f32 1.9841873e-09, %v5480_v19  ;;  %v5512_v20 = vfloor.f32 %v1250_v9  ;;  %v5523_v43 = vmul.f32 %v5503_v35, %v5503_v35 }
 0x254   : > { %v1436_v22 = vadd.f32 0.008333079, %v1420_v6  ;;  %v1326_v36 = vsub.f32 %v1294_v44, %v1310_v28  ;;  %v1408_v7 = vadd.f32 -0.0001981069, %v1392_v10  ;;  %v5514_v50 = vfloor.f32 %v1251_v29  ;;  %v5516_v60 = vpop.f32.mrb[15].mxu1 }
 0x255   : > { %v1327_v61 = vsub.f32 %v1295_v27, %v1311_v30  ;;  %v1282_v23 = vmul.f32 3.1414795, %v5512_v20  ;;  %v1252_v42 = vadd.f32 0.5, %v1236_v16  ;;  %v1237_v5 = vmul.f32 0.31830987, %v5485_v25 }
 0x256   : > { %v1452_v15 = vmul.f32 %v1436_v22, %v5464_v40  ;;  %v5519_v13 = vsub.f32 %v1326_v36, %v1342_v49  ;;  %v1424_v47 = vmul.f32 %v1408_v7, %v1376_v48  ;;  %v1283_v17 = vmul.f32 3.1414795, %v5514_v50 }
 0x257   : > { %v5525_v45 = vsub.f32 %v1327_v61, %v1343_v37  ;;  %v1298_v0 = vsub.f32 %v5467_v32, %v1282_v23  ;;  %v1314_v52 = vmul.f32 0.00011315942, %v5512_v20  ;;  %v1346_v53 = vmul.f32 1.9841873e-09, %v5512_v20 }
 0x258   : > { %v1468_v33 = vadd.f32 -0.1666666, %v1452_v15  ;;  %v1374_v26 = vmul.f32 %v5519_v13, %v5519_v13  ;;  %v1440_v11 = vadd.f32 0.008333079, %v1424_v47  ;;  %v1299_v8 = vsub.f32 %v5472_v14, %v1283_v17 }
 0x259   : > { %v5534_v4 = vmul.f32 %v5525_v45, %v5525_v45  ;;  %v1315_v6 = vmul.f32 0.00011315942, %v5514_v50  ;;  %v1330_v44 = vsub.f32 %v1298_v0, %v1314_v52  ;;  %v1347_v49 = vmul.f32 1.9841873e-09, %v5514_v50 }
 0x25a   : > { %v1390_v24 = vmul.f32 2.608316e-06, %v1374_v26  ;;  %v1456_v28 = vmul.f32 %v1440_v11, %v1376_v48  ;;  %v5542_v10 = vfloor.f32 %v1252_v42  ;;  %v1253_v27 = vadd.f32 0.5, %v1237_v5 }
 0x25b   : > { %v1484_v30 = vmul.f32 %v1468_v33, %v5464_v40  ;;  %v1331_v29 = vsub.f32 %v1299_v8, %v1315_v6  ;;  %v5546_v22 = vmul.f32 2.608316e-06, %v5499_v34  ;;  %v5549_v36 = vmul.f32 2.608316e-06, %v5523_v43  ;;  %v5578_v8 = vpop.permute.xlu1 %1034 }
 0x25c   : > { %v1406_v9 = vadd.f32 -0.0001981069, %v1390_v24  ;;  %v1472_v32 = vadd.f32 -0.1666666, %v1456_v28  ;;  %v5551_v14 = vsub.f32 %v1330_v44, %v1346_v53  ;;  %v1284_v7 = vmul.f32 3.1414795, %v5542_v10 }
 0x25d   : > { %v5554_v37 = vsub.f32 %v1331_v29, %v1347_v49  ;;  %v1316_v15 = vmul.f32 0.00011315942, %v5542_v10  ;;  %v5560_v23 = vfloor.f32 %v1253_v27  ;;  %v1218_v42 = vadd.f32 %v5487_v41, %v5433_v2  ;;  %7694 = vst [vmem:[#allocation13_spill] sm:$0xff] %v5578_v8 }
 0x25e   : > { %v1422_v16 = vmul.f32 %v1406_v9, %v1374_v26  ;;  %v1488_v61 = vmul.f32 %v1472_v32, %v1376_v48  ;;  %v1378_v40 = vmul.f32 %v5551_v14, %v5551_v14  ;;  %v1300_v47 = vsub.f32 %v5448_v3, %v1284_v7 }
 0x25f   : > { %v1500_v5 = vmul.f32 %v1484_v30, %v5457_v38  ;;  %v5566_v11 = vmul.f32 2.608316e-06, %v5534_v4  ;;  %v1220_v48 = vadd.f32 %v5492_v54, %v5433_v2  ;;  %v1348_v52 = vmul.f32 1.9841873e-09, %v5542_v10 }
 0x260   : > { %v1438_v33 = vadd.f32 0.008333079, %v1422_v16  ;;  %v1394_v17 = vmul.f32 2.608316e-06, %v1378_v40  ;;  %v1332_v0 = vsub.f32 %v1300_v47, %v1316_v15  ;;  %v1285_v3 = vmul.f32 3.1414795, %v5560_v23 }
 0x261   : > { %v1504_v24 = vmul.f32 %v1488_v61, %v5477_v1  ;;  %v5575_v41 = vmul.f32 %v5554_v37, %v5554_v37  ;;  %v1317_v28 = vmul.f32 0.00011315942, %v5560_v23  ;;  %v1238_v49 = vmul.f32 0.31830987, %v1218_v42 }
 0x262   : > { %v1454_v53 = vmul.f32 %v1438_v33, %v1374_v26  ;;  %v1410_v6 = vadd.f32 -0.0001981069, %v1394_v17  ;;  %v5580_v44 = vsub.f32 %v1332_v0, %v1348_v52  ;;  %v1301_v54 = vsub.f32 %v5485_v25, %v1285_v3 }
 0x263   : > { %v1239_v30 = vmul.f32 0.31830987, %v1220_v48  ;;  %v1135_v9 = vadd.f32 %v5443_v58, %v5578_v8  ;;  %v1137_v32 = vadd.f32 %v5450_v59, %v5578_v8  ;;  %v1254_v61 = vadd.f32 0.5, %v1238_v49 }
 0x264   : > { %v1470_v27 = vadd.f32 -0.1666666, %v1454_v53  ;;  %v1426_v29 = vmul.f32 %v1410_v6, %v1378_v40  ;;  %v5589_v7 = vmul.f32 %v5580_v44, %v5580_v44  ;;  %v1333_v16 = vsub.f32 %v1301_v54, %v1317_v28 }
 0x265   : > { %v1255_v47 = vadd.f32 0.5, %v1239_v30  ;;  %v1240_v33 = vmul.f32 0.31830987, %v1135_v9  ;;  %v1241_v25 = vmul.f32 0.31830987, %v1137_v32  ;;  %v5592_v17 = vadd.f32 %v1500_v5, %v5457_v38 }
 0x266   : > { %v1486_v15 = vmul.f32 %v1470_v27, %v1374_v26  ;;  %v1442_v0 = vadd.f32 0.008333079, %v1426_v29  ;;  %v1396_v58 = vmul.f32 2.608316e-06, %v5589_v7  ;;  %v5595_v52 = vfloor.f32 %v1254_v61 }
 0x267   : > { %v5598_v59 = vadd.f32 %v1504_v24, %v5477_v1  ;;  %v1349_v3 = vmul.f32 1.9841873e-09, %v5560_v23  ;;  %v5601_v53 = vfloor.f32 %v1255_v47  ;;  %v1256_v28 = vadd.f32 0.5, %v1240_v33 }
 0x268   : > { %7695 = vst [vmem:[#allocation15_spill] sm:$0xff] %v5595_v52  ;;  %v1458_v26 = vmul.f32 %v1442_v0, %v1378_v40  ;;  %v1412_v6 = vadd.f32 -0.0001981069, %v1396_v58  ;;  %v1286_v54 = vmul.f32 3.1414795, %v5595_v52  ;;  %v1257_v49 = vadd.f32 0.5, %v1241_v25 }
 0x269   : > { %7696 = vst [vmem:[#allocation17_spill] sm:$0xff] %v5601_v53  ;;  %v1502_v38 = vmul.f32 %v1486_v15, %v5519_v13  ;;  %v5606_v5 = vmul.f32 2.608316e-06, %v5575_v41  ;;  %v5608_v27 = vsub.f32 %v1333_v16, %v1349_v3  ;;  %v1287_v1 = vmul.f32 3.1414795, %v5601_v53 }
 0x26a   : > { %v1474_v24 = vadd.f32 -0.1666666, %v1458_v26  ;;  %v1428_v30 = vmul.f32 %v1412_v6, %v5589_v7  ;;  %v1302_v29 = vsub.f32 %v1218_v42, %v1286_v54  ;;  %v1318_v61 = vmul.f32 0.00011315942, %v5595_v52 }
 0x26b   : > { %7697 = vst [vmem:[#allocation18_spill] sm:$0xff] %v5608_v27  ;;  %v1350_v47 = vmul.f32 1.9841873e-09, %v5595_v52  ;;  %v1303_v33 = vsub.f32 %v1220_v48, %v1287_v1  ;;  %v1319_v25 = vmul.f32 0.00011315942, %v5601_v53  ;;  %v5615_v0 = vfloor.f32 %v1256_v28 }
 0x26c   : > { %v1490_v15 = vmul.f32 %v1474_v24, %v1378_v40  ;;  %v1444_v58 = vadd.f32 0.008333079, %v1428_v30  ;;  %v1334_v2 = vsub.f32 %v1302_v29, %v1318_v61  ;;  %v5617_v16 = vfloor.f32 %v1257_v49 }
 0x26d   : > { %v5620_v3 = vadd.f32 %v1502_v38, %v5519_v13  ;;  %v5624_v42 = vmul.f32 %v5608_v27, %v5608_v27  ;;  %v1335_v26 = vsub.f32 %v1303_v33, %v1319_v25  ;;  %v1288_v6 = vmul.f32 3.1414795, %v5615_v0 }
 0x26e   : > { %v1460_v48 = vmul.f32 %v1444_v58, %v5589_v7  ;;  %v5628_v54 = vsub.f32 %v1334_v2, %v1350_v47  ;;  %v1351_v40 = vmul.f32 1.9841873e-09, %v5601_v53  ;;  %v1289_v28 = vmul.f32 3.1414795, %v5617_v16 }
 0x26f   : > { %v1506_v49 = vmul.f32 %v1490_v15, %v5551_v14  ;;  %v1304_v1 = vsub.f32 %v1135_v9, %v1288_v6  ;;  %v1320_v13 = vmul.f32 0.00011315942, %v5615_v0  ;;  %v1352_v38 = vmul.f32 1.9841873e-09, %v5615_v0 }
 0x270   : > { %7698 = vst [vmem:[#allocation19_spill] sm:$0xff] %v5628_v54  ;;  %v1476_v24 = vadd.f32 -0.1666666, %v1460_v48  ;;  %v5637_v30 = vmul.f32 %v5628_v54, %v5628_v54  ;;  %v1305_v29 = vsub.f32 %v1137_v32, %v1289_v28  ;;  %v1321_v2 = vmul.f32 0.00011315942, %v5617_v16 }
 0x271   : > { %v5640_v61 = vsub.f32 %v1335_v26, %v1351_v40  ;;  %v1336_v47 = vsub.f32 %v1304_v1, %v1320_v13  ;;  %v1224_v33 = vadd.f32 %v5508_v31, %v5578_v8  ;;  %v1226_v9 = vadd.f32 %v5516_v60, %v5578_v8 }
 0x272   : > { %v1398_v25 = vmul.f32 2.608316e-06, %v5637_v30  ;;  %v1337_v15 = vsub.f32 %v1305_v29, %v1321_v2  ;;  %v1353_v58 = vmul.f32 1.9841873e-09, %v5617_v16  ;;  %v1405_v6 = vadd.f32 -0.0001981069, %v5546_v22 }
 0x273   : > { %7699 = vst [vmem:[#allocation20_spill] sm:$0xff] %v5640_v61  ;;  %v5650_v32 = vmul.f32 2.608316e-06, %v5624_v42  ;;  %v5652_v48 = vsub.f32 %v1336_v47, %v1352_v38  ;;  %v1242_v26 = vmul.f32 0.31830987, %v1224_v33  ;;  %v1492_v28 = vmul.f32 %v1476_v24, %v5589_v7 }
 0x274   : > { %v1243_v40 = vmul.f32 0.31830987, %v1226_v9  ;;  %v1414_v31 = vadd.f32 -0.0001981069, %v1398_v25  ;;  %v5655_v1 = vsub.f32 %v1337_v15, %v1353_v58  ;;  %v1409_v60 = vadd.f32 -0.0001981069, %v5549_v36 }
 0x275   : > { %v1384_v13 = vmul.f32 %v5652_v48, %v5652_v48  ;;  %v1258_v29 = vadd.f32 0.5, %v1242_v26  ;;  %v1421_v22 = vmul.f32 %v1405_v6, %v5499_v34  ;;  %v5662_v8 = vadd.f32 %v1506_v49, %v5551_v14 }
 0x276   : > { %7700 = vst [vmem:[#allocation21_spill] sm:$0xff] %v5655_v1  ;;  %v1259_v2 = vadd.f32 0.5, %v1243_v40  ;;  %v1430_v38 = vmul.f32 %v1414_v31, %v5637_v30  ;;  %v5667_v7 = vmul.f32 %v5640_v61, %v5640_v61  ;;  %v1425_v24 = vmul.f32 %v1409_v60, %v5523_v43 }
 0x277   : > { %v1400_v47 = vmul.f32 2.608316e-06, %v1384_v13  ;;  %v5670_v36 = vfloor.f32 %v1258_v29  ;;  %v1437_v15 = vadd.f32 0.008333079, %v1421_v22  ;;  %v1508_v58 = vmul.f32 %v1492_v28, %v5580_v44 }
 0x278   : > { %v5672_v25 = vfloor.f32 %v1259_v2  ;;  %v1446_v6 = vadd.f32 0.008333079, %v1430_v38  ;;  %v1441_v26 = vadd.f32 0.008333079, %v1425_v24  ;;  %v1549_v14 = vfloor.f32 %v5455_v39 }
 0x279   : > { %7701 = vst [vmem:[#allocation22_spill] sm:$0xff] %v5670_v36  ;;  %v1416_v49 = vadd.f32 -0.0001981069, %v1400_v47  ;;  %v5678_v40 = vmul.f32 %v5655_v1, %v5655_v1  ;;  %v1290_v31 = vmul.f32 3.1414795, %v5670_v36  ;;  %v1322_v60 = vmul.f32 0.00011315942, %v5670_v36 }
 0x27a   : > { %v1462_v29 = vmul.f32 %v1446_v6, %v5637_v30  ;;  %v1354_v2 = vmul.f32 1.9841873e-09, %v5670_v36  ;;  %v1291_v22 = vmul.f32 3.1414795, %v5672_v25  ;;  %v1323_v28 = vmul.f32 0.00011315942, %v5672_v25 }
 0x27b   : > { %v1432_v38 = vmul.f32 %v1416_v49, %v1384_v13  ;;  %v1306_v24 = vsub.f32 %v1224_v33, %v1290_v31  ;;  %v1453_v39 = vmul.f32 %v1437_v15, %v5499_v34  ;;  %v1457_v47 = vmul.f32 %v1441_v26, %v5523_v43 }
 0x27c   : > { %v1307_v62 = vsub.f32 %v1226_v9, %v1291_v22  ;;  %v1355_v57 = vmul.f32 1.9841873e-09, %v5672_v25  ;;  %v1537_v51 = vmul.f32 0.5, %v5441_v56  ;;  %v1565_v54 = vmul.f32 2.0, %v1549_v14 }
 0x27d   : > { %v1448_v61 = vadd.f32 0.008333079, %v1432_v38  ;;  %v1338_v6 = vsub.f32 %v1306_v24, %v1322_v60  ;;  %v1469_v52 = vadd.f32 -0.1666666, %v1453_v39  ;;  %v1473_v36 = vadd.f32 -0.1666666, %v1457_v47 }
 0x27e   : > { %v1478_v53 = vadd.f32 -0.1666666, %v1462_v29  ;;  %v1339_v1 = vsub.f32 %v1307_v62, %v1323_v28  ;;  %v1553_v27 = vfloor.f32 %v1537_v51  ;;  %v1581_v49 = vsub.f32 %v5429_v63, %v1565_v54 }
 0x27f   : > { %v1464_v33 = vmul.f32 %v1448_v61, %v1384_v13  ;;  %v5691_v31 = vsub.f32 %v1338_v6, %v1354_v2  ;;  %v1485_v15 = vmul.f32 %v1469_v52, %v5499_v34  ;;  %v1489_v9 = vmul.f32 %v1473_v36, %v5523_v43 }
 0x280   : > { %v5696_v26 = vmul.f32 2.608316e-06, %v5667_v7  ;;  %v5698_v14 = vsub.f32 %v1339_v1, %v1355_v57  ;;  %v1569_v60 = vmul.f32 2.0, %v1553_v27  ;;  %v1597_v22 = vmul.f32 2.0, %v1581_v49 }
 0x281   : > { %v1480_v38 = vadd.f32 -0.1666666, %v1464_v33  ;;  %v5702_v51 = vmul.f32 %v5691_v31, %v5691_v31  ;;  %v1501_v62 = vmul.f32 %v1485_v15, %v5469_v12  ;;  %v1505_v63 = vmul.f32 %v1489_v9, %v5503_v35 }
 0x282   : > { %v5707_v34 = vadd.f32 %v1508_v58, %v5580_v44  ;;  %v5710_v43 = vmul.f32 %v1478_v53, %v5637_v30  ;;  %v5713_v57 = vmul.f32 2.608316e-06, %v5678_v40  ;;  %v1585_v52 = vsub.f32 %v5441_v56, %v1569_v60 }
 0x283   : > { %v1496_v27 = vmul.f32 %v1480_v38, %v1384_v13  ;;  %v1402_v54 = vmul.f32 2.608316e-06, %v5702_v51  ;;  %v5719_v61 = vmul.f32 %v5698_v14, %v5698_v14  ;;  %v1517_v1 = vadd.f32 %v1501_v62, %v5469_v12 }
 0x284   : > { %v1521_v44 = vadd.f32 %v1505_v63, %v5503_v35  ;;  %v1601_v36 = vmul.f32 2.0, %v1585_v52  ;;  %v1536_v53 = vmul.f32 0.5, %v5437_v46  ;;  %v1548_v30 = vfloor.f32 %v5495_v21 }
 0x285   : > { %v1512_v58 = vmul.f32 %v1496_v27, %v5652_v48  ;;  %v1418_v29 = vadd.f32 -0.0001981069, %v1402_v54  ;;  %v1613_v56 = vsub.f32 1.0, %v1597_v22  ;;  %v1407_v13 = vadd.f32 -0.0001981069, %v5566_v11 }
 0x286   : > { %v1617_v2 = vsub.f32 1.0, %v1601_v36  ;;  %v1552_v28 = vfloor.f32 %v1536_v53  ;;  %v1564_v24 = vmul.f32 2.0, %v1548_v30  ;;  %v1411_v39 = vadd.f32 -0.0001981069, %v5606_v5 }
 0x287   : > { %v1434_v12 = vmul.f32 %v1418_v29, %v5702_v51  ;;  %v1629_v47 = vmul.f32 %v1613_v56, %v1517_v1  ;;  %v1423_v35 = vmul.f32 %v1407_v13, %v5534_v4  ;;  %v1535_v6 = vmul.f32 0.5, %v5480_v19 }
 0x288   : > { %v1633_v49 = vmul.f32 %v1617_v2, %v1521_v44  ;;  %v1568_v21 = vmul.f32 2.0, %v1552_v28  ;;  %v1580_v33 = vsub.f32 %v5427_v18, %v1564_v24  ;;  %v1427_v15 = vmul.f32 %v1411_v39, %v5575_v41 }
 0x289   : > { %v1450_v9 = vadd.f32 0.008333079, %v1434_v12  ;;  %v1439_v11 = vadd.f32 0.008333079, %v1423_v35  ;;  %v1539_v60 = vmul.f32 0.5, %v5514_v50  ;;  %v1551_v22 = vfloor.f32 %v1535_v6 }
 0x28a   : > { %v4606_v38 = vpack.c.bf16 %v1633_v49, %v1629_v47  ;;  %v1584_v5 = vsub.f32 %v5437_v46, %v1568_v21  ;;  %v1596_v62 = vmul.f32 2.0, %v1580_v33  ;;  %v1443_v63 = vadd.f32 0.008333079, %v1427_v15 }
 0x28b   : > { %v1466_v52 = vmul.f32 %v1450_v9, %v5702_v51  ;;  %v1455_v27 = vmul.f32 %v1439_v11, %v5534_v4  ;;  %v1555_v54 = vfloor.f32 %v1539_v60  ;;  %v1567_v1 = vmul.f32 2.0, %v1551_v22 }
 0x28c   : > { %4607 = vmatprep.subr.bf16.mxu0 %v4606_v38  ;;  %v1600_v18 = vmul.f32 2.0, %v1584_v5  ;;  %v1612_v44 = vsub.f32 1.0, %v1596_v62  ;;  %v1459_v36 = vmul.f32 %v1443_v63, %v5575_v41  ;;  %v1534_v53 = vmul.f32 0.5, %v5475_v55 }
 0x28d   : > { %v1482_v30 = vadd.f32 -0.1666666, %v1466_v52  ;;  %v1471_v29 = vadd.f32 -0.1666666, %v1455_v27  ;;  %v1571_v56 = vmul.f32 2.0, %v1555_v54  ;;  %v1583_v46 = vsub.f32 %v5480_v19, %v1567_v1 }
 0x28e   : > { %v5741_v13 = vmul.f32 2.608316e-06, %v5719_v61  ;;  %v1616_v2 = vsub.f32 1.0, %v1600_v18  ;;  %v1475_v28 = vadd.f32 -0.1666666, %v1459_v36  ;;  %v1538_v24 = vmul.f32 0.5, %v5512_v20 }
 0x28f   : > { %v1628_v39 = vmul.f32 %v1612_v44, %v5592_v17  ;;  %v1487_v12 = vmul.f32 %v1471_v29, %v5534_v4  ;;  %v1587_v47 = vsub.f32 %v5514_v50, %v1571_v56  ;;  %v1599_v35 = vmul.f32 2.0, %v1583_v46 }
 0x290   : > { %v1632_v6 = vmul.f32 %v1616_v2, %v5598_v59  ;;  %v1491_v49 = vmul.f32 %v1475_v28, %v5575_v41  ;;  %v1550_v21 = vfloor.f32 %v1534_v53  ;;  %v1554_v19 = vfloor.f32 %v1538_v24 }
 0x291   : > { %v5750_v33 = vadd.f32 %v1512_v58, %v5652_v48  ;;  %v5753_v15 = vmul.f32 %v1482_v30, %v5702_v51  ;;  %v1503_v9 = vmul.f32 %v1487_v12, %v5525_v45  ;;  %v1603_v17 = vmul.f32 2.0, %v1587_v47 }
 0x292   : > { %v4608_v11 = vpack.c.bf16 %v1632_v6, %v1628_v39  ;;  %v1507_v4 = vmul.f32 %v1491_v49, %v5554_v37  ;;  %v1566_v50 = vmul.f32 2.0, %v1550_v21  ;;  %v1570_v60 = vmul.f32 2.0, %v1554_v19 }
 0x293   : > { %v1519_v59 = vadd.f32 %v1503_v9, %v5525_v45  ;;  %v1615_v22 = vsub.f32 1.0, %v1599_v35  ;;  %v1619_v41 = vsub.f32 1.0, %v1603_v17  ;;  %v1413_v38 = vadd.f32 -0.0001981069, %v5650_v32 }
 0x294   : > { %4609 = vmatpush1.bf16.msra.mxu0 %v4608_v11  ;;  %v1523_v48 = vadd.f32 %v1507_v4, %v5554_v37  ;;  %v1582_v51 = vsub.f32 %v5475_v55, %v1566_v50  ;;  %v1586_v58 = vsub.f32 %v5512_v20, %v1570_v60  ;;  %v1417_v5 = vadd.f32 -0.0001981069, %v5713_v57  ;;  %v7702_v60 = vld [vmem:[#allocation18_spill] sm:$0xff] }
 0x295   : > { %v1631_v62 = vmul.f32 %v1615_v22, %v1519_v59  ;;  %v1429_v63 = vmul.f32 %v1413_v38, %v5624_v42  ;;  %v1541_v52 = vmul.f32 0.5, %v5560_v23  ;;  %v1545_v45 = vmul.f32 0.5, %v5617_v16  ;;  %v7703_v38 = vld [vmem:[#allocation21_spill] sm:$0xff] }
 0x296   : > { %v1635_v27 = vmul.f32 %v1619_v41, %v1523_v48  ;;  %v1598_v54 = vmul.f32 2.0, %v1582_v51  ;;  %v1602_v1 = vmul.f32 2.0, %v1586_v58  ;;  %v1433_v32 = vmul.f32 %v1417_v5, %v5678_v40 }
 0x297   : > { %v1445_v18 = vadd.f32 0.008333079, %v1429_v63  ;;  %v1557_v37 = vfloor.f32 %v1541_v52  ;;  %v1561_v44 = vfloor.f32 %v1545_v45  ;;  %v1540_v55 = vmul.f32 0.5, %v5542_v10 }
 0x298   : > { %v4614_v20 = vpack.c.bf16 %v1635_v27, %v1631_v62  ;;  %v1614_v36 = vsub.f32 1.0, %v1598_v54  ;;  %v1618_v57 = vsub.f32 1.0, %v1602_v1  ;;  %v1449_v53 = vadd.f32 0.008333079, %v1433_v32 }
 0x299   : > { %v1461_v30 = vmul.f32 %v1445_v18, %v5624_v42  ;;  %v1573_v29 = vmul.f32 2.0, %v1557_v37  ;;  %v1577_v56 = vmul.f32 2.0, %v1561_v44  ;;  %v1544_v46 = vmul.f32 0.5, %v5615_v0 }
 0x29a   : > { %4615 = vmatprep.subr.bf16.mxu1 %v4614_v20  ;;  %v1630_v2 = vmul.f32 %v1614_v36, %v5620_v3  ;;  %v1634_v28 = vmul.f32 %v1618_v57, %v5662_v8  ;;  %v1465_v24 = vmul.f32 %v1449_v53, %v5678_v40  ;;  %v1556_v39 = vfloor.f32 %v1540_v55  ;;  %v7705_v53 = vld [vmem:[#allocation15_spill] sm:$0xff] }
 0x29b   : > { %v1477_v12 = vadd.f32 -0.1666666, %v1461_v30  ;;  %v1589_v47 = vsub.f32 %v5560_v23, %v1573_v29  ;;  %v1593_v35 = vsub.f32 %v5617_v16, %v1577_v56  ;;  %v1560_v6 = vfloor.f32 %v1544_v46 }
 0x29c   : > { %v4616_v49 = vpack.c.bf16 %v1634_v28, %v1630_v2  ;;  %v1481_v21 = vadd.f32 -0.1666666, %v1465_v24  ;;  %v1572_v19 = vmul.f32 2.0, %v1556_v39  ;;  %v1415_v9 = vadd.f32 -0.0001981069, %v5696_v26  ;;  %v7706_v2 = vld [vmem:[#allocation22_spill] sm:$0xff] }
 0x29d   : > { %v1493_v17 = vmul.f32 %v1477_v12, %v5624_v42  ;;  %v1605_v11 = vmul.f32 2.0, %v1589_v47  ;;  %v1609_v3 = vmul.f32 2.0, %v1593_v35  ;;  %v1576_v4 = vmul.f32 2.0, %v1560_v6 }
 0x29e   : > { %4617 = vmatpush1.bf16.msra.mxu1 %v4616_v49  ;;  %v1497_v8 = vmul.f32 %v1481_v21, %v5678_v40  ;;  %v1588_v50 = vsub.f32 %v5542_v10, %v1572_v19  ;;  %v1419_v23 = vadd.f32 -0.0001981069, %v5741_v13  ;;  %v1431_v16 = vmul.f32 %v1415_v9, %v5667_v7  ;;  %v7704_v10 = vld [vmem:[#allocation17_spill] sm:$0xff]  ;;  %v7708_v49 = vld [vmem:[#allocation19_spill] sm:$0xff] }
 0x29f   : > { %v1509_v59 = vmul.f32 %v1493_v17, %v7702_v60  ;;  %v1621_v22 = vsub.f32 1.0, %v1605_v11  ;;  %v1625_v41 = vsub.f32 1.0, %v1609_v3  ;;  %v1592_v26 = vsub.f32 %v5615_v0, %v1576_v4  ;;  %v344_v17 = vld [vmem:[%s7568_s5] sm:$0xff] }
 0x2a0   : > { %v1513_v42 = vmul.f32 %v1497_v8, %v7703_v38  ;;  %v1604_v48 = vmul.f32 2.0, %v1588_v50  ;;  %v1435_v51 = vmul.f32 %v1419_v23, %v5719_v61  ;;  %v1447_v58 = vadd.f32 0.008333079, %v1431_v16 }
 0x2a1   : > { %v1525_v40 = vadd.f32 %v1509_v59, %v7702_v60  ;;  %v1608_v5 = vmul.f32 2.0, %v1592_v26  ;;  %v1543_v62 = vmul.f32 0.5, %v7704_v10  ;;  %v1547_v13 = vmul.f32 0.5, %v5672_v25 }
 0x2a2   : > { %v1529_v63 = vadd.f32 %v1513_v42, %v7703_v38  ;;  %v1620_v52 = vsub.f32 1.0, %v1604_v48  ;;  %v1451_v45 = vadd.f32 0.008333079, %v1435_v51  ;;  %v1463_v27 = vmul.f32 %v1447_v58, %v5667_v7  ;;  %v346_v51 = vld [vmem:[%s7568_s5 + $0x10] sm:$0xff] }
 0x2a3   : > { %v1637_v0 = vmul.f32 %v1621_v22, %v1525_v40  ;;  %v1624_v54 = vsub.f32 1.0, %v1608_v5  ;;  %v1559_v1 = vfloor.f32 %v1543_v62  ;;  %v1563_v32 = vfloor.f32 %v1547_v13 }
 0x2a4   : > { %v1641_v18 = vmul.f32 %v1625_v41, %v1529_v63  ;;  %v1636_v37 = vmul.f32 %v1620_v52, %v5707_v34  ;;  %v1467_v44 = vmul.f32 %v1451_v45, %v5719_v61  ;;  %v1479_v55 = vadd.f32 -0.1666666, %v1463_v27  ;;  %v5843_v27 = vpop.permute.xlu1 %1651 }
 0x2a5   : > { %v1640_v20 = vmul.f32 %v1624_v54, %v5750_v33  ;;  %v1575_v36 = vmul.f32 2.0, %v1559_v1  ;;  %v1579_v57 = vmul.f32 2.0, %v1563_v32  ;;  %v1542_v30 = vmul.f32 0.5, %v7705_v53  ;;  %v7707_v33 = vld [vmem:[#allocation20_spill] sm:$0xff]  ;;  %7711 = vst [vmem:[#allocation21_spill] sm:$0xff] %v5843_v27 }
 0x2a6   : > { %v4610_v29 = vpack.c.bf16 %v1641_v18, %v1637_v0  ;;  %v1483_v56 = vadd.f32 -0.1666666, %v1467_v44  ;;  %v1495_v46 = vmul.f32 %v1479_v55, %v5667_v7  ;;  %v1546_v28 = vmul.f32 0.5, %v7706_v2  ;;  %v5848_v55 = vld [vmem:[%s4937_s15 + $0x8] sm:$0xff]  ;;  %s7516_s15 = scalar_lea.hbm %s7572_s9, %s4589_s17 }
 0x2a7   : > { %v4612_v24 = vpack.c.bf16 %v1640_v20, %v1636_v37  ;;  %v1591_v39 = vsub.f32 %v7704_v10, %v1575_v36  ;;  %v1595_v34 = vsub.f32 %v5672_v25, %v1579_v57  ;;  %v1558_v12 = vfloor.f32 %v1542_v30  ;;  %v5839_v10 = vpop.permute.xlu0 %1646  ;;  %7712 = vst [vmem:[#allocation17_spill] sm:$0xff] %v5848_v55 }
 0x2a8   : > { %4611 = vmatprep.subr.bf16.mxu0 %v4610_v29  ;;  %v1499_v47 = vmul.f32 %v1483_v56, %v5719_v61  ;;  %v1511_v35 = vmul.f32 %v1495_v46, %v7707_v33  ;;  %v1562_v6 = vfloor.f32 %v1546_v28  ;;  %v1510_v21 = vmul.f32 %v5710_v43, %v7708_v49  ;;  %7710 = vst [vmem:[#allocation18_spill] sm:$0xff] %v5839_v10  ;;  %v7713_v46 = vld [vmem:[#allocation7_spill] sm:$0xff] }
 0x2a9   : > { %4613 = vmatpush1.bf16.msra.mxu0 %v4612_v24  ;;  %v1607_v19 = vmul.f32 2.0, %v1591_v39  ;;  %v1611_v7 = vmul.f32 2.0, %v1595_v34  ;;  %v1574_v9 = vmul.f32 2.0, %v1558_v12  ;;  %v1514_v25 = vmul.f32 %v5753_v15, %v5691_v31  ;;  %v345_v15 = vld [vmem:[%s7568_s5 + $0x8] sm:$0xff] }
 0x2aa   : > { %v1515_v11 = vmul.f32 %v1499_v47, %v5698_v14  ;;  %v1527_v61 = vadd.f32 %v1511_v35, %v7707_v33  ;;  %v1578_v3 = vmul.f32 2.0, %v1562_v6  ;;  %v1526_v16 = vadd.f32 %v1510_v21, %v7708_v49 }
 0x2ab   : > { %v1590_v4 = vsub.f32 %v7705_v53, %v1574_v9  ;;  %v1623_v8 = vsub.f32 1.0, %v1607_v19  ;;  %v1627_v50 = vsub.f32 1.0, %v1611_v7  ;;  %v7709_v59 = vmov 0.0   ;;  %v5861_v34 = vpop.permute.xlu0 %1656 }
 0x2ac   : > { %v1531_v43 = vadd.f32 %v1515_v11, %v5698_v14  ;;  %v1594_v23 = vsub.f32 %v7706_v2, %v1578_v3  ;;  %4542 = vmatmul.mubr.msk.f32.vlgmr.msra.gmra.mrb[16].mxu0 %vm1037_vm2, %v344_v17  ;;  %v1530_v22 = vadd.f32 %v1514_v25, %v5691_v31  ;;  %v347_v31 = vld [vmem:[%s7568_s5 + $0x18] sm:$0xff]  ;;  %v5857_v2 = vrot.slane %v5848_v55, %v7713_v46 }
 0x2ad   : > { %v1606_v60 = vmul.f32 2.0, %v1590_v4  ;;  %1746 = vmatprep.mubr.f32.mxu0 %v7709_v59  ;;  %v1639_v41 = vmul.f32 %v1623_v8, %v1527_v61  ;;  %7715 = vst [vmem:[#allocation22_spill] sm:$0xff] %v5861_v34 }
 0x2ae   : > { %v1643_v26 = vmul.f32 %v1627_v50, %v1531_v43  ;;  %v1610_v14 = vmul.f32 2.0, %v1594_v23  ;;  %7714 = vst [vmem:[#allocation15_spill] sm:$0xff] %v5857_v2 }
 0x2af   : > { %v1622_v42 = vsub.f32 1.0, %v1606_v60 }
 0x2b0   : > { %v4618_v38 = vpack.c.bf16 %v1643_v26, %v1639_v41  ;;  %v1626_v48 = vsub.f32 1.0, %v1610_v14  ;;  %4543 = vmatmul.mubr.msk.f32.gmra.mrb[18].mxu0 %vm1037_vm2, %v345_v15 }
 0x2b1   : > { %1752 = vmatprep.mubr.f32.mxu0 %v7709_v59  ;;  %v1638_v58 = vmul.f32 %v1622_v42, %v1526_v16 }
 0x2b2   : > { %4619 = vmatprep.subr.bf16.mxu1 %v4618_v38  ;;  %v1642_v40 = vmul.f32 %v1626_v48, %v1530_v22 }
 0x2b4   : > { %v4620_v5 = vpack.c.bf16 %v1642_v40, %v1638_v58  ;;  %4544 = vmatmul.mubr.msk.f32.gmra.mrb[20].mxu0 %vm1037_vm2, %v346_v51 }
 0x2b5   : > { %1758 = vmatprep.mubr.f32.mxu0 %v7709_v59 }
 0x2b6   : > { %4621 = vmatpush1.bf16.msra.mxu1 %v4620_v5 }
 0x2b8   : > { %4545 = vmatmul.mubr.msk.f32.gmra.mrb[22].mxu0 %vm1037_vm2, %v347_v31 }
 0x2b9   : > { %4546 = vmatmul.mubr.msk.f32.vlgmr.msra.gmra.mrb[16].mxu1 %vm1037_vm2, %v344_v17  ;;  %2346 = vmatprep.mubr.f32.mxu0 %v7709_v59 }
 0x2ba   : > { %1835 = vmatprep.mubr.f32.mxu1 %v7709_v59 }
 0x2bd   : > { %4547 = vmatmul.mubr.msk.f32.gmra.mrb[18].mxu1 %vm1037_vm2, %v345_v15 }
 0x2be   : > { %1841 = vmatprep.mubr.f32.mxu1 %v7709_v59 }
 0x2c1   : > { %4548 = vmatmul.mubr.msk.f32.gmra.mrb[20].mxu1 %vm1037_vm2, %v346_v51 }
 0x2c2   : > { %1847 = vmatprep.mubr.f32.mxu1 %v7709_v59 }
 0x2c5   : > { %4549 = vmatmul.mubr.msk.f32.gmra.mrb[22].mxu1 %vm1037_vm2, %v347_v31 }
 0x2c6   : > { %2417 = vmatprep.mubr.f32.mxu1 %v7709_v59 }
 0x37f   : > { %v1742_v62 = vpop.f32.mrb[16].mxu0 }
 0x380   : > { %v1743_v13 = vadd.f32 %v1742_v62, %v5839_v10  ;;  %v1744_v63 = vpop.f32.mrb[17].mxu0 }
 0x381   : > { %v1745_v52 = vadd.f32 %v1744_v63, %v5839_v10 }
 0x382   : > { %v1854_v45 = vmul.f32 0.31830987, %v1743_v13 }
 0x383   : > { %v1855_v0 = vmul.f32 0.31830987, %v1745_v52  ;;  %v1748_v54 = vpop.f32.mrb[18].mxu0 }
 0x384   : > { %v1870_v1 = vadd.f32 0.5, %v1854_v45  ;;  %v1749_v32 = vadd.f32 %v1748_v54, %v5843_v27  ;;  %v1750_v18 = vpop.f32.mrb[19].mxu0 }
 0x385   : > { %v1871_v37 = vadd.f32 0.5, %v1855_v0  ;;  %v1751_v44 = vadd.f32 %v1750_v18, %v5843_v27 }
 0x386   : > { %v5850_v20 = vfloor.f32 %v1870_v1  ;;  %v1858_v36 = vmul.f32 0.31830987, %v1749_v32 }
 0x387   : > { %v5852_v57 = vfloor.f32 %v1871_v37  ;;  %v1859_v53 = vmul.f32 0.31830987, %v1751_v44  ;;  %v1754_v30 = vpop.f32.mrb[20].mxu0 }
 0x388   : > { %v1902_v29 = vmul.f32 3.1414795, %v5850_v20  ;;  %v1874_v56 = vadd.f32 0.5, %v1858_v36  ;;  %v1934_v28 = vmul.f32 0.00011315942, %v5850_v20  ;;  %v1966_v47 = vmul.f32 1.9841873e-09, %v5850_v20 }
 0x389   : > { %v1903_v24 = vmul.f32 3.1414795, %v5852_v57  ;;  %v1875_v39 = vadd.f32 0.5, %v1859_v53  ;;  %v1935_v33 = vmul.f32 0.00011315942, %v5852_v57  ;;  %v1756_v6 = vpop.f32.mrb[21].mxu0  ;;  %v5871_v7 = vadd.f32 %v1754_v30, %v5861_v34 }
 0x38a   : > { %v1918_v12 = vsub.f32 %v1743_v13, %v1902_v29  ;;  %v5865_v35 = vfloor.f32 %v1874_v56  ;;  %v1967_v21 = vmul.f32 1.9841873e-09, %v5852_v57  ;;  %v5877_v61 = vadd.f32 %v1756_v6, %v5861_v34 }
 0x38b   : > { %v1919_v49 = vsub.f32 %v1745_v52, %v1903_v24  ;;  %v5868_v19 = vfloor.f32 %v1875_v39  ;;  %v5873_v9 = vpop.f32.mrb[22].mxu0  ;;  %v5880_v3 = vmul.f32 0.5, %v5852_v57  ;;  %v1862_v37 = vmul.f32 0.31830987, %v5871_v7 }
 0x38c   : > { %v1950_v17 = vsub.f32 %v1918_v12, %v1934_v28  ;;  %v1831_v25 = vpop.f32.mrb[16].mxu1  ;;  %v1906_v11 = vmul.f32 3.1414795, %v5865_v35  ;;  %v1938_v50 = vmul.f32 0.00011315942, %v5865_v35  ;;  %v5885_v16 = vpop.f32.mrb[23].mxu0 }
 0x38d   : > { %v1951_v4 = vsub.f32 %v1919_v49, %v1935_v33  ;;  %v1832_v43 = vadd.f32 %v1831_v25, %v5839_v10  ;;  %v1833_v8 = vpop.f32.mrb[17].mxu1  ;;  %v1907_v23 = vmul.f32 3.1414795, %v5868_v19  ;;  %v1970_v41 = vmul.f32 1.9841873e-09, %v5865_v35 }
 0x38e   : > { %v5887_v60 = vsub.f32 %v1950_v17, %v1966_v47  ;;  %v1834_v15 = vadd.f32 %v1833_v8, %v5839_v10  ;;  %v1922_v22 = vsub.f32 %v1749_v32, %v1906_v11  ;;  %v1939_v42 = vmul.f32 0.00011315942, %v5868_v19 }
 0x38f   : > { %v5891_v26 = vsub.f32 %v1951_v4, %v1967_v21  ;;  %v1856_v14 = vmul.f32 0.31830987, %v1832_v43  ;;  %v1923_v38 = vsub.f32 %v1751_v44, %v1907_v23  ;;  %v1971_v40 = vmul.f32 1.9841873e-09, %v5868_v19 }
 0x390   : > { %v1998_v48 = vmul.f32 %v5887_v60, %v5887_v60  ;;  %v1857_v51 = vmul.f32 0.31830987, %v1834_v15  ;;  %v1954_v58 = vsub.f32 %v1922_v22, %v1938_v50  ;;  %v1837_v5 = vpop.f32.mrb[18].mxu1  ;;  %v1863_v44 = vmul.f32 0.31830987, %v5877_v61 }
 0x391   : > { %v5899_v31 = vmul.f32 %v5891_v26, %v5891_v26  ;;  %v1872_v62 = vadd.f32 0.5, %v1856_v14  ;;  %v1955_v13 = vsub.f32 %v1923_v38, %v1939_v42  ;;  %v1838_v63 = vadd.f32 %v1837_v5, %v5843_v27  ;;  %v1839_v52 = vpop.f32.mrb[19].mxu1 }
 0x392   : > { %v2014_v45 = vmul.f32 2.608316e-06, %v1998_v48  ;;  %v1873_v0 = vadd.f32 0.5, %v1857_v51  ;;  %v5902_v54 = vsub.f32 %v1954_v58, %v1970_v41  ;;  %v1840_v1 = vadd.f32 %v1839_v52, %v5843_v27 }
 0x393   : > { %v5905_v32 = vfloor.f32 %v1872_v62  ;;  %v1860_v18 = vmul.f32 0.31830987, %v1838_v63  ;;  %v5918_v28 = vmul.f32 2.608316e-06, %v5899_v31  ;;  %v5921_v39 = vsub.f32 %v1955_v13, %v1971_v40 }
 0x394   : > { %v2030_v36 = vadd.f32 -0.0001981069, %v2014_v45  ;;  %v5909_v53 = vfloor.f32 %v1873_v0  ;;  %v5913_v30 = vmul.f32 %v5902_v54, %v5902_v54  ;;  %v1861_v29 = vmul.f32 0.31830987, %v1840_v1  ;;  %v5915_v56 = vpop.f32.mrb[20].mxu1 }
 0x395   : > { %v1904_v24 = vmul.f32 3.1414795, %v5905_v32  ;;  %v5923_v12 = vpop.f32.mrb[21].mxu1  ;;  %v5926_v47 = vmul.f32 0.5, %v5850_v20  ;;  %v1936_v6 = vmul.f32 0.00011315942, %v5905_v32  ;;  %v1876_v4 = vadd.f32 0.5, %v1860_v18 }
 0x396   : > { %v2046_v33 = vmul.f32 %v2030_v36, %v1998_v48  ;;  %v1968_v49 = vmul.f32 1.9841873e-09, %v5905_v32  ;;  %v1905_v21 = vmul.f32 3.1414795, %v5909_v53  ;;  %v1937_v25 = vmul.f32 0.00011315942, %v5909_v53 }
 0x397   : > { %v1920_v17 = vsub.f32 %v1832_v43, %v1904_v24  ;;  %v2018_v11 = vmul.f32 2.608316e-06, %v5913_v30  ;;  %v1877_v23 = vadd.f32 0.5, %v1861_v29  ;;  %v1878_v22 = vadd.f32 0.5, %v1862_v37 }
 0x398   : > { %v2062_v8 = vadd.f32 0.008333079, %v2046_v33  ;;  %v1921_v50 = vsub.f32 %v1834_v15, %v1905_v21  ;;  %v5933_v41 = vpop.f32.mrb[22].mxu1  ;;  %v5937_v42 = vmul.f32 %v5921_v39, %v5921_v39  ;;  %v5939_v51 = vfloor.f32 %v1876_v4 }
 0x399   : > { %v1952_v14 = vsub.f32 %v1920_v17, %v1936_v6  ;;  %v2034_v38 = vadd.f32 -0.0001981069, %v2018_v11  ;;  %v5941_v43 = vpop.f32.mrb[23].mxu1  ;;  %v1969_v5 = vmul.f32 1.9841873e-09, %v5909_v53  ;;  %v5944_v62 = vfloor.f32 %v1877_v23 }
 0x39a   : > { %v2078_v58 = vmul.f32 %v2062_v8, %v1998_v48  ;;  %v1953_v40 = vsub.f32 %v1921_v50, %v1937_v25  ;;  %v1908_v52 = vmul.f32 3.1414795, %v5939_v51  ;;  %v5950_v45 = vfloor.f32 %v1878_v22 }
 0x39b   : > { %v5946_v15 = vsub.f32 %v1952_v14, %v1968_v49  ;;  %v2050_v13 = vmul.f32 %v2034_v38, %v5913_v30  ;;  %v1909_v37 = vmul.f32 3.1414795, %v5944_v62  ;;  %v1879_v36 = vadd.f32 0.5, %v1863_v44 }
 0x39c   : > { %v2094_v0 = vadd.f32 -0.1666666, %v2078_v58  ;;  %v5952_v18 = vsub.f32 %v1953_v40, %v1969_v5  ;;  %v1924_v33 = vsub.f32 %v1838_v63, %v1908_v52  ;;  %v1940_v6 = vmul.f32 0.00011315942, %v5939_v51 }
 0x39d   : > { %v5957_v29 = vmul.f32 %v5946_v15, %v5946_v15  ;;  %v2066_v24 = vadd.f32 0.008333079, %v2050_v13  ;;  %v1972_v21 = vmul.f32 1.9841873e-09, %v5939_v51  ;;  %v1925_v17 = vsub.f32 %v1840_v1, %v1909_v37 }
 0x39e   : > { %v2110_v49 = vmul.f32 %v2094_v0, %v1998_v48  ;;  %v1941_v25 = vmul.f32 0.00011315942, %v5944_v62  ;;  %v1956_v8 = vsub.f32 %v1924_v33, %v1940_v6  ;;  %v1910_v44 = vmul.f32 3.1414795, %v5950_v45 }
 0x39f   : > { %v2016_v11 = vmul.f32 2.608316e-06, %v5957_v29  ;;  %v2082_v4 = vmul.f32 %v2066_v24, %v5913_v30  ;;  %v5967_v50 = vmul.f32 %v5952_v18, %v5952_v18  ;;  %v1973_v23 = vmul.f32 1.9841873e-09, %v5944_v62 }
 0x3a0   : > { %v1957_v63 = vsub.f32 %v1925_v17, %v1941_v25  ;;  %v1942_v48 = vmul.f32 0.00011315942, %v5950_v45  ;;  %v5971_v14 = vsub.f32 %v1956_v8, %v1972_v21  ;;  %v1926_v38 = vsub.f32 %v5871_v7, %v1910_v44  ;;  %v6004_v44 = vpop.permute.xlu1 %1661 }
 0x3a1   : > { %v2032_v22 = vadd.f32 -0.0001981069, %v2016_v11  ;;  %v2098_v1 = vadd.f32 -0.1666666, %v2082_v4  ;;  %v5975_v58 = vmul.f32 2.608316e-06, %v5937_v42  ;;  %v5980_v13 = vfloor.f32 %v1879_v36 }
 0x3a2   : > { %v5977_v40 = vsub.f32 %v1957_v63, %v1973_v23  ;;  %v1974_v5 = vmul.f32 1.9841873e-09, %v5950_v45  ;;  %v2004_v37 = vmul.f32 %v5971_v14, %v5971_v14  ;;  %v1958_v24 = vsub.f32 %v1926_v38, %v1942_v48  ;;  %7716 = vst [vmem:[#allocation20_spill] sm:$0xff] %v6004_v44 }
 0x3a3   : > { %v2048_v52 = vmul.f32 %v2032_v22, %v5957_v29  ;;  %v2114_v0 = vmul.f32 %v2098_v1, %v5913_v30  ;;  %v2126_v33 = vmul.f32 %v2110_v49, %v5887_v60  ;;  %v5988_v7 = vmul.f32 2.608316e-06, %v5967_v50 }
 0x3a4   : > { %v5992_v6 = vmul.f32 %v5977_v40, %v5977_v40  ;;  %v1911_v36 = vmul.f32 3.1414795, %v5980_v13  ;;  %v2020_v17 = vmul.f32 2.608316e-06, %v2004_v37  ;;  %v5995_v25 = vsub.f32 %v1958_v24, %v1974_v5 }
 0x3a5   : > { %v2064_v21 = vadd.f32 0.008333079, %v2048_v52  ;;  %v1943_v30 = vmul.f32 0.00011315942, %v5980_v13  ;;  %v1975_v4 = vmul.f32 1.9841873e-09, %v5980_v13  ;;  %v1844_v49 = vadd.f32 %v5915_v56, %v5861_v34 }
 0x3a6   : > { %v1927_v11 = vsub.f32 %v5877_v61, %v1911_v36  ;;  %v1846_v8 = vadd.f32 %v5923_v12, %v5861_v34  ;;  %v2130_v23 = vmul.f32 %v2114_v0, %v5902_v54  ;;  %v2036_v48 = vadd.f32 -0.0001981069, %v2020_v17 }
 0x3a7   : > { %v2080_v63 = vmul.f32 %v2064_v21, %v5957_v29  ;;  %v2006_v22 = vmul.f32 %v5995_v25, %v5995_v25  ;;  %v1864_v61 = vmul.f32 0.31830987, %v1844_v49  ;;  %v1761_v5 = vadd.f32 %v5873_v9, %v6004_v44 }
 0x3a8   : > { %v1959_v1 = vsub.f32 %v1927_v11, %v1943_v30  ;;  %v1865_v38 = vmul.f32 0.31830987, %v1846_v8  ;;  %v2052_v52 = vmul.f32 %v2036_v48, %v2004_v37  ;;  %v1763_v12 = vadd.f32 %v5885_v16, %v6004_v44 }
 0x3a9   : > { %v2096_v56 = vadd.f32 -0.1666666, %v2080_v63  ;;  %v2022_v24 = vmul.f32 2.608316e-06, %v2006_v22  ;;  %v1880_v21 = vadd.f32 0.5, %v1864_v61 }
 0x3aa   : > { %v6014_v36 = vsub.f32 %v1959_v1, %v1975_v4  ;;  %v1881_v0 = vadd.f32 0.5, %v1865_v38  ;;  %v1866_v17 = vmul.f32 0.31830987, %v1761_v5  ;;  %v2068_v34 = vadd.f32 0.008333079, %v2052_v52 }
 0x3ab   : > { %v2038_v27 = vadd.f32 -0.0001981069, %v2022_v24  ;;  %v1867_v10 = vmul.f32 0.31830987, %v1763_v12  ;;  %v6022_v11 = vfloor.f32 %v1880_v21  ;;  %v6027_v4 = vadd.f32 %v2126_v33, %v5887_v60 }
 0x3ac   : > { %v6020_v9 = vmul.f32 %v6014_v36, %v6014_v36  ;;  %v6024_v63 = vfloor.f32 %v1881_v0  ;;  %v1882_v16 = vadd.f32 0.5, %v1866_v17  ;;  %v2084_v48 = vmul.f32 %v2068_v34, %v2004_v37 }
 0x3ad   : > { %7717 = vst [vmem:[#allocation19_spill] sm:$0xff] %v6022_v11  ;;  %v2054_v1 = vmul.f32 %v2038_v27, %v2006_v22  ;;  %v1883_v61 = vadd.f32 0.5, %v1867_v10  ;;  %v6030_v38 = vadd.f32 %v2130_v23, %v5902_v54  ;;  %v6033_v52 = vmul.f32 2.608316e-06, %v5992_v6 }
 0x3ae   : > { %7718 = vst [vmem:[#allocation23_spill] sm:$0xff] %v6024_v63  ;;  %v6036_v24 = vmul.f32 2.608316e-06, %v6020_v9  ;;  %v1912_v21 = vmul.f32 3.1414795, %v6022_v11  ;;  %v2112_v0 = vmul.f32 %v2096_v56, %v5957_v29  ;;  %v1944_v60 = vmul.f32 0.00011315942, %v6022_v11 }
 0x3af   : > { %v2100_v17 = vadd.f32 -0.1666666, %v2084_v48  ;;  %v2070_v30 = vadd.f32 0.008333079, %v2054_v1  ;;  %v1913_v10 = vmul.f32 3.1414795, %v6024_v63  ;;  %v6043_v54 = vfloor.f32 %v1882_v16 }
 0x3b0   : > { %v1928_v34 = vsub.f32 %v1844_v49, %v1912_v21  ;;  %v1945_v27 = vmul.f32 0.00011315942, %v6024_v63  ;;  %v1976_v46 = vmul.f32 1.9841873e-09, %v6022_v11  ;;  %v6046_v59 = vfloor.f32 %v1883_v61 }
 0x3b1   : > { %v2116_v33 = vmul.f32 %v2100_v17, %v2004_v37  ;;  %v2086_v23 = vmul.f32 %v2070_v30, %v2006_v22  ;;  %v1929_v2 = vsub.f32 %v1846_v8, %v1913_v10  ;;  %v1914_v29 = vmul.f32 3.1414795, %v6043_v54 }
 0x3b2   : > { %v1960_v55 = vsub.f32 %v1928_v34, %v1944_v60  ;;  %v1850_v56 = vadd.f32 %v5933_v41, %v6004_v44  ;;  %v2128_v49 = vmul.f32 %v2112_v0, %v5946_v15  ;;  %v1977_v1 = vmul.f32 1.9841873e-09, %v6024_v63 }
 0x3b3   : > { %v2102_v48 = vadd.f32 -0.1666666, %v2086_v23  ;;  %v1915_v16 = vmul.f32 3.1414795, %v6046_v59  ;;  %v1961_v30 = vsub.f32 %v1929_v2, %v1945_v27  ;;  %v1930_v21 = vsub.f32 %v1761_v5, %v1914_v29 }
 0x3b4   : > { %v6054_v37 = vsub.f32 %v1960_v55, %v1976_v46  ;;  %v1946_v61 = vmul.f32 0.00011315942, %v6043_v54  ;;  %v2132_v8 = vmul.f32 %v2116_v33, %v5971_v14  ;;  %v1978_v17 = vmul.f32 1.9841873e-09, %v6043_v54 }
 0x3b5   : > { %v1931_v60 = vsub.f32 %v1763_v12, %v1915_v16  ;;  %v1947_v41 = vmul.f32 0.00011315942, %v6046_v59  ;;  %v2118_v34 = vmul.f32 %v2102_v48, %v2006_v22  ;;  %v1868_v23 = vmul.f32 0.31830987, %v1850_v56 }
 0x3b6   : > { %7719 = vst [vmem:[#allocation24_spill] sm:$0xff] %v6054_v37  ;;  %v6062_v0 = vmul.f32 %v6054_v37, %v6054_v37  ;;  %v1962_v10 = vsub.f32 %v1930_v21, %v1946_v61  ;;  %v1979_v46 = vmul.f32 1.9841873e-09, %v6046_v59  ;;  %v1852_v2 = vadd.f32 %v5941_v43, %v6004_v44 }
 0x3b7   : > { %v1963_v55 = vsub.f32 %v1931_v60, %v1947_v41  ;;  %v2031_v5 = vadd.f32 -0.0001981069, %v5918_v28  ;;  %v6069_v12 = vsub.f32 %v1961_v30, %v1977_v1  ;;  %v1884_v22 = vadd.f32 0.5, %v1868_v23 }
 0x3b8   : > { %v2024_v27 = vmul.f32 2.608316e-06, %v6062_v0  ;;  %v6071_v33 = vsub.f32 %v1962_v10, %v1978_v17  ;;  %v6074_v29 = vadd.f32 %v2128_v49, %v5946_v15  ;;  %v1869_v16 = vmul.f32 0.31830987, %v1852_v2 }
 0x3b9   : > { %7720 = vst [vmem:[#allocation25_spill] sm:$0xff] %v6069_v12  ;;  %v6076_v48 = vsub.f32 %v1963_v55, %v1979_v46  ;;  %v2035_v21 = vadd.f32 -0.0001981069, %v5975_v58  ;;  %v6080_v61 = vadd.f32 %v2132_v8, %v5971_v14  ;;  %v6084_v1 = vfloor.f32 %v1884_v22 }
 0x3ba   : > { %v2040_v43 = vadd.f32 -0.0001981069, %v2024_v27  ;;  %v2010_v28 = vmul.f32 %v6071_v33, %v6071_v33  ;;  %v2134_v30 = vmul.f32 %v2118_v34, %v5995_v25  ;;  %v1885_v17 = vadd.f32 0.5, %v1869_v16 }
 0x3bb   : > { %7721 = vst [vmem:[#allocation26_spill] sm:$0xff] %v6084_v1  ;;  %v2047_v15 = vmul.f32 %v2031_v5, %v5899_v31  ;;  %v2051_v49 = vmul.f32 %v2035_v21, %v5937_v42  ;;  %v6092_v58 = vmul.f32 %v6069_v12, %v6069_v12  ;;  %v1916_v8 = vmul.f32 3.1414795, %v6084_v1 }
 0x3bc   : > { %v2056_v60 = vmul.f32 %v2040_v43, %v6062_v0  ;;  %v2026_v14 = vmul.f32 2.608316e-06, %v2010_v28  ;;  %v6097_v41 = vmul.f32 %v6076_v48, %v6076_v48  ;;  %v1948_v34 = vmul.f32 0.00011315942, %v6084_v1 }
 0x3bd   : > { %v6100_v10 = vfloor.f32 %v1885_v17  ;;  %v2063_v23 = vadd.f32 0.008333079, %v2047_v15  ;;  %v1932_v5 = vsub.f32 %v1850_v56, %v1916_v8  ;;  %v2067_v27 = vadd.f32 0.008333079, %v2051_v49 }
 0x3be   : > { %v2072_v55 = vadd.f32 0.008333079, %v2056_v60  ;;  %v2042_v46 = vadd.f32 -0.0001981069, %v2026_v14  ;;  %v1980_v22 = vmul.f32 1.9841873e-09, %v6084_v1  ;;  %v2175_v56 = vfloor.f32 %v5880_v3 }
 0x3bf   : > { %v1917_v16 = vmul.f32 3.1414795, %v6100_v10  ;;  %v1949_v21 = vmul.f32 0.00011315942, %v6100_v10  ;;  %v2079_v43 = vmul.f32 %v2063_v23, %v5899_v31  ;;  %v1964_v37 = vsub.f32 %v1932_v5, %v1948_v34 }
 0x3c0   : > { %v2088_v44 = vmul.f32 %v2072_v55, %v6062_v0  ;;  %v2058_v12 = vmul.f32 %v2042_v46, %v2010_v28  ;;  %v2083_v17 = vmul.f32 %v2067_v27, %v5937_v42  ;;  %v2163_v60 = vmul.f32 0.5, %v5868_v19 }
 0x3c1   : > { %v1933_v11 = vsub.f32 %v1852_v2, %v1917_v16  ;;  %v2095_v15 = vadd.f32 -0.1666666, %v2079_v43  ;;  %v6110_v14 = vsub.f32 %v1964_v37, %v1980_v22  ;;  %v1981_v8 = vmul.f32 1.9841873e-09, %v6100_v10 }
 0x3c2   : > { %v2074_v49 = vadd.f32 0.008333079, %v2058_v12  ;;  %v2099_v1 = vadd.f32 -0.1666666, %v2083_v17  ;;  %v2179_v55 = vfloor.f32 %v2163_v60  ;;  %v2191_v46 = vmul.f32 2.0, %v2175_v56 }
 0x3c3   : > { %v1965_v63 = vsub.f32 %v1933_v11, %v1949_v21  ;;  %v2111_v23 = vmul.f32 %v2095_v15, %v5899_v31  ;;  %v2104_v34 = vadd.f32 -0.1666666, %v2088_v44  ;;  %v6116_v2 = vmul.f32 %v6110_v14, %v6110_v14 }
 0x3c4   : > { %v2090_v5 = vmul.f32 %v2074_v49, %v2010_v28  ;;  %v2115_v27 = vmul.f32 %v2099_v1, %v5937_v42  ;;  %v2195_v12 = vmul.f32 2.0, %v2179_v55  ;;  %v2207_v22 = vsub.f32 %v5852_v57, %v2191_v46 }
 0x3c5   : > { %v6119_v3 = vsub.f32 %v1965_v63, %v1981_v8  ;;  %v2127_v37 = vmul.f32 %v2111_v23, %v5891_v26  ;;  %v6124_v11 = vadd.f32 %v2134_v30, %v5995_v25  ;;  %v2028_v44 = vmul.f32 2.608316e-06, %v6116_v2 }
 0x3c6   : > { %v2106_v31 = vadd.f32 -0.1666666, %v2090_v5  ;;  %v2131_v16 = vmul.f32 %v2115_v27, %v5921_v39  ;;  %v6129_v21 = vmul.f32 2.608316e-06, %v6092_v58  ;;  %v2211_v63 = vsub.f32 %v5868_v19, %v2195_v12 }
 0x3c7   : > { %v6133_v42 = vmul.f32 %v6119_v3, %v6119_v3  ;;  %v2223_v1 = vmul.f32 2.0, %v2207_v22  ;;  %v6137_v57 = vmul.f32 %v2104_v34, %v6062_v0  ;;  %v6140_v25 = vmul.f32 2.608316e-06, %v6097_v41 }
 0x3c8   : > { %v2044_v30 = vadd.f32 -0.0001981069, %v2028_v44  ;;  %v2143_v43 = vadd.f32 %v2127_v37, %v5891_v26  ;;  %v2122_v17 = vmul.f32 %v2106_v31, %v2010_v28  ;;  %v2147_v15 = vadd.f32 %v2131_v16, %v5921_v39 }
 0x3c9   : > { %v2227_v60 = vmul.f32 2.0, %v2211_v63  ;;  %v2162_v56 = vmul.f32 0.5, %v5865_v35  ;;  %v2239_v8 = vsub.f32 1.0, %v2223_v1  ;;  %v2174_v19 = vfloor.f32 %v5926_v47 }
 0x3ca   : > { %v2060_v49 = vmul.f32 %v2044_v30, %v6116_v2  ;;  %v2033_v0 = vadd.f32 -0.0001981069, %v5988_v7  ;;  %v6149_v23 = vmul.f32 2.608316e-06, %v6133_v42  ;;  %v2037_v26 = vadd.f32 -0.0001981069, %v6033_v52 }
 0x3cb   : > { %v2243_v55 = vsub.f32 1.0, %v2227_v60  ;;  %v2178_v46 = vfloor.f32 %v2162_v56  ;;  %v2255_v34 = vmul.f32 %v2239_v8, %v2143_v43  ;;  %v2190_v39 = vmul.f32 2.0, %v2174_v19 }
 0x3cc   : > { %v2076_v28 = vadd.f32 0.008333079, %v2060_v49  ;;  %v2049_v5 = vmul.f32 %v2033_v0, %v5967_v50  ;;  %v2053_v12 = vmul.f32 %v2037_v26, %v5992_v6  ;;  %v2161_v47 = vmul.f32 0.5, %v5909_v53 }
 0x3cd   : > { %v2259_v27 = vmul.f32 %v2243_v55, %v2147_v15  ;;  %v2194_v37 = vmul.f32 2.0, %v2178_v46  ;;  %v2206_v22 = vsub.f32 %v5850_v20, %v2190_v39  ;;  %v2165_v44 = vmul.f32 0.5, %v5944_v62 }
 0x3ce   : > { %v2092_v7 = vmul.f32 %v2076_v28, %v6116_v2  ;;  %v2065_v31 = vadd.f32 0.008333079, %v2049_v5  ;;  %v2069_v63 = vadd.f32 0.008333079, %v2053_v12  ;;  %v2177_v1 = vfloor.f32 %v2161_v47 }
 0x3cf   : > { %v4622_v16 = vpack.c.bf16 %v2259_v27, %v2255_v34  ;;  %v2210_v52 = vsub.f32 %v5865_v35, %v2194_v37  ;;  %v2138_v30 = vmul.f32 %v2122_v17, %v6071_v33  ;;  %v2222_v43 = vmul.f32 2.0, %v2206_v22 }
 0x3d0   : > { %v2081_v15 = vmul.f32 %v2065_v31, %v5967_v50  ;;  %v2181_v60 = vfloor.f32 %v2165_v44  ;;  %v2085_v49 = vmul.f32 %v2069_v63, %v5992_v6  ;;  %v2193_v8 = vmul.f32 2.0, %v2177_v1 }
 0x3d1   : > { %4623 = vmatprep.subr.bf16.mxu0 %v4622_v16  ;;  %v2226_v56 = vmul.f32 2.0, %v2210_v52  ;;  %v2160_v20 = vmul.f32 0.5, %v5905_v32  ;;  %v2108_v19 = vadd.f32 -0.1666666, %v2092_v7  ;;  %v2238_v0 = vsub.f32 1.0, %v2222_v43 }
 0x3d2   : > { %v2097_v55 = vadd.f32 -0.1666666, %v2081_v15  ;;  %v2197_v46 = vmul.f32 2.0, %v2181_v60  ;;  %v2101_v26 = vadd.f32 -0.1666666, %v2085_v49  ;;  %v2209_v28 = vsub.f32 %v5909_v53, %v2193_v8 }
 0x3d3   : > { %v2242_v35 = vsub.f32 1.0, %v2226_v56  ;;  %v2164_v17 = vmul.f32 0.5, %v5939_v51  ;;  %v6166_v34 = vadd.f32 %v2138_v30, %v6071_v33  ;;  %v2254_v39 = vmul.f32 %v2238_v0, %v6027_v4 }
 0x3d4   : > { %v2113_v5 = vmul.f32 %v2097_v55, %v5967_v50  ;;  %v2213_v27 = vsub.f32 %v5944_v62, %v2197_v46  ;;  %v2117_v12 = vmul.f32 %v2101_v26, %v5992_v6  ;;  %v2225_v47 = vmul.f32 2.0, %v2209_v28 }
 0x3d5   : > { %v2258_v37 = vmul.f32 %v2242_v35, %v6030_v38  ;;  %v2176_v7 = vfloor.f32 %v2160_v20  ;;  %v6174_v22 = vmul.f32 %v2108_v19, %v6116_v2  ;;  %v2180_v33 = vfloor.f32 %v2164_v17 }
 0x3d6   : > { %v2129_v53 = vmul.f32 %v2113_v5, %v5952_v18  ;;  %v2229_v31 = vmul.f32 2.0, %v2213_v27  ;;  %v2133_v4 = vmul.f32 %v2117_v12, %v5977_v40  ;;  %v2241_v16 = vsub.f32 1.0, %v2225_v47 }
 0x3d7   : > { %v4624_v44 = vpack.c.bf16 %v2258_v37, %v2254_v39  ;;  %v2192_v50 = vmul.f32 2.0, %v2176_v7  ;;  %v2196_v38 = vmul.f32 2.0, %v2180_v33  ;;  %v2039_v6 = vadd.f32 -0.0001981069, %v6036_v24 }
 0x3d8   : > { %v2145_v62 = vadd.f32 %v2129_v53, %v5952_v18  ;;  %v2245_v52 = vsub.f32 1.0, %v2229_v31  ;;  %v2149_v63 = vadd.f32 %v2133_v4, %v5977_v40  ;;  %v2043_v1 = vadd.f32 -0.0001981069, %v6140_v25 }
 0x3d9   : > { %4625 = vmatpush1.bf16.msra.mxu0 %v4624_v44  ;;  %v2208_v2 = vsub.f32 %v5905_v32, %v2192_v50  ;;  %v2167_v30 = vmul.f32 0.5, %v5980_v13  ;;  %v2212_v15 = vsub.f32 %v5939_v51, %v2196_v38  ;;  %v2055_v60 = vmul.f32 %v2039_v6, %v6020_v9 }
 0x3da   : > { %v2257_v43 = vmul.f32 %v2241_v16, %v2145_v62  ;;  %v2171_v18 = vmul.f32 0.5, %v6046_v59  ;;  %v2261_v56 = vmul.f32 %v2245_v52, %v2149_v63  ;;  %v2059_v24 = vmul.f32 %v2043_v1, %v6097_v41  ;;  %v7722_v1 = vld [vmem:[#allocation23_spill] sm:$0xff] }
 0x3db   : > { %v2224_v49 = vmul.f32 2.0, %v2208_v2  ;;  %v2183_v8 = vfloor.f32 %v2167_v30  ;;  %v2228_v20 = vmul.f32 2.0, %v2212_v15  ;;  %v2071_v40 = vadd.f32 0.008333079, %v2055_v60 }
 0x3dc   : > { %v2187_v19 = vfloor.f32 %v2171_v18  ;;  %v2166_v32 = vmul.f32 0.5, %v5950_v45  ;;  %v4630_v25 = vpack.c.bf16 %v2261_v56, %v2257_v43  ;;  %v2075_v55 = vadd.f32 0.008333079, %v2059_v24 }
 0x3dd   : > { %v2240_v0 = vsub.f32 1.0, %v2224_v49  ;;  %v2199_v46 = vmul.f32 2.0, %v2183_v8  ;;  %v2244_v35 = vsub.f32 1.0, %v2228_v20  ;;  %v2087_v51 = vmul.f32 %v2071_v40, %v6020_v9 }
 0x3de   : > { %v2203_v26 = vmul.f32 2.0, %v2187_v19  ;;  %v2170_v28 = vmul.f32 0.5, %v6043_v54  ;;  %4631 = vmatprep.subr.bf16.mxu1 %v4630_v25  ;;  %v2091_v39 = vmul.f32 %v2075_v55, %v6097_v41  ;;  %v2182_v27 = vfloor.f32 %v2166_v32  ;;  %v7723_v55 = vld [vmem:[#allocation19_spill] sm:$0xff] }
 0x3df   : > { %v2256_v17 = vmul.f32 %v2240_v0, %v6074_v29  ;;  %v2215_v5 = vsub.f32 %v5980_v13, %v2199_v46  ;;  %v2260_v37 = vmul.f32 %v2244_v35, %v6080_v61  ;;  %v2103_v12 = vadd.f32 -0.1666666, %v2087_v51 }
 0x3e0   : > { %v2219_v47 = vsub.f32 %v6046_v59, %v2203_v26  ;;  %v2186_v7 = vfloor.f32 %v2170_v28  ;;  %v2107_v53 = vadd.f32 -0.1666666, %v2091_v39  ;;  %v2198_v33 = vmul.f32 2.0, %v2182_v27  ;;  %v7724_v26 = vld [vmem:[#allocation26_spill] sm:$0xff] }
 0x3e1   : > { %v2231_v31 = vmul.f32 2.0, %v2215_v5  ;;  %v2041_v44 = vadd.f32 -0.0001981069, %v6129_v21  ;;  %v4632_v4 = vpack.c.bf16 %v2260_v37, %v2256_v17  ;;  %v2119_v16 = vmul.f32 %v2103_v12, %v6020_v9  ;;  %v7725_v12 = vld [vmem:[#allocation24_spill] sm:$0xff] }
 0x3e2   : > { %v2235_v29 = vmul.f32 2.0, %v2219_v47  ;;  %v2202_v50 = vmul.f32 2.0, %v2186_v7  ;;  %v2123_v62 = vmul.f32 %v2107_v53, %v6097_v41  ;;  %v2214_v52 = vsub.f32 %v5950_v45, %v2198_v33  ;;  %v7726_v7 = vld [vmem:[#allocation25_spill] sm:$0xff] }
 0x3e3   : > { %v2247_v13 = vsub.f32 1.0, %v2231_v31  ;;  %v2045_v61 = vadd.f32 -0.0001981069, %v6149_v23  ;;  %4633 = vmatpush1.bf16.msra.mxu1 %v4632_v4  ;;  %v2135_v59 = vmul.f32 %v2119_v16, %v6014_v36  ;;  %v2057_v21 = vmul.f32 %v2041_v44, %v6092_v58  ;;  %v7727_v4 = vld [vmem:[#allocation15_spill] sm:$0xff] }
 0x3e4   : > { %v2251_v38 = vsub.f32 1.0, %v2235_v29  ;;  %v2218_v6 = vsub.f32 %v6043_v54, %v2202_v50  ;;  %v2139_v63 = vmul.f32 %v2123_v62, %v6076_v48  ;;  %v2230_v9 = vmul.f32 2.0, %v2214_v52 }
 0x3e5   : > { %v2061_v2 = vmul.f32 %v2045_v61, %v6133_v42  ;;  %v2169_v41 = vmul.f32 0.5, %v7722_v1  ;;  %v2151_v30 = vadd.f32 %v2135_v59, %v6014_v36  ;;  %v2073_v43 = vadd.f32 0.008333079, %v2057_v21 }
 0x3e6   : > { %v2234_v45 = vmul.f32 2.0, %v2218_v6  ;;  %v2173_v23 = vmul.f32 0.5, %v6100_v10  ;;  %v2155_v15 = vadd.f32 %v2139_v63, %v6076_v48  ;;  %v2246_v60 = vsub.f32 1.0, %v2230_v9 }
 0x3e7   : > { %v2077_v18 = vadd.f32 0.008333079, %v2061_v2  ;;  %v2185_v54 = vfloor.f32 %v2169_v41  ;;  %v2263_v56 = vmul.f32 %v2247_v13, %v2151_v30  ;;  %v2089_v24 = vmul.f32 %v2073_v43, %v6092_v58  ;;  %v4733_v43 = vld [vmem:[%s7564_s1] sm:$0xff] }
 0x3e8   : > { %v2250_v49 = vsub.f32 1.0, %v2234_v45  ;;  %v2189_v8 = vfloor.f32 %v2173_v23  ;;  %v2267_v20 = vmul.f32 %v2251_v38, %v2155_v15  ;;  %v2262_v40 = vmul.f32 %v2246_v60, %v6124_v11 }
 0x3e9   : > { %v2093_v19 = vmul.f32 %v2077_v18, %v6133_v42  ;;  %v2201_v36 = vmul.f32 2.0, %v2185_v54  ;;  %v2105_v25 = vadd.f32 -0.1666666, %v2089_v24  ;;  %v2168_v48 = vmul.f32 0.5, %v7723_v55  ;;  %v4734_v18 = vld [vmem:[%s7564_s1 + $0x8] sm:$0xff]  ;;  %v4735_v54 = vld [vmem:[%s7564_s1 + $0x10] sm:$0xff] }
 0x3ea   : > { %v2266_v32 = vmul.f32 %v2250_v49, %v6166_v34  ;;  %v2205_v0 = vmul.f32 2.0, %v2189_v8  ;;  %v4626_v46 = vpack.c.bf16 %v2267_v20, %v2263_v56  ;;  %v2172_v28 = vmul.f32 0.5, %v7724_v26  ;;  %v4736_v56 = vld [vmem:[%s7564_s1 + $0x18] sm:$0xff]  ;;  %v2273_v8 = vpop.permute.xlu0 %2272 }
 0x3eb   : > { %v2109_v35 = vadd.f32 -0.1666666, %v2093_v19  ;;  %v2217_v51 = vsub.f32 %v7722_v1, %v2201_v36  ;;  %v2121_v39 = vmul.f32 %v2105_v25, %v6092_v58  ;;  %v2184_v5 = vfloor.f32 %v2168_v48  ;;  %v348_v58 = vld [vmem:[%s7570_s7] sm:$0x1]  ;;  %v7732_v49 = vld [vmem:[#allocation6_spill] sm:$0xff] }
 0x3ec   : > { %v4628_v17 = vpack.c.bf16 %v2266_v32, %v2262_v40  ;;  %v2221_v11 = vsub.f32 %v6100_v10, %v2205_v0  ;;  %4627 = vmatprep.subr.bf16.mxu0 %v4626_v46  ;;  %v2188_v37 = vfloor.f32 %v2172_v28  ;;  %v2136_v47 = vmul.f32 %v6137_v57, %v7725_v12  ;;  %v7729_v57 = vld [vmem:[#allocation17_spill] sm:$0xff]  ;;  %v7734_v46 = vld [vmem:[#allocation8_spill] sm:$0xff] }
 0x3ed   : > { %v2125_v27 = vmul.f32 %v2109_v35, %v6133_v42  ;;  %v2233_v34 = vmul.f32 2.0, %v2217_v51  ;;  %v2137_v53 = vmul.f32 %v2121_v39, %v7726_v7  ;;  %v2200_v33 = vmul.f32 2.0, %v2184_v5 }
 0x3ee   : > { %4629 = vmatpush1.bf16.msra.mxu0 %v4628_v17  ;;  %v2237_v31 = vmul.f32 2.0, %v2221_v11  ;;  %v2140_v10 = vmul.f32 %v6174_v22, %v6110_v14  ;;  %v2204_v42 = vmul.f32 2.0, %v2188_v37  ;;  %v7728_v16 = vcombine.high %v7727_v4, %v7727_v4 }
 0x3ef   : > { %v2141_v44 = vmul.f32 %v2125_v27, %v6119_v3  ;;  %v2461_v29 = vcombine.high %v7729_v57, %v7729_v57  ;;  %v2153_v50 = vadd.f32 %v2137_v53, %v7726_v7  ;;  %v2216_v62 = vsub.f32 %v7723_v55, %v2200_v33  ;;  %v7735_v27 = vld [vmem:[#allocation9_spill] sm:$0xff] }
 0x3f0   : > { %4553 = vmatprep.subr.msk.mxu0 %vm414_vm0, %v7728_v16  ;;  %v2249_v52 = vsub.f32 1.0, %v2233_v34  ;;  %v2253_v61 = vsub.f32 1.0, %v2237_v31  ;;  %v2220_v22 = vsub.f32 %v7724_v26, %v2204_v42  ;;  %v2152_v59 = vadd.f32 %v2136_v47, %v7725_v12 }
 0x3f1   : > { %v2157_v13 = vadd.f32 %v2141_v44, %v6119_v3  ;;  %4550 = vmatmul.mubr.msk.f32.vlgmr.msra.gmra.mrb[24].mxu0 %vm1037_vm2, %v348_v58  ;;  %v2232_v38 = vmul.f32 2.0, %v2216_v62  ;;  %v7730_v6 = vmov 0.0   ;;  %v2156_v21 = vadd.f32 %v2140_v10, %v6110_v14  ;;  %v7731_v3 = vld [vmem:[#allocation7_spill] sm:$0xff] }
 0x3f2   : > { %4554 = vmatpush1.msk.msra.mxu0 %vm414_vm0, %v7727_v4  ;;  %2550 = vmatprep.mubr.f32.mxu0 %v7730_v6  ;;  %v2265_v63 = vmul.f32 %v2249_v52, %v2153_v50  ;;  %v2236_v2 = vmul.f32 2.0, %v2220_v22  ;;  %v2475_v1 = vrot.slane %v2461_v29, %v7731_v3  ;;  %v2277_v24 = vsub.s32 0, %v7732_v49  ;;  %v7737_v4 = vld [vmem:[#allocation10_spill] sm:$0xff] }
 0x3f3   : > { %v2269_v9 = vmul.f32 %v2253_v61, %v2157_v13  ;;  %v2248_v30 = vsub.f32 1.0, %v2232_v38  ;;  %v4813_v25 = vmov 1966171168  }
 0x3f4   : > { %v2252_v45 = vsub.f32 1.0, %v2236_v2  ;;  %v2477_v14 = vcombine.high %v2475_v1, %v2475_v1  ;;  %v6279_v20 = vrot.slane %v2273_v8, %v2277_v24  ;;  %v2431_v0 = vunpack.c.l.s4 %v4813_v25 }
 0x3f5   : > { %v4634_v41 = vpack.c.bf16 %v2269_v9, %v2265_v63  ;;  %4555 = vmatmul.mubr.msk.f32.vlgmr.msra.gmra.mrb[26].mxu0 %vm401_vm1, %v4733_v43  ;;  %v2264_v23 = vmul.f32 %v2248_v30, %v2152_v59 }
 0x3f6   : > { %2556 = vmatprep.mubr.f32.mxu0 %v7730_v6  ;;  %v2268_v15 = vmul.f32 %v2252_v45, %v2156_v21  ;;  %7733 = vst [vmem:[#allocation23_spill] sm:$0xff] %v6279_v20  ;;  %v2432_v17 = vunpack.c.0.s8 %v2431_v0 }
 0x3f7   : > { %4635 = vmatprep.subr.bf16.mxu1 %v4634_v41 }
 0x3f8   : > { %v4636_v60 = vpack.c.bf16 %v2268_v15, %v2264_v23  ;;  %v6292_v31 = vsub.s32 %v2432_v17, %v7732_v49 }
 0x3f9   : > { %4556 = vmatmul.mubr.msk.f32.gmra.mrb[28].mxu0 %vm401_vm1, %v4734_v18 }
 0x3fa   : > { %2562 = vmatprep.mubr.f32.mxu0 %v7730_v6  ;;  %4637 = vmatpush1.bf16.msra.mxu1 %v4636_v60  ;;  %7736 = vst [vmem:[#allocation19_spill] sm:$0xff] %v6292_v31 }
 0x3fb   : > { %4559 = vmatprep.subr.msk.mxu1 %vm414_vm0, %v2477_v14 }
 0x3fd   : > { %4557 = vmatmul.mubr.msk.f32.gmra.mrb[30].mxu0 %vm401_vm1, %v4735_v54  ;;  %4551 = vmatmul.mubr.msk.f32.vlgmr.msra.gmra.mrb[24].mxu1 %vm1037_vm2, %v348_v58 }
 0x3fe   : > { %2568 = vmatprep.mubr.f32.mxu0 %v7730_v6  ;;  %4560 = vmatpush1.msk.msra.mxu1 %vm414_vm0, %v2475_v1 }
 0x3ff   : > { %2639 = vmatprep.mubr.f32.mxu1 %v7730_v6 }
 0x401   : > { %4558 = vmatmul.mubr.msk.f32.gmra.mrb[32].mxu0 %vm401_vm1, %v4736_v56  ;;  %4561 = vmatmul.mubr.msk.f32.vlgmr.msra.gmra.mrb[26].mxu1 %vm401_vm1, %v4733_v43 }
 0x402   : > { %3144 = vmatprep.mubr.f32.mxu0 %v7730_v6  ;;  %2645 = vmatprep.mubr.f32.mxu1 %v7730_v6 }
 0x405   : > { %4562 = vmatmul.mubr.msk.f32.gmra.mrb[28].mxu1 %vm401_vm1, %v4734_v18 }
 0x406   : > { %2651 = vmatprep.mubr.f32.mxu1 %v7730_v6 }
 0x409   : > { %4563 = vmatmul.mubr.msk.f32.gmra.mrb[30].mxu1 %vm401_vm1, %v4735_v54 }
 0x40a   : > { %2657 = vmatprep.mubr.f32.mxu1 %v7730_v6 }
 0x40d   : > { %4564 = vmatmul.mubr.msk.f32.gmra.mrb[32].mxu1 %vm401_vm1, %v4736_v56 }
 0x40e   : > { %3233 = vmatprep.mubr.f32.mxu1 %v7730_v6 }
 0x4c4   : > { %v2348_v40 = vpop.f32.mrb[24].mxu0 }
 0x4c5   : > { %v2349_v19 = vadd.f32 %v2348_v40, %v6279_v20  ;;  %v2350_v36 = vpop.f32.mrb[25].mxu0 }
 0x4c6   : > { %v2351_v32 = vadd.f32 %v2350_v36, %v6279_v20 }
 0x4c8   : > { %v2428_v55 = vcombine.low %v2349_v19, %v2351_v32  ;;  %v2552_v48 = vpop.f32.mrb[26].mxu0 }
 0x4c9   : > { %v2553_v35 = vadd.f32 %v2552_v48, %v7734_v46  ;;  %v2554_v51 = vpop.f32.mrb[27].mxu0 }
 0x4ca   : > { %v2555_v26 = vadd.f32 %v2554_v51, %v7734_v46  ;;  %v6306_v38 = vrot.slane %v2428_v55, %v6292_v31 }
 0x4cb   : > { %v2664_v28 = vmul.f32 0.31830987, %v2553_v35 }
 0x4cc   : > { %v2665_v39 = vmul.f32 0.31830987, %v2555_v26  ;;  %v2558_v11 = vpop.f32.mrb[28].mxu0 }
 0x4cd   : > { %v2680_v5 = vadd.f32 0.5, %v2664_v28  ;;  %v2559_v34 = vadd.f32 %v2558_v11, %v7735_v27  ;;  %v2560_v37 = vpop.f32.mrb[29].mxu0 }
 0x4ce   : > { %v2681_v12 = vadd.f32 0.5, %v2665_v39  ;;  %v6287_v47 = vadd.f32 %v2560_v37, %v7735_v27 }
 0x4cf   : > { %v6289_v7 = vfloor.f32 %v2680_v5  ;;  %v2668_v53 = vmul.f32 0.31830987, %v2559_v34 }
 0x4d0   : > { %v6294_v33 = vfloor.f32 %v2681_v12  ;;  %v2669_v58 = vmul.f32 0.31830987, %v6287_v47  ;;  %v2564_v10 = vpop.f32.mrb[30].mxu0  ;;  %v2419_v44 = vpop.f32.mrb[24].mxu1 }
 0x4d1   : > { %v2712_v42 = vmul.f32 3.1414795, %v6289_v7  ;;  %v6299_v16 = vadd.f32 %v2564_v10, %v7737_v4  ;;  %v2420_v57 = vadd.f32 %v2419_v44, %v6279_v20  ;;  %v2421_v29 = vpop.f32.mrb[25].mxu1  ;;  %v2744_v50 = vmul.f32 0.00011315942, %v6289_v7  ;;  %v2566_v59 = vpop.f32.mrb[31].mxu0 }
 0x4d2   : > { %v2713_v62 = vmul.f32 3.1414795, %v6294_v33  ;;  %v2422_v13 = vadd.f32 %v2421_v29, %v6279_v20  ;;  %v2684_v61 = vadd.f32 0.5, %v2668_v53  ;;  %v2685_v22 = vadd.f32 0.5, %v2669_v58 }
 0x4d3   : > { %v2728_v52 = vsub.f32 %v2553_v35, %v2712_v42  ;;  %v2745_v63 = vmul.f32 0.00011315942, %v6294_v33  ;;  %v2672_v9 = vmul.f32 0.31830987, %v6299_v16  ;;  %v2776_v41 = vmul.f32 1.9841873e-09, %v6289_v7 }
 0x4d4   : > { %v2729_v21 = vsub.f32 %v2555_v26, %v2713_v62  ;;  %v6310_v2 = vpop.f32.mrb[32].mxu0  ;;  %v2429_v3 = vcombine.low %v2420_v57, %v2422_v13  ;;  %v2641_v30 = vpop.f32.mrb[26].mxu1  ;;  %v6313_v45 = vfloor.f32 %v2684_v61  ;;  %v2777_v15 = vmul.f32 1.9841873e-09, %v6294_v33 }
 0x4d5   : > { %v2760_v1 = vsub.f32 %v2728_v52, %v2744_v50  ;;  %v6315_v43 = vpop.f32.mrb[33].mxu0  ;;  %v2642_v14 = vadd.f32 %v2641_v30, %v7734_v46  ;;  %v2643_v60 = vpop.f32.mrb[27].mxu1  ;;  %v6319_v18 = vfloor.f32 %v2685_v22  ;;  %v2688_v36 = vadd.f32 0.5, %v2672_v9 }
 0x4d6   : > { %v2761_v23 = vsub.f32 %v2729_v21, %v2745_v63  ;;  %v6322_v54 = vrot.slane %v2429_v3, %v6292_v31  ;;  %v2644_v49 = vadd.f32 %v2643_v60, %v7734_v46  ;;  %v2716_v24 = vmul.f32 3.1414795, %v6313_v45 }
 0x4d7   : > { %v6324_v56 = vsub.f32 %v2760_v1, %v2776_v41  ;;  %v2666_v40 = vmul.f32 0.31830987, %v2642_v14  ;;  %v2748_v19 = vmul.f32 0.00011315942, %v6313_v45  ;;  %v2780_v46 = vmul.f32 1.9841873e-09, %v6313_v45 }
 0x4d8   : > { %v6328_v8 = vsub.f32 %v2761_v23, %v2777_v15  ;;  %v2444_v32 = vcombine.low %v6306_v38, %v6322_v54  ;;  %v2667_v0 = vmul.f32 0.31830987, %v2644_v49  ;;  %v2732_v55 = vsub.f32 %v2559_v34, %v2716_v24  ;;  %v2647_v48 = vpop.f32.mrb[28].mxu1 }
 0x4d9   : > { %v6335_v25 = vmul.f32 %v6324_v56, %v6324_v56  ;;  %v2682_v35 = vadd.f32 0.5, %v2666_v40  ;;  %v2717_v51 = vmul.f32 3.1414795, %v6319_v18  ;;  %v2649_v26 = vpop.f32.mrb[29].mxu1  ;;  %v6340_v28 = vadd.f32 %v2566_v59, %v7737_v4 }
 0x4da   : > { %v6345_v39 = vmul.f32 %v6328_v8, %v6328_v8  ;;  %v2683_v11 = vadd.f32 0.5, %v2667_v0  ;;  %v2764_v5 = vsub.f32 %v2732_v55, %v2748_v19  ;;  %v2749_v12 = vmul.f32 0.00011315942, %v6319_v18 }
 0x4db   : > { %v2824_v17 = vmul.f32 2.608316e-06, %v6335_v25  ;;  %v6347_v37 = vfloor.f32 %v2682_v35  ;;  %v2733_v34 = vsub.f32 %v6287_v47, %v2717_v51  ;;  %v2781_v53 = vmul.f32 1.9841873e-09, %v6319_v18 }
 0x4dc   : > { %v6352_v10 = vfloor.f32 %v2683_v11  ;;  %v6354_v44 = vsub.f32 %v2764_v5, %v2780_v46  ;;  %v2648_v42 = vadd.f32 %v2647_v48, %v7735_v27  ;;  %v6357_v57 = vpop.f32.mrb[30].mxu1  ;;  %v2650_v41 = vadd.f32 %v2649_v26, %v7735_v27 }
 0x4dd   : > { %v2840_v58 = vadd.f32 -0.0001981069, %v2824_v17  ;;  %v2714_v29 = vmul.f32 3.1414795, %v6347_v37  ;;  %v2746_v50 = vmul.f32 0.00011315942, %v6347_v37  ;;  %v2765_v47 = vsub.f32 %v2733_v34, %v2749_v12  ;;  %v2655_v13 = vpop.f32.mrb[31].mxu1 }
 0x4de   : > { %v2778_v62 = vmul.f32 1.9841873e-09, %v6347_v37  ;;  %v2715_v61 = vmul.f32 3.1414795, %v6352_v10  ;;  %v2747_v22 = vmul.f32 0.00011315942, %v6352_v10  ;;  %v2812_v21 = vmul.f32 %v6354_v44, %v6354_v44 }
 0x4df   : > { %v2856_v52 = vmul.f32 %v2840_v58, %v6335_v25  ;;  %v2779_v59 = vmul.f32 1.9841873e-09, %v6352_v10  ;;  %v2730_v38 = vsub.f32 %v2642_v14, %v2714_v29  ;;  %v6368_v63 = vsub.f32 %v2765_v47, %v2781_v53 }
 0x4e0   : > { %v2670_v9 = vmul.f32 0.31830987, %v2648_v42  ;;  %v2731_v1 = vsub.f32 %v2644_v49, %v2715_v61  ;;  %v6371_v30 = vfloor.f32 %v2688_v36  ;;  %v6373_v23 = vpop.f32.mrb[32].mxu1  ;;  %v2828_v60 = vmul.f32 2.608316e-06, %v2812_v21 }
 0x4e1   : > { %v2872_v3 = vadd.f32 0.008333079, %v2856_v52  ;;  %v2762_v15 = vsub.f32 %v2730_v38, %v2746_v50  ;;  %v6377_v54 = vmul.f32 %v6368_v63, %v6368_v63  ;;  %v6379_v24 = vpop.f32.mrb[33].mxu1  ;;  %v2671_v0 = vmul.f32 0.31830987, %v2650_v41 }
 0x4e2   : > { %v2686_v14 = vadd.f32 0.5, %v2670_v9  ;;  %v2763_v19 = vsub.f32 %v2731_v1, %v2747_v22  ;;  %v2720_v49 = vmul.f32 3.1414795, %v6371_v30  ;;  %v2844_v36 = vadd.f32 -0.0001981069, %v2828_v60 }
 0x4e3   : > { %v2888_v40 = vmul.f32 %v2872_v3, %v6335_v25  ;;  %v6383_v27 = vsub.f32 %v2762_v15, %v2778_v62  ;;  %v6388_v48 = vmul.f32 0.5, %v6294_v33  ;;  %v2687_v51 = vadd.f32 0.5, %v2671_v0 }
 0x4e4   : > { %v6385_v55 = vfloor.f32 %v2686_v14  ;;  %v6390_v46 = vsub.f32 %v2763_v19, %v2779_v59  ;;  %v2673_v26 = vmul.f32 0.31830987, %v6340_v28  ;;  %v6394_v17 = vrot.slane %v2444_v32, %v6292_v31 }
 0x4e5   : > { %v2904_v35 = vadd.f32 -0.1666666, %v2888_v40  ;;  %v2810_v11 = vmul.f32 %v6383_v27, %v6383_v27  ;;  %v2860_v5 = vmul.f32 %v2844_v36, %v2812_v21  ;;  %v6400_v12 = vmul.f32 2.608316e-06, %v6345_v39 }
 0x4e6   : > { %7738 = vst [vmem:[#allocation26_spill] sm:$0xff] %v6394_v17  ;;  %v2718_v34 = vmul.f32 3.1414795, %v6385_v55  ;;  %v6403_v53 = vmul.f32 2.608316e-06, %v6377_v54  ;;  %v6405_v58 = vfloor.f32 %v2687_v51  ;;  %v2736_v29 = vsub.f32 %v6299_v16, %v2720_v49 }
 0x4e7   : > { %v2826_v50 = vmul.f32 2.608316e-06, %v2810_v11  ;;  %v2876_v62 = vadd.f32 0.008333079, %v2860_v5  ;;  %v2750_v47 = vmul.f32 0.00011315942, %v6385_v55  ;;  %v2920_v52 = vmul.f32 %v2904_v35, %v6335_v25 }
 0x4e8   : > { %v2734_v32 = vsub.f32 %v2648_v42, %v2718_v34  ;;  %v6412_v61 = vmul.f32 %v6390_v46, %v6390_v46  ;;  %v2719_v22 = vmul.f32 3.1414795, %v6405_v58  ;;  %v2752_v59 = vmul.f32 0.00011315942, %v6371_v30 }
 0x4e9   : > { %v2842_v38 = vadd.f32 -0.0001981069, %v2826_v50  ;;  %v2892_v9 = vmul.f32 %v2876_v62, %v2812_v21  ;;  %v2782_v16 = vmul.f32 1.9841873e-09, %v6385_v55  ;;  %v2751_v42 = vmul.f32 0.00011315942, %v6405_v58 }
 0x4ea   : > { %v2766_v3 = vsub.f32 %v2734_v32, %v2750_v47  ;;  %v2735_v1 = vsub.f32 %v2650_v41, %v2719_v22  ;;  %v2768_v15 = vsub.f32 %v2736_v29, %v2752_v59  ;;  %v2784_v60 = vmul.f32 1.9841873e-09, %v6371_v30 }
 0x4eb   : > { %v2858_v25 = vmul.f32 %v2842_v38, %v2810_v11  ;;  %v2908_v14 = vadd.f32 -0.1666666, %v2892_v9  ;;  %v2689_v19 = vadd.f32 0.5, %v2673_v26  ;;  %v2654_v36 = vadd.f32 %v6357_v57, %v7737_v4 }
 0x4ec   : > { %v6419_v40 = vsub.f32 %v2766_v3, %v2782_v16  ;;  %v2767_v0 = vsub.f32 %v2735_v1, %v2751_v42  ;;  %v6421_v49 = vsub.f32 %v2768_v15, %v2784_v60  ;;  %v6426_v35 = vadd.f32 %v2655_v13, %v7737_v4 }
 0x4ed   : > { %v2874_v41 = vadd.f32 0.008333079, %v2858_v25  ;;  %v2924_v51 = vmul.f32 %v2908_v14, %v2812_v21  ;;  %v6430_v34 = vfloor.f32 %v2689_v19  ;;  %v2783_v29 = vmul.f32 1.9841873e-09, %v6405_v58  ;;  %v7739_v19 = vld [vmem:[#allocation11_spill] sm:$0xff] }
 0x4ee   : > { %v2814_v5 = vmul.f32 %v6419_v40, %v6419_v40  ;;  %v2816_v26 = vmul.f32 %v6421_v49, %v6421_v49  ;;  %v2674_v50 = vmul.f32 0.31830987, %v2654_v36  ;;  %v2675_v62 = vmul.f32 0.31830987, %v6426_v35 }
 0x4ef   : > { %v2936_v57 = vmul.f32 %v2920_v52, %v6324_v56  ;;  %v2890_v32 = vmul.f32 %v2874_v41, %v2810_v11  ;;  %v2721_v13 = vmul.f32 3.1414795, %v6430_v34  ;;  %v6439_v21 = vmul.f32 2.608316e-06, %v6412_v61 }
 0x4f0   : > { %v2830_v4 = vmul.f32 2.608316e-06, %v2814_v5  ;;  %v2940_v47 = vmul.f32 %v2924_v51, %v6354_v44  ;;  %v6442_v22 = vsub.f32 %v2767_v0, %v2783_v29  ;;  %v2832_v59 = vmul.f32 2.608316e-06, %v2816_v26 }
 0x4f1   : > { %v2906_v38 = vadd.f32 -0.1666666, %v2890_v32  ;;  %v2737_v3 = vsub.f32 %v6340_v28, %v2721_v13  ;;  %v2753_v16 = vmul.f32 0.00011315942, %v6430_v34  ;;  %v2785_v52 = vmul.f32 1.9841873e-09, %v6430_v34 }
 0x4f2   : > { %v2846_v9 = vadd.f32 -0.0001981069, %v2830_v4  ;;  %v2848_v1 = vadd.f32 -0.0001981069, %v2832_v59  ;;  %v2690_v42 = vadd.f32 0.5, %v2674_v50  ;;  %v2691_v15 = vadd.f32 0.5, %v2675_v62 }
 0x4f3   : > { %v2922_v60 = vmul.f32 %v2906_v38, %v2810_v11  ;;  %v2769_v14 = vsub.f32 %v2737_v3, %v2753_v16  ;;  %v2571_v41 = vadd.f32 %v6310_v2, %v7739_v19  ;;  %v6450_v0 = vadd.f32 %v2936_v57, %v6324_v56 }
 0x4f4   : > { %v2862_v25 = vmul.f32 %v2846_v9, %v2814_v5  ;;  %v2864_v51 = vmul.f32 %v2848_v1, %v2816_v26  ;;  %v6452_v29 = vfloor.f32 %v2690_v42  ;;  %v6454_v28 = vfloor.f32 %v2691_v15 }
 0x4f5   : > { %v6458_v4 = vmul.f32 %v6442_v22, %v6442_v22  ;;  %v6460_v50 = vsub.f32 %v2769_v14, %v2785_v52  ;;  %v2676_v11 = vmul.f32 0.31830987, %v2571_v41  ;;  %v6463_v62 = vadd.f32 %v2940_v47, %v6354_v44 }
 0x4f6   : > { %v2878_v32 = vadd.f32 0.008333079, %v2862_v25  ;;  %v2880_v2 = vadd.f32 0.008333079, %v2864_v51  ;;  %v2722_v56 = vmul.f32 3.1414795, %v6452_v29  ;;  %v2573_v57 = vadd.f32 %v6315_v43, %v7739_v19 }
 0x4f7   : > { %v2938_v13 = vmul.f32 %v2922_v60, %v6383_v27  ;;  %v2754_v38 = vmul.f32 0.00011315942, %v6452_v29  ;;  %v2755_v9 = vmul.f32 0.00011315942, %v6454_v28  ;;  %v6473_v16 = vmul.f32 %v6460_v50, %v6460_v50 }
 0x4f8   : > { %v2894_v59 = vmul.f32 %v2878_v32, %v2814_v5  ;;  %v2896_v3 = vmul.f32 %v2880_v2, %v2816_v26  ;;  %v2738_v44 = vsub.f32 %v2654_v36, %v2722_v56  ;;  %v2723_v47 = vmul.f32 3.1414795, %v6454_v28 }
 0x4f9   : > { %v2786_v52 = vmul.f32 1.9841873e-09, %v6452_v29  ;;  %v2692_v42 = vadd.f32 0.5, %v2676_v11  ;;  %v2660_v43 = vadd.f32 %v6373_v23, %v7739_v19  ;;  %v2677_v14 = vmul.f32 0.31830987, %v2573_v57 }
 0x4fa   : > { %v2910_v1 = vadd.f32 -0.1666666, %v2894_v59  ;;  %v2912_v15 = vadd.f32 -0.1666666, %v2896_v3  ;;  %v2770_v60 = vsub.f32 %v2738_v44, %v2754_v38  ;;  %v2739_v25 = vsub.f32 %v6426_v35, %v2723_v47 }
 0x4fb   : > { %v2787_v51 = vmul.f32 1.9841873e-09, %v6454_v28  ;;  %v6481_v32 = vfloor.f32 %v2692_v42  ;;  %v2678_v2 = vmul.f32 0.31830987, %v2660_v43  ;;  %v2662_v36 = vadd.f32 %v6379_v24, %v7739_v19 }
 0x4fc   : > { %v2926_v56 = vmul.f32 %v2910_v1, %v2814_v5  ;;  %v6485_v59 = vsub.f32 %v2770_v60, %v2786_v52  ;;  %v2771_v11 = vsub.f32 %v2739_v25, %v2755_v9  ;;  %v2693_v31 = vadd.f32 0.5, %v2677_v14 }
 0x4fd   : > { %v6488_v23 = vadd.f32 %v2938_v13, %v6383_v27  ;;  %v6491_v38 = vmul.f32 2.608316e-06, %v6458_v4  ;;  %v2928_v35 = vmul.f32 %v2912_v15, %v2816_v26  ;;  %v2724_v3 = vmul.f32 3.1414795, %v6481_v32 }
 0x4fe   : > { %v6495_v44 = vmul.f32 2.608316e-06, %v6473_v16  ;;  %v6499_v24 = vmul.f32 %v6485_v59, %v6485_v59  ;;  %v6501_v5 = vsub.f32 %v2771_v11, %v2787_v51  ;;  %v6503_v19 = vfloor.f32 %v2693_v31 }
 0x4ff   : > { %v2740_v9 = vsub.f32 %v2571_v41, %v2724_v3  ;;  %v2756_v27 = vmul.f32 0.00011315942, %v6481_v32  ;;  %v2694_v13 = vadd.f32 0.5, %v2678_v2  ;;  %v2679_v47 = vmul.f32 0.31830987, %v2662_v36 }
 0x500   : > { %7740 = vst [vmem:[#allocation24_spill] sm:$0xff] %v6501_v5  ;;  %v2942_v26 = vmul.f32 %v2926_v56, %v6419_v40  ;;  %v2834_v1 = vmul.f32 2.608316e-06, %v6499_v24  ;;  %v6510_v52 = vmul.f32 %v6501_v5, %v6501_v5  ;;  %v2725_v42 = vmul.f32 3.1414795, %v6503_v19 }
 0x501   : > { %v2944_v15 = vmul.f32 %v2928_v35, %v6421_v49  ;;  %v2772_v60 = vsub.f32 %v2740_v9, %v2756_v27  ;;  %v2788_v31 = vmul.f32 1.9841873e-09, %v6481_v32  ;;  %v6515_v41 = vfloor.f32 %v2694_v13 }
 0x502   : > { %v2850_v25 = vadd.f32 -0.0001981069, %v2834_v1  ;;  %v2741_v14 = vsub.f32 %v2573_v57, %v2725_v42  ;;  %v2757_v51 = vmul.f32 0.00011315942, %v6503_v19  ;;  %v2695_v2 = vadd.f32 0.5, %v2679_v47 }
 0x503   : > { %7741 = vst [vmem:[#allocation25_spill] sm:$0xff] %v6515_v41  ;;  %v6519_v56 = vmul.f32 2.608316e-06, %v6510_v52  ;;  %v6521_v11 = vsub.f32 %v2772_v60, %v2788_v31  ;;  %v2789_v3 = vmul.f32 1.9841873e-09, %v6503_v19  ;;  %v2758_v1 = vmul.f32 0.00011315942, %v6515_v41 }
 0x504   : > { %v2726_v20 = vmul.f32 3.1414795, %v6515_v41  ;;  %v2866_v35 = vmul.f32 %v2850_v25, %v6499_v24  ;;  %v2773_v9 = vsub.f32 %v2741_v14, %v2757_v51  ;;  %v6526_v27 = vfloor.f32 %v2695_v2 }
 0x505   : > { %v2841_v13 = vadd.f32 -0.0001981069, %v6400_v12  ;;  %v2820_v57 = vmul.f32 %v6521_v11, %v6521_v11  ;;  %v2845_v42 = vadd.f32 -0.0001981069, %v6403_v53  ;;  %v2790_v6 = vmul.f32 1.9841873e-09, %v6515_v41 }
 0x506   : > { %v2742_v47 = vsub.f32 %v2660_v43, %v2726_v20  ;;  %v2882_v60 = vadd.f32 0.008333079, %v2866_v35  ;;  %v6533_v31 = vsub.f32 %v2773_v9, %v2789_v3  ;;  %v2727_v25 = vmul.f32 3.1414795, %v6526_v27 }
 0x507   : > { %v2836_v14 = vmul.f32 2.608316e-06, %v2820_v57  ;;  %v2857_v2 = vmul.f32 %v2841_v13, %v6345_v39  ;;  %v2973_v12 = vmul.f32 0.5, %v6319_v18  ;;  %v2759_v43 = vmul.f32 0.00011315942, %v6526_v27 }
 0x508   : > { %v2774_v51 = vsub.f32 %v2742_v47, %v2758_v1  ;;  %v2898_v17 = vmul.f32 %v2882_v60, %v6499_v24  ;;  %v2743_v20 = vsub.f32 %v2662_v36, %v2727_v25  ;;  %v2861_v53 = vmul.f32 %v2845_v42, %v6377_v54 }
 0x509   : > { %v2852_v35 = vadd.f32 -0.0001981069, %v2836_v14  ;;  %v2873_v9 = vadd.f32 0.008333079, %v2857_v2  ;;  %v2985_v5 = vfloor.f32 %v6388_v48  ;;  %v6547_v47 = vmul.f32 %v6533_v31, %v6533_v31 }
 0x50a   : > { %v6542_v3 = vsub.f32 %v2774_v51, %v2790_v6  ;;  %v2775_v13 = vsub.f32 %v2743_v20, %v2759_v43  ;;  %v2791_v1 = vmul.f32 1.9841873e-09, %v6526_v27  ;;  %v2877_v41 = vadd.f32 0.008333079, %v2861_v53 }
 0x50b   : > { %v2868_v60 = vmul.f32 %v2852_v35, %v2820_v57  ;;  %v2889_v42 = vmul.f32 %v2873_v9, %v6345_v39  ;;  %v2989_v6 = vfloor.f32 %v2973_v12  ;;  %v2914_v25 = vadd.f32 -0.1666666, %v2898_v17 }
 0x50c   : > { %7742 = vst [vmem:[#allocation15_spill] sm:$0xff] %v6542_v3  ;;  %v6552_v36 = vmul.f32 %v6542_v3, %v6542_v3  ;;  %v6555_v14 = vsub.f32 %v2775_v13, %v2791_v1  ;;  %v2893_v48 = vmul.f32 %v2877_v41, %v6377_v54  ;;  %v3001_v51 = vmul.f32 2.0, %v2985_v5 }
 0x50d   : > { %v6559_v2 = vadd.f32 %v2942_v26, %v6419_v40  ;;  %v2884_v20 = vadd.f32 0.008333079, %v2868_v60  ;;  %v2905_v53 = vadd.f32 -0.1666666, %v2889_v42  ;;  %v6563_v35 = vadd.f32 %v2944_v15, %v6421_v49 }
 0x50e   : > { %v2838_v43 = vmul.f32 2.608316e-06, %v6552_v36  ;;  %v6566_v3 = vmul.f32 2.608316e-06, %v6547_v47  ;;  %v2909_v12 = vadd.f32 -0.1666666, %v2893_v48  ;;  %v3017_v5 = vsub.f32 %v6294_v33, %v3001_v51 }
 0x50f   : > { %v3005_v17 = vmul.f32 2.0, %v2989_v6  ;;  %v2900_v9 = vmul.f32 %v2884_v20, %v2820_v57  ;;  %v2921_v41 = vmul.f32 %v2905_v53, %v6345_v39  ;;  %v2930_v40 = vmul.f32 %v2914_v25, %v6499_v24 }
 0x510   : > { %v2854_v13 = vadd.f32 -0.0001981069, %v2838_v43  ;;  %v6573_v26 = vmul.f32 %v6555_v14, %v6555_v14  ;;  %v2925_v49 = vmul.f32 %v2909_v12, %v6377_v54  ;;  %v3033_v6 = vmul.f32 2.0, %v3017_v5 }
 0x511   : > { %v3021_v15 = vsub.f32 %v6319_v18, %v3005_v17  ;;  %v2916_v1 = vadd.f32 -0.1666666, %v2900_v9  ;;  %v2937_v42 = vmul.f32 %v2921_v41, %v6328_v8  ;;  %v2968_v33 = vmul.f32 0.5, %v6289_v7 }
 0x512   : > { %v2870_v60 = vmul.f32 %v2854_v13, %v6552_v36  ;;  %v2941_v39 = vmul.f32 %v2925_v49, %v6368_v63  ;;  %v2972_v24 = vmul.f32 0.5, %v6313_v45  ;;  %v3049_v54 = vsub.f32 1.0, %v3033_v6 }
 0x513   : > { %v3037_v48 = vmul.f32 2.0, %v3021_v15  ;;  %v2932_v25 = vmul.f32 %v2916_v1, %v2820_v57  ;;  %v2953_v20 = vadd.f32 %v2937_v42, %v6328_v8  ;;  %v2984_v53 = vfloor.f32 %v2968_v33 }
 0x514   : > { %v2886_v51 = vadd.f32 0.008333079, %v2870_v60  ;;  %v2957_v18 = vadd.f32 %v2941_v39, %v6368_v63  ;;  %v2988_v12 = vfloor.f32 %v2972_v24  ;;  %v6585_v17 = vmul.f32 %v2930_v40, %v6485_v59 }
 0x515   : > { %v3053_v43 = vsub.f32 1.0, %v3037_v48  ;;  %v3065_v13 = vmul.f32 %v3049_v54, %v2953_v20  ;;  %v2843_v41 = vadd.f32 -0.0001981069, %v6439_v21  ;;  %v3000_v49 = vmul.f32 2.0, %v2984_v53 }
 0x516   : > { %v2902_v9 = vmul.f32 %v2886_v51, %v6552_v36  ;;  %v3004_v57 = vmul.f32 2.0, %v2988_v12  ;;  %v2847_v15 = vadd.f32 -0.0001981069, %v6491_v38  ;;  %v2948_v8 = vmul.f32 %v2932_v25, %v6521_v11 }
 0x517   : > { %v3069_v5 = vmul.f32 %v3053_v43, %v2957_v18  ;;  %v6592_v63 = vmul.f32 2.608316e-06, %v6573_v26  ;;  %v2859_v1 = vmul.f32 %v2843_v41, %v6412_v61  ;;  %v2971_v40 = vmul.f32 0.5, %v6352_v10 }
 0x518   : > { %v3016_v42 = vsub.f32 %v6289_v7, %v3000_v49  ;;  %v3020_v6 = vsub.f32 %v6313_v45, %v3004_v57  ;;  %v2863_v21 = vmul.f32 %v2847_v15, %v6458_v4  ;;  %v2918_v39 = vadd.f32 -0.1666666, %v2902_v9 }
 0x519   : > { %v4638_v60 = vpack.c.bf16 %v3069_v5, %v3065_v13  ;;  %v2875_v48 = vadd.f32 0.008333079, %v2859_v1  ;;  %v2975_v38 = vmul.f32 0.5, %v6405_v58  ;;  %v2987_v33 = vfloor.f32 %v2971_v40 }
 0x51a   : > { %v3032_v24 = vmul.f32 2.0, %v3016_v42  ;;  %v3036_v25 = vmul.f32 2.0, %v3020_v6  ;;  %v2879_v51 = vadd.f32 0.008333079, %v2863_v21  ;;  %v2970_v20 = vmul.f32 0.5, %v6347_v37 }
 0x51b   : > { %4639 = vmatprep.subr.bf16.mxu0 %v4638_v60  ;;  %v6602_v54 = vadd.f32 %v2948_v8, %v6521_v11  ;;  %v2891_v7 = vmul.f32 %v2875_v48, %v6412_v61  ;;  %v2991_v18 = vfloor.f32 %v2975_v38  ;;  %v3003_v45 = vmul.f32 2.0, %v2987_v33 }
 0x51c   : > { %v3048_v43 = vsub.f32 1.0, %v3032_v24  ;;  %v3052_v53 = vsub.f32 1.0, %v3036_v25  ;;  %v2895_v12 = vmul.f32 %v2879_v51, %v6458_v4  ;;  %v2974_v9 = vmul.f32 0.5, %v6385_v55 }
 0x51d   : > { %v6608_v13 = vmul.f32 %v2918_v39, %v6552_v36  ;;  %v2907_v41 = vadd.f32 -0.1666666, %v2891_v7  ;;  %v3007_v5 = vmul.f32 2.0, %v2991_v18  ;;  %v3019_v49 = vsub.f32 %v6352_v10, %v3003_v45 }
 0x51e   : > { %v3064_v11 = vmul.f32 %v3048_v43, %v6450_v0  ;;  %v3068_v57 = vmul.f32 %v3052_v53, %v6463_v62  ;;  %v2911_v15 = vadd.f32 -0.1666666, %v2895_v12  ;;  %v2986_v8 = vfloor.f32 %v2970_v20 }
 0x51f   : > { %v2923_v1 = vmul.f32 %v2907_v41, %v6412_v61  ;;  %v3023_v40 = vsub.f32 %v6405_v58, %v3007_v5  ;;  %v3035_v60 = vmul.f32 2.0, %v3019_v49  ;;  %v2990_v42 = vfloor.f32 %v2974_v9 }
 0x520   : > { %v4640_v6 = vpack.c.bf16 %v3068_v57, %v3064_v11  ;;  %v2927_v36 = vmul.f32 %v2911_v15, %v6458_v4  ;;  %v3002_v21 = vmul.f32 2.0, %v2986_v8  ;;  %v2849_v39 = vadd.f32 -0.0001981069, %v6495_v44 }
 0x521   : > { %v2939_v10 = vmul.f32 %v2923_v1, %v6390_v46  ;;  %v3039_v48 = vmul.f32 2.0, %v3023_v40  ;;  %v3051_v0 = vsub.f32 1.0, %v3035_v60  ;;  %v3006_v38 = vmul.f32 2.0, %v2990_v42 }
 0x522   : > { %4641 = vmatpush1.bf16.msra.mxu0 %v4640_v6  ;;  %v2943_v62 = vmul.f32 %v2927_v36, %v6442_v22  ;;  %v3018_v61 = vsub.f32 %v6347_v37, %v3002_v21  ;;  %v2853_v58 = vadd.f32 -0.0001981069, %v6566_v3  ;;  %v2865_v33 = vmul.f32 %v2849_v39, %v6473_v16 }
 0x523   : > { %v2955_v24 = vadd.f32 %v2939_v10, %v6390_v46  ;;  %v3055_v4 = vsub.f32 1.0, %v3039_v48  ;;  %v3022_v25 = vsub.f32 %v6385_v55, %v3006_v38  ;;  %v2977_v44 = vmul.f32 0.5, %v6430_v34 }
 0x524   : > { %v2959_v51 = vadd.f32 %v2943_v62, %v6442_v22  ;;  %v3034_v20 = vmul.f32 2.0, %v3018_v61  ;;  %v2869_v7 = vmul.f32 %v2853_v58, %v6547_v47  ;;  %v2881_v18 = vadd.f32 0.008333079, %v2865_v33 }
 0x525   : > { %v3067_v45 = vmul.f32 %v3051_v0, %v2955_v24  ;;  %v3038_v43 = vmul.f32 2.0, %v3022_v25  ;;  %v2981_v37 = vmul.f32 0.5, %v6503_v19  ;;  %v2993_v3 = vfloor.f32 %v2977_v44 }
 0x526   : > { %v3071_v53 = vmul.f32 %v3055_v4, %v2959_v51  ;;  %v3050_v12 = vsub.f32 1.0, %v3034_v20  ;;  %v2885_v9 = vadd.f32 0.008333079, %v2869_v7  ;;  %v2897_v46 = vmul.f32 %v2881_v18, %v6473_v16 }
 0x527   : > { %v3054_v41 = vsub.f32 1.0, %v3038_v43  ;;  %v2997_v55 = vfloor.f32 %v2981_v37  ;;  %v3009_v5 = vmul.f32 2.0, %v2993_v3  ;;  %v2976_v49 = vmul.f32 0.5, %v6371_v30 }
 0x528   : > { %v4646_v22 = vpack.c.bf16 %v3071_v53, %v3067_v45  ;;  %v3066_v11 = vmul.f32 %v3050_v12, %v6488_v23  ;;  %v2901_v57 = vmul.f32 %v2885_v9, %v6547_v47  ;;  %v2913_v15 = vadd.f32 -0.1666666, %v2897_v46 }
 0x529   : > { %v3070_v8 = vmul.f32 %v3054_v41, %v6559_v2  ;;  %v3013_v1 = vmul.f32 2.0, %v2997_v55  ;;  %v3025_v40 = vsub.f32 %v6430_v34, %v3009_v5  ;;  %v2980_v60 = vmul.f32 0.5, %v6481_v32  ;;  %v7743_v5 = vld [vmem:[#allocation25_spill] sm:$0xff] }
 0x52a   : > { %4647 = vmatprep.subr.bf16.mxu1 %v4646_v22  ;;  %v2917_v42 = vadd.f32 -0.1666666, %v2901_v57  ;;  %v2929_v6 = vmul.f32 %v2913_v15, %v6473_v16  ;;  %v2992_v36 = vfloor.f32 %v2976_v49  ;;  %v2851_v21 = vadd.f32 -0.0001981069, %v6519_v56 }
 0x52b   : > { %v4648_v39 = vpack.c.bf16 %v3070_v8, %v3066_v11  ;;  %v3029_v23 = vsub.f32 %v6503_v19, %v3013_v1  ;;  %v3041_v10 = vmul.f32 2.0, %v3025_v40  ;;  %v2996_v48 = vfloor.f32 %v2980_v60 }
 0x52c   : > { %v2933_v2 = vmul.f32 %v2917_v42, %v6547_v47  ;;  %v2945_v0 = vmul.f32 %v2929_v6, %v6460_v50  ;;  %v3008_v34 = vmul.f32 2.0, %v2992_v36  ;;  %v2855_v38 = vadd.f32 -0.0001981069, %v6592_v63  ;;  %v7748_v6 = vld [vmem:[#allocation24_spill] sm:$0xff] }
 0x52d   : > { %4649 = vmatpush1.bf16.msra.mxu1 %v4648_v39  ;;  %v3045_v62 = vmul.f32 2.0, %v3029_v23  ;;  %v3057_v61 = vsub.f32 1.0, %v3041_v10  ;;  %v3012_v16 = vmul.f32 2.0, %v2996_v48  ;;  %v2867_v58 = vmul.f32 %v2851_v21, %v6510_v52 }
 0x52e   : > { %v2949_v56 = vmul.f32 %v2933_v2, %v6533_v31  ;;  %v2961_v19 = vadd.f32 %v2945_v0, %v6460_v50  ;;  %v3024_v33 = vsub.f32 %v6371_v30, %v3008_v34  ;;  %v2871_v47 = vmul.f32 %v2855_v38, %v6573_v26 }
 0x52f   : > { %v3061_v24 = vsub.f32 1.0, %v3045_v62  ;;  %v3028_v4 = vsub.f32 %v6481_v32, %v3012_v16  ;;  %v2883_v63 = vadd.f32 0.008333079, %v2867_v58  ;;  %v2979_v25 = vmul.f32 0.5, %v6454_v28 }
 0x530   : > { %v2965_v44 = vadd.f32 %v2949_v56, %v6533_v31  ;;  %v3073_v51 = vmul.f32 %v3057_v61, %v2961_v19  ;;  %v3040_v20 = vmul.f32 2.0, %v3024_v33  ;;  %v2887_v7 = vadd.f32 0.008333079, %v2871_v47  ;;  %v4737_v56 = vld [vmem:[%s7566_s3] sm:$0xff] }
 0x531   : > { %v3044_v18 = vmul.f32 2.0, %v3028_v4  ;;  %v2899_v50 = vmul.f32 %v2883_v63, %v6510_v52  ;;  %v2983_v45 = vmul.f32 0.5, %v6526_v27  ;;  %v2995_v30 = vfloor.f32 %v2979_v25  ;;  %v4739_v25 = vld [vmem:[%s7566_s3 + $0x10] sm:$0xff] }
 0x532   : > { %v3077_v43 = vmul.f32 %v3061_v24, %v2965_v44  ;;  %v3056_v37 = vsub.f32 1.0, %v3040_v20  ;;  %v2903_v32 = vmul.f32 %v2887_v7, %v6573_v26  ;;  %v2978_v3 = vmul.f32 0.5, %v6452_v29  ;;  %v4740_v44 = vld [vmem:[%s7566_s3 + $0x18] sm:$0xff]  ;;  %v7752_v20 = vld [vmem:[#allocation16_spill] sm:$0xff] }
 0x533   : > { %v3060_v53 = vsub.f32 1.0, %v3044_v18  ;;  %v2915_v12 = vadd.f32 -0.1666666, %v2899_v50  ;;  %v2999_v31 = vfloor.f32 %v2983_v45  ;;  %v3011_v9 = vmul.f32 2.0, %v2995_v30 }
 0x534   : > { %v4642_v46 = vpack.c.bf16 %v3077_v43, %v3073_v51  ;;  %v3072_v41 = vmul.f32 %v3056_v37, %v6563_v35  ;;  %v2919_v55 = vadd.f32 -0.1666666, %v2903_v32  ;;  %v2982_v49 = vmul.f32 0.5, %v7743_v5  ;;  %v7753_v32 = vld [vmem:[#allocation14_spill] sm:$0xff] }
 0x535   : > { %v3076_v22 = vmul.f32 %v3060_v53, %v6602_v54  ;;  %v2931_v11 = vmul.f32 %v2915_v12, %v6510_v52  ;;  %v3015_v57 = vmul.f32 2.0, %v2999_v31  ;;  %v3027_v15 = vsub.f32 %v6454_v28, %v3011_v9  ;;  %v7749_v52 = vld [vmem:[#allocation26_spill] sm:$0xff]  ;;  %v7750_v28 = vld [vmem:[#allocation15_spill] sm:$0xff] }
 0x536   : > { %4643 = vmatprep.subr.bf16.mxu0 %v4642_v46  ;;  %v2935_v8 = vmul.f32 %v2919_v55, %v6573_v26  ;;  %v2994_v1 = vfloor.f32 %v2978_v3  ;;  %v2998_v40 = vfloor.f32 %v2982_v49  ;;  %v7744_v60 = vlaneseq }
 0x537   : > { %v7745_v42 = vmov 0  ;;  %v4644_v35 = vpack.c.bf16 %v3076_v22, %v3072_v41  ;;  %v2947_v36 = vmul.f32 %v2931_v11, %v7748_v6  ;;  %v3031_v54 = vsub.f32 %v6526_v27, %v3015_v57 }
 0x538   : > { %vm6663_vm3 = vcmp.lt.s32.totalorder %v7744_v60, 512  ;;  %v3043_v21 = vmul.f32 2.0, %v3027_v15  ;;  %v2950_v26 = vmul.f32 %v6608_v13, %v7750_v28  ;;  %v2951_v39 = vmul.f32 %v2935_v8, %v6555_v14 }
 0x539   : > { %v7746_v42 = vsel %vm6663_vm3, 4294967295, %v7745_v42  ;;  %2457 = vst.msk [vmem:[%s6669_s25] sm:$0xf] %vm6663_vm3, %v7749_v52  ;;  %v3010_v23 = vmul.f32 2.0, %v2994_v1  ;;  %v3014_v10 = vmul.f32 2.0, %v2998_v40  ;;  %4645 = vmatpush1.bf16.msra.mxu0 %v4644_v35  ;;  %v2963_v48 = vadd.f32 %v2947_v36, %v7748_v6 }
 0x53a   : > { %7747 = vst [vmem:[#allocation17_spill] sm:$0xff] %v7746_v42  ;;  %v3047_v2 = vmul.f32 2.0, %v3031_v54  ;;  %v2967_v27 = vadd.f32 %v2951_v39, %v6555_v14  ;;  %v3059_v38 = vsub.f32 1.0, %v3043_v21  ;;  %v2962_v61 = vadd.f32 %v6585_v17, %v6485_v59  ;;  %v4738_v59 = vld [vmem:[%s7566_s3 + $0x8] sm:$0xff] }
 0x53b   : > { %v3026_v0 = vsub.f32 %v6452_v29, %v3010_v23  ;;  %v3030_v34 = vsub.f32 %v7743_v5, %v3014_v10  ;;  %v2966_v13 = vadd.f32 %v2950_v26, %v7750_v28  ;;  %v7751_v29 = vmov 0.0  }
 0x53c   : > { %v3063_v62 = vsub.f32 1.0, %v3047_v2  ;;  %4565 = vmatmul.mubr.msk.f32.vlgmr.msra.gmra.mrb[34].mxu0 %vm1037_vm2, %v4737_v56  ;;  %v3075_v14 = vmul.f32 %v3059_v38, %v2963_v48 }
 0x53d   : > { %v3042_v16 = vmul.f32 2.0, %v3026_v0  ;;  %v3046_v58 = vmul.f32 2.0, %v3030_v34  ;;  %3150 = vmatprep.mubr.f32.mxu0 %v7751_v29 }
 0x53e   : > { %v3079_v19 = vmul.f32 %v3063_v62, %v2967_v27 }
 0x53f   : > { %v3058_v33 = vsub.f32 1.0, %v3042_v16  ;;  %v3062_v47 = vsub.f32 1.0, %v3046_v58 }
 0x540   : > { %v4650_v24 = vpack.c.bf16 %v3079_v19, %v3075_v14  ;;  %4566 = vmatmul.mubr.msk.f32.gmra.mrb[36].mxu0 %vm1037_vm2, %v4738_v59 }
 0x541   : > { %v3074_v4 = vmul.f32 %v3058_v33, %v2962_v61  ;;  %v3078_v63 = vmul.f32 %v3062_v47, %v2966_v13  ;;  %3156 = vmatprep.mubr.f32.mxu0 %v7751_v29 }
 0x542   : > { %4651 = vmatprep.subr.bf16.mxu1 %v4650_v24 }
 0x543   : > { %v4652_v17 = vpack.c.bf16 %v3078_v63, %v3074_v4 }
 0x544   : > { %4567 = vmatmul.mubr.msk.f32.gmra.mrb[38].mxu0 %vm1037_vm2, %v4739_v25 }
 0x545   : > { %4653 = vmatpush1.bf16.msra.mxu1 %v4652_v17  ;;  %3162 = vmatprep.mubr.f32.mxu0 %v7751_v29 }
 0x548   : > { %4569 = vmatmul.mubr.msk.f32.vlgmr.msra.gmra.mrb[34].mxu1 %vm1037_vm2, %v4737_v56  ;;  %4568 = vmatmul.mubr.msk.f32.gmra.mrb[40].mxu0 %vm1037_vm2, %v4740_v44 }
 0x549   : > { %3239 = vmatprep.mubr.f32.mxu1 %v7751_v29  ;;  %3738 = vmatprep.mubr.f32.mxu0 %v7751_v29 }
 0x54c   : > { %4570 = vmatmul.mubr.msk.f32.gmra.mrb[36].mxu1 %vm1037_vm2, %v4738_v59 }
 0x54d   : > { %3245 = vmatprep.mubr.f32.mxu1 %v7751_v29 }
 0x550   : > { %4571 = vmatmul.mubr.msk.f32.gmra.mrb[38].mxu1 %vm1037_vm2, %v4739_v25  ;;  %v7754_v25 = vld [vmem:[#allocation12_spill] sm:$0xff] }
 0x551   : > { %3251 = vmatprep.mubr.f32.mxu1 %v7751_v29 }
 0x554   : > { %4572 = vmatmul.mubr.msk.f32.gmra.mrb[40].mxu1 %vm1037_vm2, %v4740_v44 }
 0x555   : > { %3827 = vmatprep.mubr.f32.mxu1 %v7751_v29 }
 0x60f   : > { %v3146_v51 = vpop.f32.mrb[34].mxu0 }
 0x610   : > { %v3147_v7 = vadd.f32 %v3146_v51, %v7752_v20  ;;  %v3148_v18 = vpop.f32.mrb[35].mxu0 }
 0x611   : > { %v3149_v50 = vadd.f32 %v3148_v18, %v7752_v20 }
 0x612   : > { %v3258_v45 = vmul.f32 0.31830987, %v3147_v7 }
 0x613   : > { %v3259_v30 = vmul.f32 0.31830987, %v3149_v50  ;;  %v3152_v43 = vpop.f32.mrb[36].mxu0 }
 0x614   : > { %v3274_v37 = vadd.f32 0.5, %v3258_v45  ;;  %v3153_v3 = vadd.f32 %v3152_v43, %v7753_v32  ;;  %v3154_v53 = vpop.f32.mrb[37].mxu0 }
 0x615   : > { %v3275_v12 = vadd.f32 0.5, %v3259_v30  ;;  %v3155_v31 = vadd.f32 %v3154_v53, %v7753_v32 }
 0x616   : > { %v6717_v9 = vfloor.f32 %v3274_v37  ;;  %v3262_v46 = vmul.f32 0.31830987, %v3153_v3 }
 0x617   : > { %v6719_v41 = vfloor.f32 %v3275_v12  ;;  %v3263_v55 = vmul.f32 0.31830987, %v3155_v31  ;;  %v3158_v5 = vpop.f32.mrb[38].mxu0 }
 0x618   : > { %v3306_v49 = vmul.f32 3.1414795, %v6717_v9  ;;  %v3278_v22 = vadd.f32 0.5, %v3262_v46  ;;  %v3338_v8 = vmul.f32 0.00011315942, %v6717_v9  ;;  %v3370_v1 = vmul.f32 1.9841873e-09, %v6717_v9 }
 0x619   : > { %v3307_v11 = vmul.f32 3.1414795, %v6719_v41  ;;  %v3279_v57 = vadd.f32 0.5, %v3263_v55  ;;  %v6727_v35 = vpop.f32.mrb[39].mxu0  ;;  %v3339_v36 = vmul.f32 0.00011315942, %v6719_v41  ;;  %v6756_v44 = vadd.f32 %v3158_v5, %v7754_v25 }
 0x61a   : > { %v3322_v15 = vsub.f32 %v3147_v7, %v3306_v49  ;;  %v6725_v60 = vfloor.f32 %v3278_v22  ;;  %v3371_v39 = vmul.f32 1.9841873e-09, %v6719_v41  ;;  %v6759_v51 = vmul.f32 0.5, %v6719_v41 }
 0x61b   : > { %v3235_v40 = vpop.f32.mrb[34].mxu1  ;;  %v3323_v6 = vsub.f32 %v3149_v50, %v3307_v11  ;;  %v6731_v52 = vfloor.f32 %v3279_v57  ;;  %v6733_v28 = vpop.f32.mrb[40].mxu0 }
 0x61c   : > { %v3236_v54 = vadd.f32 %v3235_v40, %v7752_v20  ;;  %v3237_v21 = vpop.f32.mrb[35].mxu1  ;;  %v3354_v26 = vsub.f32 %v3322_v15, %v3338_v8  ;;  %v3310_v10 = vmul.f32 3.1414795, %v6725_v60  ;;  %v6738_v48 = vpop.f32.mrb[41].mxu0  ;;  %v3342_v0 = vmul.f32 0.00011315942, %v6725_v60 }
 0x61d   : > { %v3238_v23 = vadd.f32 %v3237_v21, %v7752_v20  ;;  %v3355_v2 = vsub.f32 %v3323_v6, %v3339_v36  ;;  %v3311_v34 = vmul.f32 3.1414795, %v6731_v52  ;;  %v3374_v13 = vmul.f32 1.9841873e-09, %v6725_v60 }
 0x61e   : > { %v3260_v27 = vmul.f32 0.31830987, %v3236_v54  ;;  %v6742_v38 = vsub.f32 %v3354_v26, %v3370_v1  ;;  %v3326_v61 = vsub.f32 %v3153_v3, %v3310_v10  ;;  %v3343_v19 = vmul.f32 0.00011315942, %v6731_v52 }
 0x61f   : > { %v3261_v62 = vmul.f32 0.31830987, %v3238_v23  ;;  %v3241_v16 = vpop.f32.mrb[36].mxu1  ;;  %v6745_v58 = vsub.f32 %v3355_v2, %v3371_v39  ;;  %v3327_v14 = vsub.f32 %v3155_v31, %v3311_v34  ;;  %v3375_v37 = vmul.f32 1.9841873e-09, %v6731_v52 }
 0x620   : > { %v3276_v56 = vadd.f32 0.5, %v3260_v27  ;;  %v3243_v33 = vpop.f32.mrb[37].mxu1  ;;  %v6750_v47 = vmul.f32 %v6742_v38, %v6742_v38  ;;  %v3358_v4 = vsub.f32 %v3326_v61, %v3342_v0  ;;  %v3242_v63 = vadd.f32 %v3241_v16, %v7753_v32 }
 0x621   : > { %v3277_v24 = vadd.f32 0.5, %v3261_v62  ;;  %v3359_v17 = vsub.f32 %v3327_v14, %v3343_v19  ;;  %v6770_v30 = vmul.f32 %v6745_v58, %v6745_v58  ;;  %v3244_v3 = vadd.f32 %v3243_v33, %v7753_v32 }
 0x622   : > { %v6753_v59 = vfloor.f32 %v3276_v56  ;;  %v3418_v20 = vmul.f32 2.608316e-06, %v6750_v47  ;;  %v6764_v18 = vsub.f32 %v3358_v4, %v3374_v13  ;;  %v3264_v50 = vmul.f32 0.31830987, %v3242_v63 }
 0x623   : > { %v6762_v7 = vfloor.f32 %v3277_v24  ;;  %v6766_v45 = vpop.f32.mrb[38].mxu1  ;;  %v6785_v11 = vsub.f32 %v3359_v17, %v3375_v37  ;;  %v3265_v36 = vmul.f32 0.31830987, %v3244_v3  ;;  %v6808_v16 = vadd.f32 %v6727_v35, %v7754_v25 }
 0x624   : > { %v3308_v43 = vmul.f32 3.1414795, %v6753_v59  ;;  %v6775_v53 = vpop.f32.mrb[39].mxu1  ;;  %v3434_v12 = vadd.f32 -0.0001981069, %v3418_v20  ;;  %v3340_v31 = vmul.f32 0.00011315942, %v6753_v59  ;;  %v6781_v55 = vmul.f32 %v6764_v18, %v6764_v18 }
 0x625   : > { %v3309_v46 = vmul.f32 3.1414795, %v6762_v7  ;;  %v3372_v49 = vmul.f32 1.9841873e-09, %v6753_v59  ;;  %v3341_v22 = vmul.f32 0.00011315942, %v6762_v7  ;;  %v3280_v8 = vadd.f32 0.5, %v3264_v50 }
 0x626   : > { %v3324_v5 = vsub.f32 %v3236_v54, %v3308_v43  ;;  %v3450_v32 = vmul.f32 %v3434_v12, %v6750_v47  ;;  %v3422_v15 = vmul.f32 2.608316e-06, %v6781_v55  ;;  %v3373_v6 = vmul.f32 1.9841873e-09, %v6762_v7 }
 0x627   : > { %v3325_v57 = vsub.f32 %v3238_v23, %v3309_v46  ;;  %v6789_v1 = vpop.f32.mrb[40].mxu1  ;;  %v3266_v54 = vmul.f32 0.31830987, %v6756_v44  ;;  %v6793_v10 = vfloor.f32 %v3280_v8  ;;  %v6801_v23 = vmul.f32 %v6785_v11, %v6785_v11 }
 0x628   : > { %v3356_v40 = vsub.f32 %v3324_v5, %v3340_v31  ;;  %v3466_v21 = vadd.f32 0.008333079, %v3450_v32  ;;  %v3438_v39 = vadd.f32 -0.0001981069, %v3422_v15  ;;  %v6795_v2 = vpop.f32.mrb[41].mxu1  ;;  %v3281_v0 = vadd.f32 0.5, %v3265_v36 }
 0x629   : > { %v3357_v26 = vsub.f32 %v3325_v57, %v3341_v22  ;;  %v3282_v34 = vadd.f32 0.5, %v3266_v54  ;;  %v3312_v13 = vmul.f32 3.1414795, %v6793_v10  ;;  %v6811_v56 = vmul.f32 2.608316e-06, %v6770_v30 }
 0x62a   : > { %v6797_v27 = vsub.f32 %v3356_v40, %v3372_v49  ;;  %v3482_v62 = vmul.f32 %v3466_v21, %v6750_v47  ;;  %v3454_v61 = vmul.f32 %v3438_v39, %v6781_v55  ;;  %v6817_v33 = vfloor.f32 %v3281_v0 }
 0x62b   : > { %v6815_v19 = vsub.f32 %v3357_v26, %v3373_v6  ;;  %v3328_v17 = vsub.f32 %v3242_v63, %v3312_v13  ;;  %v3344_v20 = vmul.f32 0.00011315942, %v6793_v10  ;;  %v6821_v43 = vmul.f32 2.608316e-06, %v6801_v23 }
 0x62c   : > { %v3404_v14 = vmul.f32 %v6797_v27, %v6797_v27  ;;  %v3498_v24 = vadd.f32 -0.1666666, %v3482_v62  ;;  %v3470_v4 = vadd.f32 0.008333079, %v3454_v61  ;;  %v3313_v35 = vmul.f32 3.1414795, %v6817_v33 }
 0x62d   : > { %v6824_v37 = vfloor.f32 %v3282_v34  ;;  %v3360_v31 = vsub.f32 %v3328_v17, %v3344_v20  ;;  %v3376_v46 = vmul.f32 1.9841873e-09, %v6793_v10  ;;  %v3267_v5 = vmul.f32 0.31830987, %v6808_v16 }
 0x62e   : > { %v3420_v50 = vmul.f32 2.608316e-06, %v3404_v14  ;;  %v3486_v12 = vmul.f32 %v3470_v4, %v6781_v55  ;;  %v3329_v22 = vsub.f32 %v3244_v3, %v3313_v35  ;;  %v3345_v63 = vmul.f32 0.00011315942, %v6817_v33 }
 0x62f   : > { %v3314_v32 = vmul.f32 3.1414795, %v6824_v37  ;;  %v3514_v57 = vmul.f32 %v3498_v24, %v6750_v47  ;;  %v6834_v15 = vmul.f32 %v6815_v19, %v6815_v19  ;;  %v6836_v8 = vsub.f32 %v3360_v31, %v3376_v46 }
 0x630   : > { %v3436_v49 = vadd.f32 -0.0001981069, %v3420_v50  ;;  %v3377_v40 = vmul.f32 1.9841873e-09, %v6817_v33  ;;  %v3361_v36 = vsub.f32 %v3329_v22, %v3345_v63  ;;  %v3346_v3 = vmul.f32 0.00011315942, %v6824_v37 }
 0x631   : > { %v3330_v54 = vsub.f32 %v6756_v44, %v3314_v32  ;;  %v3502_v21 = vadd.f32 -0.1666666, %v3486_v12  ;;  %v3408_v26 = vmul.f32 %v6836_v8, %v6836_v8  ;;  %v3378_v47 = vmul.f32 1.9841873e-09, %v6824_v37 }
 0x632   : > { %v3452_v6 = vmul.f32 %v3436_v49, %v3404_v14  ;;  %v3283_v39 = vadd.f32 0.5, %v3267_v5  ;;  %v6844_v34 = vsub.f32 %v3361_v36, %v3377_v40  ;;  %v3248_v61 = vadd.f32 %v6766_v45, %v7754_v25 }
 0x633   : > { %v3362_v62 = vsub.f32 %v3330_v54, %v3346_v3  ;;  %v6849_v13 = vmul.f32 2.608316e-06, %v6834_v15  ;;  %v3424_v44 = vmul.f32 2.608316e-06, %v3408_v26  ;;  %v3250_v4 = vadd.f32 %v6775_v53, %v7754_v25 }
 0x634   : > { %v3468_v0 = vadd.f32 0.008333079, %v3452_v6  ;;  %v6851_v24 = vfloor.f32 %v3283_v39  ;;  %v3530_v17 = vmul.f32 %v3514_v57, %v6742_v38  ;;  %v3268_v35 = vmul.f32 0.31830987, %v3248_v61  ;;  %v7755_v6 = vld [vmem:[#allocation13_spill] sm:$0xff] }
 0x635   : > { %v6856_v50 = vsub.f32 %v3362_v62, %v3378_v47  ;;  %v3518_v12 = vmul.f32 %v3502_v21, %v6781_v55  ;;  %v3440_v31 = vadd.f32 -0.0001981069, %v3424_v44  ;;  %v6861_v45 = vmul.f32 %v6844_v34, %v6844_v34 }
 0x636   : > { %v3484_v20 = vmul.f32 %v3468_v0, %v3404_v14  ;;  %v3315_v46 = vmul.f32 3.1414795, %v6851_v24  ;;  %v3347_v25 = vmul.f32 0.00011315942, %v6851_v24  ;;  %v3379_v53 = vmul.f32 1.9841873e-09, %v6851_v24 }
 0x637   : > { %v3410_v49 = vmul.f32 %v6856_v50, %v6856_v50  ;;  %v3456_v22 = vmul.f32 %v3440_v31, %v3408_v26  ;;  %v3284_v32 = vadd.f32 0.5, %v3268_v35  ;;  %v3269_v55 = vmul.f32 0.31830987, %v3250_v4 }
 0x638   : > { %v3500_v5 = vadd.f32 -0.1666666, %v3484_v20  ;;  %v3331_v63 = vsub.f32 %v6808_v16, %v3315_v46  ;;  %v3165_v36 = vadd.f32 %v6733_v28, %v7755_v6  ;;  %v3167_v54 = vadd.f32 %v6738_v48, %v7755_v6 }
 0x639   : > { %v3426_v40 = vmul.f32 2.608316e-06, %v3410_v49  ;;  %v3472_v3 = vadd.f32 0.008333079, %v3456_v22  ;;  %v6873_v47 = vfloor.f32 %v3284_v32  ;;  %v3285_v39 = vadd.f32 0.5, %v3269_v55 }
 0x63a   : > { %v3516_v57 = vmul.f32 %v3500_v5, %v3404_v14  ;;  %v3363_v21 = vsub.f32 %v3331_v63, %v3347_v25  ;;  %v3534_v0 = vmul.f32 %v3518_v12, %v6764_v18  ;;  %v3270_v44 = vmul.f32 0.31830987, %v3165_v36 }
 0x63b   : > { %7756 = vst [vmem:[#allocation7_spill] sm:$0xff] %v6873_v47  ;;  %v3442_v62 = vadd.f32 -0.0001981069, %v3426_v40  ;;  %v3271_v16 = vmul.f32 0.31830987, %v3167_v54  ;;  %v6877_v20 = vadd.f32 %v3530_v17, %v6742_v38  ;;  %v3488_v14 = vmul.f32 %v3472_v3, %v3408_v26 }
 0x63c   : > { %v6880_v35 = vmul.f32 2.608316e-06, %v6861_v45  ;;  %v3316_v28 = vmul.f32 3.1414795, %v6873_v47  ;;  %v3532_v48 = vmul.f32 %v3516_v57, %v6797_v27  ;;  %v6884_v46 = vsub.f32 %v3363_v21, %v3379_v53 }
 0x63d   : > { %v3458_v31 = vmul.f32 %v3442_v62, %v3410_v49  ;;  %v6886_v5 = vfloor.f32 %v3285_v39  ;;  %v3504_v12 = vadd.f32 -0.1666666, %v3488_v14  ;;  %v3348_v22 = vmul.f32 0.00011315942, %v6873_v47 }
 0x63e   : > { %v3332_v25 = vsub.f32 %v3248_v61, %v3316_v28  ;;  %v3286_v63 = vadd.f32 0.5, %v3270_v44  ;;  %v6890_v38 = vadd.f32 %v3534_v0, %v6764_v18  ;;  %v3287_v55 = vadd.f32 0.5, %v3271_v16 }
 0x63f   : > { %7757 = vst [vmem:[#allocation6_spill] sm:$0xff] %v6886_v5  ;;  %v3474_v17 = vadd.f32 0.008333079, %v3458_v31  ;;  %v3317_v32 = vmul.f32 3.1414795, %v6886_v5  ;;  %v3520_v40 = vmul.f32 %v3504_v12, %v3408_v26  ;;  %v3349_v53 = vmul.f32 0.00011315942, %v6886_v5 }
 0x640   : > { %v3364_v3 = vsub.f32 %v3332_v25, %v3348_v22  ;;  %v3380_v57 = vmul.f32 1.9841873e-09, %v6873_v47  ;;  %v6895_v62 = vfloor.f32 %v3286_v63  ;;  %v6897_v61 = vfloor.f32 %v3287_v55 }
 0x641   : > { %v3490_v21 = vmul.f32 %v3474_v17, %v3410_v49  ;;  %v3333_v39 = vsub.f32 %v3250_v4, %v3317_v32  ;;  %v6900_v44 = vadd.f32 %v3532_v48, %v6797_v27  ;;  %v6904_v18 = vmul.f32 %v6884_v46, %v6884_v46 }
 0x642   : > { %v6906_v0 = vsub.f32 %v3364_v3, %v3380_v57  ;;  %v3254_v26 = vadd.f32 %v6789_v1, %v7755_v6  ;;  %v3318_v4 = vmul.f32 3.1414795, %v6895_v62  ;;  %v3256_v28 = vadd.f32 %v6795_v2, %v7755_v6 }
 0x643   : > { %v3506_v16 = vadd.f32 -0.1666666, %v3490_v21  ;;  %v3365_v14 = vsub.f32 %v3333_v39, %v3349_v53  ;;  %v3536_v31 = vmul.f32 %v3520_v40, %v6836_v8  ;;  %v3381_v48 = vmul.f32 1.9841873e-09, %v6886_v5 }
 0x644   : > { %7758 = vst [vmem:[#allocation8_spill] sm:$0xff] %v6906_v0  ;;  %v6916_v27 = vmul.f32 %v6906_v0, %v6906_v0  ;;  %v3319_v12 = vmul.f32 3.1414795, %v6897_v61  ;;  %v3334_v22 = vsub.f32 %v3165_v36, %v3318_v4  ;;  %v3350_v1 = vmul.f32 0.00011315942, %v6895_v62 }
 0x645   : > { %v3522_v25 = vmul.f32 %v3506_v16, %v3410_v49  ;;  %v3382_v63 = vmul.f32 1.9841873e-09, %v6895_v62  ;;  %v3351_v2 = vmul.f32 0.00011315942, %v6897_v61  ;;  %v3272_v6 = vmul.f32 0.31830987, %v3254_v26 }
 0x646   : > { %v3428_v17 = vmul.f32 2.608316e-06, %v6916_v27  ;;  %v3335_v32 = vsub.f32 %v3167_v54, %v3319_v12  ;;  %v6924_v55 = vsub.f32 %v3365_v14, %v3381_v48  ;;  %v3366_v40 = vsub.f32 %v3334_v22, %v3350_v1 }
 0x647   : > { %v3383_v3 = vmul.f32 1.9841873e-09, %v6897_v61  ;;  %v3273_v57 = vmul.f32 0.31830987, %v3256_v28  ;;  %v3288_v49 = vadd.f32 0.5, %v3272_v6  ;;  %v6929_v39 = vadd.f32 %v3536_v31, %v6836_v8 }
 0x648   : > { %7759 = vst [vmem:[#allocation9_spill] sm:$0xff] %v6924_v55  ;;  %v3444_v53 = vadd.f32 -0.0001981069, %v3428_v17  ;;  %v3367_v21 = vsub.f32 %v3335_v32, %v3351_v2  ;;  %v3435_v36 = vadd.f32 -0.0001981069, %v6811_v56  ;;  %v6934_v54 = vsub.f32 %v3366_v40, %v3382_v63 }
 0x649   : > { %v6932_v16 = vmul.f32 2.608316e-06, %v6904_v18  ;;  %v3289_v4 = vadd.f32 0.5, %v3273_v57  ;;  %v6939_v12 = vfloor.f32 %v3288_v49  ;;  %v3439_v22 = vadd.f32 -0.0001981069, %v6821_v43 }
 0x64a   : > { %v3460_v14 = vmul.f32 %v3444_v53, %v6916_v27  ;;  %v6937_v48 = vsub.f32 %v3367_v21, %v3383_v3  ;;  %v3538_v1 = vmul.f32 %v3522_v25, %v6856_v50  ;;  %v6945_v56 = vmul.f32 %v6934_v54, %v6934_v54 }
 0x64b   : > { %v6947_v8 = vfloor.f32 %v3289_v4  ;;  %v3451_v31 = vmul.f32 %v3435_v36, %v6770_v30  ;;  %v6952_v17 = vmul.f32 %v6924_v55, %v6924_v55  ;;  %v3320_v32 = vmul.f32 3.1414795, %v6939_v12 }
 0x64c   : > { %v3476_v63 = vadd.f32 0.008333079, %v3460_v14  ;;  %v3567_v2 = vmul.f32 0.5, %v6731_v52  ;;  %v3430_v43 = vmul.f32 2.608316e-06, %v6945_v56  ;;  %v6959_v25 = vmul.f32 %v6937_v48, %v6937_v48 }
 0x64d   : > { %v3321_v6 = vmul.f32 3.1414795, %v6947_v8  ;;  %v3455_v40 = vmul.f32 %v3439_v22, %v6801_v23  ;;  %v3336_v57 = vsub.f32 %v3254_v26, %v3320_v32  ;;  %v3352_v53 = vmul.f32 0.00011315942, %v6939_v12 }
 0x64e   : > { %v3492_v3 = vmul.f32 %v3476_v63, %v6916_v27  ;;  %v3384_v21 = vmul.f32 1.9841873e-09, %v6939_v12  ;;  %v3446_v49 = vadd.f32 -0.0001981069, %v3430_v43  ;;  %v3353_v4 = vmul.f32 0.00011315942, %v6947_v8 }
 0x64f   : > { %v3337_v36 = vsub.f32 %v3256_v28, %v3321_v6  ;;  %v3467_v14 = vadd.f32 0.008333079, %v3451_v31  ;;  %v3368_v42 = vsub.f32 %v3336_v57, %v3352_v53  ;;  %v3385_v29 = vmul.f32 1.9841873e-09, %v6947_v8 }
 0x650   : > { %v3471_v55 = vadd.f32 0.008333079, %v3455_v40  ;;  %v3579_v0 = vfloor.f32 %v6759_v51  ;;  %v3462_v22 = vmul.f32 %v3446_v49, %v6945_v56  ;;  %v3583_v63 = vfloor.f32 %v3567_v2 }
 0x651   : > { %v3369_v47 = vsub.f32 %v3337_v36, %v3353_v4  ;;  %v3483_v26 = vmul.f32 %v3467_v14, %v6770_v30  ;;  %v3508_v32 = vadd.f32 -0.1666666, %v3492_v3  ;;  %v6971_v5 = vsub.f32 %v3368_v42, %v3384_v21 }
 0x652   : > { %v3487_v28 = vmul.f32 %v3471_v55, %v6801_v23  ;;  %v3595_v43 = vmul.f32 2.0, %v3579_v0  ;;  %v6975_v31 = vadd.f32 %v3538_v1, %v6856_v50  ;;  %v3478_v6 = vadd.f32 0.008333079, %v3462_v22 }
 0x653   : > { %v3499_v57 = vadd.f32 -0.1666666, %v3483_v26  ;;  %v3599_v40 = vmul.f32 2.0, %v3583_v63  ;;  %v6979_v51 = vmul.f32 %v6971_v5, %v6971_v5  ;;  %v6981_v53 = vsub.f32 %v3369_v47, %v3385_v29 }
 0x654   : > { %v3503_v49 = vadd.f32 -0.1666666, %v3487_v28  ;;  %v3611_v2 = vsub.f32 %v6719_v41, %v3595_v43  ;;  %v6985_v42 = vmul.f32 2.608316e-06, %v6952_v17  ;;  %v3494_v0 = vmul.f32 %v3478_v6, %v6945_v56 }
 0x655   : > { %v3515_v50 = vmul.f32 %v3499_v57, %v6770_v30  ;;  %v3615_v55 = vsub.f32 %v6731_v52, %v3599_v40  ;;  %v6991_v1 = vmul.f32 2.608316e-06, %v6959_v25  ;;  %v3432_v3 = vmul.f32 2.608316e-06, %v6979_v51 }
 0x656   : > { %v3519_v29 = vmul.f32 %v3503_v49, %v6801_v23  ;;  %v3627_v47 = vmul.f32 2.0, %v3611_v2  ;;  %v6996_v21 = vmul.f32 %v3508_v32, %v6916_v27  ;;  %v3510_v41 = vadd.f32 -0.1666666, %v3494_v0 }
 0x657   : > { %v3531_v36 = vmul.f32 %v3515_v50, %v6745_v58  ;;  %v3631_v4 = vmul.f32 2.0, %v3615_v55  ;;  %v3448_v14 = vadd.f32 -0.0001981069, %v3432_v3  ;;  %v7001_v30 = vmul.f32 %v6981_v53, %v6981_v53 }
 0x658   : > { %v3535_v52 = vmul.f32 %v3519_v29, %v6785_v11  ;;  %v3562_v22 = vmul.f32 0.5, %v6717_v9  ;;  %v3643_v23 = vsub.f32 1.0, %v3627_v47  ;;  %v3566_v27 = vmul.f32 0.5, %v6725_v60 }
 0x659   : > { %v3547_v26 = vadd.f32 %v3531_v36, %v6745_v58  ;;  %v3647_v63 = vsub.f32 1.0, %v3631_v4  ;;  %v3464_v32 = vmul.f32 %v3448_v14, %v6979_v51  ;;  %v3437_v6 = vadd.f32 -0.0001981069, %v6849_v13 }
 0x65a   : > { %v3551_v28 = vadd.f32 %v3535_v52, %v6785_v11  ;;  %v3578_v43 = vfloor.f32 %v3562_v22  ;;  %v3526_v57 = vmul.f32 %v3510_v41, %v6945_v56  ;;  %v3582_v49 = vfloor.f32 %v3566_v27 }
 0x65b   : > { %v3659_v40 = vmul.f32 %v3643_v23, %v3547_v26  ;;  %v3441_v2 = vadd.f32 -0.0001981069, %v6880_v35  ;;  %v3480_v0 = vadd.f32 0.008333079, %v3464_v32  ;;  %v3453_v55 = vmul.f32 %v3437_v6, %v6834_v15 }
 0x65c   : > { %v3663_v50 = vmul.f32 %v3647_v63, %v3551_v28  ;;  %v3594_v58 = vmul.f32 2.0, %v3578_v43  ;;  %v7014_v3 = vmul.f32 2.608316e-06, %v7001_v30  ;;  %v3598_v29 = vmul.f32 2.0, %v3582_v49 }
 0x65d   : > { %v3457_v11 = vmul.f32 %v3441_v2, %v6861_v45  ;;  %v3565_v47 = vmul.f32 0.5, %v6762_v7  ;;  %v3496_v13 = vmul.f32 %v3480_v0, %v6979_v51  ;;  %v3469_v36 = vadd.f32 0.008333079, %v3453_v55 }
 0x65e   : > { %v4654_v56 = vpack.c.bf16 %v3663_v50, %v3659_v40  ;;  %v3610_v41 = vsub.f32 %v6717_v9, %v3594_v58  ;;  %v3614_v35 = vsub.f32 %v6725_v60, %v3598_v29  ;;  %v3569_v14 = vmul.f32 0.5, %v6817_v33 }
 0x65f   : > { %v3473_v4 = vadd.f32 0.008333079, %v3457_v11  ;;  %v3581_v52 = vfloor.f32 %v3565_v47  ;;  %v3542_v22 = vmul.f32 %v3526_v57, %v6934_v54  ;;  %v3485_v23 = vmul.f32 %v3469_v36, %v6834_v15 }
 0x660   : > { %4655 = vmatprep.subr.bf16.mxu0 %v4654_v56  ;;  %v3626_v26 = vmul.f32 2.0, %v3610_v41  ;;  %v3564_v63 = vmul.f32 0.5, %v6753_v59  ;;  %v3630_v27 = vmul.f32 2.0, %v3614_v35  ;;  %v3585_v28 = vfloor.f32 %v3569_v14 }
 0x661   : > { %v3489_v32 = vmul.f32 %v3473_v4, %v6861_v45  ;;  %v3597_v9 = vmul.f32 2.0, %v3581_v52  ;;  %v3512_v43 = vadd.f32 -0.1666666, %v3496_v13  ;;  %v3501_v60 = vadd.f32 -0.1666666, %v3485_v23 }
 0x662   : > { %v3642_v6 = vsub.f32 1.0, %v3626_v26  ;;  %v3568_v40 = vmul.f32 0.5, %v6793_v10  ;;  %v3646_v49 = vsub.f32 1.0, %v3630_v27  ;;  %v3601_v0 = vmul.f32 2.0, %v3585_v28 }
 0x663   : > { %v3505_v2 = vadd.f32 -0.1666666, %v3489_v32  ;;  %v3613_v57 = vsub.f32 %v6762_v7, %v3597_v9  ;;  %v7029_v50 = vadd.f32 %v3542_v22, %v6934_v54  ;;  %v3517_v55 = vmul.f32 %v3501_v60, %v6834_v15 }
 0x664   : > { %v3658_v58 = vmul.f32 %v3642_v6, %v6877_v20  ;;  %v3580_v29 = vfloor.f32 %v3564_v63  ;;  %v3662_v11 = vmul.f32 %v3646_v49, %v6890_v38  ;;  %v3617_v13 = vsub.f32 %v6817_v33, %v3601_v0 }
 0x665   : > { %v3521_v47 = vmul.f32 %v3505_v2, %v6861_v45  ;;  %v3629_v56 = vmul.f32 2.0, %v3613_v57  ;;  %v7037_v41 = vmul.f32 %v3512_v43, %v6979_v51  ;;  %v3533_v7 = vmul.f32 %v3517_v55, %v6815_v19 }
 0x666   : > { %v3584_v36 = vfloor.f32 %v3568_v40  ;;  %v3596_v54 = vmul.f32 2.0, %v3580_v29  ;;  %v4656_v35 = vpack.c.bf16 %v3662_v11, %v3658_v58  ;;  %v3633_v4 = vmul.f32 2.0, %v3617_v13 }
 0x667   : > { %v3537_v20 = vmul.f32 %v3521_v47, %v6844_v34  ;;  %v3645_v15 = vsub.f32 1.0, %v3629_v56  ;;  %v3549_v14 = vadd.f32 %v3533_v7, %v6815_v19  ;;  %v3443_v33 = vadd.f32 -0.0001981069, %v6932_v16 }
 0x668   : > { %v3600_v38 = vmul.f32 2.0, %v3584_v36  ;;  %v3612_v45 = vsub.f32 %v6753_v59, %v3596_v54  ;;  %4657 = vmatpush1.bf16.msra.mxu0 %v4656_v35  ;;  %v3649_v52 = vsub.f32 1.0, %v3633_v4  ;;  %v3447_v22 = vadd.f32 -0.0001981069, %v6991_v1 }
 0x669   : > { %v3553_v51 = vadd.f32 %v3537_v20, %v6844_v34  ;;  %v3571_v26 = vmul.f32 0.5, %v6851_v24  ;;  %v3661_v23 = vmul.f32 %v3645_v15, %v3549_v14  ;;  %v3459_v32 = vmul.f32 %v3443_v33, %v6904_v18 }
 0x66a   : > { %v3616_v63 = vsub.f32 %v6793_v10, %v3600_v38  ;;  %v3628_v27 = vmul.f32 2.0, %v3612_v45  ;;  %v3463_v28 = vmul.f32 %v3447_v22, %v6959_v25  ;;  %v3575_v59 = vmul.f32 0.5, %v6897_v61 }
 0x66b   : > { %v3665_v19 = vmul.f32 %v3649_v52, %v3553_v51  ;;  %v3587_v16 = vfloor.f32 %v3571_v26  ;;  %v3475_v34 = vadd.f32 0.008333079, %v3459_v32  ;;  %v3570_v6 = vmul.f32 0.5, %v6824_v37 }
 0x66c   : > { %v3632_v9 = vmul.f32 2.0, %v3616_v63  ;;  %v3644_v43 = vsub.f32 1.0, %v3628_v27  ;;  %v3479_v60 = vadd.f32 0.008333079, %v3463_v28  ;;  %v3591_v40 = vfloor.f32 %v3575_v59 }
 0x66d   : > { %v4662_v1 = vpack.c.bf16 %v3665_v19, %v3661_v23  ;;  %v3603_v49 = vmul.f32 2.0, %v3587_v16  ;;  %v3491_v0 = vmul.f32 %v3475_v34, %v6904_v18  ;;  %v3574_v57 = vmul.f32 0.5, %v6895_v62 }
 0x66e   : > { %v3648_v2 = vsub.f32 1.0, %v3632_v9  ;;  %v3660_v10 = vmul.f32 %v3644_v43, %v6900_v44  ;;  %v3495_v58 = vmul.f32 %v3479_v60, %v6959_v25  ;;  %v3607_v55 = vmul.f32 2.0, %v3591_v40 }
 0x66f   : > { %4663 = vmatprep.subr.bf16.mxu1 %v4662_v1  ;;  %v3619_v29 = vsub.f32 %v6851_v24, %v3603_v49  ;;  %v3586_v11 = vfloor.f32 %v3570_v6  ;;  %v3507_v13 = vadd.f32 -0.1666666, %v3491_v0  ;;  %v3590_v56 = vfloor.f32 %v3574_v57 }
 0x670   : > { %v3664_v47 = vmul.f32 %v3648_v2, %v6929_v39  ;;  %v3445_v7 = vadd.f32 -0.0001981069, %v6985_v42  ;;  %v3511_v36 = vadd.f32 -0.1666666, %v3495_v58  ;;  %v3623_v44 = vsub.f32 %v6897_v61, %v3607_v55 }
 0x671   : > { %v3635_v54 = vmul.f32 2.0, %v3619_v29  ;;  %v3602_v35 = vmul.f32 2.0, %v3586_v11  ;;  %v3523_v4 = vmul.f32 %v3507_v13, %v6904_v18  ;;  %v3606_v15 = vmul.f32 2.0, %v3590_v56  ;;  %v7762_v13 = vld [vmem:[#allocation8_spill] sm:$0xff] }
 0x672   : > { %v4664_v20 = vpack.c.bf16 %v3664_v47, %v3660_v10  ;;  %v3449_v14 = vadd.f32 -0.0001981069, %v7014_v3  ;;  %v3527_v24 = vmul.f32 %v3511_v36, %v6959_v25  ;;  %v3639_v38 = vmul.f32 2.0, %v3623_v44  ;;  %v7760_v3 = vld [vmem:[#allocation6_spill] sm:$0xff] }
 0x673   : > { %v3651_v45 = vsub.f32 1.0, %v3635_v54  ;;  %v3618_v39 = vsub.f32 %v6824_v37, %v3602_v35  ;;  %v3539_v42 = vmul.f32 %v3523_v4, %v6884_v46  ;;  %v3622_v33 = vsub.f32 %v6895_v62, %v3606_v15 }
 0x674   : > { %4665 = vmatpush1.bf16.msra.mxu1 %v4664_v20  ;;  %v3461_v61 = vmul.f32 %v3445_v7, %v6952_v17  ;;  %v3465_v51 = vmul.f32 %v3449_v14, %v7001_v30  ;;  %v3543_v18 = vmul.f32 %v3527_v24, %v6937_v48  ;;  %v3655_v52 = vsub.f32 1.0, %v3639_v38  ;;  %v7763_v7 = vld [vmem:[#allocation9_spill] sm:$0xff]  ;;  %v4741_v24 = vld [vmem:[%s7568_s5] sm:$0xff] }
 0x675   : > { %v3634_v22 = vmul.f32 2.0, %v3618_v39  ;;  %v3573_v26 = vmul.f32 0.5, %v7760_v3  ;;  %v3555_v25 = vadd.f32 %v3539_v42, %v6884_v46  ;;  %v3638_v23 = vmul.f32 2.0, %v3622_v33 }
 0x676   : > { %v3477_v63 = vadd.f32 0.008333079, %v3461_v61  ;;  %v3481_v37 = vadd.f32 0.008333079, %v3465_v51  ;;  %v3559_v27 = vadd.f32 %v3543_v18, %v6937_v48  ;;  %v3577_v62 = vmul.f32 0.5, %v6947_v8  ;;  %v7761_v48 = vld [vmem:[#allocation7_spill] sm:$0xff] }
 0x677   : > { %v3650_v32 = vsub.f32 1.0, %v3634_v22  ;;  %v3589_v19 = vfloor.f32 %v3573_v26  ;;  %v3667_v28 = vmul.f32 %v3651_v45, %v3555_v25  ;;  %v3654_v59 = vsub.f32 1.0, %v3638_v23  ;;  %v4744_v26 = vld [vmem:[%s7568_s5 + $0x18] sm:$0xff] }
 0x678   : > { %v3493_v16 = vmul.f32 %v3477_v63, %v6952_v17  ;;  %v3497_v9 = vmul.f32 %v3481_v37, %v7001_v30  ;;  %v3671_v43 = vmul.f32 %v3655_v52, %v3559_v27  ;;  %v3593_v6 = vfloor.f32 %v3577_v62  ;;  %v7765_v23 = vld [vmem:[#allocation18_spill] sm:$0xff] }
 0x679   : > { %v3666_v34 = vmul.f32 %v3650_v32, %v6975_v31  ;;  %v3605_v46 = vmul.f32 2.0, %v3589_v19  ;;  %v3670_v1 = vmul.f32 %v3654_v59, %v7029_v50  ;;  %v3572_v49 = vmul.f32 0.5, %v7761_v48  ;;  %v7766_v59 = vld [vmem:[#allocation21_spill] sm:$0xff] }
 0x67a   : > { %v3509_v60 = vadd.f32 -0.1666666, %v3493_v16  ;;  %v3513_v40 = vadd.f32 -0.1666666, %v3497_v9  ;;  %v4658_v2 = vpack.c.bf16 %v3671_v43, %v3667_v28  ;;  %v3609_v10 = vmul.f32 2.0, %v3593_v6 }
 0x67b   : > { %v3621_v0 = vsub.f32 %v7760_v3, %v3605_v46  ;;  %v3576_v57 = vmul.f32 0.5, %v6939_v12  ;;  %v4660_v58 = vpack.c.bf16 %v3670_v1, %v3666_v34  ;;  %v3588_v31 = vfloor.f32 %v3572_v49 }
 0x67c   : > { %v3525_v55 = vmul.f32 %v3509_v60, %v6952_v17  ;;  %v3529_v29 = vmul.f32 %v3513_v40, %v7001_v30  ;;  %4659 = vmatprep.subr.bf16.mxu0 %v4658_v2  ;;  %v3625_v11 = vsub.f32 %v6947_v8, %v3609_v10  ;;  %v3540_v56 = vmul.f32 %v6996_v21, %v7762_v13 }
 0x67d   : > { %v3637_v50 = vmul.f32 2.0, %v3621_v0  ;;  %v3592_v47 = vfloor.f32 %v3576_v57  ;;  %4661 = vmatpush1.bf16.msra.mxu0 %v4660_v58  ;;  %v3604_v54 = vmul.f32 2.0, %v3588_v31  ;;  %v3544_v17 = vmul.f32 %v7037_v41, %v6971_v5 }
 0x67e   : > { %v3541_v36 = vmul.f32 %v3525_v55, %v7763_v7  ;;  %v3545_v44 = vmul.f32 %v3529_v29, %v6981_v53  ;;  %v3641_v35 = vmul.f32 2.0, %v3625_v11  ;;  %v3556_v41 = vadd.f32 %v3540_v56, %v7762_v13  ;;  %v7767_v13 = vld [vmem:[#allocation22_spill] sm:$0xff] }
 0x67f   : > { %v3608_v30 = vmul.f32 2.0, %v3592_v47  ;;  %v3620_v4 = vsub.f32 %v7761_v48, %v3604_v54  ;;  %v3653_v15 = vsub.f32 1.0, %v3637_v50  ;;  %v7764_v45 = vmov 0.0  }
 0x680   : > { %v3557_v20 = vadd.f32 %v3541_v36, %v7763_v7  ;;  %v3561_v8 = vadd.f32 %v3545_v44, %v6981_v53  ;;  %v3657_v14 = vsub.f32 1.0, %v3641_v35  ;;  %4573 = vmatmul.mubr.msk.f32.vlgmr.msra.gmra.mrb[42].mxu0 %vm1037_vm2, %v4741_v24  ;;  %v3560_v39 = vadd.f32 %v3544_v17, %v6971_v5  ;;  %v4743_v5 = vld [vmem:[%s7568_s5 + $0x10] sm:$0xff] }
 0x681   : > { %v3624_v21 = vsub.f32 %v6939_v12, %v3608_v30  ;;  %v3636_v38 = vmul.f32 2.0, %v3620_v4  ;;  %3744 = vmatprep.mubr.f32.mxu0 %v7764_v45  ;;  %v4742_v12 = vld [vmem:[%s7568_s5 + $0x8] sm:$0xff] }
 0x682   : > { %v3669_v53 = vmul.f32 %v3653_v15, %v3557_v20  ;;  %v3673_v42 = vmul.f32 %v3657_v14, %v3561_v8 }
 0x683   : > { %v3640_v33 = vmul.f32 2.0, %v3624_v21  ;;  %v3652_v51 = vsub.f32 1.0, %v3636_v38 }
 0x684   : > { %v4666_v61 = vpack.c.bf16 %v3673_v42, %v3669_v53  ;;  %4574 = vmatmul.mubr.msk.f32.gmra.mrb[44].mxu0 %vm1037_vm2, %v4742_v12 }
 0x685   : > { %v3656_v18 = vsub.f32 1.0, %v3640_v33  ;;  %3750 = vmatprep.mubr.f32.mxu0 %v7764_v45  ;;  %v3668_v52 = vmul.f32 %v3652_v51, %v3556_v41 }
 0x686   : > { %4667 = vmatprep.subr.bf16.mxu1 %v4666_v61 }
 0x687   : > { %v3672_v22 = vmul.f32 %v3656_v18, %v3560_v39 }
 0x688   : > { %4575 = vmatmul.mubr.msk.f32.gmra.mrb[46].mxu0 %vm1037_vm2, %v4743_v5 }
 0x689   : > { %v4668_v3 = vpack.c.bf16 %v3672_v22, %v3668_v52  ;;  %3756 = vmatprep.mubr.f32.mxu0 %v7764_v45 }
 0x68b   : > { %4669 = vmatpush1.bf16.msra.mxu1 %v4668_v3 }
 0x68c   : > { %4576 = vmatmul.mubr.msk.f32.gmra.mrb[48].mxu0 %vm1037_vm2, %v4744_v26 }
 0x68d   : > { %4332 = vmatprep.mubr.f32.mxu0 %v7764_v45 }
 0x68e   : > { %4577 = vmatmul.mubr.msk.f32.vlgmr.msra.gmra.mrb[42].mxu1 %vm1037_vm2, %v4741_v24 }
 0x68f   : > { %3833 = vmatprep.mubr.f32.mxu1 %v7764_v45 }
 0x692   : > { %4578 = vmatmul.mubr.msk.f32.gmra.mrb[44].mxu1 %vm1037_vm2, %v4742_v12 }
 0x693   : > { %3839 = vmatprep.mubr.f32.mxu1 %v7764_v45 }
 0x696   : > { %4579 = vmatmul.mubr.msk.f32.gmra.mrb[46].mxu1 %vm1037_vm2, %v4743_v5 }
 0x697   : > { %3845 = vmatprep.mubr.f32.mxu1 %v7764_v45 }
 0x69a   : > { %4580 = vmatmul.mubr.msk.f32.gmra.mrb[48].mxu1 %vm1037_vm2, %v4744_v26 }
 0x69b   : > { %4403 = vmatprep.mubr.f32.mxu1 %v7764_v45 }
 0x753   : > { %v3740_v25 = vpop.f32.mrb[42].mxu0 }
 0x754   : > { %v3741_v63 = vadd.f32 %v3740_v25, %v7765_v23  ;;  %v3742_v37 = vpop.f32.mrb[43].mxu0 }
 0x755   : > { %v3743_v27 = vadd.f32 %v3742_v37, %v7765_v23 }
 0x756   : > { %v3852_v32 = vmul.f32 0.31830987, %v3741_v63 }
 0x757   : > { %v3853_v62 = vmul.f32 0.31830987, %v3743_v27  ;;  %v3746_v19 = vpop.f32.mrb[44].mxu0 }
 0x758   : > { %v3868_v28 = vadd.f32 0.5, %v3852_v32  ;;  %v3747_v16 = vadd.f32 %v3746_v19, %v7766_v59  ;;  %v3748_v9 = vpop.f32.mrb[45].mxu0 }
 0x759   : > { %v3869_v43 = vadd.f32 0.5, %v3853_v62  ;;  %v3749_v34 = vadd.f32 %v3748_v9, %v7766_v59 }
 0x75a   : > { %v7127_v6 = vfloor.f32 %v3868_v28  ;;  %v3856_v46 = vmul.f32 0.31830987, %v3747_v16 }
 0x75b   : > { %v7129_v1 = vfloor.f32 %v3869_v43  ;;  %v3857_v60 = vmul.f32 0.31830987, %v3749_v34  ;;  %v3752_v40 = vpop.f32.mrb[46].mxu0 }
 0x75c   : > { %v3900_v48 = vmul.f32 3.1414795, %v7127_v6  ;;  %v3872_v49 = vadd.f32 0.5, %v3856_v46  ;;  %v3932_v2 = vmul.f32 0.00011315942, %v7127_v6  ;;  %v3964_v58 = vmul.f32 1.9841873e-09, %v7127_v6 }
 0x75d   : > { %v3901_v10 = vmul.f32 3.1414795, %v7129_v1  ;;  %v3873_v0 = vadd.f32 0.5, %v3857_v60  ;;  %v3933_v55 = vmul.f32 0.00011315942, %v7129_v1  ;;  %v3754_v31 = vpop.f32.mrb[47].mxu0  ;;  %v7142_v56 = vadd.f32 %v3752_v40, %v7767_v13 }
 0x75e   : > { %v3916_v57 = vsub.f32 %v3741_v63, %v3900_v48  ;;  %v7136_v29 = vfloor.f32 %v3872_v49  ;;  %v3965_v50 = vmul.f32 1.9841873e-09, %v7129_v1  ;;  %v7148_v17 = vadd.f32 %v3754_v31, %v7767_v13 }
 0x75f   : > { %v3917_v11 = vsub.f32 %v3743_v27, %v3901_v10  ;;  %v7139_v47 = vfloor.f32 %v3873_v0  ;;  %v7144_v7 = vpop.f32.mrb[48].mxu0  ;;  %v7151_v35 = vmul.f32 0.5, %v7129_v1  ;;  %v3860_v62 = vmul.f32 0.31830987, %v7142_v56 }
 0x760   : > { %v3948_v36 = vsub.f32 %v3916_v57, %v3932_v2  ;;  %v3904_v54 = vmul.f32 3.1414795, %v7136_v29  ;;  %v3936_v4 = vmul.f32 0.00011315942, %v7136_v29  ;;  %v7156_v14 = vpop.f32.mrb[49].mxu0  ;;  %v3968_v38 = vmul.f32 1.9841873e-09, %v7136_v29 }
 0x761   : > { %v3829_v44 = vpop.f32.mrb[42].mxu1  ;;  %v3949_v30 = vsub.f32 %v3917_v11, %v3933_v55  ;;  %v3905_v15 = vmul.f32 3.1414795, %v7139_v47  ;;  %v3937_v42 = vmul.f32 0.00011315942, %v7139_v47  ;;  %v3969_v18 = vmul.f32 1.9841873e-09, %v7139_v47 }
 0x762   : > { %v3830_v20 = vadd.f32 %v3829_v44, %v7765_v23  ;;  %v3831_v8 = vpop.f32.mrb[43].mxu1  ;;  %v7158_v21 = vsub.f32 %v3948_v36, %v3964_v58  ;;  %v3920_v41 = vsub.f32 %v3747_v16, %v3904_v54  ;;  %v3861_v19 = vmul.f32 0.31830987, %v7148_v17 }
 0x763   : > { %v3832_v24 = vadd.f32 %v3831_v8, %v7765_v23  ;;  %v7162_v45 = vsub.f32 %v3949_v30, %v3965_v50  ;;  %v3921_v53 = vsub.f32 %v3749_v34, %v3905_v15  ;;  %v7197_v48 = vmul.f32 0.5, %v7127_v6 }
 0x764   : > { %v3854_v39 = vmul.f32 0.31830987, %v3830_v20  ;;  %v3996_v33 = vmul.f32 %v7158_v21, %v7158_v21  ;;  %v3952_v51 = vsub.f32 %v3920_v41, %v3936_v4  ;;  %v3876_v44 = vadd.f32 0.5, %v3860_v62 }
 0x765   : > { %v3855_v61 = vmul.f32 0.31830987, %v3832_v24  ;;  %v3835_v12 = vpop.f32.mrb[44].mxu1  ;;  %v7170_v52 = vmul.f32 %v7162_v45, %v7162_v45  ;;  %v3953_v3 = vsub.f32 %v3921_v53, %v3937_v42 }
 0x766   : > { %v3870_v22 = vadd.f32 0.5, %v3854_v39  ;;  %v3836_v5 = vadd.f32 %v3835_v12, %v7766_v59  ;;  %v3837_v26 = vpop.f32.mrb[45].mxu1  ;;  %v4012_v25 = vmul.f32 2.608316e-06, %v3996_v33  ;;  %v7173_v63 = vsub.f32 %v3952_v51, %v3968_v38 }
 0x767   : > { %v3871_v23 = vadd.f32 0.5, %v3855_v61  ;;  %v3838_v37 = vadd.f32 %v3837_v26, %v7766_v59  ;;  %v7189_v46 = vmul.f32 2.608316e-06, %v7170_v52  ;;  %v7192_v60 = vsub.f32 %v3953_v3, %v3969_v18 }
 0x768   : > { %v7176_v27 = vfloor.f32 %v3870_v22  ;;  %v3858_v32 = vmul.f32 0.31830987, %v3836_v5  ;;  %v4028_v28 = vadd.f32 -0.0001981069, %v4012_v25  ;;  %v7184_v9 = vmul.f32 %v7173_v63, %v7173_v63 }
 0x769   : > { %v7180_v16 = vfloor.f32 %v3871_v23  ;;  %v3859_v43 = vmul.f32 0.31830987, %v3838_v37  ;;  %v7186_v34 = vpop.f32.mrb[46].mxu1  ;;  %v7208_v4 = vmul.f32 %v7192_v60, %v7192_v60  ;;  %v7221_v51 = vfloor.f32 %v3876_v44 }
 0x76a   : > { %v3902_v59 = vmul.f32 3.1414795, %v7176_v27  ;;  %v7194_v40 = vpop.f32.mrb[47].mxu1  ;;  %v4044_v49 = vmul.f32 %v4028_v28, %v3996_v33  ;;  %v3934_v2 = vmul.f32 0.00011315942, %v7176_v27  ;;  %v3966_v10 = vmul.f32 1.9841873e-09, %v7176_v27 }
 0x76b   : > { %v3903_v0 = vmul.f32 3.1414795, %v7180_v16  ;;  %v3935_v58 = vmul.f32 0.00011315942, %v7180_v16  ;;  %v4016_v55 = vmul.f32 2.608316e-06, %v7184_v9  ;;  %v3874_v31 = vadd.f32 0.5, %v3858_v32 }
 0x76c   : > { %v3918_v57 = vsub.f32 %v3830_v20, %v3902_v59  ;;  %v4060_v11 = vadd.f32 0.008333079, %v4044_v49  ;;  %v3875_v36 = vadd.f32 0.5, %v3859_v43  ;;  %v3967_v39 = vmul.f32 1.9841873e-09, %v7180_v16 }
 0x76d   : > { %v3919_v50 = vsub.f32 %v3832_v24, %v3903_v0  ;;  %v7204_v54 = vpop.f32.mrb[48].mxu1  ;;  %v4032_v8 = vadd.f32 -0.0001981069, %v4016_v55  ;;  %v7210_v15 = vfloor.f32 %v3874_v31  ;;  %v3877_v3 = vadd.f32 0.5, %v3861_v19 }
 0x76e   : > { %v3950_v30 = vsub.f32 %v3918_v57, %v3934_v2  ;;  %v7212_v20 = vpop.f32.mrb[49].mxu1  ;;  %v4076_v41 = vmul.f32 %v4060_v11, %v3996_v33  ;;  %v7215_v53 = vfloor.f32 %v3875_v36  ;;  %v3908_v19 = vmul.f32 3.1414795, %v7221_v51 }
 0x76f   : > { %v3951_v38 = vsub.f32 %v3919_v50, %v3935_v58  ;;  %v4048_v42 = vmul.f32 %v4032_v8, %v7184_v9  ;;  %v3906_v61 = vmul.f32 3.1414795, %v7210_v15  ;;  %v3938_v32 = vmul.f32 0.00011315942, %v7210_v15 }
 0x770   : > { %v7217_v24 = vsub.f32 %v3950_v30, %v3966_v10  ;;  %v4092_v18 = vadd.f32 -0.1666666, %v4076_v41  ;;  %v3907_v22 = vmul.f32 3.1414795, %v7215_v53  ;;  %v3970_v28 = vmul.f32 1.9841873e-09, %v7210_v15 }
 0x771   : > { %v7223_v12 = vsub.f32 %v3951_v38, %v3967_v39  ;;  %v4064_v25 = vadd.f32 0.008333079, %v4048_v42  ;;  %v3922_v23 = vsub.f32 %v3836_v5, %v3906_v61  ;;  %v3939_v59 = vmul.f32 0.00011315942, %v7215_v53 }
 0x772   : > { %v7228_v26 = vmul.f32 %v7217_v24, %v7217_v24  ;;  %v4108_v62 = vmul.f32 %v4092_v18, %v3996_v33  ;;  %v3923_v43 = vsub.f32 %v3838_v37, %v3907_v22  ;;  %v3971_v57 = vmul.f32 1.9841873e-09, %v7215_v53 }
 0x773   : > { %v4080_v2 = vmul.f32 %v4064_v25, %v7184_v9  ;;  %v3954_v10 = vsub.f32 %v3922_v23, %v3938_v32  ;;  %v7238_v0 = vmul.f32 %v7223_v12, %v7223_v12  ;;  %v3940_v33 = vmul.f32 0.00011315942, %v7221_v51 }
 0x774   : > { %v4014_v49 = vmul.f32 2.608316e-06, %v7228_v26  ;;  %v3955_v5 = vsub.f32 %v3923_v43, %v3939_v59  ;;  %v3924_v31 = vsub.f32 %v7142_v56, %v3908_v19  ;;  %v7246_v11 = vmul.f32 2.608316e-06, %v7208_v4 }
 0x775   : > { %v4096_v37 = vadd.f32 -0.1666666, %v4080_v2  ;;  %v7242_v55 = vsub.f32 %v3954_v10, %v3970_v28  ;;  %v3972_v36 = vmul.f32 1.9841873e-09, %v7221_v51  ;;  %v7251_v44 = vfloor.f32 %v3877_v3 }
 0x776   : > { %v4030_v58 = vadd.f32 -0.0001981069, %v4014_v49  ;;  %v7248_v50 = vsub.f32 %v3955_v5, %v3971_v57  ;;  %v3956_v38 = vsub.f32 %v3924_v31, %v3940_v33  ;;  %v4124_v39 = vmul.f32 %v4108_v62, %v7158_v21 }
 0x777   : > { %v4112_v8 = vmul.f32 %v4096_v37, %v7184_v9  ;;  %v4002_v41 = vmul.f32 %v7242_v55, %v7242_v55  ;;  %v7259_v56 = vmul.f32 2.608316e-06, %v7238_v0  ;;  %v3909_v61 = vmul.f32 3.1414795, %v7251_v44 }
 0x778   : > { %v4046_v30 = vmul.f32 %v4030_v58, %v7228_v26  ;;  %v7263_v42 = vmul.f32 %v7248_v50, %v7248_v50  ;;  %v7266_v3 = vsub.f32 %v3956_v38, %v3972_v36  ;;  %v3941_v9 = vmul.f32 0.00011315942, %v7251_v44 }
 0x779   : > { %v4018_v22 = vmul.f32 2.608316e-06, %v4002_v41  ;;  %v3925_v25 = vsub.f32 %v7148_v17, %v3909_v61  ;;  %v3973_v23 = vmul.f32 1.9841873e-09, %v7251_v44  ;;  %v3842_v32 = vadd.f32 %v7186_v34, %v7767_v13  ;;  %v7768_v17 = vld [vmem:[#allocation20_spill] sm:$0xff] }
 0x77a   : > { %v4062_v18 = vadd.f32 0.008333079, %v4046_v30  ;;  %v3844_v62 = vadd.f32 %v7194_v40, %v7767_v13  ;;  %v4128_v43 = vmul.f32 %v4112_v8, %v7173_v63  ;;  %v4004_v49 = vmul.f32 %v7266_v3, %v7266_v3 }
 0x77b   : > { %v4034_v59 = vadd.f32 -0.0001981069, %v4018_v22  ;;  %v3957_v2 = vsub.f32 %v3925_v25, %v3941_v9  ;;  %v3862_v10 = vmul.f32 0.31830987, %v3842_v32  ;;  %v3759_v5 = vadd.f32 %v7144_v7, %v7768_v17 }
 0x77c   : > { %v4078_v28 = vmul.f32 %v4062_v18, %v7228_v26  ;;  %v3863_v19 = vmul.f32 0.31830987, %v3844_v62  ;;  %v4020_v34 = vmul.f32 2.608316e-06, %v4004_v49  ;;  %v3761_v13 = vadd.f32 %v7156_v14, %v7768_v17 }
 0x77d   : > { %v4050_v33 = vmul.f32 %v4034_v59, %v4002_v41  ;;  %v7283_v40 = vsub.f32 %v3957_v2, %v3973_v23  ;;  %v3878_v58 = vadd.f32 0.5, %v3862_v10  ;;  %v3864_v31 = vmul.f32 0.31830987, %v3759_v5 }
 0x77e   : > { %v4094_v57 = vadd.f32 -0.1666666, %v4078_v28  ;;  %v3879_v37 = vadd.f32 0.5, %v3863_v19  ;;  %v4036_v30 = vadd.f32 -0.0001981069, %v4020_v34  ;;  %v7294_v22 = vadd.f32 %v4124_v39, %v7158_v21 }
 0x77f   : > { %v4066_v36 = vadd.f32 0.008333079, %v4050_v33  ;;  %v3865_v8 = vmul.f32 0.31830987, %v3761_v13  ;;  %v7287_v38 = vmul.f32 %v7283_v40, %v7283_v40  ;;  %v7289_v61 = vfloor.f32 %v3878_v58 }
 0x780   : > { %v7291_v7 = vfloor.f32 %v3879_v37  ;;  %v3880_v18 = vadd.f32 0.5, %v3864_v31  ;;  %v4052_v9 = vmul.f32 %v4036_v30, %v4004_v49  ;;  %v7297_v23 = vadd.f32 %v4128_v43, %v7173_v63 }
 0x781   : > { %7769 = vst [vmem:[#allocation10_spill] sm:$0xff] %v7289_v61  ;;  %v4082_v14 = vmul.f32 %v4066_v36, %v4002_v41  ;;  %v3881_v25 = vadd.f32 0.5, %v3865_v8  ;;  %v7300_v28 = vmul.f32 2.608316e-06, %v7263_v42  ;;  %v7303_v59 = vmul.f32 2.608316e-06, %v7287_v38 }
 0x782   : > { %7770 = vst [vmem:[#allocation11_spill] sm:$0xff] %v7291_v7  ;;  %v3910_v2 = vmul.f32 3.1414795, %v7289_v61  ;;  %v4110_v10 = vmul.f32 %v4094_v57, %v7228_v26  ;;  %v4068_v33 = vadd.f32 0.008333079, %v4052_v9  ;;  %v3942_v21 = vmul.f32 0.00011315942, %v7289_v61 }
 0x783   : > { %v4098_v19 = vadd.f32 -0.1666666, %v4082_v14  ;;  %v3911_v34 = vmul.f32 3.1414795, %v7291_v7  ;;  %v3943_v63 = vmul.f32 0.00011315942, %v7291_v7  ;;  %v7310_v43 = vfloor.f32 %v3880_v18 }
 0x784   : > { %v3926_v39 = vsub.f32 %v3842_v32, %v3910_v2  ;;  %v4084_v37 = vmul.f32 %v4068_v33, %v4004_v49  ;;  %v3974_v31 = vmul.f32 1.9841873e-09, %v7289_v61  ;;  %v7313_v36 = vfloor.f32 %v3881_v25 }
 0x785   : > { %v4114_v58 = vmul.f32 %v4098_v19, %v4002_v41  ;;  %v3927_v8 = vsub.f32 %v3844_v62, %v3911_v34  ;;  %v3912_v26 = vmul.f32 3.1414795, %v7310_v43  ;;  %v3848_v57 = vadd.f32 %v7204_v54, %v7768_v17 }
 0x786   : > { %v3958_v30 = vsub.f32 %v3926_v39, %v3942_v21  ;;  %v4126_v32 = vmul.f32 %v4110_v10, %v7217_v24  ;;  %v4100_v14 = vadd.f32 -0.1666666, %v4084_v37  ;;  %v3975_v9 = vmul.f32 1.9841873e-09, %v7291_v7 }
 0x787   : > { %v3913_v18 = vmul.f32 3.1414795, %v7313_v36  ;;  %v3959_v2 = vsub.f32 %v3927_v8, %v3943_v63  ;;  %v3928_v19 = vsub.f32 %v3759_v5, %v3912_v26  ;;  %v3944_v25 = vmul.f32 0.00011315942, %v7310_v43 }
 0x788   : > { %v7321_v41 = vsub.f32 %v3958_v30, %v3974_v31  ;;  %v4130_v62 = vmul.f32 %v4114_v58, %v7242_v55  ;;  %v3976_v33 = vmul.f32 1.9841873e-09, %v7310_v43  ;;  %v3945_v54 = vmul.f32 0.00011315942, %v7313_v36 }
 0x789   : > { %v3929_v21 = vsub.f32 %v3761_v13, %v3913_v18  ;;  %v4116_v39 = vmul.f32 %v4100_v14, %v4004_v49  ;;  %v3960_v34 = vsub.f32 %v3928_v19, %v3944_v25  ;;  %v3866_v37 = vmul.f32 0.31830987, %v3848_v57 }
 0x78a   : > { %7771 = vst [vmem:[#allocation25_spill] sm:$0xff] %v7321_v41  ;;  %v7329_v10 = vmul.f32 %v7321_v41, %v7321_v41  ;;  %v3977_v63 = vmul.f32 1.9841873e-09, %v7313_v36  ;;  %v3850_v5 = vadd.f32 %v7212_v20, %v7768_v17  ;;  %v4029_v58 = vadd.f32 -0.0001981069, %v7189_v46 }
 0x78b   : > { %v3961_v31 = vsub.f32 %v3929_v21, %v3945_v54  ;;  %v7336_v13 = vsub.f32 %v3959_v2, %v3975_v9  ;;  %v7338_v8 = vsub.f32 %v3960_v34, %v3976_v33  ;;  %v3882_v49 = vadd.f32 0.5, %v3866_v37 }
 0x78c   : > { %v4022_v30 = vmul.f32 2.608316e-06, %v7329_v10  ;;  %v7341_v26 = vadd.f32 %v4126_v32, %v7217_v24  ;;  %v3867_v18 = vmul.f32 0.31830987, %v3850_v5  ;;  %v4033_v19 = vadd.f32 -0.0001981069, %v7246_v11 }
 0x78d   : > { %7772 = vst [vmem:[#allocation24_spill] sm:$0xff] %v7336_v13  ;;  %v7343_v14 = vsub.f32 %v3961_v31, %v3977_v63  ;;  %v7347_v25 = vadd.f32 %v4130_v62, %v7242_v55  ;;  %v4008_v46 = vmul.f32 %v7338_v8, %v7338_v8  ;;  %v7351_v17 = vfloor.f32 %v3882_v49 }
 0x78e   : > { %v4038_v20 = vadd.f32 -0.0001981069, %v4022_v30  ;;  %v4132_v9 = vmul.f32 %v4116_v39, %v7266_v3  ;;  %v3883_v2 = vadd.f32 0.5, %v3867_v18  ;;  %v4045_v24 = vmul.f32 %v4029_v58, %v7170_v52 }
 0x78f   : > { %7773 = vst [vmem:[#allocation26_spill] sm:$0xff] %v7351_v17  ;;  %v4049_v32 = vmul.f32 %v4033_v19, %v7208_v4  ;;  %v7359_v11 = vmul.f32 %v7336_v13, %v7336_v13  ;;  %v4024_v55 = vmul.f32 2.608316e-06, %v4008_v46  ;;  %v3914_v62 = vmul.f32 3.1414795, %v7351_v17 }
 0x790   : > { %v4054_v33 = vmul.f32 %v4038_v20, %v7329_v10  ;;  %v7364_v21 = vmul.f32 %v7343_v14, %v7343_v14  ;;  %v3946_v54 = vmul.f32 0.00011315942, %v7351_v17  ;;  %v7367_v39 = vfloor.f32 %v3883_v2 }
 0x791   : > { %v4061_v34 = vadd.f32 0.008333079, %v4045_v24  ;;  %v4040_v31 = vadd.f32 -0.0001981069, %v4024_v55  ;;  %v3930_v63 = vsub.f32 %v3848_v57, %v3914_v62  ;;  %v4065_v58 = vadd.f32 0.008333079, %v4049_v32 }
 0x792   : > { %v4070_v37 = vadd.f32 0.008333079, %v4054_v33  ;;  %v3978_v30 = vmul.f32 1.9841873e-09, %v7351_v17  ;;  %v3915_v49 = vmul.f32 3.1414795, %v7367_v39  ;;  %v4173_v57 = vfloor.f32 %v7151_v35 }
 0x793   : > { %v3947_v18 = vmul.f32 0.00011315942, %v7367_v39  ;;  %v4077_v19 = vmul.f32 %v4061_v34, %v7170_v52  ;;  %v4056_v13 = vmul.f32 %v4040_v31, %v4008_v46  ;;  %v3962_v41 = vsub.f32 %v3930_v63, %v3946_v54 }
 0x794   : > { %v4086_v20 = vmul.f32 %v4070_v37, %v7329_v10  ;;  %v4081_v2 = vmul.f32 %v4065_v58, %v7208_v4  ;;  %v3931_v61 = vsub.f32 %v3850_v5, %v3915_v49  ;;  %v4161_v33 = vmul.f32 0.5, %v7139_v47 }
 0x795   : > { %v4093_v24 = vadd.f32 -0.1666666, %v4077_v19  ;;  %v4072_v32 = vadd.f32 0.008333079, %v4056_v13  ;;  %v7377_v55 = vsub.f32 %v3962_v41, %v3978_v30  ;;  %v3979_v62 = vmul.f32 1.9841873e-09, %v7367_v39 }
 0x796   : > { %v4097_v17 = vadd.f32 -0.1666666, %v4081_v2  ;;  %v3963_v7 = vsub.f32 %v3931_v61, %v3947_v18  ;;  %v4177_v37 = vfloor.f32 %v4161_v33  ;;  %v4189_v31 = vmul.f32 2.0, %v4173_v57 }
 0x797   : > { %v4109_v34 = vmul.f32 %v4093_v24, %v7170_v52  ;;  %v4102_v54 = vadd.f32 -0.1666666, %v4086_v20  ;;  %v4088_v63 = vmul.f32 %v4072_v32, %v4008_v46  ;;  %v7383_v5 = vmul.f32 %v7377_v55, %v7377_v55 }
 0x798   : > { %v4113_v58 = vmul.f32 %v4097_v17, %v7208_v4  ;;  %v7386_v35 = vsub.f32 %v3963_v7, %v3979_v62  ;;  %v4193_v13 = vmul.f32 2.0, %v4177_v37  ;;  %v4205_v30 = vsub.f32 %v7129_v1, %v4189_v31 }
 0x799   : > { %v4125_v41 = vmul.f32 %v4109_v34, %v7162_v45  ;;  %v7391_v61 = vadd.f32 %v4132_v9, %v7266_v3  ;;  %v4104_v52 = vadd.f32 -0.1666666, %v4088_v63  ;;  %v4026_v49 = vmul.f32 2.608316e-06, %v7383_v5 }
 0x79a   : > { %v4129_v18 = vmul.f32 %v4113_v58, %v7192_v60  ;;  %v7396_v19 = vmul.f32 2.608316e-06, %v7359_v11  ;;  %v7400_v4 = vmul.f32 %v7386_v35, %v7386_v35  ;;  %v4209_v7 = vsub.f32 %v7139_v47, %v4193_v13 }
 0x79b   : > { %v4221_v17 = vmul.f32 2.0, %v4205_v30  ;;  %v7404_v1 = vmul.f32 %v4102_v54, %v7329_v10  ;;  %v7407_v3 = vmul.f32 2.608316e-06, %v7364_v21  ;;  %v4042_v9 = vadd.f32 -0.0001981069, %v4026_v49 }
 0x79c   : > { %v4141_v20 = vadd.f32 %v4125_v41, %v7162_v45  ;;  %v4120_v2 = vmul.f32 %v4104_v52, %v4008_v46  ;;  %v4145_v24 = vadd.f32 %v4129_v18, %v7192_v60  ;;  %v4225_v33 = vmul.f32 2.0, %v4209_v7 }
 0x79d   : > { %v4160_v57 = vmul.f32 0.5, %v7136_v29  ;;  %v4058_v32 = vmul.f32 %v4042_v9, %v7383_v5  ;;  %v4237_v62 = vsub.f32 1.0, %v4221_v17  ;;  %v4172_v47 = vfloor.f32 %v7197_v48 }
 0x79e   : > { %v4031_v10 = vadd.f32 -0.0001981069, %v7259_v56  ;;  %v7416_v34 = vmul.f32 2.608316e-06, %v7400_v4  ;;  %v4241_v37 = vsub.f32 1.0, %v4225_v33  ;;  %v4159_v48 = vmul.f32 0.5, %v7180_v16 }
 0x79f   : > { %v4176_v31 = vfloor.f32 %v4160_v57  ;;  %v4035_v45 = vadd.f32 -0.0001981069, %v7300_v28  ;;  %v4074_v46 = vadd.f32 0.008333079, %v4058_v32  ;;  %v4253_v54 = vmul.f32 %v4237_v62, %v4141_v20 }
 0x7a0   : > { %v4188_v60 = vmul.f32 2.0, %v4172_v47  ;;  %v4047_v63 = vmul.f32 %v4031_v10, %v7238_v0  ;;  %v4257_v58 = vmul.f32 %v4241_v37, %v4145_v24  ;;  %v4163_v49 = vmul.f32 0.5, %v7215_v53 }
 0x7a1   : > { %v4192_v41 = vmul.f32 2.0, %v4176_v31  ;;  %v4051_v13 = vmul.f32 %v4035_v45, %v7263_v42  ;;  %v4090_v56 = vmul.f32 %v4074_v46, %v7383_v5  ;;  %v4175_v17 = vfloor.f32 %v4159_v48 }
 0x7a2   : > { %v4204_v30 = vsub.f32 %v7127_v6, %v4188_v60  ;;  %v4063_v52 = vadd.f32 0.008333079, %v4047_v63  ;;  %v4670_v18 = vpack.c.bf16 %v4257_v58, %v4253_v54  ;;  %v4136_v9 = vmul.f32 %v4120_v2, %v7338_v8 }
 0x7a3   : > { %v4208_v28 = vsub.f32 %v7136_v29, %v4192_v41  ;;  %v4067_v7 = vadd.f32 0.008333079, %v4051_v13  ;;  %v4179_v33 = vfloor.f32 %v4163_v49  ;;  %v4191_v62 = vmul.f32 2.0, %v4175_v17 }
 0x7a4   : > { %v4220_v20 = vmul.f32 2.0, %v4204_v30  ;;  %v4079_v24 = vmul.f32 %v4063_v52, %v7238_v0  ;;  %4671 = vmatprep.subr.bf16.mxu0 %v4670_v18  ;;  %v4158_v6 = vmul.f32 0.5, %v7176_v27  ;;  %v4106_v47 = vadd.f32 -0.1666666, %v4090_v56 }
 0x7a5   : > { %v4224_v57 = vmul.f32 2.0, %v4208_v28  ;;  %v4083_v32 = vmul.f32 %v4067_v7, %v7263_v42  ;;  %v4195_v31 = vmul.f32 2.0, %v4179_v33  ;;  %v4207_v46 = vsub.f32 %v7180_v16, %v4191_v62 }
 0x7a6   : > { %v4236_v10 = vsub.f32 1.0, %v4220_v20  ;;  %v4095_v37 = vadd.f32 -0.1666666, %v4079_v24  ;;  %v4162_v2 = vmul.f32 0.5, %v7210_v15  ;;  %v7433_v54 = vadd.f32 %v4136_v9, %v7338_v8 }
 0x7a7   : > { %v4240_v29 = vsub.f32 1.0, %v4224_v57  ;;  %v4099_v45 = vadd.f32 -0.1666666, %v4083_v32  ;;  %v4211_v58 = vsub.f32 %v7215_v53, %v4195_v31  ;;  %v4223_v48 = vmul.f32 2.0, %v4207_v46 }
 0x7a8   : > { %v4252_v60 = vmul.f32 %v4236_v10, %v7294_v22  ;;  %v4111_v63 = vmul.f32 %v4095_v37, %v7238_v0  ;;  %v4174_v56 = vfloor.f32 %v4158_v6  ;;  %v7441_v30 = vmul.f32 %v4106_v47, %v7383_v5 }
 0x7a9   : > { %v4256_v41 = vmul.f32 %v4240_v29, %v7297_v23  ;;  %v4115_v13 = vmul.f32 %v4099_v45, %v7263_v42  ;;  %v4227_v52 = vmul.f32 2.0, %v4211_v58  ;;  %v4178_v8 = vfloor.f32 %v4162_v2 }
 0x7aa   : > { %v4127_v16 = vmul.f32 %v4111_v63, %v7223_v12  ;;  %v4239_v18 = vsub.f32 1.0, %v4223_v48  ;;  %v4190_v0 = vmul.f32 2.0, %v4174_v56  ;;  %v4037_v42 = vadd.f32 -0.0001981069, %v7303_v59 }
 0x7ab   : > { %v4672_v49 = vpack.c.bf16 %v4256_v41, %v4252_v60  ;;  %v4131_v22 = vmul.f32 %v4115_v13, %v7248_v50  ;;  %v4243_v28 = vsub.f32 1.0, %v4227_v52  ;;  %v4194_v23 = vmul.f32 2.0, %v4178_v8 }
 0x7ac   : > { %v4143_v53 = vadd.f32 %v4127_v16, %v7223_v12  ;;  %v4206_v5 = vsub.f32 %v7176_v27, %v4190_v0  ;;  %v4041_v17 = vadd.f32 -0.0001981069, %v7407_v3  ;;  %v4165_v9 = vmul.f32 0.5, %v7251_v44 }
 0x7ad   : > { %4673 = vmatpush1.bf16.msra.mxu0 %v4672_v49  ;;  %v4147_v7 = vadd.f32 %v4131_v22, %v7248_v50  ;;  %v4210_v24 = vsub.f32 %v7210_v15, %v4194_v23  ;;  %v4053_v33 = vmul.f32 %v4037_v42, %v7287_v38  ;;  %v4169_v12 = vmul.f32 0.5, %v7313_v36 }
 0x7ae   : > { %v4255_v20 = vmul.f32 %v4239_v18, %v4143_v53  ;;  %v4222_v32 = vmul.f32 2.0, %v4206_v5  ;;  %v4057_v59 = vmul.f32 %v4041_v17, %v7364_v21  ;;  %v4181_v62 = vfloor.f32 %v4165_v9  ;;  %v7774_v17 = vld [vmem:[#allocation11_spill] sm:$0xff] }
 0x7af   : > { %v4259_v57 = vmul.f32 %v4243_v28, %v4147_v7  ;;  %v4226_v6 = vmul.f32 2.0, %v4210_v24  ;;  %v4069_v50 = vadd.f32 0.008333079, %v4053_v33  ;;  %v4185_v47 = vfloor.f32 %v4169_v12 }
 0x7b0   : > { %v4164_v27 = vmul.f32 0.5, %v7221_v51  ;;  %v4238_v10 = vsub.f32 1.0, %v4222_v32  ;;  %v4073_v37 = vadd.f32 0.008333079, %v4057_v59  ;;  %v4197_v31 = vmul.f32 2.0, %v4181_v62 }
 0x7b1   : > { %v4678_v3 = vpack.c.bf16 %v4259_v57, %v4255_v20  ;;  %v4242_v29 = vsub.f32 1.0, %v4226_v6  ;;  %v4085_v15 = vmul.f32 %v4069_v50, %v7287_v38  ;;  %v4201_v45 = vmul.f32 2.0, %v4185_v47 }
 0x7b2   : > { %v4168_v46 = vmul.f32 0.5, %v7310_v43  ;;  %v4254_v2 = vmul.f32 %v4238_v10, %v7341_v26  ;;  %v4089_v60 = vmul.f32 %v4073_v37, %v7364_v21  ;;  %v4213_v63 = vsub.f32 %v7251_v44, %v4197_v31  ;;  %v7775_v37 = vld [vmem:[#allocation10_spill] sm:$0xff] }
 0x7b3   : > { %4679 = vmatprep.subr.bf16.mxu1 %v4678_v3  ;;  %v4180_v58 = vfloor.f32 %v4164_v27  ;;  %v4258_v41 = vmul.f32 %v4242_v29, %v7347_v25  ;;  %v4101_v13 = vadd.f32 -0.1666666, %v4085_v15  ;;  %v4217_v48 = vsub.f32 %v7313_v36, %v4201_v45  ;;  %v7776_v45 = vld [vmem:[#allocation26_spill] sm:$0xff] }
 0x7b4   : > { %v4184_v56 = vfloor.f32 %v4168_v46  ;;  %v4105_v16 = vadd.f32 -0.1666666, %v4089_v60  ;;  %v4229_v52 = vmul.f32 2.0, %v4213_v63  ;;  %v4039_v49 = vadd.f32 -0.0001981069, %v7396_v19 }
 0x7b5   : > { %v4196_v8 = vmul.f32 2.0, %v4180_v58  ;;  %v4680_v22 = vpack.c.bf16 %v4258_v41, %v4254_v2  ;;  %v4117_v18 = vmul.f32 %v4101_v13, %v7287_v38  ;;  %v4233_v26 = vmul.f32 2.0, %v4217_v48  ;;  %v7777_v13 = vld [vmem:[#allocation25_spill] sm:$0xff] }
 0x7b6   : > { %v4200_v0 = vmul.f32 2.0, %v4184_v56  ;;  %v4121_v53 = vmul.f32 %v4105_v16, %v7364_v21  ;;  %v4245_v44 = vsub.f32 1.0, %v4229_v52  ;;  %v4043_v25 = vadd.f32 -0.0001981069, %v7416_v34  ;;  %v7778_v56 = vld [vmem:[#allocation24_spill] sm:$0xff] }
 0x7b7   : > { %v4212_v28 = vsub.f32 %v7221_v51, %v4196_v8  ;;  %4681 = vmatpush1.bf16.msra.mxu1 %v4680_v22  ;;  %v4133_v36 = vmul.f32 %v4117_v18, %v7283_v40  ;;  %v4249_v23 = vsub.f32 1.0, %v4233_v26  ;;  %v4055_v19 = vmul.f32 %v4039_v49, %v7359_v11 }
 0x7b8   : > { %v4216_v42 = vsub.f32 %v7310_v43, %v4200_v0  ;;  %v4137_v7 = vmul.f32 %v4121_v53, %v7343_v14  ;;  %v4059_v5 = vmul.f32 %v4043_v25, %v7400_v4  ;;  %v4167_v21 = vmul.f32 0.5, %v7774_v17  ;;  %v4745_v53 = vld [vmem:[%s7570_s7] sm:$0x1] }
 0x7b9   : > { %v4228_v38 = vmul.f32 2.0, %v4212_v28  ;;  %v4149_v9 = vadd.f32 %v4133_v36, %v7283_v40  ;;  %v4071_v20 = vadd.f32 0.008333079, %v4055_v19  ;;  %v4171_v34 = vmul.f32 0.5, %v7367_v39 }
 0x7ba   : > { %v4232_v51 = vmul.f32 2.0, %v4216_v42  ;;  %v4153_v24 = vadd.f32 %v4137_v7, %v7343_v14  ;;  %v4075_v12 = vadd.f32 0.008333079, %v4059_v5  ;;  %v4183_v43 = vfloor.f32 %v4167_v21  ;;  %v7779_v21 = vld [vmem:[#allocation23_spill] sm:$0xff] }
 0x7bb   : > { %v4244_v33 = vsub.f32 1.0, %v4228_v38  ;;  %v4261_v57 = vmul.f32 %v4245_v44, %v4149_v9  ;;  %v4087_v59 = vmul.f32 %v4071_v20, %v7359_v11  ;;  %v4187_v62 = vfloor.f32 %v4171_v34 }
 0x7bc   : > { %v4248_v32 = vsub.f32 1.0, %v4232_v51  ;;  %v4265_v6 = vmul.f32 %v4249_v23, %v4153_v24  ;;  %v4091_v47 = vmul.f32 %v4075_v12, %v7400_v4  ;;  %v4199_v40 = vmul.f32 2.0, %v4183_v43 }
 0x7bd   : > { %v4260_v50 = vmul.f32 %v4244_v33, %v7391_v61  ;;  %v4103_v3 = vadd.f32 -0.1666666, %v4087_v59  ;;  %v4203_v10 = vmul.f32 2.0, %v4187_v62  ;;  %v4166_v14 = vmul.f32 0.5, %v7775_v37 }
 0x7be   : > { %v4264_v27 = vmul.f32 %v4248_v32, %v7433_v54  ;;  %v4674_v31 = vpack.c.bf16 %v4265_v6, %v4261_v57  ;;  %v4107_v29 = vadd.f32 -0.1666666, %v4091_v47  ;;  %v4215_v15 = vsub.f32 %v7774_v17, %v4199_v40  ;;  %v7780_v57 = vld [vmem:[#allocation19_spill] sm:$0xff] }
 0x7bf   : > { %v4170_v46 = vmul.f32 0.5, %v7776_v45  ;;  %v4119_v60 = vmul.f32 %v4103_v3, %v7359_v11  ;;  %v4219_v61 = vsub.f32 %v7367_v39, %v4203_v10  ;;  %v4182_v63 = vfloor.f32 %v4166_v14 }
 0x7c0   : > { %v4676_v2 = vpack.c.bf16 %v4264_v27, %v4260_v50  ;;  %4675 = vmatprep.subr.bf16.mxu0 %v4674_v31  ;;  %v4123_v58 = vmul.f32 %v4107_v29, %v7400_v4  ;;  %v4231_v54 = vmul.f32 2.0, %v4215_v15  ;;  %v4134_v48 = vmul.f32 %v7404_v1, %v7777_v13 }
 0x7c1   : > { %v4186_v41 = vfloor.f32 %v4170_v46  ;;  %v4135_v16 = vmul.f32 %v4119_v60, %v7778_v56  ;;  %v4235_v52 = vmul.f32 2.0, %v4219_v61  ;;  %v4198_v8 = vmul.f32 2.0, %v4182_v63 }
 0x7c2   : > { %4677 = vmatpush1.bf16.msra.mxu0 %v4676_v2  ;;  %v4138_v49 = vmul.f32 %v7441_v30, %v7377_v55  ;;  %v4139_v11 = vmul.f32 %v4123_v58, %v7386_v35  ;;  %v4247_v26 = vsub.f32 1.0, %v4231_v54  ;;  %v4150_v30 = vadd.f32 %v4134_v48, %v7777_v13 }
 0x7c3   : > { %v4202_v39 = vmul.f32 2.0, %v4186_v41  ;;  %v4151_v22 = vadd.f32 %v4135_v16, %v7778_v56  ;;  %v4214_v4 = vsub.f32 %v7775_v37, %v4198_v8  ;;  %v4251_v0 = vsub.f32 1.0, %v4235_v52 }
 0x7c4   : > { %v4155_v18 = vadd.f32 %v4139_v11, %v7386_v35  ;;  %v4154_v28 = vadd.f32 %v4138_v49, %v7377_v55 }
 0x7c5   : > { %v4218_v1 = vsub.f32 %v7776_v45, %v4202_v39  ;;  %4581 = vmatmul.mubr.msk.f32.vlgmr.msra.gmra.mrb[50].mxu0 %vm1037_vm2, %v4745_v53  ;;  %v4230_v44 = vmul.f32 2.0, %v4214_v4  ;;  %v4263_v25 = vmul.f32 %v4247_v26, %v4151_v22 }
 0x7c6   : > { %v4267_v36 = vmul.f32 %v4251_v0, %v4155_v18 }
 0x7c7   : > { %v4234_v23 = vmul.f32 2.0, %v4218_v1  ;;  %v4246_v35 = vsub.f32 1.0, %v4230_v44 }
 0x7c8   : > { %v4682_v42 = vpack.c.bf16 %v4267_v36, %v4263_v25 }
 0x7c9   : > { %v4250_v19 = vsub.f32 1.0, %v4234_v23  ;;  %v4262_v7 = vmul.f32 %v4246_v35, %v4150_v30 }
 0x7ca   : > { %4683 = vmatprep.subr.bf16.mxu1 %v4682_v42 }
 0x7cb   : > { %v4266_v38 = vmul.f32 %v4250_v19, %v4154_v28 }
 0x7cd   : > { %v4684_v5 = vpack.c.bf16 %v4266_v38, %v4262_v7 }
 0x7cf   : > { %4685 = vmatpush1.bf16.msra.mxu1 %v4684_v5 }
 0x7d2   : > { %4582 = vmatmul.mubr.msk.f32.vlgmr.msra.gmra.mrb[50].mxu1 %vm1037_vm2, %v4745_v53 }
 0x898   : > { %v4334_v17 = vpop.f32.mrb[50].mxu0 }
 0x899   : > { %v4335_v9 = vadd.f32 %v4334_v17, %v7779_v21  ;;  %v4336_v51 = vpop.f32.mrb[51].mxu0 }
 0x89a   : > { %v4337_v55 = vadd.f32 %v4336_v51, %v7779_v21 }
 0x89c   : > { %v4414_v20 = vcombine.low %v4335_v9, %v4337_v55 }
 0x89e   : > { %v4422_v32 = vrot.slane %v4414_v20, %v7780_v57 }
 0x8a5   : > { %v4405_v34 = vpop.f32.mrb[50].mxu1 }
 0x8a6   : > { %v4406_v24 = vadd.f32 %v4405_v34, %v7779_v21  ;;  %v4407_v33 = vpop.f32.mrb[51].mxu1 }
 0x8a7   : > { %v4408_v12 = vadd.f32 %v4407_v33, %v7779_v21 }
 0x8a9   : > { %v4415_v43 = vcombine.low %v4406_v24, %v4408_v12 }
 0x8ab   : > { %v4429_v59 = vrot.slane %v4415_v43, %v7780_v57 }
 0x8ad   : > { %v4430_v62 = vcombine.low %v4422_v32, %v4429_v59 }
 0x8af   : > { %v4437_v6 = vrot.slane %v4430_v62, %v7780_v57 }
 0x8b1   : > { %4583 = vst.msk [vmem:[%s6669_s25 + $0x4] sm:$0xf] %vm6663_vm3, %v4437_v6 }
 0x8b2   : > { %4759 = shalt.err (!%p4756_p3)
}
 0x8b3   : > { %s4760_s23 = scalar_lea.hbm %s7516_s15, 128  ;;  %s4764_s10 = scalar_lea.hbm %s7572_s9, 256 }
 0x8b4   : > { %p4761_p4 = scmp.ne.s32.totalorder %s7516_s15, %s4760_s23  ;;  %p4765_p9 = scmp.lt.u32.totalorder %s7516_s15, %s7572_s9 }
 0x8b5   : > { %p4766_p10 = scmp.lt.u32.totalorder %s4764_s10, %s4760_s23  ;;  %p4768_p12 = scmp.lt.u32.totalorder %s4760_s23, %s7516_s15 }
 0x8b6   : > { %p4762_p7 = pnand %p4761_p4, %p4906_p5 }
 0x8b7   : > { %p4767_p11 = por %p4766_p10, %p4765_p9 }
 0x8b8   : > { %p4763_p8 = pneg %p4762_p7 }
 0x8b9   : > { %p4769_p13 = por %p4768_p12, %p4767_p11 }
 0x8bb   : > { %p4770_p0 = pnand %p4769_p13, %p4763_p8 }
 0x8bd   : > { %4773 = shalt.err (!%p4770_p0)
}
 0x8be   : > { %4686 = dma.vmem_to_hbm [thread:$0]  (%p4906_p5), %s7518_s18, 128, %s7516_s15, %s4442_s26  }
 0x8bf PF: > { %p4692_p1 = scmp.ge.s32.totalorder %s4808_s14, 2  ;;  %s4468_s24 = sand.u32 1, %s4796_s11  }
 0x8c0   : > { %s4469_s8 = scalar_lea.sflag [#allocation4], %s4468_s24 }
 0x8c1   : > { %p4689_p2 = pnand %p4692_p1, %p4910_p6 }
 0x8c3   : > { %4791 = dma.done.wait (!%p4689_p2), %s4469_s8, 128  }
 0x8c4   : > { %4793 = vsyncadd (!%p4689_p2), %s4469_s8, 4294967168  ;;  %p21_p3 = scmp.ge.s32.totalorder %s4893_s16, 4   ;;  %s7782_s11 = smov %s4800_s12 }
 0x8c5   : > { %s7783_s12 = smov %s4804_s13  ;;  %s7784_s13 = smov %s4904_s19 }
 0x8c6   : > { %s7785_s14 = smov %s4893_s16  ;;  %23 = sbr.rel (!%p21_p3) target bundleno = 6 (0x6), region = 93 }
 0x8cd   :  { %4474 = vsyncpa [#allocation4], 1 }
 0x8ce   :  { %4476 = vsyncpa [#allocation4 + $0x1], 1 }

// kernel: tpu_custom_call.1
= control target key start
LH: loop header
LB: loop body
LE: loop exit
PB: predicated region body
PF: predicated region fallthrough
CT: control target
= control target key end

     0   :  { %s7563_s0 = inlined_call_operand.vmem [shape: f32[2,2048], index: 0, kind: input, shape index: {}]   ;;  %s7564_s1 = inlined_call_operand.vmem [shape: f32[32,2], index: 1, kind: input, shape index: {}]   ;;  %s7565_s2 = inlined_call_operand.vmem [shape: f32[32,1], index: 2, kind: input, shape index: {}]   ;;  %s7566_s3 = inlined_call_operand.vmem [shape: f32[32,32], index: 3, kind: input, shape index: {}]   ;;  %s7567_s4 = inlined_call_operand.vmem [shape: f32[32,1], index: 4, kind: input, shape index: {}]   ;;  %s7568_s5 = inlined_call_operand.vmem [shape: f32[32,32], index: 5, kind: input, shape index: {}]   ;;  %s7569_s6 = inlined_call_operand.vmem [shape: f32[32,1], index: 6, kind: input, shape index: {}]   ;;  %s7570_s7 = inlined_call_operand.vmem [shape: f32[1,32], index: 7, kind: input, shape index: {}]   ;;  %s7571_s8 = inlined_call_operand.<no memory space> [shape: f32[1,1], index: 8, kind: input, shape index: {}]   ;;  %s7572_s9 = inlined_call_operand.hbm [shape: f32[1,2048], index: 9, kind: output, shape index: {}]  }
   0x1   :  { %v14_v0 = vstv %s7571_s8 }
   0x2   :  { %15 = vst [vmem:[#allocation2] sm:$0x1] %v14_v0 }
   0x3   :  { %16 = vsyncpa [#allocation4], 0 }
   0x4   :  { %18 = vsyncpa [#allocation4 + $0x1], 0  ;;  %s4868_s11 = smov 0   ;;  %s4870_s12 = smov 0  }
   0x5   :  { %s4872_s13 = smov 0   ;;  %s4874_s14 = smov 0  }
   0x6 LB: > { %s4889_s8 = sadd.s32 4294967295, %s4808_s14   ;;  %s4515_s15 = sadd.s32 4294967294, %s4808_s14   ;;  %s4808_s14 = sphi %s4874_s14, %s7785_s14   ;;  %s4804_s13 = sphi %s4872_s13, %s7784_s13   ;;  %s4800_s12 = sphi %s4870_s12, %s7783_s12   ;;  %s4796_s11 = sphi %s4868_s11, %s7782_s11  }
   0x7   : > { %s4893_s16 = sadd.s32 1, %s4808_s14   ;;  %s225_s17 = sadd.s32 1, %s4804_s13 }
   0x8   : > { %s222_s18 = ssub.s32 %s4808_s14, %s4893_s16  ;;  %p235_p0 = scmp.ne.s32.totalorder %s4804_s13, %s4800_s12 }
   0x9   : > { %p223_p1 = scmp.eq.s32.totalorder %s222_s18, 0  ;;  %p236_p2 = scmp.eq.s32.totalorder %s4889_s8, 1 }
   0xa   : > { %p241_p3 = scmp.ne.s32.totalorder %s4800_s12, %s4796_s11  ;;  %p242_p4 = scmp.eq.s32.totalorder %s4515_s15, 1 }
   0xb   : > { %s4904_s19 = scalar_select %p223_p1, %s4804_s13, %s225_s17  }
   0xc   : > { %p4906_p5 = por %p236_p2, %p235_p0  ;;  %p4910_p6 = por %p242_p4, %p241_p3 }
   0xd   : > { %p4518_p7 = scmp.ge.s32.totalorder %s4808_s14, 1  ;;  %p293_p8 = scmp.lt.s32.totalorder %s4808_s14, 3 }
   0xf   : > { %p294_p9 = pnand %p4518_p7, %p293_p8 }
  0x11   : > { %297 = sbr.rel (%p294_p9) target bundleno = 2239 (0x8bf), region = 56 }
  0x18   : > { %s4520_s22 = sshll.u32 %s4889_s8, 3  ;;  %v7573_v1 = vlaneseq  ;;  %v4810_v2 = vmov 1983009808   ;;  %v7574_v5 = vmov 0.0   ;;  %v349_v6 = vld [vmem:[%s7565_s2] sm:$0xff]  ;;  %v4812_v8 = vmov 0  }
  0x19   : > { %p330_p10 = scmp.lt.s32.totalorder %s4520_s22, 15  ;;  %v386_v3 = vunpack.c.l.s4 %v4810_v2  ;;  %487 = vmatprep.mubr.f32.mxu0 %v7574_v5  ;;  %576 = vmatprep.mubr.f32.mxu1 %v7574_v5  ;;  %v351_v9 = vld [vmem:[%s7565_s2 + $0x10] sm:$0xff]  ;;  %v350_v11 = vld [vmem:[%s7565_s2 + $0x8] sm:$0xff]  ;;  %v352_v12 = vld [vmem:[%s7565_s2 + $0x18] sm:$0xff]  ;;  %vm414_vm0 = vcmask 1041408   ;;  %vm401_vm1 = vcmask 15360  }
  0x1a   : > { %v4918_v4 = vshrl.u32 %v7573_v1, 7  ;;  %4729 = vset.pattern.permute.xlu0 %v4812_v8  ;;  %4730 = vset.pattern.permute.xlu1 %v4812_v8  ;;  %v353_v16 = vld [vmem:[%s7567_s4] sm:$0xff]  ;;  %v354_v19 = vld [vmem:[%s7567_s4 + $0x8] sm:$0xff]  ;;  %v355_v22 = vld [vmem:[%s7567_s4 + $0x10] sm:$0xff]  ;;  %vm1037_vm2 = vcmask 261120   ;;  %s326_s23 = sand.u32 1, %s4800_s12  }
  0x1b   : > { %s7787_s22 = smov (!%p330_p10, %s4520_s22), 15  ;;  %v387_v7 = vunpack.c.0.s8 %v386_v3  ;;  %365 = vperm.xlu0 %4729, %v349_v6   ;;  %375 = vperm.xlu1 %4730, %v351_v9   ;;  %v336_v20 = vld [vmem:[%s7564_s1] sm:$0xff]  ;;  %v356_v23 = vld [vmem:[%s7567_s4 + $0x18] sm:$0xff]  ;;  %v337_v24 = vld [vmem:[%s7564_s1 + $0x8] sm:$0xff]  ;;  %s4519_s24 = sshll.u32 %s326_s23, 3 }
  0x1c   : > { %7674 = vst [vmem:[#allocation6_spill] sm:$0xff] %v4918_v4  ;;  %s4521_s27 = sshll.u32 %s7787_s22, 1  ;;  %v357_v25 = vld [vmem:[%s7569_s6] sm:$0xff]  ;;  %v358_v26 = vld [vmem:[%s7569_s6 + $0x8] sm:$0xff]  ;;  %v338_v27 = vld [vmem:[%s7564_s1 + $0x10] sm:$0xff]  ;;  %s6669_s25 = scalar_lea.vmem [#allocation3], %s4519_s24 }
  0x1d   : > { %v4929_v10 = vsub.s32 %v387_v7, %v4918_v4  ;;  %s4937_s15 = scalar_lea.vmem %s7563_s0, %s4521_s27  ;;  %v359_v28 = vld [vmem:[%s7569_s6 + $0x10] sm:$0xff]  ;;  %v360_v29 = vld [vmem:[%s7569_s6 + $0x18] sm:$0xff]  ;;  %v361_v31 = vld [vmem:[#allocation2] sm:$0x1]  ;;  %s4589_s17 = sshll.u32 %s4889_s8, 7 }
  0x1e   : > { %v362_v13 = vld [vmem:[%s4937_s15] sm:$0xff]  ;;  %v339_v30 = vld [vmem:[%s7564_s1 + $0x18] sm:$0xff]  ;;  %s4456_s18 = sshll.u32 %s6669_s25, 4  ;;  %s4442_s26 = scalar_lea.sflag [#allocation4], %s326_s23  ;;  %s7518_s18 = int_to_ptr.vmem [resolvable:$true] %s4456_s18 }
  0x1f   : > { %7675 = vst [vmem:[#allocation7_spill] sm:$0xff] %v4929_v10  ;;  %v391_v14 = vrot.slane %v362_v13, %v4929_v10  ;;  %v384_v15 = vcombine.high %v362_v13, %v362_v13  ;;  %370 = vperm.xlu0 %4729, %v350_v11   ;;  %380 = vperm.xlu1 %4730, %v352_v12   ;;  %s4746_s8 = scalar_lea.vmem %s7518_s18, 128  ;;  %s4814_s27 = smov [#allocation3]  }
  0x20   : > { %p4747_p11 = scmp.ne.s32.totalorder %s7518_s18, %s4746_s8  ;;  %s4750_s28 = sshll.u32 %s4814_s27, 4  ;;  %s4751_s28 = int_to_ptr.vmem [resolvable:$false] %s4750_s28 }
  0x21   : > { %v399_v17 = vcombine.high %v391_v14, %v391_v14  ;;  %v398_v18 = vrot.slane %v384_v15, %v4929_v10  ;;  %s4752_s29 = scalar_lea.vmem %s4751_s28, 256  ;;  %p4753_p0 = scmp.lt.s32.totalorder %s7518_s18, %s4751_s28 }
  0x22   : > { %p4748_p12 = pnand %p4747_p11, %p4906_p5  ;;  %p4754_p1 = scmp.lt.s32.totalorder %s4752_s29, %s4746_s8 }
  0x23   : > { %4522 = vmatprep.subr.msk.mxu0 %vm414_vm0, %v399_v17  ;;  %v400_v21 = vcombine.high %v398_v18, %v398_v18  ;;  %1019 = vperm.xlu0 %4729, %v353_v16  }
  0x24   : > { %4523 = vmatpush1.msk.msra.mxu0 %vm414_vm0, %v391_v14  ;;  %1024 = vperm.xlu1 %4730, %v354_v19   ;;  %p4749_p13 = pneg %p4748_p12  ;;  %p4755_p2 = por %p4754_p1, %p4753_p0 }
  0x25   : > { %4524 = vmatmul.mubr.msk.f32.vlgmr.msra.gmra.mrb[0].mxu0 %vm401_vm1, %v336_v20  ;;  %4528 = vmatprep.subr.msk.mxu1 %vm414_vm0, %v400_v21 }
  0x26   : > { %4529 = vmatpush1.msk.msra.mxu1 %vm414_vm0, %v398_v18  ;;  %493 = vmatprep.mubr.f32.mxu0 %v7574_v5  ;;  %p4756_p3 = pnand %p4755_p2, %p4749_p13 }
  0x27   : > { %4530 = vmatmul.mubr.msk.f32.vlgmr.msra.gmra.mrb[0].mxu1 %vm401_vm1, %v336_v20  ;;  %1029 = vperm.xlu0 %4729, %v355_v22  }
  0x28   : > { %582 = vmatprep.mubr.f32.mxu1 %v7574_v5  ;;  %1034 = vperm.xlu1 %4730, %v356_v23  }
  0x29   : > { %4525 = vmatmul.mubr.msk.f32.gmra.mrb[2].mxu0 %vm401_vm1, %v337_v24 }
  0x2a   : > { %499 = vmatprep.mubr.f32.mxu0 %v7574_v5 }
  0x2b   : > { %4531 = vmatmul.mubr.msk.f32.gmra.mrb[2].mxu1 %vm401_vm1, %v337_v24  ;;  %1646 = vperm.xlu0 %4729, %v357_v25  }
  0x2c   : > { %588 = vmatprep.mubr.f32.mxu1 %v7574_v5  ;;  %1651 = vperm.xlu1 %4730, %v358_v26  }
  0x2d   : > { %4526 = vmatmul.mubr.msk.f32.gmra.mrb[4].mxu0 %vm401_vm1, %v338_v27 }
  0x2e   : > { %505 = vmatprep.mubr.f32.mxu0 %v7574_v5 }
  0x2f   : > { %4532 = vmatmul.mubr.msk.f32.gmra.mrb[4].mxu1 %vm401_vm1, %v338_v27  ;;  %1656 = vperm.xlu0 %4729, %v359_v28  }
  0x30   : > { %594 = vmatprep.mubr.f32.mxu1 %v7574_v5  ;;  %1661 = vperm.xlu1 %4730, %v360_v29  }
  0x31   : > { %4527 = vmatmul.mubr.msk.f32.gmra.mrb[6].mxu0 %vm401_vm1, %v339_v30 }
  0x32   : > { %1114 = vmatprep.mubr.f32.mxu0 %v7574_v5 }
  0x33   : > { %4533 = vmatmul.mubr.msk.f32.gmra.mrb[6].mxu1 %vm401_vm1, %v339_v30  ;;  %2272 = vperm.xlu0 %4729, %v361_v31  }
  0x34   : > { %1203 = vmatprep.mubr.f32.mxu1 %v7574_v5 }
  0x9a   : > { %v5001_v32 = vpop.permute.xlu0 %365 }
  0x9b   : > { %7676 = vst [vmem:[#allocation8_spill] sm:$0xff] %v5001_v32 }
  0x9e   : > { %v5006_v41 = vpop.permute.xlu0 %370 }
  0x9f   : > { %7677 = vst [vmem:[#allocation9_spill] sm:$0xff] %v5006_v41 }
  0xf8   : > { %v489_v33 = vpop.f32.mrb[0].mxu0 }
  0xf9   : > { %v490_v34 = vadd.f32 %v489_v33, %v5001_v32  ;;  %v491_v35 = vpop.f32.mrb[1].mxu0 }
  0xfa   : > { %v492_v36 = vadd.f32 %v491_v35, %v5001_v32  ;;  %v578_v37 = vpop.f32.mrb[0].mxu1 }
  0xfb   : > { %v601_v38 = vmul.f32 0.31830987, %v490_v34  ;;  %v579_v39 = vadd.f32 %v578_v37, %v5001_v32  ;;  %v580_v40 = vpop.f32.mrb[1].mxu1 }
  0xfc   : > { %v602_v42 = vmul.f32 0.31830987, %v492_v36  ;;  %v581_v43 = vadd.f32 %v580_v40, %v5001_v32  ;;  %v495_v44 = vpop.f32.mrb[2].mxu0 }
  0xfd   : > { %v617_v45 = vadd.f32 0.5, %v601_v38  ;;  %v603_v46 = vmul.f32 0.31830987, %v579_v39  ;;  %v5010_v47 = vadd.f32 %v495_v44, %v5006_v41  ;;  %v497_v48 = vpop.f32.mrb[3].mxu0 }
  0xfe   : > { %v618_v49 = vadd.f32 0.5, %v602_v42  ;;  %v604_v50 = vmul.f32 0.31830987, %v581_v43  ;;  %v5013_v51 = vadd.f32 %v497_v48, %v5006_v41  ;;  %v584_v52 = vpop.f32.mrb[2].mxu1 }
  0xff   : > { %v5015_v53 = vfloor.f32 %v617_v45  ;;  %v619_v54 = vadd.f32 0.5, %v603_v46  ;;  %v586_v55 = vpop.f32.mrb[3].mxu1  ;;  %v605_v58 = vmul.f32 0.31830987, %v5010_v47  ;;  %v5021_v59 = vadd.f32 %v584_v52, %v5006_v41 }
 0x100   : > { %v5017_v56 = vfloor.f32 %v618_v49  ;;  %v620_v57 = vadd.f32 0.5, %v604_v50  ;;  %v5023_v60 = vpop.f32.mrb[4].mxu0  ;;  %v606_v0 = vmul.f32 0.31830987, %v5013_v51  ;;  %v5037_v8 = vadd.f32 %v586_v55, %v5006_v41 }
 0x101   : > { %v649_v61 = vmul.f32 3.1414795, %v5015_v53  ;;  %v681_v62 = vmul.f32 0.00011315942, %v5015_v53  ;;  %v5027_v63 = vfloor.f32 %v619_v54  ;;  %v5030_v2 = vpop.f32.mrb[5].mxu0  ;;  %v713_v12 = vmul.f32 1.9841873e-09, %v5015_v53 }
 0x102   : > { %v650_v3 = vmul.f32 3.1414795, %v5017_v56  ;;  %v682_v6 = vmul.f32 0.00011315942, %v5017_v56  ;;  %v5034_v7 = vfloor.f32 %v620_v57  ;;  %v5039_v9 = vpop.f32.mrb[4].mxu1  ;;  %v621_v23 = vadd.f32 0.5, %v605_v58 }
 0x103   : > { %v665_v11 = vsub.f32 %v490_v34, %v649_v61  ;;  %v651_v13 = vmul.f32 3.1414795, %v5027_v63  ;;  %v683_v14 = vmul.f32 0.00011315942, %v5027_v63  ;;  %v5044_v15 = vpop.f32.mrb[5].mxu1  ;;  %v715_v17 = vmul.f32 1.9841873e-09, %v5027_v63 }
 0x104   : > { %v666_v16 = vsub.f32 %v492_v36, %v650_v3  ;;  %v652_v18 = vmul.f32 3.1414795, %v5034_v7  ;;  %v684_v19 = vmul.f32 0.00011315942, %v5034_v7  ;;  %v5049_v20 = vpop.f32.mrb[6].mxu0  ;;  %v622_v24 = vadd.f32 0.5, %v606_v0 }
 0x105   : > { %v697_v21 = vsub.f32 %v665_v11, %v681_v62  ;;  %v667_v22 = vsub.f32 %v579_v39, %v651_v13  ;;  %v5051_v25 = vpop.f32.mrb[7].mxu0  ;;  %v607_v28 = vmul.f32 0.31830987, %v5021_v59  ;;  %v608_v29 = vmul.f32 0.31830987, %v5037_v8 }
 0x106   : > { %v698_v26 = vsub.f32 %v666_v16, %v682_v6  ;;  %v668_v27 = vsub.f32 %v581_v43, %v652_v18  ;;  %v5055_v30 = vpop.f32.mrb[6].mxu1  ;;  %v5059_v34 = vfloor.f32 %v621_v23  ;;  %v5061_v35 = vfloor.f32 %v622_v24 }
 0x107   : > { %v5057_v31 = vsub.f32 %v697_v21, %v713_v12  ;;  %v699_v33 = vsub.f32 %v667_v22, %v683_v14  ;;  %v5063_v36 = vpop.f32.mrb[7].mxu1  ;;  %v714_v37 = vmul.f32 1.9841873e-09, %v5017_v56  ;;  %v716_v39 = vmul.f32 1.9841873e-09, %v5034_v7  ;;  %v5096_v14 = vpop.permute.xlu1 %375 }
 0x108   : > { %v700_v38 = vsub.f32 %v668_v27, %v684_v19  ;;  %v623_v40 = vadd.f32 0.5, %v607_v28  ;;  %v653_v44 = vmul.f32 3.1414795, %v5059_v34  ;;  %v685_v45 = vmul.f32 0.00011315942, %v5059_v34  ;;  %7678 = vst [vmem:[#allocation10_spill] sm:$0xff] %v5096_v14 }
 0x109   : > { %v745_v42 = vmul.f32 %v5057_v31, %v5057_v31  ;;  %v5069_v43 = vsub.f32 %v699_v33, %v715_v17  ;;  %v5073_v46 = vsub.f32 %v698_v26, %v714_v37  ;;  %v654_v49 = vmul.f32 3.1414795, %v5061_v35 }
 0x10a   : > { %v5075_v48 = vsub.f32 %v700_v38, %v716_v39  ;;  %v624_v50 = vadd.f32 0.5, %v608_v29  ;;  %v669_v55 = vsub.f32 %v5010_v47, %v653_v44  ;;  %v686_v57 = vmul.f32 0.00011315942, %v5061_v35 }
 0x10b   : > { %v761_v52 = vmul.f32 2.608316e-06, %v745_v42  ;;  %v747_v54 = vmul.f32 %v5069_v43, %v5069_v43  ;;  %v717_v58 = vmul.f32 1.9841873e-09, %v5059_v34  ;;  %v670_v61 = vsub.f32 %v5013_v51, %v654_v49 }
 0x10c   : > { %v701_v3 = vsub.f32 %v669_v55, %v685_v45  ;;  %v5084_v6 = vfloor.f32 %v623_v40  ;;  %v5088_v11 = vmul.f32 %v5073_v46, %v5073_v46  ;;  %v5092_v12 = vmul.f32 %v5075_v48, %v5075_v48 }
 0x10d   : > { %v777_v62 = vadd.f32 -0.0001981069, %v761_v52  ;;  %v763_v0 = vmul.f32 2.608316e-06, %v747_v54  ;;  %v702_v47 = vsub.f32 %v670_v61, %v686_v57  ;;  %v5094_v13 = vfloor.f32 %v624_v50 }
 0x10e   : > { %v5098_v17 = vsub.f32 %v701_v3, %v717_v58  ;;  %v655_v18 = vmul.f32 3.1414795, %v5084_v6  ;;  %v718_v19 = vmul.f32 1.9841873e-09, %v5061_v35  ;;  %v687_v21 = vmul.f32 0.00011315942, %v5084_v6 }
 0x10f   : > { %v793_v16 = vmul.f32 %v777_v62, %v745_v42  ;;  %v779_v51 = vadd.f32 -0.0001981069, %v763_v0  ;;  %v656_v22 = vmul.f32 3.1414795, %v5094_v13  ;;  %v502_v23 = vadd.f32 %v5023_v60, %v5096_v14 }
 0x110   : > { %v5108_v27 = vmul.f32 %v5098_v17, %v5098_v17  ;;  %v671_v28 = vsub.f32 %v5021_v59, %v655_v18  ;;  %v5111_v29 = vsub.f32 %v702_v47, %v718_v19  ;;  %v719_v33 = vmul.f32 1.9841873e-09, %v5084_v6 }
 0x111   : > { %v809_v24 = vadd.f32 0.008333079, %v793_v16  ;;  %v795_v26 = vmul.f32 %v779_v51, %v747_v54  ;;  %v672_v37 = vsub.f32 %v5037_v8, %v656_v22  ;;  %v688_v38 = vmul.f32 0.00011315942, %v5094_v13 }
 0x112   : > { %v765_v60 = vmul.f32 2.608316e-06, %v5108_v27  ;;  %v703_v44 = vsub.f32 %v671_v28, %v687_v21  ;;  %v720_v49 = vmul.f32 1.9841873e-09, %v5094_v13  ;;  %v609_v50 = vmul.f32 0.31830987, %v502_v23 }
 0x113   : > { %v825_v39 = vmul.f32 %v809_v24, %v745_v42  ;;  %v811_v40 = vadd.f32 0.008333079, %v795_v26  ;;  %v704_v45 = vsub.f32 %v672_v37, %v688_v38  ;;  %v504_v59 = vadd.f32 %v5030_v2, %v5096_v14 }
 0x114   : > { %v781_v57 = vadd.f32 -0.0001981069, %v765_v60  ;;  %v5120_v58 = vsub.f32 %v703_v44, %v719_v33  ;;  %v625_v61 = vadd.f32 0.5, %v609_v50  ;;  %v5126_v0 = vadd.f32 %v5039_v9, %v5096_v14 }
 0x115   : > { %v841_v52 = vadd.f32 -0.1666666, %v825_v39  ;;  %v827_v55 = vmul.f32 %v811_v40, %v747_v54  ;;  %v5122_v8 = vsub.f32 %v704_v45, %v720_v49  ;;  %v610_v62 = vmul.f32 0.31830987, %v504_v59 }
 0x116   : > { %v797_v47 = vmul.f32 %v781_v57, %v5108_v27  ;;  %v5131_v16 = vmul.f32 %v5111_v29, %v5111_v29  ;;  %v751_v2 = vmul.f32 %v5120_v58, %v5120_v58  ;;  %v5136_v18 = vmul.f32 2.608316e-06, %v5088_v11 }
 0x117   : > { %v843_v3 = vadd.f32 -0.1666666, %v827_v55  ;;  %v857_v51 = vmul.f32 %v841_v52, %v745_v42  ;;  %v5138_v19 = vfloor.f32 %v625_v61  ;;  %v626_v21 = vadd.f32 0.5, %v610_v62  ;;  %v5164_v61 = vpop.permute.xlu1 %380 }
 0x118   : > { %v813_v9 = vadd.f32 0.008333079, %v797_v47  ;;  %v767_v24 = vmul.f32 2.608316e-06, %v751_v2  ;;  %v5142_v26 = vmul.f32 %v5122_v8, %v5122_v8  ;;  %v611_v42 = vmul.f32 0.31830987, %v5126_v0 }
 0x119   : > { %v859_v22 = vmul.f32 %v843_v3, %v747_v54  ;;  %v657_v28 = vmul.f32 3.1414795, %v5138_v19  ;;  %v689_v33 = vmul.f32 0.00011315942, %v5138_v19  ;;  %v5146_v37 = vfloor.f32 %v626_v21  ;;  %7679 = vst [vmem:[#allocation11_spill] sm:$0xff] %v5164_v61 }
 0x11a   : > { %v5150_v38 = vmul.f32 2.608316e-06, %v5092_v12  ;;  %v829_v39 = vmul.f32 %v813_v9, %v5108_v27  ;;  %v5154_v54 = vmul.f32 2.608316e-06, %v5131_v16  ;;  %v783_v40 = vadd.f32 -0.0001981069, %v767_v24 }
 0x11b   : > { %v873_v60 = vmul.f32 %v857_v51, %v5057_v31  ;;  %v673_v44 = vsub.f32 %v502_v23, %v657_v28  ;;  %v658_v45 = vmul.f32 3.1414795, %v5146_v37  ;;  %v690_v49 = vmul.f32 0.00011315942, %v5146_v37 }
 0x11c   : > { %v875_v50 = vmul.f32 %v859_v22, %v5069_v43  ;;  %v799_v52 = vmul.f32 %v783_v40, %v751_v2  ;;  %v5161_v55 = vmul.f32 2.608316e-06, %v5142_v26  ;;  %v721_v57 = vmul.f32 1.9841873e-09, %v5138_v19 }
 0x11d   : > { %v705_v62 = vsub.f32 %v673_v44, %v689_v33  ;;  %v674_v3 = vsub.f32 %v504_v59, %v658_v45  ;;  %v627_v47 = vadd.f32 0.5, %v611_v42  ;;  %v593_v23 = vadd.f32 %v5044_v15, %v5096_v14 }
 0x11e   : > { %v845_v51 = vadd.f32 -0.1666666, %v829_v39  ;;  %v815_v21 = vadd.f32 0.008333079, %v799_v52  ;;  %v508_v9 = vadd.f32 %v5049_v20, %v5164_v61  ;;  %v510_v22 = vadd.f32 %v5051_v25, %v5164_v61 }
 0x11f   : > { %v5172_v24 = vsub.f32 %v705_v62, %v721_v57  ;;  %v706_v28 = vsub.f32 %v674_v3, %v690_v49  ;;  %v5174_v40 = vfloor.f32 %v627_v47  ;;  %v612_v1 = vmul.f32 0.31830987, %v593_v23 }
 0x120   : > { %v831_v33 = vmul.f32 %v815_v21, %v751_v2  ;;  %v722_v59 = vmul.f32 1.9841873e-09, %v5146_v37  ;;  %v613_v42 = vmul.f32 0.31830987, %v508_v9  ;;  %v614_v44 = vmul.f32 0.31830987, %v510_v22 }
 0x121   : > { %v5178_v15 = vadd.f32 %v873_v60, %v5057_v31  ;;  %v5181_v39 = vadd.f32 %v875_v50, %v5069_v43  ;;  %v753_v20 = vmul.f32 %v5172_v24, %v5172_v24  ;;  %v659_v25 = vmul.f32 3.1414795, %v5174_v40 }
 0x122   : > { %v861_v45 = vmul.f32 %v845_v51, %v5108_v27  ;;  %v847_v49 = vadd.f32 -0.1666666, %v831_v33  ;;  %v5187_v52 = vsub.f32 %v706_v28, %v722_v59  ;;  %v628_v57 = vadd.f32 0.5, %v612_v1 }
 0x123   : > { %v769_v62 = vmul.f32 2.608316e-06, %v753_v20  ;;  %v675_v3 = vsub.f32 %v5126_v0, %v659_v25  ;;  %v691_v31 = vmul.f32 0.00011315942, %v5174_v40  ;;  %v629_v60 = vadd.f32 0.5, %v613_v42 }
 0x124   : > { %v863_v47 = vmul.f32 %v847_v49, %v751_v2  ;;  %v723_v43 = vmul.f32 1.9841873e-09, %v5174_v40  ;;  %v5192_v50 = vfloor.f32 %v628_v57  ;;  %v630_v21 = vadd.f32 0.5, %v614_v44 }
 0x125   : > { %v785_v5 = vadd.f32 -0.0001981069, %v769_v62  ;;  %v707_v14 = vsub.f32 %v675_v3, %v691_v31  ;;  %v5194_v41 = vfloor.f32 %v629_v60  ;;  %v597_v27 = vadd.f32 %v5055_v30, %v5164_v61 }
 0x126   : > { %v877_v1 = vmul.f32 %v861_v45, %v5098_v17  ;;  %v879_v0 = vmul.f32 %v863_v47, %v5120_v58  ;;  %v5202_v51 = vmul.f32 %v5187_v52, %v5187_v52  ;;  %v660_v2 = vmul.f32 3.1414795, %v5192_v50 }
 0x127   : > { %v801_v28 = vmul.f32 %v785_v5, %v753_v20  ;;  %v5205_v33 = vsub.f32 %v707_v14, %v723_v43  ;;  %v692_v59 = vmul.f32 0.00011315942, %v5192_v50  ;;  %v661_v42 = vmul.f32 3.1414795, %v5194_v41 }
 0x128   : > { %v676_v44 = vsub.f32 %v593_v23, %v660_v2  ;;  %v724_v30 = vmul.f32 1.9841873e-09, %v5192_v50  ;;  %v693_v25 = vmul.f32 0.00011315942, %v5194_v41  ;;  %v5211_v45 = vfloor.f32 %v630_v21 }
 0x129   : > { %7680 = vst [vmem:[#allocation12_spill] sm:$0xff] %v5205_v33  ;;  %v817_v49 = vadd.f32 0.008333079, %v801_v28  ;;  %v5215_v57 = vmul.f32 %v5205_v33, %v5205_v33  ;;  %v677_v62 = vsub.f32 %v508_v9, %v661_v42  ;;  %v615_v5 = vmul.f32 0.31830987, %v597_v27 }
 0x12a   : > { %v708_v14 = vsub.f32 %v676_v44, %v692_v59  ;;  %v725_v3 = vmul.f32 1.9841873e-09, %v5194_v41  ;;  %v662_v31 = vmul.f32 3.1414795, %v5211_v45  ;;  %v694_v23 = vmul.f32 0.00011315942, %v5211_v45 }
 0x12b   : > { %v833_v60 = vmul.f32 %v817_v49, %v753_v20  ;;  %v771_v47 = vmul.f32 2.608316e-06, %v5215_v57  ;;  %v709_v43 = vsub.f32 %v677_v62, %v693_v25  ;;  %v631_v21 = vadd.f32 0.5, %v615_v5 }
 0x12c   : > { %v5221_v2 = vsub.f32 %v708_v14, %v724_v30  ;;  %v678_v28 = vsub.f32 %v510_v22, %v662_v31  ;;  %v726_v32 = vmul.f32 1.9841873e-09, %v5211_v45  ;;  %v599_v9 = vadd.f32 %v5063_v36, %v5164_v61 }
 0x12d   : > { %v849_v59 = vadd.f32 -0.1666666, %v833_v60  ;;  %v787_v42 = vadd.f32 -0.0001981069, %v771_v47  ;;  %v5226_v44 = vsub.f32 %v709_v43, %v725_v3  ;;  %v5228_v4 = vfloor.f32 %v631_v21 }
 0x12e   : > { %7681 = vst [vmem:[#allocation13_spill] sm:$0xff] %v5221_v2  ;;  %v710_v10 = vsub.f32 %v678_v28, %v694_v23  ;;  %v616_v49 = vmul.f32 0.31830987, %v599_v9  ;;  %v778_v33 = vadd.f32 -0.0001981069, %v5136_v18  ;;  %v5237_v5 = vadd.f32 %v877_v1, %v5098_v17 }
 0x12f   : > { %7682 = vst [vmem:[#allocation14_spill] sm:$0xff] %v5228_v4  ;;  %v782_v25 = vadd.f32 -0.0001981069, %v5154_v54  ;;  %v865_v30 = vmul.f32 %v849_v59, %v753_v20  ;;  %v803_v22 = vmul.f32 %v787_v42, %v5215_v57  ;;  %v757_v62 = vmul.f32 %v5226_v44, %v5226_v44 }
 0x130   : > { %v663_v36 = vmul.f32 3.1414795, %v5228_v4  ;;  %v5240_v14 = vmul.f32 2.608316e-06, %v5202_v51  ;;  %v5244_v3 = vmul.f32 %v5221_v2, %v5221_v2  ;;  %v5246_v18 = vsub.f32 %v710_v10, %v726_v32 }
 0x131   : > { %v881_v54 = vmul.f32 %v865_v30, %v5172_v24  ;;  %v773_v20 = vmul.f32 2.608316e-06, %v757_v62  ;;  %v695_v23 = vmul.f32 0.00011315942, %v5228_v4  ;;  %v819_v60 = vadd.f32 0.008333079, %v803_v22 }
 0x132   : > { %v679_v31 = vsub.f32 %v597_v27, %v663_v36  ;;  %v632_v47 = vadd.f32 0.5, %v616_v49  ;;  %v794_v17 = vmul.f32 %v778_v33, %v5088_v11  ;;  %v798_v1 = vmul.f32 %v782_v25, %v5131_v16 }
 0x133   : > { %v5253_v43 = vadd.f32 %v879_v0, %v5120_v58  ;;  %v789_v21 = vadd.f32 -0.0001981069, %v773_v20  ;;  %v727_v10 = vmul.f32 1.9841873e-09, %v5228_v4  ;;  %v5257_v32 = vmul.f32 2.608316e-06, %v5244_v3 }
 0x134   : > { %v711_v28 = vsub.f32 %v679_v31, %v695_v23  ;;  %v5259_v59 = vfloor.f32 %v632_v47  ;;  %v810_v27 = vadd.f32 0.008333079, %v794_v17  ;;  %v814_v42 = vadd.f32 0.008333079, %v798_v1 }
 0x135   : > { %v805_v30 = vmul.f32 %v789_v21, %v757_v62  ;;  %v5263_v33 = vmul.f32 %v5246_v18, %v5246_v18  ;;  %v906_v58 = vmul.f32 0.5, %v5017_v56  ;;  %v5269_v0 = vadd.f32 %v881_v54, %v5172_v24 }
 0x136   : > { %v5265_v49 = vsub.f32 %v711_v28, %v727_v10  ;;  %v835_v25 = vmul.f32 %v819_v60, %v5215_v57  ;;  %v664_v22 = vmul.f32 3.1414795, %v5259_v59  ;;  %v826_v36 = vmul.f32 %v810_v27, %v5088_v11 }
 0x137   : > { %7684 = vst [vmem:[#allocation16_spill] sm:$0xff] %v5269_v0  ;;  %v821_v20 = vadd.f32 0.008333079, %v805_v30  ;;  %v696_v23 = vmul.f32 0.00011315942, %v5259_v59  ;;  %v830_v47 = vmul.f32 %v814_v42, %v5131_v16  ;;  %v910_v24 = vmul.f32 0.5, %v5061_v35 }
 0x138   : > { %7683 = vst [vmem:[#allocation15_spill] sm:$0xff] %v5265_v49  ;;  %v5276_v31 = vmul.f32 %v5265_v49, %v5265_v49  ;;  %v680_v17 = vsub.f32 %v599_v9, %v664_v22  ;;  %v842_v1 = vadd.f32 -0.1666666, %v826_v36  ;;  %v922_v54 = vfloor.f32 %v906_v58 }
 0x139   : > { %v837_v21 = vmul.f32 %v821_v20, %v757_v62  ;;  %v728_v28 = vmul.f32 1.9841873e-09, %v5259_v59  ;;  %v846_v10 = vadd.f32 -0.1666666, %v830_v47  ;;  %v926_v61 = vfloor.f32 %v910_v24 }
 0x13a   : > { %v775_v60 = vmul.f32 2.608316e-06, %v5276_v31  ;;  %v712_v27 = vsub.f32 %v680_v17, %v696_v23  ;;  %v858_v30 = vmul.f32 %v842_v1, %v5088_v11  ;;  %v938_v49 = vmul.f32 2.0, %v922_v54 }
 0x13b   : > { %v851_v2 = vadd.f32 -0.1666666, %v835_v25  ;;  %v853_v4 = vadd.f32 -0.1666666, %v837_v21  ;;  %v862_v9 = vmul.f32 %v846_v10, %v5131_v16  ;;  %v942_v22 = vmul.f32 2.0, %v926_v61 }
 0x13c   : > { %v791_v0 = vadd.f32 -0.0001981069, %v775_v60  ;;  %v5285_v42 = vsub.f32 %v712_v27, %v728_v28  ;;  %v874_v58 = vmul.f32 %v858_v30, %v5073_v46  ;;  %v954_v36 = vsub.f32 %v5017_v56, %v938_v49 }
 0x13d   : > { %v869_v20 = vmul.f32 %v853_v4, %v757_v62  ;;  %v878_v23 = vmul.f32 %v862_v9, %v5111_v29  ;;  %v905_v11 = vmul.f32 0.5, %v5015_v53  ;;  %v5293_v25 = vmul.f32 2.608316e-06, %v5263_v33 }
 0x13e   : > { %v807_v47 = vmul.f32 %v791_v0, %v5276_v31  ;;  %v5297_v16 = vmul.f32 %v5285_v42, %v5285_v42  ;;  %v958_v17 = vsub.f32 %v5061_v35, %v942_v22  ;;  %v970_v1 = vmul.f32 2.0, %v954_v36 }
 0x13f   : > { %v5301_v61 = vmul.f32 %v851_v2, %v5215_v57  ;;  %v890_v56 = vadd.f32 %v874_v58, %v5073_v46  ;;  %v909_v62 = vmul.f32 0.5, %v5059_v34  ;;  %v885_v49 = vmul.f32 %v869_v20, %v5226_v44 }
 0x140   : > { %v823_v4 = vadd.f32 0.008333079, %v807_v47  ;;  %v894_v0 = vadd.f32 %v878_v23, %v5111_v29  ;;  %v974_v24 = vmul.f32 2.0, %v958_v17  ;;  %v921_v54 = vfloor.f32 %v905_v11 }
 0x141   : > { %v986_v60 = vsub.f32 1.0, %v970_v1  ;;  %v925_v28 = vfloor.f32 %v909_v62  ;;  %v780_v35 = vadd.f32 -0.0001981069, %v5150_v38  ;;  %v5310_v57 = vmul.f32 2.608316e-06, %v5297_v16 }
 0x142   : > { %v839_v21 = vmul.f32 %v823_v4, %v5276_v31  ;;  %v990_v2 = vsub.f32 1.0, %v974_v24  ;;  %v937_v10 = vmul.f32 2.0, %v921_v54  ;;  %v784_v46 = vadd.f32 -0.0001981069, %v5161_v55 }
 0x143   : > { %v1002_v27 = vmul.f32 %v986_v60, %v890_v56  ;;  %v941_v30 = vmul.f32 2.0, %v925_v28  ;;  %v796_v9 = vmul.f32 %v780_v35, %v5092_v12  ;;  %v908_v29 = vmul.f32 0.5, %v5034_v7 }
 0x144   : > { %v1006_v58 = vmul.f32 %v990_v2, %v894_v0  ;;  %v953_v22 = vsub.f32 %v5015_v53, %v937_v10  ;;  %v800_v36 = vmul.f32 %v784_v46, %v5142_v26  ;;  %v912_v38 = vmul.f32 0.5, %v5094_v13 }
 0x145   : > { %v855_v20 = vadd.f32 -0.1666666, %v839_v21  ;;  %v957_v47 = vsub.f32 %v5059_v34, %v941_v30  ;;  %v812_v23 = vadd.f32 0.008333079, %v796_v9  ;;  %v924_v11 = vfloor.f32 %v908_v29 }
 0x146   : > { %v4590_v17 = vpack.c.bf16 %v1006_v58, %v1002_v27  ;;  %v969_v55 = vmul.f32 2.0, %v953_v22  ;;  %v816_v1 = vadd.f32 0.008333079, %v800_v36  ;;  %v928_v4 = vfloor.f32 %v912_v38 }
 0x147   : > { %v5320_v56 = vadd.f32 %v885_v49, %v5226_v44  ;;  %v973_v62 = vmul.f32 2.0, %v957_v47  ;;  %v828_v0 = vmul.f32 %v812_v23, %v5092_v12  ;;  %v940_v53 = vmul.f32 2.0, %v924_v11 }
 0x148   : > { %4591 = vmatprep.subr.bf16.mxu0 %v4590_v17  ;;  %v985_v24 = vsub.f32 1.0, %v969_v55  ;;  %v832_v54 = vmul.f32 %v816_v1, %v5142_v26  ;;  %v944_v21 = vmul.f32 2.0, %v928_v4  ;;  %v907_v34 = vmul.f32 0.5, %v5027_v63 }
 0x149   : > { %v5326_v60 = vmul.f32 %v855_v20, %v5276_v31  ;;  %v989_v28 = vsub.f32 1.0, %v973_v62  ;;  %v844_v35 = vadd.f32 -0.1666666, %v828_v0  ;;  %v956_v2 = vsub.f32 %v5034_v7, %v940_v53 }
 0x14a   : > { %v1001_v44 = vmul.f32 %v985_v24, %v5178_v15  ;;  %v848_v49 = vadd.f32 -0.1666666, %v832_v54  ;;  %v960_v10 = vsub.f32 %v5094_v13, %v944_v21  ;;  %v911_v46 = vmul.f32 0.5, %v5084_v6 }
 0x14b   : > { %v1005_v27 = vmul.f32 %v989_v28, %v5237_v5  ;;  %v860_v30 = vmul.f32 %v844_v35, %v5092_v12  ;;  %v972_v9 = vmul.f32 2.0, %v956_v2  ;;  %v923_v29 = vfloor.f32 %v907_v34 }
 0x14c   : > { %v864_v31 = vmul.f32 %v848_v49, %v5142_v26  ;;  %v976_v58 = vmul.f32 2.0, %v960_v10  ;;  %v927_v22 = vfloor.f32 %v911_v46  ;;  %v786_v36 = vadd.f32 -0.0001981069, %v5240_v14 }
 0x14d   : > { %v4592_v7 = vpack.c.bf16 %v1005_v27, %v1001_v44  ;;  %v876_v15 = vmul.f32 %v860_v30, %v5075_v48  ;;  %v988_v38 = vsub.f32 1.0, %v972_v9  ;;  %v939_v20 = vmul.f32 2.0, %v923_v29 }
 0x14e   : > { %v880_v13 = vmul.f32 %v864_v31, %v5122_v8  ;;  %v992_v47 = vsub.f32 1.0, %v976_v58  ;;  %v943_v23 = vmul.f32 2.0, %v927_v22  ;;  %v790_v5 = vadd.f32 -0.0001981069, %v5293_v25 }
 0x14f   : > { %4593 = vmatpush1.bf16.msra.mxu0 %v4592_v7  ;;  %v892_v12 = vadd.f32 %v876_v15, %v5075_v48  ;;  %v955_v26 = vsub.f32 %v5027_v63, %v939_v20  ;;  %v802_v11 = vmul.f32 %v786_v36, %v5202_v51  ;;  %v914_v14 = vmul.f32 0.5, %v5146_v37 }
 0x150   : > { %v896_v17 = vadd.f32 %v880_v13, %v5122_v8  ;;  %v959_v55 = vsub.f32 %v5084_v6, %v943_v23  ;;  %v806_v1 = vmul.f32 %v790_v5, %v5263_v33  ;;  %v918_v4 = vmul.f32 0.5, %v5211_v45 }
 0x151   : > { %v1004_v62 = vmul.f32 %v988_v38, %v892_v12  ;;  %v971_v0 = vmul.f32 2.0, %v955_v26  ;;  %v818_v25 = vadd.f32 0.008333079, %v802_v11  ;;  %v930_v53 = vfloor.f32 %v914_v14 }
 0x152   : > { %v1008_v24 = vmul.f32 %v992_v47, %v896_v17  ;;  %v975_v48 = vmul.f32 2.0, %v959_v55  ;;  %v822_v54 = vadd.f32 0.008333079, %v806_v1  ;;  %v934_v63 = vfloor.f32 %v918_v4 }
 0x153   : > { %v987_v21 = vsub.f32 1.0, %v971_v0  ;;  %v834_v34 = vmul.f32 %v818_v25, %v5202_v51  ;;  %v946_v28 = vmul.f32 2.0, %v930_v53  ;;  %v913_v8 = vmul.f32 0.5, %v5138_v19 }
 0x154   : > { %v4598_v35 = vpack.c.bf16 %v1008_v24, %v1004_v62  ;;  %v991_v6 = vsub.f32 1.0, %v975_v48  ;;  %v838_v2 = vmul.f32 %v822_v54, %v5263_v33  ;;  %v950_v44 = vmul.f32 2.0, %v934_v63  ;;  %v7685_v54 = vld [vmem:[#allocation16_spill] sm:$0xff] }
 0x155   : > { %v1003_v49 = vmul.f32 %v987_v21, %v5181_v39  ;;  %v850_v10 = vadd.f32 -0.1666666, %v834_v34  ;;  %v962_v46 = vsub.f32 %v5146_v37, %v946_v28  ;;  %v917_v27 = vmul.f32 0.5, %v5194_v41 }
 0x156   : > { %4599 = vmatprep.subr.bf16.mxu1 %v4598_v35  ;;  %v1007_v30 = vmul.f32 %v991_v6, %v5253_v43  ;;  %v854_v9 = vadd.f32 -0.1666666, %v838_v2  ;;  %v966_v29 = vsub.f32 %v5211_v45, %v950_v44  ;;  %v929_v31 = vfloor.f32 %v913_v8  ;;  %v7686_v6 = vld [vmem:[#allocation14_spill] sm:$0xff] }
 0x157   : > { %v866_v58 = vmul.f32 %v850_v10, %v5202_v51  ;;  %v978_v22 = vmul.f32 2.0, %v962_v46  ;;  %v933_v36 = vfloor.f32 %v917_v27  ;;  %v788_v7 = vadd.f32 -0.0001981069, %v5257_v32 }
 0x158   : > { %v4600_v15 = vpack.c.bf16 %v1007_v30, %v1003_v49  ;;  %v870_v39 = vmul.f32 %v854_v9, %v5263_v33  ;;  %v982_v38 = vmul.f32 2.0, %v966_v29  ;;  %v945_v37 = vmul.f32 2.0, %v929_v31  ;;  %v7687_v29 = vld [vmem:[#allocation12_spill] sm:$0xff] }
 0x159   : > { %v882_v20 = vmul.f32 %v866_v58, %v5187_v52  ;;  %v994_v13 = vsub.f32 1.0, %v978_v22  ;;  %v949_v47 = vmul.f32 2.0, %v933_v36  ;;  %v792_v43 = vadd.f32 -0.0001981069, %v5310_v57  ;;  %v7689_v36 = vld [vmem:[#allocation15_spill] sm:$0xff] }
 0x15a   : > { %4601 = vmatpush1.bf16.msra.mxu1 %v4600_v15  ;;  %v886_v45 = vmul.f32 %v870_v39, %v5246_v18  ;;  %v998_v23 = vsub.f32 1.0, %v982_v38  ;;  %v961_v51 = vsub.f32 %v5138_v19, %v945_v37  ;;  %v804_v5 = vmul.f32 %v788_v7, %v5244_v3 }
 0x15b   : > { %v898_v32 = vadd.f32 %v882_v20, %v5187_v52  ;;  %v965_v33 = vsub.f32 %v5194_v41, %v949_v47  ;;  %v808_v12 = vmul.f32 %v792_v43, %v5297_v16  ;;  %v916_v26 = vmul.f32 0.5, %v5192_v50 }
 0x15c   : > { %v902_v11 = vadd.f32 %v886_v45, %v5246_v18  ;;  %v977_v14 = vmul.f32 2.0, %v961_v51  ;;  %v820_v57 = vadd.f32 0.008333079, %v804_v5  ;;  %v920_v17 = vmul.f32 0.5, %v5259_v59 }
 0x15d   : > { %v1010_v55 = vmul.f32 %v994_v13, %v898_v32  ;;  %v981_v1 = vmul.f32 2.0, %v965_v33  ;;  %v824_v4 = vadd.f32 0.008333079, %v808_v12  ;;  %v932_v19 = vfloor.f32 %v916_v26  ;;  %v342_v26 = vld [vmem:[%s7566_s3 + $0x10] sm:$0xff] }
 0x15e   : > { %v1014_v62 = vmul.f32 %v998_v23, %v902_v11  ;;  %v993_v0 = vsub.f32 1.0, %v977_v14  ;;  %v836_v52 = vmul.f32 %v820_v57, %v5244_v3  ;;  %v936_v25 = vfloor.f32 %v920_v17  ;;  %v343_v14 = vld [vmem:[%s7566_s3 + $0x18] sm:$0xff]  ;;  %v5419_v57 = vpop.permute.xlu0 %1019 }
 0x15f   : > { %v997_v41 = vsub.f32 1.0, %v981_v1  ;;  %v840_v53 = vmul.f32 %v824_v4, %v5297_v16  ;;  %v948_v24 = vmul.f32 2.0, %v932_v19  ;;  %v915_v48 = vmul.f32 0.5, %v5174_v40  ;;  %7691 = vst [vmem:[#allocation16_spill] sm:$0xff] %v5419_v57 }
 0x160   : > { %v4594_v18 = vpack.c.bf16 %v1014_v62, %v1010_v55  ;;  %v1009_v63 = vmul.f32 %v993_v0, %v7685_v54  ;;  %v852_v21 = vadd.f32 -0.1666666, %v836_v52  ;;  %v952_v34 = vmul.f32 2.0, %v936_v25  ;;  %v5423_v62 = vpop.permute.xlu1 %1024 }
 0x161   : > { %v1013_v28 = vmul.f32 %v997_v41, %v5320_v56  ;;  %v856_v8 = vadd.f32 -0.1666666, %v840_v53  ;;  %v964_v35 = vsub.f32 %v5192_v50, %v948_v24  ;;  %v919_v2 = vmul.f32 0.5, %v7686_v6  ;;  %v7688_v56 = vld [vmem:[#allocation13_spill] sm:$0xff]  ;;  %7692 = vst [vmem:[#allocation14_spill] sm:$0xff] %v5423_v62 }
 0x162   : > { %4595 = vmatprep.subr.bf16.mxu0 %v4594_v18  ;;  %v868_v44 = vmul.f32 %v852_v21, %v5244_v3  ;;  %v968_v49 = vsub.f32 %v5259_v59, %v952_v34  ;;  %v931_v10 = vfloor.f32 %v915_v48  ;;  %v883_v31 = vmul.f32 %v5301_v61, %v7687_v29 }
 0x163   : > { %v4596_v46 = vpack.c.bf16 %v1013_v28, %v1009_v63  ;;  %v872_v27 = vmul.f32 %v856_v8, %v5297_v16  ;;  %v980_v30 = vmul.f32 2.0, %v964_v35  ;;  %v935_v9 = vfloor.f32 %v919_v2  ;;  %v340_v16 = vld [vmem:[%s7566_s3] sm:$0xff]  ;;  %v5433_v2 = vpop.permute.xlu0 %1029 }
 0x164   : > { %v884_v58 = vmul.f32 %v868_v44, %v7688_v56  ;;  %v984_v22 = vmul.f32 2.0, %v968_v49  ;;  %v947_v50 = vmul.f32 2.0, %v931_v10  ;;  %v887_v7 = vmul.f32 %v5326_v60, %v7689_v36  ;;  %7693 = vst [vmem:[#allocation12_spill] sm:$0xff] %v5433_v2 }
 0x165   : > { %4597 = vmatpush1.bf16.msra.mxu0 %v4596_v46  ;;  %v888_v3 = vmul.f32 %v872_v27, %v5285_v42  ;;  %v951_v59 = vmul.f32 2.0, %v935_v9  ;;  %v996_v38 = vsub.f32 1.0, %v980_v30  ;;  %v899_v60 = vadd.f32 %v883_v31, %v7687_v29 }
 0x166   : > { %v900_v15 = vadd.f32 %v884_v58, %v7688_v56  ;;  %v963_v61 = vsub.f32 %v5174_v40, %v947_v50  ;;  %v1000_v37 = vsub.f32 1.0, %v984_v22  ;;  %v903_v47 = vadd.f32 %v887_v7, %v7689_v36  ;;  %v341_v40 = vld [vmem:[%s7566_s3 + $0x8] sm:$0xff] }
 0x167   : > { %v904_v39 = vadd.f32 %v888_v3, %v5285_v42  ;;  %v967_v20 = vsub.f32 %v7686_v6, %v951_v59  ;;  %v7690_v51 = vmov 0.0  }
 0x168   : > { %v979_v13 = vmul.f32 2.0, %v963_v61  ;;  %4534 = vmatmul.mubr.msk.f32.vlgmr.msra.gmra.mrb[8].mxu0 %vm1037_vm2, %v340_v16  ;;  %v1012_v43 = vmul.f32 %v996_v38, %v900_v15 }
 0x169   : > { %v1016_v45 = vmul.f32 %v1000_v37, %v904_v39  ;;  %v983_v23 = vmul.f32 2.0, %v967_v20  ;;  %1120 = vmatprep.mubr.f32.mxu0 %v7690_v51 }
 0x16a   : > { %v995_v5 = vsub.f32 1.0, %v979_v13 }
 0x16b   : > { %v4602_v42 = vpack.c.bf16 %v1016_v45, %v1012_v43  ;;  %v999_v32 = vsub.f32 1.0, %v983_v23 }
 0x16c   : > { %4535 = vmatmul.mubr.msk.f32.gmra.mrb[10].mxu0 %vm1037_vm2, %v341_v40  ;;  %v1011_v33 = vmul.f32 %v995_v5, %v899_v60 }
 0x16d   : > { %4603 = vmatprep.subr.bf16.mxu1 %v4602_v42  ;;  %v1015_v12 = vmul.f32 %v999_v32, %v903_v47  ;;  %1126 = vmatprep.mubr.f32.mxu0 %v7690_v51 }
 0x16f   : > { %v4604_v11 = vpack.c.bf16 %v1015_v12, %v1011_v33 }
 0x170   : > { %4536 = vmatmul.mubr.msk.f32.gmra.mrb[12].mxu0 %vm1037_vm2, %v342_v26 }
 0x171   : > { %4605 = vmatpush1.bf16.msra.mxu1 %v4604_v11  ;;  %1132 = vmatprep.mubr.f32.mxu0 %v7690_v51 }
 0x174   : > { %4538 = vmatmul.mubr.msk.f32.vlgmr.msra.gmra.mrb[8].mxu1 %vm1037_vm2, %v340_v16  ;;  %4537 = vmatmul.mubr.msk.f32.gmra.mrb[14].mxu0 %vm1037_vm2, %v343_v14 }
 0x175   : > { %1209 = vmatprep.mubr.f32.mxu1 %v7690_v51  ;;  %1740 = vmatprep.mubr.f32.mxu0 %v7690_v51 }
 0x178   : > { %4539 = vmatmul.mubr.msk.f32.gmra.mrb[10].mxu1 %vm1037_vm2, %v341_v40 }
 0x179   : > { %1215 = vmatprep.mubr.f32.mxu1 %v7690_v51 }
 0x17c   : > { %4540 = vmatmul.mubr.msk.f32.gmra.mrb[12].mxu1 %vm1037_vm2, %v342_v26 }
 0x17d   : > { %1221 = vmatprep.mubr.f32.mxu1 %v7690_v51 }
 0x180   : > { %4541 = vmatmul.mubr.msk.f32.gmra.mrb[14].mxu1 %vm1037_vm2, %v343_v14 }
 0x181   : > { %1829 = vmatprep.mubr.f32.mxu1 %v7690_v51 }
 0x23b   : > { %v1116_v17 = vpop.f32.mrb[8].mxu0 }
 0x23c   : > { %v1117_v55 = vadd.f32 %v1116_v17, %v5419_v57  ;;  %v1118_v1 = vpop.f32.mrb[9].mxu0 }
 0x23d   : > { %v1119_v4 = vadd.f32 %v1118_v1, %v5419_v57 }
 0x23e   : > { %v1228_v19 = vmul.f32 0.31830987, %v1117_v55 }
 0x23f   : > { %v1229_v0 = vmul.f32 0.31830987, %v1119_v4  ;;  %v1122_v52 = vpop.f32.mrb[10].mxu0 }
 0x240   : > { %v1244_v25 = vadd.f32 0.5, %v1228_v19  ;;  %v1123_v41 = vadd.f32 %v1122_v52, %v5423_v62  ;;  %v1124_v53 = vpop.f32.mrb[11].mxu0 }
 0x241   : > { %v1245_v24 = vadd.f32 0.5, %v1229_v0  ;;  %v1125_v48 = vadd.f32 %v1124_v53, %v5423_v62 }
 0x242   : > { %v5427_v18 = vfloor.f32 %v1244_v25  ;;  %v1232_v54 = vmul.f32 0.31830987, %v1123_v41 }
 0x243   : > { %v5429_v63 = vfloor.f32 %v1245_v24  ;;  %v1233_v21 = vmul.f32 0.31830987, %v1125_v48  ;;  %v1128_v34 = vpop.f32.mrb[12].mxu0 }
 0x244   : > { %v1276_v28 = vmul.f32 3.1414795, %v5427_v18  ;;  %v1248_v8 = vadd.f32 0.5, %v1232_v54  ;;  %v1308_v49 = vmul.f32 0.00011315942, %v5427_v18  ;;  %v1340_v10 = vmul.f32 1.9841873e-09, %v5427_v18 }
 0x245   : > { %v1277_v35 = vmul.f32 3.1414795, %v5429_v63  ;;  %v1249_v6 = vadd.f32 0.5, %v1233_v21  ;;  %v1130_v27 = vpop.f32.mrb[13].mxu0  ;;  %v1309_v9 = vmul.f32 0.00011315942, %v5429_v63  ;;  %v5448_v3 = vadd.f32 %v1128_v34, %v5433_v2 }
 0x246   : > { %v1292_v44 = vsub.f32 %v1117_v55, %v1276_v28  ;;  %v5437_v46 = vfloor.f32 %v1248_v8  ;;  %v1341_v29 = vmul.f32 1.9841873e-09, %v5429_v63  ;;  %v5455_v39 = vmul.f32 0.5, %v5429_v63 }
 0x247   : > { %v1293_v30 = vsub.f32 %v1119_v4, %v1277_v35  ;;  %v1205_v31 = vpop.f32.mrb[8].mxu1  ;;  %v5441_v56 = vfloor.f32 %v1249_v6  ;;  %v5443_v58 = vpop.f32.mrb[14].mxu0  ;;  %v5485_v25 = vadd.f32 %v1130_v27, %v5433_v2  ;;  %v5495_v21 = vmul.f32 0.5, %v5427_v18 }
 0x248   : > { %v1324_v22 = vsub.f32 %v1292_v44, %v1308_v49  ;;  %v1206_v50 = vadd.f32 %v1205_v31, %v5419_v57  ;;  %v1207_v36 = vpop.f32.mrb[9].mxu1  ;;  %v1280_v7 = vmul.f32 3.1414795, %v5437_v46  ;;  %v5450_v59 = vpop.f32.mrb[15].mxu0  ;;  %v1312_v60 = vmul.f32 0.00011315942, %v5437_v46 }
 0x249   : > { %v1325_v16 = vsub.f32 %v1293_v30, %v1309_v9  ;;  %v1208_v15 = vadd.f32 %v1207_v36, %v5419_v57  ;;  %v1281_v61 = vmul.f32 3.1414795, %v5441_v56  ;;  %v1344_v47 = vmul.f32 1.9841873e-09, %v5437_v46 }
 0x24a   : > { %v5457_v38 = vsub.f32 %v1324_v22, %v1340_v10  ;;  %v1230_v37 = vmul.f32 0.31830987, %v1206_v50  ;;  %v1296_v20 = vsub.f32 %v1123_v41, %v1280_v7  ;;  %v1313_v45 = vmul.f32 0.00011315942, %v5441_v56 }
 0x24b   : > { %v1231_v13 = vmul.f32 0.31830987, %v1208_v15  ;;  %v1297_v43 = vsub.f32 %v1125_v48, %v1281_v61  ;;  %v1211_v23 = vpop.f32.mrb[10].mxu1  ;;  %v5469_v12 = vsub.f32 %v1325_v16, %v1341_v29  ;;  %v1345_v4 = vmul.f32 1.9841873e-09, %v5441_v56 }
 0x24c   : > { %v5464_v40 = vmul.f32 %v5457_v38, %v5457_v38  ;;  %v1246_v42 = vadd.f32 0.5, %v1230_v37  ;;  %v1328_v5 = vsub.f32 %v1296_v20, %v1312_v60  ;;  %v5467_v32 = vadd.f32 %v1211_v23, %v5423_v62  ;;  %v1213_v33 = vpop.f32.mrb[11].mxu1 }
 0x24d   : > { %v1247_v26 = vadd.f32 0.5, %v1231_v13  ;;  %v1329_v11 = vsub.f32 %v1297_v43, %v1313_v45  ;;  %v5472_v14 = vadd.f32 %v1213_v33, %v5423_v62  ;;  %v5499_v34 = vmul.f32 %v5469_v12, %v5469_v12 }
 0x24e   : > { %v1388_v17 = vmul.f32 2.608316e-06, %v5464_v40  ;;  %v5475_v55 = vfloor.f32 %v1246_v42  ;;  %v5477_v1 = vsub.f32 %v1328_v5, %v1344_v47  ;;  %v1234_v0 = vmul.f32 0.31830987, %v5467_v32 }
 0x24f   : > { %v5480_v19 = vfloor.f32 %v1247_v26  ;;  %v1235_v52 = vmul.f32 0.31830987, %v5472_v14  ;;  %v5487_v41 = vpop.f32.mrb[12].mxu1  ;;  %v5503_v35 = vsub.f32 %v1329_v11, %v1345_v4  ;;  %v1236_v16 = vmul.f32 0.31830987, %v5448_v3 }
 0x250   : > { %v1404_v53 = vadd.f32 -0.0001981069, %v1388_v17  ;;  %v1278_v24 = vmul.f32 3.1414795, %v5475_v55  ;;  %v1376_v48 = vmul.f32 %v5477_v1, %v5477_v1  ;;  %v5492_v54 = vpop.f32.mrb[13].mxu1  ;;  %v1310_v28 = vmul.f32 0.00011315942, %v5475_v55 }
 0x251   : > { %v1279_v8 = vmul.f32 3.1414795, %v5480_v19  ;;  %v1342_v49 = vmul.f32 1.9841873e-09, %v5475_v55  ;;  %v1311_v30 = vmul.f32 0.00011315942, %v5480_v19  ;;  %v1250_v9 = vadd.f32 0.5, %v1234_v0 }
 0x252   : > { %v1420_v6 = vmul.f32 %v1404_v53, %v5464_v40  ;;  %v1294_v44 = vsub.f32 %v1206_v50, %v1278_v24  ;;  %v1392_v10 = vmul.f32 2.608316e-06, %v1376_v48  ;;  %v1251_v29 = vadd.f32 0.5, %v1235_v52 }
 0x253   : > { %v1295_v27 = vsub.f32 %v1208_v15, %v1279_v8  ;;  %v5508_v31 = vpop.f32.mrb[14].mxu1  ;;  %v1343_v37 = vmul.f32 1.9841873e-09, %v5480_v19  ;;  %v5512_v20 = vfloor.f32 %v1250_v9  ;;  %v5523_v43 = vmul.f32 %v5503_v35, %v5503_v35 }
 0x254   : > { %v1436_v22 = vadd.f32 0.008333079, %v1420_v6  ;;  %v1326_v36 = vsub.f32 %v1294_v44, %v1310_v28  ;;  %v1408_v7 = vadd.f32 -0.0001981069, %v1392_v10  ;;  %v5514_v50 = vfloor.f32 %v1251_v29  ;;  %v5516_v60 = vpop.f32.mrb[15].mxu1 }
 0x255   : > { %v1327_v61 = vsub.f32 %v1295_v27, %v1311_v30  ;;  %v1282_v23 = vmul.f32 3.1414795, %v5512_v20  ;;  %v1252_v42 = vadd.f32 0.5, %v1236_v16  ;;  %v1237_v5 = vmul.f32 0.31830987, %v5485_v25 }
 0x256   : > { %v1452_v15 = vmul.f32 %v1436_v22, %v5464_v40  ;;  %v5519_v13 = vsub.f32 %v1326_v36, %v1342_v49  ;;  %v1424_v47 = vmul.f32 %v1408_v7, %v1376_v48  ;;  %v1283_v17 = vmul.f32 3.1414795, %v5514_v50 }
 0x257   : > { %v5525_v45 = vsub.f32 %v1327_v61, %v1343_v37  ;;  %v1298_v0 = vsub.f32 %v5467_v32, %v1282_v23  ;;  %v1314_v52 = vmul.f32 0.00011315942, %v5512_v20  ;;  %v1346_v53 = vmul.f32 1.9841873e-09, %v5512_v20 }
 0x258   : > { %v1468_v33 = vadd.f32 -0.1666666, %v1452_v15  ;;  %v1374_v26 = vmul.f32 %v5519_v13, %v5519_v13  ;;  %v1440_v11 = vadd.f32 0.008333079, %v1424_v47  ;;  %v1299_v8 = vsub.f32 %v5472_v14, %v1283_v17 }
 0x259   : > { %v5534_v4 = vmul.f32 %v5525_v45, %v5525_v45  ;;  %v1315_v6 = vmul.f32 0.00011315942, %v5514_v50  ;;  %v1330_v44 = vsub.f32 %v1298_v0, %v1314_v52  ;;  %v1347_v49 = vmul.f32 1.9841873e-09, %v5514_v50 }
 0x25a   : > { %v1390_v24 = vmul.f32 2.608316e-06, %v1374_v26  ;;  %v1456_v28 = vmul.f32 %v1440_v11, %v1376_v48  ;;  %v5542_v10 = vfloor.f32 %v1252_v42  ;;  %v1253_v27 = vadd.f32 0.5, %v1237_v5 }
 0x25b   : > { %v1484_v30 = vmul.f32 %v1468_v33, %v5464_v40  ;;  %v1331_v29 = vsub.f32 %v1299_v8, %v1315_v6  ;;  %v5546_v22 = vmul.f32 2.608316e-06, %v5499_v34  ;;  %v5549_v36 = vmul.f32 2.608316e-06, %v5523_v43  ;;  %v5578_v8 = vpop.permute.xlu1 %1034 }
 0x25c   : > { %v1406_v9 = vadd.f32 -0.0001981069, %v1390_v24  ;;  %v1472_v32 = vadd.f32 -0.1666666, %v1456_v28  ;;  %v5551_v14 = vsub.f32 %v1330_v44, %v1346_v53  ;;  %v1284_v7 = vmul.f32 3.1414795, %v5542_v10 }
 0x25d   : > { %v5554_v37 = vsub.f32 %v1331_v29, %v1347_v49  ;;  %v1316_v15 = vmul.f32 0.00011315942, %v5542_v10  ;;  %v5560_v23 = vfloor.f32 %v1253_v27  ;;  %v1218_v42 = vadd.f32 %v5487_v41, %v5433_v2  ;;  %7694 = vst [vmem:[#allocation13_spill] sm:$0xff] %v5578_v8 }
 0x25e   : > { %v1422_v16 = vmul.f32 %v1406_v9, %v1374_v26  ;;  %v1488_v61 = vmul.f32 %v1472_v32, %v1376_v48  ;;  %v1378_v40 = vmul.f32 %v5551_v14, %v5551_v14  ;;  %v1300_v47 = vsub.f32 %v5448_v3, %v1284_v7 }
 0x25f   : > { %v1500_v5 = vmul.f32 %v1484_v30, %v5457_v38  ;;  %v5566_v11 = vmul.f32 2.608316e-06, %v5534_v4  ;;  %v1220_v48 = vadd.f32 %v5492_v54, %v5433_v2  ;;  %v1348_v52 = vmul.f32 1.9841873e-09, %v5542_v10 }
 0x260   : > { %v1438_v33 = vadd.f32 0.008333079, %v1422_v16  ;;  %v1394_v17 = vmul.f32 2.608316e-06, %v1378_v40  ;;  %v1332_v0 = vsub.f32 %v1300_v47, %v1316_v15  ;;  %v1285_v3 = vmul.f32 3.1414795, %v5560_v23 }
 0x261   : > { %v1504_v24 = vmul.f32 %v1488_v61, %v5477_v1  ;;  %v5575_v41 = vmul.f32 %v5554_v37, %v5554_v37  ;;  %v1317_v28 = vmul.f32 0.00011315942, %v5560_v23  ;;  %v1238_v49 = vmul.f32 0.31830987, %v1218_v42 }
 0x262   : > { %v1454_v53 = vmul.f32 %v1438_v33, %v1374_v26  ;;  %v1410_v6 = vadd.f32 -0.0001981069, %v1394_v17  ;;  %v5580_v44 = vsub.f32 %v1332_v0, %v1348_v52  ;;  %v1301_v54 = vsub.f32 %v5485_v25, %v1285_v3 }
 0x263   : > { %v1239_v30 = vmul.f32 0.31830987, %v1220_v48  ;;  %v1135_v9 = vadd.f32 %v5443_v58, %v5578_v8  ;;  %v1137_v32 = vadd.f32 %v5450_v59, %v5578_v8  ;;  %v1254_v61 = vadd.f32 0.5, %v1238_v49 }
 0x264   : > { %v1470_v27 = vadd.f32 -0.1666666, %v1454_v53  ;;  %v1426_v29 = vmul.f32 %v1410_v6, %v1378_v40  ;;  %v5589_v7 = vmul.f32 %v5580_v44, %v5580_v44  ;;  %v1333_v16 = vsub.f32 %v1301_v54, %v1317_v28 }
 0x265   : > { %v1255_v47 = vadd.f32 0.5, %v1239_v30  ;;  %v1240_v33 = vmul.f32 0.31830987, %v1135_v9  ;;  %v1241_v25 = vmul.f32 0.31830987, %v1137_v32  ;;  %v5592_v17 = vadd.f32 %v1500_v5, %v5457_v38 }
 0x266   : > { %v1486_v15 = vmul.f32 %v1470_v27, %v1374_v26  ;;  %v1442_v0 = vadd.f32 0.008333079, %v1426_v29  ;;  %v1396_v58 = vmul.f32 2.608316e-06, %v5589_v7  ;;  %v5595_v52 = vfloor.f32 %v1254_v61 }
 0x267   : > { %v5598_v59 = vadd.f32 %v1504_v24, %v5477_v1  ;;  %v1349_v3 = vmul.f32 1.9841873e-09, %v5560_v23  ;;  %v5601_v53 = vfloor.f32 %v1255_v47  ;;  %v1256_v28 = vadd.f32 0.5, %v1240_v33 }
 0x268   : > { %7695 = vst [vmem:[#allocation15_spill] sm:$0xff] %v5595_v52  ;;  %v1458_v26 = vmul.f32 %v1442_v0, %v1378_v40  ;;  %v1412_v6 = vadd.f32 -0.0001981069, %v1396_v58  ;;  %v1286_v54 = vmul.f32 3.1414795, %v5595_v52  ;;  %v1257_v49 = vadd.f32 0.5, %v1241_v25 }
 0x269   : > { %7696 = vst [vmem:[#allocation17_spill] sm:$0xff] %v5601_v53  ;;  %v1502_v38 = vmul.f32 %v1486_v15, %v5519_v13  ;;  %v5606_v5 = vmul.f32 2.608316e-06, %v5575_v41  ;;  %v5608_v27 = vsub.f32 %v1333_v16, %v1349_v3  ;;  %v1287_v1 = vmul.f32 3.1414795, %v5601_v53 }
 0x26a   : > { %v1474_v24 = vadd.f32 -0.1666666, %v1458_v26  ;;  %v1428_v30 = vmul.f32 %v1412_v6, %v5589_v7  ;;  %v1302_v29 = vsub.f32 %v1218_v42, %v1286_v54  ;;  %v1318_v61 = vmul.f32 0.00011315942, %v5595_v52 }
 0x26b   : > { %7697 = vst [vmem:[#allocation18_spill] sm:$0xff] %v5608_v27  ;;  %v1350_v47 = vmul.f32 1.9841873e-09, %v5595_v52  ;;  %v1303_v33 = vsub.f32 %v1220_v48, %v1287_v1  ;;  %v1319_v25 = vmul.f32 0.00011315942, %v5601_v53  ;;  %v5615_v0 = vfloor.f32 %v1256_v28 }
 0x26c   : > { %v1490_v15 = vmul.f32 %v1474_v24, %v1378_v40  ;;  %v1444_v58 = vadd.f32 0.008333079, %v1428_v30  ;;  %v1334_v2 = vsub.f32 %v1302_v29, %v1318_v61  ;;  %v5617_v16 = vfloor.f32 %v1257_v49 }
 0x26d   : > { %v5620_v3 = vadd.f32 %v1502_v38, %v5519_v13  ;;  %v5624_v42 = vmul.f32 %v5608_v27, %v5608_v27  ;;  %v1335_v26 = vsub.f32 %v1303_v33, %v1319_v25  ;;  %v1288_v6 = vmul.f32 3.1414795, %v5615_v0 }
 0x26e   : > { %v1460_v48 = vmul.f32 %v1444_v58, %v5589_v7  ;;  %v5628_v54 = vsub.f32 %v1334_v2, %v1350_v47  ;;  %v1351_v40 = vmul.f32 1.9841873e-09, %v5601_v53  ;;  %v1289_v28 = vmul.f32 3.1414795, %v5617_v16 }
 0x26f   : > { %v1506_v49 = vmul.f32 %v1490_v15, %v5551_v14  ;;  %v1304_v1 = vsub.f32 %v1135_v9, %v1288_v6  ;;  %v1320_v13 = vmul.f32 0.00011315942, %v5615_v0  ;;  %v1352_v38 = vmul.f32 1.9841873e-09, %v5615_v0 }
 0x270   : > { %7698 = vst [vmem:[#allocation19_spill] sm:$0xff] %v5628_v54  ;;  %v1476_v24 = vadd.f32 -0.1666666, %v1460_v48  ;;  %v5637_v30 = vmul.f32 %v5628_v54, %v5628_v54  ;;  %v1305_v29 = vsub.f32 %v1137_v32, %v1289_v28  ;;  %v1321_v2 = vmul.f32 0.00011315942, %v5617_v16 }
 0x271   : > { %v5640_v61 = vsub.f32 %v1335_v26, %v1351_v40  ;;  %v1336_v47 = vsub.f32 %v1304_v1, %v1320_v13  ;;  %v1224_v33 = vadd.f32 %v5508_v31, %v5578_v8  ;;  %v1226_v9 = vadd.f32 %v5516_v60, %v5578_v8 }
 0x272   : > { %v1398_v25 = vmul.f32 2.608316e-06, %v5637_v30  ;;  %v1337_v15 = vsub.f32 %v1305_v29, %v1321_v2  ;;  %v1353_v58 = vmul.f32 1.9841873e-09, %v5617_v16  ;;  %v1405_v6 = vadd.f32 -0.0001981069, %v5546_v22 }
 0x273   : > { %7699 = vst [vmem:[#allocation20_spill] sm:$0xff] %v5640_v61  ;;  %v5650_v32 = vmul.f32 2.608316e-06, %v5624_v42  ;;  %v5652_v48 = vsub.f32 %v1336_v47, %v1352_v38  ;;  %v1242_v26 = vmul.f32 0.31830987, %v1224_v33  ;;  %v1492_v28 = vmul.f32 %v1476_v24, %v5589_v7 }
 0x274   : > { %v1243_v40 = vmul.f32 0.31830987, %v1226_v9  ;;  %v1414_v31 = vadd.f32 -0.0001981069, %v1398_v25  ;;  %v5655_v1 = vsub.f32 %v1337_v15, %v1353_v58  ;;  %v1409_v60 = vadd.f32 -0.0001981069, %v5549_v36 }
 0x275   : > { %v1384_v13 = vmul.f32 %v5652_v48, %v5652_v48  ;;  %v1258_v29 = vadd.f32 0.5, %v1242_v26  ;;  %v1421_v22 = vmul.f32 %v1405_v6, %v5499_v34  ;;  %v5662_v8 = vadd.f32 %v1506_v49, %v5551_v14 }
 0x276   : > { %7700 = vst [vmem:[#allocation21_spill] sm:$0xff] %v5655_v1  ;;  %v1259_v2 = vadd.f32 0.5, %v1243_v40  ;;  %v1430_v38 = vmul.f32 %v1414_v31, %v5637_v30  ;;  %v5667_v7 = vmul.f32 %v5640_v61, %v5640_v61  ;;  %v1425_v24 = vmul.f32 %v1409_v60, %v5523_v43 }
 0x277   : > { %v1400_v47 = vmul.f32 2.608316e-06, %v1384_v13  ;;  %v5670_v36 = vfloor.f32 %v1258_v29  ;;  %v1437_v15 = vadd.f32 0.008333079, %v1421_v22  ;;  %v1508_v58 = vmul.f32 %v1492_v28, %v5580_v44 }
 0x278   : > { %v5672_v25 = vfloor.f32 %v1259_v2  ;;  %v1446_v6 = vadd.f32 0.008333079, %v1430_v38  ;;  %v1441_v26 = vadd.f32 0.008333079, %v1425_v24  ;;  %v1549_v14 = vfloor.f32 %v5455_v39 }
 0x279   : > { %7701 = vst [vmem:[#allocation22_spill] sm:$0xff] %v5670_v36  ;;  %v1416_v49 = vadd.f32 -0.0001981069, %v1400_v47  ;;  %v5678_v40 = vmul.f32 %v5655_v1, %v5655_v1  ;;  %v1290_v31 = vmul.f32 3.1414795, %v5670_v36  ;;  %v1322_v60 = vmul.f32 0.00011315942, %v5670_v36 }
 0x27a   : > { %v1462_v29 = vmul.f32 %v1446_v6, %v5637_v30  ;;  %v1354_v2 = vmul.f32 1.9841873e-09, %v5670_v36  ;;  %v1291_v22 = vmul.f32 3.1414795, %v5672_v25  ;;  %v1323_v28 = vmul.f32 0.00011315942, %v5672_v25 }
 0x27b   : > { %v1432_v38 = vmul.f32 %v1416_v49, %v1384_v13  ;;  %v1306_v24 = vsub.f32 %v1224_v33, %v1290_v31  ;;  %v1453_v39 = vmul.f32 %v1437_v15, %v5499_v34  ;;  %v1457_v47 = vmul.f32 %v1441_v26, %v5523_v43 }
 0x27c   : > { %v1307_v62 = vsub.f32 %v1226_v9, %v1291_v22  ;;  %v1355_v57 = vmul.f32 1.9841873e-09, %v5672_v25  ;;  %v1537_v51 = vmul.f32 0.5, %v5441_v56  ;;  %v1565_v54 = vmul.f32 2.0, %v1549_v14 }
 0x27d   : > { %v1448_v61 = vadd.f32 0.008333079, %v1432_v38  ;;  %v1338_v6 = vsub.f32 %v1306_v24, %v1322_v60  ;;  %v1469_v52 = vadd.f32 -0.1666666, %v1453_v39  ;;  %v1473_v36 = vadd.f32 -0.1666666, %v1457_v47 }
 0x27e   : > { %v1478_v53 = vadd.f32 -0.1666666, %v1462_v29  ;;  %v1339_v1 = vsub.f32 %v1307_v62, %v1323_v28  ;;  %v1553_v27 = vfloor.f32 %v1537_v51  ;;  %v1581_v49 = vsub.f32 %v5429_v63, %v1565_v54 }
 0x27f   : > { %v1464_v33 = vmul.f32 %v1448_v61, %v1384_v13  ;;  %v5691_v31 = vsub.f32 %v1338_v6, %v1354_v2  ;;  %v1485_v15 = vmul.f32 %v1469_v52, %v5499_v34  ;;  %v1489_v9 = vmul.f32 %v1473_v36, %v5523_v43 }
 0x280   : > { %v5696_v26 = vmul.f32 2.608316e-06, %v5667_v7  ;;  %v5698_v14 = vsub.f32 %v1339_v1, %v1355_v57  ;;  %v1569_v60 = vmul.f32 2.0, %v1553_v27  ;;  %v1597_v22 = vmul.f32 2.0, %v1581_v49 }
 0x281   : > { %v1480_v38 = vadd.f32 -0.1666666, %v1464_v33  ;;  %v5702_v51 = vmul.f32 %v5691_v31, %v5691_v31  ;;  %v1501_v62 = vmul.f32 %v1485_v15, %v5469_v12  ;;  %v1505_v63 = vmul.f32 %v1489_v9, %v5503_v35 }
 0x282   : > { %v5707_v34 = vadd.f32 %v1508_v58, %v5580_v44  ;;  %v5710_v43 = vmul.f32 %v1478_v53, %v5637_v30  ;;  %v5713_v57 = vmul.f32 2.608316e-06, %v5678_v40  ;;  %v1585_v52 = vsub.f32 %v5441_v56, %v1569_v60 }
 0x283   : > { %v1496_v27 = vmul.f32 %v1480_v38, %v1384_v13  ;;  %v1402_v54 = vmul.f32 2.608316e-06, %v5702_v51  ;;  %v5719_v61 = vmul.f32 %v5698_v14, %v5698_v14  ;;  %v1517_v1 = vadd.f32 %v1501_v62, %v5469_v12 }
 0x284   : > { %v1521_v44 = vadd.f32 %v1505_v63, %v5503_v35  ;;  %v1601_v36 = vmul.f32 2.0, %v1585_v52  ;;  %v1536_v53 = vmul.f32 0.5, %v5437_v46  ;;  %v1548_v30 = vfloor.f32 %v5495_v21 }
 0x285   : > { %v1512_v58 = vmul.f32 %v1496_v27, %v5652_v48  ;;  %v1418_v29 = vadd.f32 -0.0001981069, %v1402_v54  ;;  %v1613_v56 = vsub.f32 1.0, %v1597_v22  ;;  %v1407_v13 = vadd.f32 -0.0001981069, %v5566_v11 }
 0x286   : > { %v1617_v2 = vsub.f32 1.0, %v1601_v36  ;;  %v1552_v28 = vfloor.f32 %v1536_v53  ;;  %v1564_v24 = vmul.f32 2.0, %v1548_v30  ;;  %v1411_v39 = vadd.f32 -0.0001981069, %v5606_v5 }
 0x287   : > { %v1434_v12 = vmul.f32 %v1418_v29, %v5702_v51  ;;  %v1629_v47 = vmul.f32 %v1613_v56, %v1517_v1  ;;  %v1423_v35 = vmul.f32 %v1407_v13, %v5534_v4  ;;  %v1535_v6 = vmul.f32 0.5, %v5480_v19 }
 0x288   : > { %v1633_v49 = vmul.f32 %v1617_v2, %v1521_v44  ;;  %v1568_v21 = vmul.f32 2.0, %v1552_v28  ;;  %v1580_v33 = vsub.f32 %v5427_v18, %v1564_v24  ;;  %v1427_v15 = vmul.f32 %v1411_v39, %v5575_v41 }
 0x289   : > { %v1450_v9 = vadd.f32 0.008333079, %v1434_v12  ;;  %v1439_v11 = vadd.f32 0.008333079, %v1423_v35  ;;  %v1539_v60 = vmul.f32 0.5, %v5514_v50  ;;  %v1551_v22 = vfloor.f32 %v1535_v6 }
 0x28a   : > { %v4606_v38 = vpack.c.bf16 %v1633_v49, %v1629_v47  ;;  %v1584_v5 = vsub.f32 %v5437_v46, %v1568_v21  ;;  %v1596_v62 = vmul.f32 2.0, %v1580_v33  ;;  %v1443_v63 = vadd.f32 0.008333079, %v1427_v15 }
 0x28b   : > { %v1466_v52 = vmul.f32 %v1450_v9, %v5702_v51  ;;  %v1455_v27 = vmul.f32 %v1439_v11, %v5534_v4  ;;  %v1555_v54 = vfloor.f32 %v1539_v60  ;;  %v1567_v1 = vmul.f32 2.0, %v1551_v22 }
 0x28c   : > { %4607 = vmatprep.subr.bf16.mxu0 %v4606_v38  ;;  %v1600_v18 = vmul.f32 2.0, %v1584_v5  ;;  %v1612_v44 = vsub.f32 1.0, %v1596_v62  ;;  %v1459_v36 = vmul.f32 %v1443_v63, %v5575_v41  ;;  %v1534_v53 = vmul.f32 0.5, %v5475_v55 }
 0x28d   : > { %v1482_v30 = vadd.f32 -0.1666666, %v1466_v52  ;;  %v1471_v29 = vadd.f32 -0.1666666, %v1455_v27  ;;  %v1571_v56 = vmul.f32 2.0, %v1555_v54  ;;  %v1583_v46 = vsub.f32 %v5480_v19, %v1567_v1 }
 0x28e   : > { %v5741_v13 = vmul.f32 2.608316e-06, %v5719_v61  ;;  %v1616_v2 = vsub.f32 1.0, %v1600_v18  ;;  %v1475_v28 = vadd.f32 -0.1666666, %v1459_v36  ;;  %v1538_v24 = vmul.f32 0.5, %v5512_v20 }
 0x28f   : > { %v1628_v39 = vmul.f32 %v1612_v44, %v5592_v17  ;;  %v1487_v12 = vmul.f32 %v1471_v29, %v5534_v4  ;;  %v1587_v47 = vsub.f32 %v5514_v50, %v1571_v56  ;;  %v1599_v35 = vmul.f32 2.0, %v1583_v46 }
 0x290   : > { %v1632_v6 = vmul.f32 %v1616_v2, %v5598_v59  ;;  %v1491_v49 = vmul.f32 %v1475_v28, %v5575_v41  ;;  %v1550_v21 = vfloor.f32 %v1534_v53  ;;  %v1554_v19 = vfloor.f32 %v1538_v24 }
 0x291   : > { %v5750_v33 = vadd.f32 %v1512_v58, %v5652_v48  ;;  %v5753_v15 = vmul.f32 %v1482_v30, %v5702_v51  ;;  %v1503_v9 = vmul.f32 %v1487_v12, %v5525_v45  ;;  %v1603_v17 = vmul.f32 2.0, %v1587_v47 }
 0x292   : > { %v4608_v11 = vpack.c.bf16 %v1632_v6, %v1628_v39  ;;  %v1507_v4 = vmul.f32 %v1491_v49, %v5554_v37  ;;  %v1566_v50 = vmul.f32 2.0, %v1550_v21  ;;  %v1570_v60 = vmul.f32 2.0, %v1554_v19 }
 0x293   : > { %v1519_v59 = vadd.f32 %v1503_v9, %v5525_v45  ;;  %v1615_v22 = vsub.f32 1.0, %v1599_v35  ;;  %v1619_v41 = vsub.f32 1.0, %v1603_v17  ;;  %v1413_v38 = vadd.f32 -0.0001981069, %v5650_v32 }
 0x294   : > { %4609 = vmatpush1.bf16.msra.mxu0 %v4608_v11  ;;  %v1523_v48 = vadd.f32 %v1507_v4, %v5554_v37  ;;  %v1582_v51 = vsub.f32 %v5475_v55, %v1566_v50  ;;  %v1586_v58 = vsub.f32 %v5512_v20, %v1570_v60  ;;  %v1417_v5 = vadd.f32 -0.0001981069, %v5713_v57  ;;  %v7702_v60 = vld [vmem:[#allocation18_spill] sm:$0xff] }
 0x295   : > { %v1631_v62 = vmul.f32 %v1615_v22, %v1519_v59  ;;  %v1429_v63 = vmul.f32 %v1413_v38, %v5624_v42  ;;  %v1541_v52 = vmul.f32 0.5, %v5560_v23  ;;  %v1545_v45 = vmul.f32 0.5, %v5617_v16  ;;  %v7703_v38 = vld [vmem:[#allocation21_spill] sm:$0xff] }
 0x296   : > { %v1635_v27 = vmul.f32 %v1619_v41, %v1523_v48  ;;  %v1598_v54 = vmul.f32 2.0, %v1582_v51  ;;  %v1602_v1 = vmul.f32 2.0, %v1586_v58  ;;  %v1433_v32 = vmul.f32 %v1417_v5, %v5678_v40 }
 0x297   : > { %v1445_v18 = vadd.f32 0.008333079, %v1429_v63  ;;  %v1557_v37 = vfloor.f32 %v1541_v52  ;;  %v1561_v44 = vfloor.f32 %v1545_v45  ;;  %v1540_v55 = vmul.f32 0.5, %v5542_v10 }
 0x298   : > { %v4614_v20 = vpack.c.bf16 %v1635_v27, %v1631_v62  ;;  %v1614_v36 = vsub.f32 1.0, %v1598_v54  ;;  %v1618_v57 = vsub.f32 1.0, %v1602_v1  ;;  %v1449_v53 = vadd.f32 0.008333079, %v1433_v32 }
 0x299   : > { %v1461_v30 = vmul.f32 %v1445_v18, %v5624_v42  ;;  %v1573_v29 = vmul.f32 2.0, %v1557_v37  ;;  %v1577_v56 = vmul.f32 2.0, %v1561_v44  ;;  %v1544_v46 = vmul.f32 0.5, %v5615_v0 }
 0x29a   : > { %4615 = vmatprep.subr.bf16.mxu1 %v4614_v20  ;;  %v1630_v2 = vmul.f32 %v1614_v36, %v5620_v3  ;;  %v1634_v28 = vmul.f32 %v1618_v57, %v5662_v8  ;;  %v1465_v24 = vmul.f32 %v1449_v53, %v5678_v40  ;;  %v1556_v39 = vfloor.f32 %v1540_v55  ;;  %v7705_v53 = vld [vmem:[#allocation15_spill] sm:$0xff] }
 0x29b   : > { %v1477_v12 = vadd.f32 -0.1666666, %v1461_v30  ;;  %v1589_v47 = vsub.f32 %v5560_v23, %v1573_v29  ;;  %v1593_v35 = vsub.f32 %v5617_v16, %v1577_v56  ;;  %v1560_v6 = vfloor.f32 %v1544_v46 }
 0x29c   : > { %v4616_v49 = vpack.c.bf16 %v1634_v28, %v1630_v2  ;;  %v1481_v21 = vadd.f32 -0.1666666, %v1465_v24  ;;  %v1572_v19 = vmul.f32 2.0, %v1556_v39  ;;  %v1415_v9 = vadd.f32 -0.0001981069, %v5696_v26  ;;  %v7706_v2 = vld [vmem:[#allocation22_spill] sm:$0xff] }
 0x29d   : > { %v1493_v17 = vmul.f32 %v1477_v12, %v5624_v42  ;;  %v1605_v11 = vmul.f32 2.0, %v1589_v47  ;;  %v1609_v3 = vmul.f32 2.0, %v1593_v35  ;;  %v1576_v4 = vmul.f32 2.0, %v1560_v6 }
 0x29e   : > { %4617 = vmatpush1.bf16.msra.mxu1 %v4616_v49  ;;  %v1497_v8 = vmul.f32 %v1481_v21, %v5678_v40  ;;  %v1588_v50 = vsub.f32 %v5542_v10, %v1572_v19  ;;  %v1419_v23 = vadd.f32 -0.0001981069, %v5741_v13  ;;  %v1431_v16 = vmul.f32 %v1415_v9, %v5667_v7  ;;  %v7704_v10 = vld [vmem:[#allocation17_spill] sm:$0xff]  ;;  %v7708_v49 = vld [vmem:[#allocation19_spill] sm:$0xff] }
 0x29f   : > { %v1509_v59 = vmul.f32 %v1493_v17, %v7702_v60  ;;  %v1621_v22 = vsub.f32 1.0, %v1605_v11  ;;  %v1625_v41 = vsub.f32 1.0, %v1609_v3  ;;  %v1592_v26 = vsub.f32 %v5615_v0, %v1576_v4  ;;  %v344_v17 = vld [vmem:[%s7568_s5] sm:$0xff] }
 0x2a0   : > { %v1513_v42 = vmul.f32 %v1497_v8, %v7703_v38  ;;  %v1604_v48 = vmul.f32 2.0, %v1588_v50  ;;  %v1435_v51 = vmul.f32 %v1419_v23, %v5719_v61  ;;  %v1447_v58 = vadd.f32 0.008333079, %v1431_v16 }
 0x2a1   : > { %v1525_v40 = vadd.f32 %v1509_v59, %v7702_v60  ;;  %v1608_v5 = vmul.f32 2.0, %v1592_v26  ;;  %v1543_v62 = vmul.f32 0.5, %v7704_v10  ;;  %v1547_v13 = vmul.f32 0.5, %v5672_v25 }
 0x2a2   : > { %v1529_v63 = vadd.f32 %v1513_v42, %v7703_v38  ;;  %v1620_v52 = vsub.f32 1.0, %v1604_v48  ;;  %v1451_v45 = vadd.f32 0.008333079, %v1435_v51  ;;  %v1463_v27 = vmul.f32 %v1447_v58, %v5667_v7  ;;  %v346_v51 = vld [vmem:[%s7568_s5 + $0x10] sm:$0xff] }
 0x2a3   : > { %v1637_v0 = vmul.f32 %v1621_v22, %v1525_v40  ;;  %v1624_v54 = vsub.f32 1.0, %v1608_v5  ;;  %v1559_v1 = vfloor.f32 %v1543_v62  ;;  %v1563_v32 = vfloor.f32 %v1547_v13 }
 0x2a4   : > { %v1641_v18 = vmul.f32 %v1625_v41, %v1529_v63  ;;  %v1636_v37 = vmul.f32 %v1620_v52, %v5707_v34  ;;  %v1467_v44 = vmul.f32 %v1451_v45, %v5719_v61  ;;  %v1479_v55 = vadd.f32 -0.1666666, %v1463_v27  ;;  %v5843_v27 = vpop.permute.xlu1 %1651 }
 0x2a5   : > { %v1640_v20 = vmul.f32 %v1624_v54, %v5750_v33  ;;  %v1575_v36 = vmul.f32 2.0, %v1559_v1  ;;  %v1579_v57 = vmul.f32 2.0, %v1563_v32  ;;  %v1542_v30 = vmul.f32 0.5, %v7705_v53  ;;  %v7707_v33 = vld [vmem:[#allocation20_spill] sm:$0xff]  ;;  %7711 = vst [vmem:[#allocation21_spill] sm:$0xff] %v5843_v27 }
 0x2a6   : > { %v4610_v29 = vpack.c.bf16 %v1641_v18, %v1637_v0  ;;  %v1483_v56 = vadd.f32 -0.1666666, %v1467_v44  ;;  %v1495_v46 = vmul.f32 %v1479_v55, %v5667_v7  ;;  %v1546_v28 = vmul.f32 0.5, %v7706_v2  ;;  %v5848_v55 = vld [vmem:[%s4937_s15 + $0x8] sm:$0xff]  ;;  %s7516_s15 = scalar_lea.hbm %s7572_s9, %s4589_s17 }
 0x2a7   : > { %v4612_v24 = vpack.c.bf16 %v1640_v20, %v1636_v37  ;;  %v1591_v39 = vsub.f32 %v7704_v10, %v1575_v36  ;;  %v1595_v34 = vsub.f32 %v5672_v25, %v1579_v57  ;;  %v1558_v12 = vfloor.f32 %v1542_v30  ;;  %v5839_v10 = vpop.permute.xlu0 %1646  ;;  %7712 = vst [vmem:[#allocation17_spill] sm:$0xff] %v5848_v55 }
 0x2a8   : > { %4611 = vmatprep.subr.bf16.mxu0 %v4610_v29  ;;  %v1499_v47 = vmul.f32 %v1483_v56, %v5719_v61  ;;  %v1511_v35 = vmul.f32 %v1495_v46, %v7707_v33  ;;  %v1562_v6 = vfloor.f32 %v1546_v28  ;;  %v1510_v21 = vmul.f32 %v5710_v43, %v7708_v49  ;;  %7710 = vst [vmem:[#allocation18_spill] sm:$0xff] %v5839_v10  ;;  %v7713_v46 = vld [vmem:[#allocation7_spill] sm:$0xff] }
 0x2a9   : > { %4613 = vmatpush1.bf16.msra.mxu0 %v4612_v24  ;;  %v1607_v19 = vmul.f32 2.0, %v1591_v39  ;;  %v1611_v7 = vmul.f32 2.0, %v1595_v34  ;;  %v1574_v9 = vmul.f32 2.0, %v1558_v12  ;;  %v1514_v25 = vmul.f32 %v5753_v15, %v5691_v31  ;;  %v345_v15 = vld [vmem:[%s7568_s5 + $0x8] sm:$0xff] }
 0x2aa   : > { %v1515_v11 = vmul.f32 %v1499_v47, %v5698_v14  ;;  %v1527_v61 = vadd.f32 %v1511_v35, %v7707_v33  ;;  %v1578_v3 = vmul.f32 2.0, %v1562_v6  ;;  %v1526_v16 = vadd.f32 %v1510_v21, %v7708_v49 }
 0x2ab   : > { %v1590_v4 = vsub.f32 %v7705_v53, %v1574_v9  ;;  %v1623_v8 = vsub.f32 1.0, %v1607_v19  ;;  %v1627_v50 = vsub.f32 1.0, %v1611_v7  ;;  %v7709_v59 = vmov 0.0   ;;  %v5861_v34 = vpop.permute.xlu0 %1656 }
 0x2ac   : > { %v1531_v43 = vadd.f32 %v1515_v11, %v5698_v14  ;;  %v1594_v23 = vsub.f32 %v7706_v2, %v1578_v3  ;;  %4542 = vmatmul.mubr.msk.f32.vlgmr.msra.gmra.mrb[16].mxu0 %vm1037_vm2, %v344_v17  ;;  %v1530_v22 = vadd.f32 %v1514_v25, %v5691_v31  ;;  %v347_v31 = vld [vmem:[%s7568_s5 + $0x18] sm:$0xff]  ;;  %v5857_v2 = vrot.slane %v5848_v55, %v7713_v46 }
 0x2ad   : > { %v1606_v60 = vmul.f32 2.0, %v1590_v4  ;;  %1746 = vmatprep.mubr.f32.mxu0 %v7709_v59  ;;  %v1639_v41 = vmul.f32 %v1623_v8, %v1527_v61  ;;  %7715 = vst [vmem:[#allocation22_spill] sm:$0xff] %v5861_v34 }
 0x2ae   : > { %v1643_v26 = vmul.f32 %v1627_v50, %v1531_v43  ;;  %v1610_v14 = vmul.f32 2.0, %v1594_v23  ;;  %7714 = vst [vmem:[#allocation15_spill] sm:$0xff] %v5857_v2 }
 0x2af   : > { %v1622_v42 = vsub.f32 1.0, %v1606_v60 }
 0x2b0   : > { %v4618_v38 = vpack.c.bf16 %v1643_v26, %v1639_v41  ;;  %v1626_v48 = vsub.f32 1.0, %v1610_v14  ;;  %4543 = vmatmul.mubr.msk.f32.gmra.mrb[18].mxu0 %vm1037_vm2, %v345_v15 }
 0x2b1   : > { %1752 = vmatprep.mubr.f32.mxu0 %v7709_v59  ;;  %v1638_v58 = vmul.f32 %v1622_v42, %v1526_v16 }
 0x2b2   : > { %4619 = vmatprep.subr.bf16.mxu1 %v4618_v38  ;;  %v1642_v40 = vmul.f32 %v1626_v48, %v1530_v22 }
 0x2b4   : > { %v4620_v5 = vpack.c.bf16 %v1642_v40, %v1638_v58  ;;  %4544 = vmatmul.mubr.msk.f32.gmra.mrb[20].mxu0 %vm1037_vm2, %v346_v51 }
 0x2b5   : > { %1758 = vmatprep.mubr.f32.mxu0 %v7709_v59 }
 0x2b6   : > { %4621 = vmatpush1.bf16.msra.mxu1 %v4620_v5 }
 0x2b8   : > { %4545 = vmatmul.mubr.msk.f32.gmra.mrb[22].mxu0 %vm1037_vm2, %v347_v31 }
 0x2b9   : > { %4546 = vmatmul.mubr.msk.f32.vlgmr.msra.gmra.mrb[16].mxu1 %vm1037_vm2, %v344_v17  ;;  %2346 = vmatprep.mubr.f32.mxu0 %v7709_v59 }
 0x2ba   : > { %1835 = vmatprep.mubr.f32.mxu1 %v7709_v59 }
 0x2bd   : > { %4547 = vmatmul.mubr.msk.f32.gmra.mrb[18].mxu1 %vm1037_vm2, %v345_v15 }
 0x2be   : > { %1841 = vmatprep.mubr.f32.mxu1 %v7709_v59 }
 0x2c1   : > { %4548 = vmatmul.mubr.msk.f32.gmra.mrb[20].mxu1 %vm1037_vm2, %v346_v51 }
 0x2c2   : > { %1847 = vmatprep.mubr.f32.mxu1 %v7709_v59 }
 0x2c5   : > { %4549 = vmatmul.mubr.msk.f32.gmra.mrb[22].mxu1 %vm1037_vm2, %v347_v31 }
 0x2c6   : > { %2417 = vmatprep.mubr.f32.mxu1 %v7709_v59 }
 0x37f   : > { %v1742_v62 = vpop.f32.mrb[16].mxu0 }
 0x380   : > { %v1743_v13 = vadd.f32 %v1742_v62, %v5839_v10  ;;  %v1744_v63 = vpop.f32.mrb[17].mxu0 }
 0x381   : > { %v1745_v52 = vadd.f32 %v1744_v63, %v5839_v10 }
 0x382   : > { %v1854_v45 = vmul.f32 0.31830987, %v1743_v13 }
 0x383   : > { %v1855_v0 = vmul.f32 0.31830987, %v1745_v52  ;;  %v1748_v54 = vpop.f32.mrb[18].mxu0 }
 0x384   : > { %v1870_v1 = vadd.f32 0.5, %v1854_v45  ;;  %v1749_v32 = vadd.f32 %v1748_v54, %v5843_v27  ;;  %v1750_v18 = vpop.f32.mrb[19].mxu0 }
 0x385   : > { %v1871_v37 = vadd.f32 0.5, %v1855_v0  ;;  %v1751_v44 = vadd.f32 %v1750_v18, %v5843_v27 }
 0x386   : > { %v5850_v20 = vfloor.f32 %v1870_v1  ;;  %v1858_v36 = vmul.f32 0.31830987, %v1749_v32 }
 0x387   : > { %v5852_v57 = vfloor.f32 %v1871_v37  ;;  %v1859_v53 = vmul.f32 0.31830987, %v1751_v44  ;;  %v1754_v30 = vpop.f32.mrb[20].mxu0 }
 0x388   : > { %v1902_v29 = vmul.f32 3.1414795, %v5850_v20  ;;  %v1874_v56 = vadd.f32 0.5, %v1858_v36  ;;  %v1934_v28 = vmul.f32 0.00011315942, %v5850_v20  ;;  %v1966_v47 = vmul.f32 1.9841873e-09, %v5850_v20 }
 0x389   : > { %v1903_v24 = vmul.f32 3.1414795, %v5852_v57  ;;  %v1875_v39 = vadd.f32 0.5, %v1859_v53  ;;  %v1935_v33 = vmul.f32 0.00011315942, %v5852_v57  ;;  %v1756_v6 = vpop.f32.mrb[21].mxu0  ;;  %v5871_v7 = vadd.f32 %v1754_v30, %v5861_v34 }
 0x38a   : > { %v1918_v12 = vsub.f32 %v1743_v13, %v1902_v29  ;;  %v5865_v35 = vfloor.f32 %v1874_v56  ;;  %v1967_v21 = vmul.f32 1.9841873e-09, %v5852_v57  ;;  %v5877_v61 = vadd.f32 %v1756_v6, %v5861_v34 }
 0x38b   : > { %v1919_v49 = vsub.f32 %v1745_v52, %v1903_v24  ;;  %v5868_v19 = vfloor.f32 %v1875_v39  ;;  %v5873_v9 = vpop.f32.mrb[22].mxu0  ;;  %v5880_v3 = vmul.f32 0.5, %v5852_v57  ;;  %v1862_v37 = vmul.f32 0.31830987, %v5871_v7 }
 0x38c   : > { %v1950_v17 = vsub.f32 %v1918_v12, %v1934_v28  ;;  %v1831_v25 = vpop.f32.mrb[16].mxu1  ;;  %v1906_v11 = vmul.f32 3.1414795, %v5865_v35  ;;  %v1938_v50 = vmul.f32 0.00011315942, %v5865_v35  ;;  %v5885_v16 = vpop.f32.mrb[23].mxu0 }
 0x38d   : > { %v1951_v4 = vsub.f32 %v1919_v49, %v1935_v33  ;;  %v1832_v43 = vadd.f32 %v1831_v25, %v5839_v10  ;;  %v1833_v8 = vpop.f32.mrb[17].mxu1  ;;  %v1907_v23 = vmul.f32 3.1414795, %v5868_v19  ;;  %v1970_v41 = vmul.f32 1.9841873e-09, %v5865_v35 }
 0x38e   : > { %v5887_v60 = vsub.f32 %v1950_v17, %v1966_v47  ;;  %v1834_v15 = vadd.f32 %v1833_v8, %v5839_v10  ;;  %v1922_v22 = vsub.f32 %v1749_v32, %v1906_v11  ;;  %v1939_v42 = vmul.f32 0.00011315942, %v5868_v19 }
 0x38f   : > { %v5891_v26 = vsub.f32 %v1951_v4, %v1967_v21  ;;  %v1856_v14 = vmul.f32 0.31830987, %v1832_v43  ;;  %v1923_v38 = vsub.f32 %v1751_v44, %v1907_v23  ;;  %v1971_v40 = vmul.f32 1.9841873e-09, %v5868_v19 }
 0x390   : > { %v1998_v48 = vmul.f32 %v5887_v60, %v5887_v60  ;;  %v1857_v51 = vmul.f32 0.31830987, %v1834_v15  ;;  %v1954_v58 = vsub.f32 %v1922_v22, %v1938_v50  ;;  %v1837_v5 = vpop.f32.mrb[18].mxu1  ;;  %v1863_v44 = vmul.f32 0.31830987, %v5877_v61 }
 0x391   : > { %v5899_v31 = vmul.f32 %v5891_v26, %v5891_v26  ;;  %v1872_v62 = vadd.f32 0.5, %v1856_v14  ;;  %v1955_v13 = vsub.f32 %v1923_v38, %v1939_v42  ;;  %v1838_v63 = vadd.f32 %v1837_v5, %v5843_v27  ;;  %v1839_v52 = vpop.f32.mrb[19].mxu1 }
 0x392   : > { %v2014_v45 = vmul.f32 2.608316e-06, %v1998_v48  ;;  %v1873_v0 = vadd.f32 0.5, %v1857_v51  ;;  %v5902_v54 = vsub.f32 %v1954_v58, %v1970_v41  ;;  %v1840_v1 = vadd.f32 %v1839_v52, %v5843_v27 }
 0x393   : > { %v5905_v32 = vfloor.f32 %v1872_v62  ;;  %v1860_v18 = vmul.f32 0.31830987, %v1838_v63  ;;  %v5918_v28 = vmul.f32 2.608316e-06, %v5899_v31  ;;  %v5921_v39 = vsub.f32 %v1955_v13, %v1971_v40 }
 0x394   : > { %v2030_v36 = vadd.f32 -0.0001981069, %v2014_v45  ;;  %v5909_v53 = vfloor.f32 %v1873_v0  ;;  %v5913_v30 = vmul.f32 %v5902_v54, %v5902_v54  ;;  %v1861_v29 = vmul.f32 0.31830987, %v1840_v1  ;;  %v5915_v56 = vpop.f32.mrb[20].mxu1 }
 0x395   : > { %v1904_v24 = vmul.f32 3.1414795, %v5905_v32  ;;  %v5923_v12 = vpop.f32.mrb[21].mxu1  ;;  %v5926_v47 = vmul.f32 0.5, %v5850_v20  ;;  %v1936_v6 = vmul.f32 0.00011315942, %v5905_v32  ;;  %v1876_v4 = vadd.f32 0.5, %v1860_v18 }
 0x396   : > { %v2046_v33 = vmul.f32 %v2030_v36, %v1998_v48  ;;  %v1968_v49 = vmul.f32 1.9841873e-09, %v5905_v32  ;;  %v1905_v21 = vmul.f32 3.1414795, %v5909_v53  ;;  %v1937_v25 = vmul.f32 0.00011315942, %v5909_v53 }
 0x397   : > { %v1920_v17 = vsub.f32 %v1832_v43, %v1904_v24  ;;  %v2018_v11 = vmul.f32 2.608316e-06, %v5913_v30  ;;  %v1877_v23 = vadd.f32 0.5, %v1861_v29  ;;  %v1878_v22 = vadd.f32 0.5, %v1862_v37 }
 0x398   : > { %v2062_v8 = vadd.f32 0.008333079, %v2046_v33  ;;  %v1921_v50 = vsub.f32 %v1834_v15, %v1905_v21  ;;  %v5933_v41 = vpop.f32.mrb[22].mxu1  ;;  %v5937_v42 = vmul.f32 %v5921_v39, %v5921_v39  ;;  %v5939_v51 = vfloor.f32 %v1876_v4 }
 0x399   : > { %v1952_v14 = vsub.f32 %v1920_v17, %v1936_v6  ;;  %v2034_v38 = vadd.f32 -0.0001981069, %v2018_v11  ;;  %v5941_v43 = vpop.f32.mrb[23].mxu1  ;;  %v1969_v5 = vmul.f32 1.9841873e-09, %v5909_v53  ;;  %v5944_v62 = vfloor.f32 %v1877_v23 }
 0x39a   : > { %v2078_v58 = vmul.f32 %v2062_v8, %v1998_v48  ;;  %v1953_v40 = vsub.f32 %v1921_v50, %v1937_v25  ;;  %v1908_v52 = vmul.f32 3.1414795, %v5939_v51  ;;  %v5950_v45 = vfloor.f32 %v1878_v22 }
 0x39b   : > { %v5946_v15 = vsub.f32 %v1952_v14, %v1968_v49  ;;  %v2050_v13 = vmul.f32 %v2034_v38, %v5913_v30  ;;  %v1909_v37 = vmul.f32 3.1414795, %v5944_v62  ;;  %v1879_v36 = vadd.f32 0.5, %v1863_v44 }
 0x39c   : > { %v2094_v0 = vadd.f32 -0.1666666, %v2078_v58  ;;  %v5952_v18 = vsub.f32 %v1953_v40, %v1969_v5  ;;  %v1924_v33 = vsub.f32 %v1838_v63, %v1908_v52  ;;  %v1940_v6 = vmul.f32 0.00011315942, %v5939_v51 }
 0x39d   : > { %v5957_v29 = vmul.f32 %v5946_v15, %v5946_v15  ;;  %v2066_v24 = vadd.f32 0.008333079, %v2050_v13  ;;  %v1972_v21 = vmul.f32 1.9841873e-09, %v5939_v51  ;;  %v1925_v17 = vsub.f32 %v1840_v1, %v1909_v37 }
 0x39e   : > { %v2110_v49 = vmul.f32 %v2094_v0, %v1998_v48  ;;  %v1941_v25 = vmul.f32 0.00011315942, %v5944_v62  ;;  %v1956_v8 = vsub.f32 %v1924_v33, %v1940_v6  ;;  %v1910_v44 = vmul.f32 3.1414795, %v5950_v45 }
 0x39f   : > { %v2016_v11 = vmul.f32 2.608316e-06, %v5957_v29  ;;  %v2082_v4 = vmul.f32 %v2066_v24, %v5913_v30  ;;  %v5967_v50 = vmul.f32 %v5952_v18, %v5952_v18  ;;  %v1973_v23 = vmul.f32 1.9841873e-09, %v5944_v62 }
 0x3a0   : > { %v1957_v63 = vsub.f32 %v1925_v17, %v1941_v25  ;;  %v1942_v48 = vmul.f32 0.00011315942, %v5950_v45  ;;  %v5971_v14 = vsub.f32 %v1956_v8, %v1972_v21  ;;  %v1926_v38 = vsub.f32 %v5871_v7, %v1910_v44  ;;  %v6004_v44 = vpop.permute.xlu1 %1661 }
 0x3a1   : > { %v2032_v22 = vadd.f32 -0.0001981069, %v2016_v11  ;;  %v2098_v1 = vadd.f32 -0.1666666, %v2082_v4  ;;  %v5975_v58 = vmul.f32 2.608316e-06, %v5937_v42  ;;  %v5980_v13 = vfloor.f32 %v1879_v36 }
 0x3a2   : > { %v5977_v40 = vsub.f32 %v1957_v63, %v1973_v23  ;;  %v1974_v5 = vmul.f32 1.9841873e-09, %v5950_v45  ;;  %v2004_v37 = vmul.f32 %v5971_v14, %v5971_v14  ;;  %v1958_v24 = vsub.f32 %v1926_v38, %v1942_v48  ;;  %7716 = vst [vmem:[#allocation20_spill] sm:$0xff] %v6004_v44 }
 0x3a3   : > { %v2048_v52 = vmul.f32 %v2032_v22, %v5957_v29  ;;  %v2114_v0 = vmul.f32 %v2098_v1, %v5913_v30  ;;  %v2126_v33 = vmul.f32 %v2110_v49, %v5887_v60  ;;  %v5988_v7 = vmul.f32 2.608316e-06, %v5967_v50 }
 0x3a4   : > { %v5992_v6 = vmul.f32 %v5977_v40, %v5977_v40  ;;  %v1911_v36 = vmul.f32 3.1414795, %v5980_v13  ;;  %v2020_v17 = vmul.f32 2.608316e-06, %v2004_v37  ;;  %v5995_v25 = vsub.f32 %v1958_v24, %v1974_v5 }
 0x3a5   : > { %v2064_v21 = vadd.f32 0.008333079, %v2048_v52  ;;  %v1943_v30 = vmul.f32 0.00011315942, %v5980_v13  ;;  %v1975_v4 = vmul.f32 1.9841873e-09, %v5980_v13  ;;  %v1844_v49 = vadd.f32 %v5915_v56, %v5861_v34 }
 0x3a6   : > { %v1927_v11 = vsub.f32 %v5877_v61, %v1911_v36  ;;  %v1846_v8 = vadd.f32 %v5923_v12, %v5861_v34  ;;  %v2130_v23 = vmul.f32 %v2114_v0, %v5902_v54  ;;  %v2036_v48 = vadd.f32 -0.0001981069, %v2020_v17 }
 0x3a7   : > { %v2080_v63 = vmul.f32 %v2064_v21, %v5957_v29  ;;  %v2006_v22 = vmul.f32 %v5995_v25, %v5995_v25  ;;  %v1864_v61 = vmul.f32 0.31830987, %v1844_v49  ;;  %v1761_v5 = vadd.f32 %v5873_v9, %v6004_v44 }
 0x3a8   : > { %v1959_v1 = vsub.f32 %v1927_v11, %v1943_v30  ;;  %v1865_v38 = vmul.f32 0.31830987, %v1846_v8  ;;  %v2052_v52 = vmul.f32 %v2036_v48, %v2004_v37  ;;  %v1763_v12 = vadd.f32 %v5885_v16, %v6004_v44 }
 0x3a9   : > { %v2096_v56 = vadd.f32 -0.1666666, %v2080_v63  ;;  %v2022_v24 = vmul.f32 2.608316e-06, %v2006_v22  ;;  %v1880_v21 = vadd.f32 0.5, %v1864_v61 }
 0x3aa   : > { %v6014_v36 = vsub.f32 %v1959_v1, %v1975_v4  ;;  %v1881_v0 = vadd.f32 0.5, %v1865_v38  ;;  %v1866_v17 = vmul.f32 0.31830987, %v1761_v5  ;;  %v2068_v34 = vadd.f32 0.008333079, %v2052_v52 }
 0x3ab   : > { %v2038_v27 = vadd.f32 -0.0001981069, %v2022_v24  ;;  %v1867_v10 = vmul.f32 0.31830987, %v1763_v12  ;;  %v6022_v11 = vfloor.f32 %v1880_v21  ;;  %v6027_v4 = vadd.f32 %v2126_v33, %v5887_v60 }
 0x3ac   : > { %v6020_v9 = vmul.f32 %v6014_v36, %v6014_v36  ;;  %v6024_v63 = vfloor.f32 %v1881_v0  ;;  %v1882_v16 = vadd.f32 0.5, %v1866_v17  ;;  %v2084_v48 = vmul.f32 %v2068_v34, %v2004_v37 }
 0x3ad   : > { %7717 = vst [vmem:[#allocation19_spill] sm:$0xff] %v6022_v11  ;;  %v2054_v1 = vmul.f32 %v2038_v27, %v2006_v22  ;;  %v1883_v61 = vadd.f32 0.5, %v1867_v10  ;;  %v6030_v38 = vadd.f32 %v2130_v23, %v5902_v54  ;;  %v6033_v52 = vmul.f32 2.608316e-06, %v5992_v6 }
 0x3ae   : > { %7718 = vst [vmem:[#allocation23_spill] sm:$0xff] %v6024_v63  ;;  %v6036_v24 = vmul.f32 2.608316e-06, %v6020_v9  ;;  %v1912_v21 = vmul.f32 3.1414795, %v6022_v11  ;;  %v2112_v0 = vmul.f32 %v2096_v56, %v5957_v29  ;;  %v1944_v60 = vmul.f32 0.00011315942, %v6022_v11 }
 0x3af   : > { %v2100_v17 = vadd.f32 -0.1666666, %v2084_v48  ;;  %v2070_v30 = vadd.f32 0.008333079, %v2054_v1  ;;  %v1913_v10 = vmul.f32 3.1414795, %v6024_v63  ;;  %v6043_v54 = vfloor.f32 %v1882_v16 }
 0x3b0   : > { %v1928_v34 = vsub.f32 %v1844_v49, %v1912_v21  ;;  %v1945_v27 = vmul.f32 0.00011315942, %v6024_v63  ;;  %v1976_v46 = vmul.f32 1.9841873e-09, %v6022_v11  ;;  %v6046_v59 = vfloor.f32 %v1883_v61 }
 0x3b1   : > { %v2116_v33 = vmul.f32 %v2100_v17, %v2004_v37  ;;  %v2086_v23 = vmul.f32 %v2070_v30, %v2006_v22  ;;  %v1929_v2 = vsub.f32 %v1846_v8, %v1913_v10  ;;  %v1914_v29 = vmul.f32 3.1414795, %v6043_v54 }
 0x3b2   : > { %v1960_v55 = vsub.f32 %v1928_v34, %v1944_v60  ;;  %v1850_v56 = vadd.f32 %v5933_v41, %v6004_v44  ;;  %v2128_v49 = vmul.f32 %v2112_v0, %v5946_v15  ;;  %v1977_v1 = vmul.f32 1.9841873e-09, %v6024_v63 }
 0x3b3   : > { %v2102_v48 = vadd.f32 -0.1666666, %v2086_v23  ;;  %v1915_v16 = vmul.f32 3.1414795, %v6046_v59  ;;  %v1961_v30 = vsub.f32 %v1929_v2, %v1945_v27  ;;  %v1930_v21 = vsub.f32 %v1761_v5, %v1914_v29 }
 0x3b4   : > { %v6054_v37 = vsub.f32 %v1960_v55, %v1976_v46  ;;  %v1946_v61 = vmul.f32 0.00011315942, %v6043_v54  ;;  %v2132_v8 = vmul.f32 %v2116_v33, %v5971_v14  ;;  %v1978_v17 = vmul.f32 1.9841873e-09, %v6043_v54 }
 0x3b5   : > { %v1931_v60 = vsub.f32 %v1763_v12, %v1915_v16  ;;  %v1947_v41 = vmul.f32 0.00011315942, %v6046_v59  ;;  %v2118_v34 = vmul.f32 %v2102_v48, %v2006_v22  ;;  %v1868_v23 = vmul.f32 0.31830987, %v1850_v56 }
 0x3b6   : > { %7719 = vst [vmem:[#allocation24_spill] sm:$0xff] %v6054_v37  ;;  %v6062_v0 = vmul.f32 %v6054_v37, %v6054_v37  ;;  %v1962_v10 = vsub.f32 %v1930_v21, %v1946_v61  ;;  %v1979_v46 = vmul.f32 1.9841873e-09, %v6046_v59  ;;  %v1852_v2 = vadd.f32 %v5941_v43, %v6004_v44 }
 0x3b7   : > { %v1963_v55 = vsub.f32 %v1931_v60, %v1947_v41  ;;  %v2031_v5 = vadd.f32 -0.0001981069, %v5918_v28  ;;  %v6069_v12 = vsub.f32 %v1961_v30, %v1977_v1  ;;  %v1884_v22 = vadd.f32 0.5, %v1868_v23 }
 0x3b8   : > { %v2024_v27 = vmul.f32 2.608316e-06, %v6062_v0  ;;  %v6071_v33 = vsub.f32 %v1962_v10, %v1978_v17  ;;  %v6074_v29 = vadd.f32 %v2128_v49, %v5946_v15  ;;  %v1869_v16 = vmul.f32 0.31830987, %v1852_v2 }
 0x3b9   : > { %7720 = vst [vmem:[#allocation25_spill] sm:$0xff] %v6069_v12  ;;  %v6076_v48 = vsub.f32 %v1963_v55, %v1979_v46  ;;  %v2035_v21 = vadd.f32 -0.0001981069, %v5975_v58  ;;  %v6080_v61 = vadd.f32 %v2132_v8, %v5971_v14  ;;  %v6084_v1 = vfloor.f32 %v1884_v22 }
 0x3ba   : > { %v2040_v43 = vadd.f32 -0.0001981069, %v2024_v27  ;;  %v2010_v28 = vmul.f32 %v6071_v33, %v6071_v33  ;;  %v2134_v30 = vmul.f32 %v2118_v34, %v5995_v25  ;;  %v1885_v17 = vadd.f32 0.5, %v1869_v16 }
 0x3bb   : > { %7721 = vst [vmem:[#allocation26_spill] sm:$0xff] %v6084_v1  ;;  %v2047_v15 = vmul.f32 %v2031_v5, %v5899_v31  ;;  %v2051_v49 = vmul.f32 %v2035_v21, %v5937_v42  ;;  %v6092_v58 = vmul.f32 %v6069_v12, %v6069_v12  ;;  %v1916_v8 = vmul.f32 3.1414795, %v6084_v1 }
 0x3bc   : > { %v2056_v60 = vmul.f32 %v2040_v43, %v6062_v0  ;;  %v2026_v14 = vmul.f32 2.608316e-06, %v2010_v28  ;;  %v6097_v41 = vmul.f32 %v6076_v48, %v6076_v48  ;;  %v1948_v34 = vmul.f32 0.00011315942, %v6084_v1 }
 0x3bd   : > { %v6100_v10 = vfloor.f32 %v1885_v17  ;;  %v2063_v23 = vadd.f32 0.008333079, %v2047_v15  ;;  %v1932_v5 = vsub.f32 %v1850_v56, %v1916_v8  ;;  %v2067_v27 = vadd.f32 0.008333079, %v2051_v49 }
 0x3be   : > { %v2072_v55 = vadd.f32 0.008333079, %v2056_v60  ;;  %v2042_v46 = vadd.f32 -0.0001981069, %v2026_v14  ;;  %v1980_v22 = vmul.f32 1.9841873e-09, %v6084_v1  ;;  %v2175_v56 = vfloor.f32 %v5880_v3 }
 0x3bf   : > { %v1917_v16 = vmul.f32 3.1414795, %v6100_v10  ;;  %v1949_v21 = vmul.f32 0.00011315942, %v6100_v10  ;;  %v2079_v43 = vmul.f32 %v2063_v23, %v5899_v31  ;;  %v1964_v37 = vsub.f32 %v1932_v5, %v1948_v34 }
 0x3c0   : > { %v2088_v44 = vmul.f32 %v2072_v55, %v6062_v0  ;;  %v2058_v12 = vmul.f32 %v2042_v46, %v2010_v28  ;;  %v2083_v17 = vmul.f32 %v2067_v27, %v5937_v42  ;;  %v2163_v60 = vmul.f32 0.5, %v5868_v19 }
 0x3c1   : > { %v1933_v11 = vsub.f32 %v1852_v2, %v1917_v16  ;;  %v2095_v15 = vadd.f32 -0.1666666, %v2079_v43  ;;  %v6110_v14 = vsub.f32 %v1964_v37, %v1980_v22  ;;  %v1981_v8 = vmul.f32 1.9841873e-09, %v6100_v10 }
 0x3c2   : > { %v2074_v49 = vadd.f32 0.008333079, %v2058_v12  ;;  %v2099_v1 = vadd.f32 -0.1666666, %v2083_v17  ;;  %v2179_v55 = vfloor.f32 %v2163_v60  ;;  %v2191_v46 = vmul.f32 2.0, %v2175_v56 }
 0x3c3   : > { %v1965_v63 = vsub.f32 %v1933_v11, %v1949_v21  ;;  %v2111_v23 = vmul.f32 %v2095_v15, %v5899_v31  ;;  %v2104_v34 = vadd.f32 -0.1666666, %v2088_v44  ;;  %v6116_v2 = vmul.f32 %v6110_v14, %v6110_v14 }
 0x3c4   : > { %v2090_v5 = vmul.f32 %v2074_v49, %v2010_v28  ;;  %v2115_v27 = vmul.f32 %v2099_v1, %v5937_v42  ;;  %v2195_v12 = vmul.f32 2.0, %v2179_v55  ;;  %v2207_v22 = vsub.f32 %v5852_v57, %v2191_v46 }
 0x3c5   : > { %v6119_v3 = vsub.f32 %v1965_v63, %v1981_v8  ;;  %v2127_v37 = vmul.f32 %v2111_v23, %v5891_v26  ;;  %v6124_v11 = vadd.f32 %v2134_v30, %v5995_v25  ;;  %v2028_v44 = vmul.f32 2.608316e-06, %v6116_v2 }
 0x3c6   : > { %v2106_v31 = vadd.f32 -0.1666666, %v2090_v5  ;;  %v2131_v16 = vmul.f32 %v2115_v27, %v5921_v39  ;;  %v6129_v21 = vmul.f32 2.608316e-06, %v6092_v58  ;;  %v2211_v63 = vsub.f32 %v5868_v19, %v2195_v12 }
 0x3c7   : > { %v6133_v42 = vmul.f32 %v6119_v3, %v6119_v3  ;;  %v2223_v1 = vmul.f32 2.0, %v2207_v22  ;;  %v6137_v57 = vmul.f32 %v2104_v34, %v6062_v0  ;;  %v6140_v25 = vmul.f32 2.608316e-06, %v6097_v41 }
 0x3c8   : > { %v2044_v30 = vadd.f32 -0.0001981069, %v2028_v44  ;;  %v2143_v43 = vadd.f32 %v2127_v37, %v5891_v26  ;;  %v2122_v17 = vmul.f32 %v2106_v31, %v2010_v28  ;;  %v2147_v15 = vadd.f32 %v2131_v16, %v5921_v39 }
 0x3c9   : > { %v2227_v60 = vmul.f32 2.0, %v2211_v63  ;;  %v2162_v56 = vmul.f32 0.5, %v5865_v35  ;;  %v2239_v8 = vsub.f32 1.0, %v2223_v1  ;;  %v2174_v19 = vfloor.f32 %v5926_v47 }
 0x3ca   : > { %v2060_v49 = vmul.f32 %v2044_v30, %v6116_v2  ;;  %v2033_v0 = vadd.f32 -0.0001981069, %v5988_v7  ;;  %v6149_v23 = vmul.f32 2.608316e-06, %v6133_v42  ;;  %v2037_v26 = vadd.f32 -0.0001981069, %v6033_v52 }
 0x3cb   : > { %v2243_v55 = vsub.f32 1.0, %v2227_v60  ;;  %v2178_v46 = vfloor.f32 %v2162_v56  ;;  %v2255_v34 = vmul.f32 %v2239_v8, %v2143_v43  ;;  %v2190_v39 = vmul.f32 2.0, %v2174_v19 }
 0x3cc   : > { %v2076_v28 = vadd.f32 0.008333079, %v2060_v49  ;;  %v2049_v5 = vmul.f32 %v2033_v0, %v5967_v50  ;;  %v2053_v12 = vmul.f32 %v2037_v26, %v5992_v6  ;;  %v2161_v47 = vmul.f32 0.5, %v5909_v53 }
 0x3cd   : > { %v2259_v27 = vmul.f32 %v2243_v55, %v2147_v15  ;;  %v2194_v37 = vmul.f32 2.0, %v2178_v46  ;;  %v2206_v22 = vsub.f32 %v5850_v20, %v2190_v39  ;;  %v2165_v44 = vmul.f32 0.5, %v5944_v62 }
 0x3ce   : > { %v2092_v7 = vmul.f32 %v2076_v28, %v6116_v2  ;;  %v2065_v31 = vadd.f32 0.008333079, %v2049_v5  ;;  %v2069_v63 = vadd.f32 0.008333079, %v2053_v12  ;;  %v2177_v1 = vfloor.f32 %v2161_v47 }
 0x3cf   : > { %v4622_v16 = vpack.c.bf16 %v2259_v27, %v2255_v34  ;;  %v2210_v52 = vsub.f32 %v5865_v35, %v2194_v37  ;;  %v2138_v30 = vmul.f32 %v2122_v17, %v6071_v33  ;;  %v2222_v43 = vmul.f32 2.0, %v2206_v22 }
 0x3d0   : > { %v2081_v15 = vmul.f32 %v2065_v31, %v5967_v50  ;;  %v2181_v60 = vfloor.f32 %v2165_v44  ;;  %v2085_v49 = vmul.f32 %v2069_v63, %v5992_v6  ;;  %v2193_v8 = vmul.f32 2.0, %v2177_v1 }
 0x3d1   : > { %4623 = vmatprep.subr.bf16.mxu0 %v4622_v16  ;;  %v2226_v56 = vmul.f32 2.0, %v2210_v52  ;;  %v2160_v20 = vmul.f32 0.5, %v5905_v32  ;;  %v2108_v19 = vadd.f32 -0.1666666, %v2092_v7  ;;  %v2238_v0 = vsub.f32 1.0, %v2222_v43 }
 0x3d2   : > { %v2097_v55 = vadd.f32 -0.1666666, %v2081_v15  ;;  %v2197_v46 = vmul.f32 2.0, %v2181_v60  ;;  %v2101_v26 = vadd.f32 -0.1666666, %v2085_v49  ;;  %v2209_v28 = vsub.f32 %v5909_v53, %v2193_v8 }
 0x3d3   : > { %v2242_v35 = vsub.f32 1.0, %v2226_v56  ;;  %v2164_v17 = vmul.f32 0.5, %v5939_v51  ;;  %v6166_v34 = vadd.f32 %v2138_v30, %v6071_v33  ;;  %v2254_v39 = vmul.f32 %v2238_v0, %v6027_v4 }
 0x3d4   : > { %v2113_v5 = vmul.f32 %v2097_v55, %v5967_v50  ;;  %v2213_v27 = vsub.f32 %v5944_v62, %v2197_v46  ;;  %v2117_v12 = vmul.f32 %v2101_v26, %v5992_v6  ;;  %v2225_v47 = vmul.f32 2.0, %v2209_v28 }
 0x3d5   : > { %v2258_v37 = vmul.f32 %v2242_v35, %v6030_v38  ;;  %v2176_v7 = vfloor.f32 %v2160_v20  ;;  %v6174_v22 = vmul.f32 %v2108_v19, %v6116_v2  ;;  %v2180_v33 = vfloor.f32 %v2164_v17 }
 0x3d6   : > { %v2129_v53 = vmul.f32 %v2113_v5, %v5952_v18  ;;  %v2229_v31 = vmul.f32 2.0, %v2213_v27  ;;  %v2133_v4 = vmul.f32 %v2117_v12, %v5977_v40  ;;  %v2241_v16 = vsub.f32 1.0, %v2225_v47 }
 0x3d7   : > { %v4624_v44 = vpack.c.bf16 %v2258_v37, %v2254_v39  ;;  %v2192_v50 = vmul.f32 2.0, %v2176_v7  ;;  %v2196_v38 = vmul.f32 2.0, %v2180_v33  ;;  %v2039_v6 = vadd.f32 -0.0001981069, %v6036_v24 }
 0x3d8   : > { %v2145_v62 = vadd.f32 %v2129_v53, %v5952_v18  ;;  %v2245_v52 = vsub.f32 1.0, %v2229_v31  ;;  %v2149_v63 = vadd.f32 %v2133_v4, %v5977_v40  ;;  %v2043_v1 = vadd.f32 -0.0001981069, %v6140_v25 }
 0x3d9   : > { %4625 = vmatpush1.bf16.msra.mxu0 %v4624_v44  ;;  %v2208_v2 = vsub.f32 %v5905_v32, %v2192_v50  ;;  %v2167_v30 = vmul.f32 0.5, %v5980_v13  ;;  %v2212_v15 = vsub.f32 %v5939_v51, %v2196_v38  ;;  %v2055_v60 = vmul.f32 %v2039_v6, %v6020_v9 }
 0x3da   : > { %v2257_v43 = vmul.f32 %v2241_v16, %v2145_v62  ;;  %v2171_v18 = vmul.f32 0.5, %v6046_v59  ;;  %v2261_v56 = vmul.f32 %v2245_v52, %v2149_v63  ;;  %v2059_v24 = vmul.f32 %v2043_v1, %v6097_v41  ;;  %v7722_v1 = vld [vmem:[#allocation23_spill] sm:$0xff] }
 0x3db   : > { %v2224_v49 = vmul.f32 2.0, %v2208_v2  ;;  %v2183_v8 = vfloor.f32 %v2167_v30  ;;  %v2228_v20 = vmul.f32 2.0, %v2212_v15  ;;  %v2071_v40 = vadd.f32 0.008333079, %v2055_v60 }
 0x3dc   : > { %v2187_v19 = vfloor.f32 %v2171_v18  ;;  %v2166_v32 = vmul.f32 0.5, %v5950_v45  ;;  %v4630_v25 = vpack.c.bf16 %v2261_v56, %v2257_v43  ;;  %v2075_v55 = vadd.f32 0.008333079, %v2059_v24 }
 0x3dd   : > { %v2240_v0 = vsub.f32 1.0, %v2224_v49  ;;  %v2199_v46 = vmul.f32 2.0, %v2183_v8  ;;  %v2244_v35 = vsub.f32 1.0, %v2228_v20  ;;  %v2087_v51 = vmul.f32 %v2071_v40, %v6020_v9 }
 0x3de   : > { %v2203_v26 = vmul.f32 2.0, %v2187_v19  ;;  %v2170_v28 = vmul.f32 0.5, %v6043_v54  ;;  %4631 = vmatprep.subr.bf16.mxu1 %v4630_v25  ;;  %v2091_v39 = vmul.f32 %v2075_v55, %v6097_v41  ;;  %v2182_v27 = vfloor.f32 %v2166_v32  ;;  %v7723_v55 = vld [vmem:[#allocation19_spill] sm:$0xff] }
 0x3df   : > { %v2256_v17 = vmul.f32 %v2240_v0, %v6074_v29  ;;  %v2215_v5 = vsub.f32 %v5980_v13, %v2199_v46  ;;  %v2260_v37 = vmul.f32 %v2244_v35, %v6080_v61  ;;  %v2103_v12 = vadd.f32 -0.1666666, %v2087_v51 }
 0x3e0   : > { %v2219_v47 = vsub.f32 %v6046_v59, %v2203_v26  ;;  %v2186_v7 = vfloor.f32 %v2170_v28  ;;  %v2107_v53 = vadd.f32 -0.1666666, %v2091_v39  ;;  %v2198_v33 = vmul.f32 2.0, %v2182_v27  ;;  %v7724_v26 = vld [vmem:[#allocation26_spill] sm:$0xff] }
 0x3e1   : > { %v2231_v31 = vmul.f32 2.0, %v2215_v5  ;;  %v2041_v44 = vadd.f32 -0.0001981069, %v6129_v21  ;;  %v4632_v4 = vpack.c.bf16 %v2260_v37, %v2256_v17  ;;  %v2119_v16 = vmul.f32 %v2103_v12, %v6020_v9  ;;  %v7725_v12 = vld [vmem:[#allocation24_spill] sm:$0xff] }
 0x3e2   : > { %v2235_v29 = vmul.f32 2.0, %v2219_v47  ;;  %v2202_v50 = vmul.f32 2.0, %v2186_v7  ;;  %v2123_v62 = vmul.f32 %v2107_v53, %v6097_v41  ;;  %v2214_v52 = vsub.f32 %v5950_v45, %v2198_v33  ;;  %v7726_v7 = vld [vmem:[#allocation25_spill] sm:$0xff] }
 0x3e3   : > { %v2247_v13 = vsub.f32 1.0, %v2231_v31  ;;  %v2045_v61 = vadd.f32 -0.0001981069, %v6149_v23  ;;  %4633 = vmatpush1.bf16.msra.mxu1 %v4632_v4  ;;  %v2135_v59 = vmul.f32 %v2119_v16, %v6014_v36  ;;  %v2057_v21 = vmul.f32 %v2041_v44, %v6092_v58  ;;  %v7727_v4 = vld [vmem:[#allocation15_spill] sm:$0xff] }
 0x3e4   : > { %v2251_v38 = vsub.f32 1.0, %v2235_v29  ;;  %v2218_v6 = vsub.f32 %v6043_v54, %v2202_v50  ;;  %v2139_v63 = vmul.f32 %v2123_v62, %v6076_v48  ;;  %v2230_v9 = vmul.f32 2.0, %v2214_v52 }
 0x3e5   : > { %v2061_v2 = vmul.f32 %v2045_v61, %v6133_v42  ;;  %v2169_v41 = vmul.f32 0.5, %v7722_v1  ;;  %v2151_v30 = vadd.f32 %v2135_v59, %v6014_v36  ;;  %v2073_v43 = vadd.f32 0.008333079, %v2057_v21 }
 0x3e6   : > { %v2234_v45 = vmul.f32 2.0, %v2218_v6  ;;  %v2173_v23 = vmul.f32 0.5, %v6100_v10  ;;  %v2155_v15 = vadd.f32 %v2139_v63, %v6076_v48  ;;  %v2246_v60 = vsub.f32 1.0, %v2230_v9 }
 0x3e7   : > { %v2077_v18 = vadd.f32 0.008333079, %v2061_v2  ;;  %v2185_v54 = vfloor.f32 %v2169_v41  ;;  %v2263_v56 = vmul.f32 %v2247_v13, %v2151_v30  ;;  %v2089_v24 = vmul.f32 %v2073_v43, %v6092_v58  ;;  %v4733_v43 = vld [vmem:[%s7564_s1] sm:$0xff] }
 0x3e8   : > { %v2250_v49 = vsub.f32 1.0, %v2234_v45  ;;  %v2189_v8 = vfloor.f32 %v2173_v23  ;;  %v2267_v20 = vmul.f32 %v2251_v38, %v2155_v15  ;;  %v2262_v40 = vmul.f32 %v2246_v60, %v6124_v11 }
 0x3e9   : > { %v2093_v19 = vmul.f32 %v2077_v18, %v6133_v42  ;;  %v2201_v36 = vmul.f32 2.0, %v2185_v54  ;;  %v2105_v25 = vadd.f32 -0.1666666, %v2089_v24  ;;  %v2168_v48 = vmul.f32 0.5, %v7723_v55  ;;  %v4734_v18 = vld [vmem:[%s7564_s1 + $0x8] sm:$0xff]  ;;  %v4735_v54 = vld [vmem:[%s7564_s1 + $0x10] sm:$0xff] }
 0x3ea   : > { %v2266_v32 = vmul.f32 %v2250_v49, %v6166_v34  ;;  %v2205_v0 = vmul.f32 2.0, %v2189_v8  ;;  %v4626_v46 = vpack.c.bf16 %v2267_v20, %v2263_v56  ;;  %v2172_v28 = vmul.f32 0.5, %v7724_v26  ;;  %v4736_v56 = vld [vmem:[%s7564_s1 + $0x18] sm:$0xff]  ;;  %v2273_v8 = vpop.permute.xlu0 %2272 }
 0x3eb   : > { %v2109_v35 = vadd.f32 -0.1666666, %v2093_v19  ;;  %v2217_v51 = vsub.f32 %v7722_v1, %v2201_v36  ;;  %v2121_v39 = vmul.f32 %v2105_v25, %v6092_v58  ;;  %v2184_v5 = vfloor.f32 %v2168_v48  ;;  %v348_v58 = vld [vmem:[%s7570_s7] sm:$0x1]  ;;  %v7732_v49 = vld [vmem:[#allocation6_spill] sm:$0xff] }
 0x3ec   : > { %v4628_v17 = vpack.c.bf16 %v2266_v32, %v2262_v40  ;;  %v2221_v11 = vsub.f32 %v6100_v10, %v2205_v0  ;;  %4627 = vmatprep.subr.bf16.mxu0 %v4626_v46  ;;  %v2188_v37 = vfloor.f32 %v2172_v28  ;;  %v2136_v47 = vmul.f32 %v6137_v57, %v7725_v12  ;;  %v7729_v57 = vld [vmem:[#allocation17_spill] sm:$0xff]  ;;  %v7734_v46 = vld [vmem:[#allocation8_spill] sm:$0xff] }
 0x3ed   : > { %v2125_v27 = vmul.f32 %v2109_v35, %v6133_v42  ;;  %v2233_v34 = vmul.f32 2.0, %v2217_v51  ;;  %v2137_v53 = vmul.f32 %v2121_v39, %v7726_v7  ;;  %v2200_v33 = vmul.f32 2.0, %v2184_v5 }
 0x3ee   : > { %4629 = vmatpush1.bf16.msra.mxu0 %v4628_v17  ;;  %v2237_v31 = vmul.f32 2.0, %v2221_v11  ;;  %v2140_v10 = vmul.f32 %v6174_v22, %v6110_v14  ;;  %v2204_v42 = vmul.f32 2.0, %v2188_v37  ;;  %v7728_v16 = vcombine.high %v7727_v4, %v7727_v4 }
 0x3ef   : > { %v2141_v44 = vmul.f32 %v2125_v27, %v6119_v3  ;;  %v2461_v29 = vcombine.high %v7729_v57, %v7729_v57  ;;  %v2153_v50 = vadd.f32 %v2137_v53, %v7726_v7  ;;  %v2216_v62 = vsub.f32 %v7723_v55, %v2200_v33  ;;  %v7735_v27 = vld [vmem:[#allocation9_spill] sm:$0xff] }
 0x3f0   : > { %4553 = vmatprep.subr.msk.mxu0 %vm414_vm0, %v7728_v16  ;;  %v2249_v52 = vsub.f32 1.0, %v2233_v34  ;;  %v2253_v61 = vsub.f32 1.0, %v2237_v31  ;;  %v2220_v22 = vsub.f32 %v7724_v26, %v2204_v42  ;;  %v2152_v59 = vadd.f32 %v2136_v47, %v7725_v12 }
 0x3f1   : > { %v2157_v13 = vadd.f32 %v2141_v44, %v6119_v3  ;;  %4550 = vmatmul.mubr.msk.f32.vlgmr.msra.gmra.mrb[24].mxu0 %vm1037_vm2, %v348_v58  ;;  %v2232_v38 = vmul.f32 2.0, %v2216_v62  ;;  %v7730_v6 = vmov 0.0   ;;  %v2156_v21 = vadd.f32 %v2140_v10, %v6110_v14  ;;  %v7731_v3 = vld [vmem:[#allocation7_spill] sm:$0xff] }
 0x3f2   : > { %4554 = vmatpush1.msk.msra.mxu0 %vm414_vm0, %v7727_v4  ;;  %2550 = vmatprep.mubr.f32.mxu0 %v7730_v6  ;;  %v2265_v63 = vmul.f32 %v2249_v52, %v2153_v50  ;;  %v2236_v2 = vmul.f32 2.0, %v2220_v22  ;;  %v2475_v1 = vrot.slane %v2461_v29, %v7731_v3  ;;  %v2277_v24 = vsub.s32 0, %v7732_v49  ;;  %v7737_v4 = vld [vmem:[#allocation10_spill] sm:$0xff] }
 0x3f3   : > { %v2269_v9 = vmul.f32 %v2253_v61, %v2157_v13  ;;  %v2248_v30 = vsub.f32 1.0, %v2232_v38  ;;  %v4813_v25 = vmov 1966171168  }
 0x3f4   : > { %v2252_v45 = vsub.f32 1.0, %v2236_v2  ;;  %v2477_v14 = vcombine.high %v2475_v1, %v2475_v1  ;;  %v6279_v20 = vrot.slane %v2273_v8, %v2277_v24  ;;  %v2431_v0 = vunpack.c.l.s4 %v4813_v25 }
 0x3f5   : > { %v4634_v41 = vpack.c.bf16 %v2269_v9, %v2265_v63  ;;  %4555 = vmatmul.mubr.msk.f32.vlgmr.msra.gmra.mrb[26].mxu0 %vm401_vm1, %v4733_v43  ;;  %v2264_v23 = vmul.f32 %v2248_v30, %v2152_v59 }
 0x3f6   : > { %2556 = vmatprep.mubr.f32.mxu0 %v7730_v6  ;;  %v2268_v15 = vmul.f32 %v2252_v45, %v2156_v21  ;;  %7733 = vst [vmem:[#allocation23_spill] sm:$0xff] %v6279_v20  ;;  %v2432_v17 = vunpack.c.0.s8 %v2431_v0 }
 0x3f7   : > { %4635 = vmatprep.subr.bf16.mxu1 %v4634_v41 }
 0x3f8   : > { %v4636_v60 = vpack.c.bf16 %v2268_v15, %v2264_v23  ;;  %v6292_v31 = vsub.s32 %v2432_v17, %v7732_v49 }
 0x3f9   : > { %4556 = vmatmul.mubr.msk.f32.gmra.mrb[28].mxu0 %vm401_vm1, %v4734_v18 }
 0x3fa   : > { %2562 = vmatprep.mubr.f32.mxu0 %v7730_v6  ;;  %4637 = vmatpush1.bf16.msra.mxu1 %v4636_v60  ;;  %7736 = vst [vmem:[#allocation19_spill] sm:$0xff] %v6292_v31 }
 0x3fb   : > { %4559 = vmatprep.subr.msk.mxu1 %vm414_vm0, %v2477_v14 }
 0x3fd   : > { %4557 = vmatmul.mubr.msk.f32.gmra.mrb[30].mxu0 %vm401_vm1, %v4735_v54  ;;  %4551 = vmatmul.mubr.msk.f32.vlgmr.msra.gmra.mrb[24].mxu1 %vm1037_vm2, %v348_v58 }
 0x3fe   : > { %2568 = vmatprep.mubr.f32.mxu0 %v7730_v6  ;;  %4560 = vmatpush1.msk.msra.mxu1 %vm414_vm0, %v2475_v1 }
 0x3ff   : > { %2639 = vmatprep.mubr.f32.mxu1 %v7730_v6 }
 0x401   : > { %4558 = vmatmul.mubr.msk.f32.gmra.mrb[32].mxu0 %vm401_vm1, %v4736_v56  ;;  %4561 = vmatmul.mubr.msk.f32.vlgmr.msra.gmra.mrb[26].mxu1 %vm401_vm1, %v4733_v43 }
 0x402   : > { %3144 = vmatprep.mubr.f32.mxu0 %v7730_v6  ;;  %2645 = vmatprep.mubr.f32.mxu1 %v7730_v6 }
 0x405   : > { %4562 = vmatmul.mubr.msk.f32.gmra.mrb[28].mxu1 %vm401_vm1, %v4734_v18 }
 0x406   : > { %2651 = vmatprep.mubr.f32.mxu1 %v7730_v6 }
 0x409   : > { %4563 = vmatmul.mubr.msk.f32.gmra.mrb[30].mxu1 %vm401_vm1, %v4735_v54 }
 0x40a   : > { %2657 = vmatprep.mubr.f32.mxu1 %v7730_v6 }
 0x40d   : > { %4564 = vmatmul.mubr.msk.f32.gmra.mrb[32].mxu1 %vm401_vm1, %v4736_v56 }
 0x40e   : > { %3233 = vmatprep.mubr.f32.mxu1 %v7730_v6 }
 0x4c4   : > { %v2348_v40 = vpop.f32.mrb[24].mxu0 }
 0x4c5   : > { %v2349_v19 = vadd.f32 %v2348_v40, %v6279_v20  ;;  %v2350_v36 = vpop.f32.mrb[25].mxu0 }
 0x4c6   : > { %v2351_v32 = vadd.f32 %v2350_v36, %v6279_v20 }
 0x4c8   : > { %v2428_v55 = vcombine.low %v2349_v19, %v2351_v32  ;;  %v2552_v48 = vpop.f32.mrb[26].mxu0 }
 0x4c9   : > { %v2553_v35 = vadd.f32 %v2552_v48, %v7734_v46  ;;  %v2554_v51 = vpop.f32.mrb[27].mxu0 }
 0x4ca   : > { %v2555_v26 = vadd.f32 %v2554_v51, %v7734_v46  ;;  %v6306_v38 = vrot.slane %v2428_v55, %v6292_v31 }
 0x4cb   : > { %v2664_v28 = vmul.f32 0.31830987, %v2553_v35 }
 0x4cc   : > { %v2665_v39 = vmul.f32 0.31830987, %v2555_v26  ;;  %v2558_v11 = vpop.f32.mrb[28].mxu0 }
 0x4cd   : > { %v2680_v5 = vadd.f32 0.5, %v2664_v28  ;;  %v2559_v34 = vadd.f32 %v2558_v11, %v7735_v27  ;;  %v2560_v37 = vpop.f32.mrb[29].mxu0 }
 0x4ce   : > { %v2681_v12 = vadd.f32 0.5, %v2665_v39  ;;  %v6287_v47 = vadd.f32 %v2560_v37, %v7735_v27 }
 0x4cf   : > { %v6289_v7 = vfloor.f32 %v2680_v5  ;;  %v2668_v53 = vmul.f32 0.31830987, %v2559_v34 }
 0x4d0   : > { %v6294_v33 = vfloor.f32 %v2681_v12  ;;  %v2669_v58 = vmul.f32 0.31830987, %v6287_v47  ;;  %v2564_v10 = vpop.f32.mrb[30].mxu0  ;;  %v2419_v44 = vpop.f32.mrb[24].mxu1 }
 0x4d1   : > { %v2712_v42 = vmul.f32 3.1414795, %v6289_v7  ;;  %v6299_v16 = vadd.f32 %v2564_v10, %v7737_v4  ;;  %v2420_v57 = vadd.f32 %v2419_v44, %v6279_v20  ;;  %v2421_v29 = vpop.f32.mrb[25].mxu1  ;;  %v2744_v50 = vmul.f32 0.00011315942, %v6289_v7  ;;  %v2566_v59 = vpop.f32.mrb[31].mxu0 }
 0x4d2   : > { %v2713_v62 = vmul.f32 3.1414795, %v6294_v33  ;;  %v2422_v13 = vadd.f32 %v2421_v29, %v6279_v20  ;;  %v2684_v61 = vadd.f32 0.5, %v2668_v53  ;;  %v2685_v22 = vadd.f32 0.5, %v2669_v58 }
 0x4d3   : > { %v2728_v52 = vsub.f32 %v2553_v35, %v2712_v42  ;;  %v2745_v63 = vmul.f32 0.00011315942, %v6294_v33  ;;  %v2672_v9 = vmul.f32 0.31830987, %v6299_v16  ;;  %v2776_v41 = vmul.f32 1.9841873e-09, %v6289_v7 }
 0x4d4   : > { %v2729_v21 = vsub.f32 %v2555_v26, %v2713_v62  ;;  %v6310_v2 = vpop.f32.mrb[32].mxu0  ;;  %v2429_v3 = vcombine.low %v2420_v57, %v2422_v13  ;;  %v2641_v30 = vpop.f32.mrb[26].mxu1  ;;  %v6313_v45 = vfloor.f32 %v2684_v61  ;;  %v2777_v15 = vmul.f32 1.9841873e-09, %v6294_v33 }
 0x4d5   : > { %v2760_v1 = vsub.f32 %v2728_v52, %v2744_v50  ;;  %v6315_v43 = vpop.f32.mrb[33].mxu0  ;;  %v2642_v14 = vadd.f32 %v2641_v30, %v7734_v46  ;;  %v2643_v60 = vpop.f32.mrb[27].mxu1  ;;  %v6319_v18 = vfloor.f32 %v2685_v22  ;;  %v2688_v36 = vadd.f32 0.5, %v2672_v9 }
 0x4d6   : > { %v2761_v23 = vsub.f32 %v2729_v21, %v2745_v63  ;;  %v6322_v54 = vrot.slane %v2429_v3, %v6292_v31  ;;  %v2644_v49 = vadd.f32 %v2643_v60, %v7734_v46  ;;  %v2716_v24 = vmul.f32 3.1414795, %v6313_v45 }
 0x4d7   : > { %v6324_v56 = vsub.f32 %v2760_v1, %v2776_v41  ;;  %v2666_v40 = vmul.f32 0.31830987, %v2642_v14  ;;  %v2748_v19 = vmul.f32 0.00011315942, %v6313_v45  ;;  %v2780_v46 = vmul.f32 1.9841873e-09, %v6313_v45 }
 0x4d8   : > { %v6328_v8 = vsub.f32 %v2761_v23, %v2777_v15  ;;  %v2444_v32 = vcombine.low %v6306_v38, %v6322_v54  ;;  %v2667_v0 = vmul.f32 0.31830987, %v2644_v49  ;;  %v2732_v55 = vsub.f32 %v2559_v34, %v2716_v24  ;;  %v2647_v48 = vpop.f32.mrb[28].mxu1 }
 0x4d9   : > { %v6335_v25 = vmul.f32 %v6324_v56, %v6324_v56  ;;  %v2682_v35 = vadd.f32 0.5, %v2666_v40  ;;  %v2717_v51 = vmul.f32 3.1414795, %v6319_v18  ;;  %v2649_v26 = vpop.f32.mrb[29].mxu1  ;;  %v6340_v28 = vadd.f32 %v2566_v59, %v7737_v4 }
 0x4da   : > { %v6345_v39 = vmul.f32 %v6328_v8, %v6328_v8  ;;  %v2683_v11 = vadd.f32 0.5, %v2667_v0  ;;  %v2764_v5 = vsub.f32 %v2732_v55, %v2748_v19  ;;  %v2749_v12 = vmul.f32 0.00011315942, %v6319_v18 }
 0x4db   : > { %v2824_v17 = vmul.f32 2.608316e-06, %v6335_v25  ;;  %v6347_v37 = vfloor.f32 %v2682_v35  ;;  %v2733_v34 = vsub.f32 %v6287_v47, %v2717_v51  ;;  %v2781_v53 = vmul.f32 1.9841873e-09, %v6319_v18 }
 0x4dc   : > { %v6352_v10 = vfloor.f32 %v2683_v11  ;;  %v6354_v44 = vsub.f32 %v2764_v5, %v2780_v46  ;;  %v2648_v42 = vadd.f32 %v2647_v48, %v7735_v27  ;;  %v6357_v57 = vpop.f32.mrb[30].mxu1  ;;  %v2650_v41 = vadd.f32 %v2649_v26, %v7735_v27 }
 0x4dd   : > { %v2840_v58 = vadd.f32 -0.0001981069, %v2824_v17  ;;  %v2714_v29 = vmul.f32 3.1414795, %v6347_v37  ;;  %v2746_v50 = vmul.f32 0.00011315942, %v6347_v37  ;;  %v2765_v47 = vsub.f32 %v2733_v34, %v2749_v12  ;;  %v2655_v13 = vpop.f32.mrb[31].mxu1 }
 0x4de   : > { %v2778_v62 = vmul.f32 1.9841873e-09, %v6347_v37  ;;  %v2715_v61 = vmul.f32 3.1414795, %v6352_v10  ;;  %v2747_v22 = vmul.f32 0.00011315942, %v6352_v10  ;;  %v2812_v21 = vmul.f32 %v6354_v44, %v6354_v44 }
 0x4df   : > { %v2856_v52 = vmul.f32 %v2840_v58, %v6335_v25  ;;  %v2779_v59 = vmul.f32 1.9841873e-09, %v6352_v10  ;;  %v2730_v38 = vsub.f32 %v2642_v14, %v2714_v29  ;;  %v6368_v63 = vsub.f32 %v2765_v47, %v2781_v53 }
 0x4e0   : > { %v2670_v9 = vmul.f32 0.31830987, %v2648_v42  ;;  %v2731_v1 = vsub.f32 %v2644_v49, %v2715_v61  ;;  %v6371_v30 = vfloor.f32 %v2688_v36  ;;  %v6373_v23 = vpop.f32.mrb[32].mxu1  ;;  %v2828_v60 = vmul.f32 2.608316e-06, %v2812_v21 }
 0x4e1   : > { %v2872_v3 = vadd.f32 0.008333079, %v2856_v52  ;;  %v2762_v15 = vsub.f32 %v2730_v38, %v2746_v50  ;;  %v6377_v54 = vmul.f32 %v6368_v63, %v6368_v63  ;;  %v6379_v24 = vpop.f32.mrb[33].mxu1  ;;  %v2671_v0 = vmul.f32 0.31830987, %v2650_v41 }
 0x4e2   : > { %v2686_v14 = vadd.f32 0.5, %v2670_v9  ;;  %v2763_v19 = vsub.f32 %v2731_v1, %v2747_v22  ;;  %v2720_v49 = vmul.f32 3.1414795, %v6371_v30  ;;  %v2844_v36 = vadd.f32 -0.0001981069, %v2828_v60 }
 0x4e3   : > { %v2888_v40 = vmul.f32 %v2872_v3, %v6335_v25  ;;  %v6383_v27 = vsub.f32 %v2762_v15, %v2778_v62  ;;  %v6388_v48 = vmul.f32 0.5, %v6294_v33  ;;  %v2687_v51 = vadd.f32 0.5, %v2671_v0 }
 0x4e4   : > { %v6385_v55 = vfloor.f32 %v2686_v14  ;;  %v6390_v46 = vsub.f32 %v2763_v19, %v2779_v59  ;;  %v2673_v26 = vmul.f32 0.31830987, %v6340_v28  ;;  %v6394_v17 = vrot.slane %v2444_v32, %v6292_v31 }
 0x4e5   : > { %v2904_v35 = vadd.f32 -0.1666666, %v2888_v40  ;;  %v2810_v11 = vmul.f32 %v6383_v27, %v6383_v27  ;;  %v2860_v5 = vmul.f32 %v2844_v36, %v2812_v21  ;;  %v6400_v12 = vmul.f32 2.608316e-06, %v6345_v39 }
 0x4e6   : > { %7738 = vst [vmem:[#allocation26_spill] sm:$0xff] %v6394_v17  ;;  %v2718_v34 = vmul.f32 3.1414795, %v6385_v55  ;;  %v6403_v53 = vmul.f32 2.608316e-06, %v6377_v54  ;;  %v6405_v58 = vfloor.f32 %v2687_v51  ;;  %v2736_v29 = vsub.f32 %v6299_v16, %v2720_v49 }
 0x4e7   : > { %v2826_v50 = vmul.f32 2.608316e-06, %v2810_v11  ;;  %v2876_v62 = vadd.f32 0.008333079, %v2860_v5  ;;  %v2750_v47 = vmul.f32 0.00011315942, %v6385_v55  ;;  %v2920_v52 = vmul.f32 %v2904_v35, %v6335_v25 }
 0x4e8   : > { %v2734_v32 = vsub.f32 %v2648_v42, %v2718_v34  ;;  %v6412_v61 = vmul.f32 %v6390_v46, %v6390_v46  ;;  %v2719_v22 = vmul.f32 3.1414795, %v6405_v58  ;;  %v2752_v59 = vmul.f32 0.00011315942, %v6371_v30 }
 0x4e9   : > { %v2842_v38 = vadd.f32 -0.0001981069, %v2826_v50  ;;  %v2892_v9 = vmul.f32 %v2876_v62, %v2812_v21  ;;  %v2782_v16 = vmul.f32 1.9841873e-09, %v6385_v55  ;;  %v2751_v42 = vmul.f32 0.00011315942, %v6405_v58 }
 0x4ea   : > { %v2766_v3 = vsub.f32 %v2734_v32, %v2750_v47  ;;  %v2735_v1 = vsub.f32 %v2650_v41, %v2719_v22  ;;  %v2768_v15 = vsub.f32 %v2736_v29, %v2752_v59  ;;  %v2784_v60 = vmul.f32 1.9841873e-09, %v6371_v30 }
 0x4eb   : > { %v2858_v25 = vmul.f32 %v2842_v38, %v2810_v11  ;;  %v2908_v14 = vadd.f32 -0.1666666, %v2892_v9  ;;  %v2689_v19 = vadd.f32 0.5, %v2673_v26  ;;  %v2654_v36 = vadd.f32 %v6357_v57, %v7737_v4 }
 0x4ec   : > { %v6419_v40 = vsub.f32 %v2766_v3, %v2782_v16  ;;  %v2767_v0 = vsub.f32 %v2735_v1, %v2751_v42  ;;  %v6421_v49 = vsub.f32 %v2768_v15, %v2784_v60  ;;  %v6426_v35 = vadd.f32 %v2655_v13, %v7737_v4 }
 0x4ed   : > { %v2874_v41 = vadd.f32 0.008333079, %v2858_v25  ;;  %v2924_v51 = vmul.f32 %v2908_v14, %v2812_v21  ;;  %v6430_v34 = vfloor.f32 %v2689_v19  ;;  %v2783_v29 = vmul.f32 1.9841873e-09, %v6405_v58  ;;  %v7739_v19 = vld [vmem:[#allocation11_spill] sm:$0xff] }
 0x4ee   : > { %v2814_v5 = vmul.f32 %v6419_v40, %v6419_v40  ;;  %v2816_v26 = vmul.f32 %v6421_v49, %v6421_v49  ;;  %v2674_v50 = vmul.f32 0.31830987, %v2654_v36  ;;  %v2675_v62 = vmul.f32 0.31830987, %v6426_v35 }
 0x4ef   : > { %v2936_v57 = vmul.f32 %v2920_v52, %v6324_v56  ;;  %v2890_v32 = vmul.f32 %v2874_v41, %v2810_v11  ;;  %v2721_v13 = vmul.f32 3.1414795, %v6430_v34  ;;  %v6439_v21 = vmul.f32 2.608316e-06, %v6412_v61 }
 0x4f0   : > { %v2830_v4 = vmul.f32 2.608316e-06, %v2814_v5  ;;  %v2940_v47 = vmul.f32 %v2924_v51, %v6354_v44  ;;  %v6442_v22 = vsub.f32 %v2767_v0, %v2783_v29  ;;  %v2832_v59 = vmul.f32 2.608316e-06, %v2816_v26 }
 0x4f1   : > { %v2906_v38 = vadd.f32 -0.1666666, %v2890_v32  ;;  %v2737_v3 = vsub.f32 %v6340_v28, %v2721_v13  ;;  %v2753_v16 = vmul.f32 0.00011315942, %v6430_v34  ;;  %v2785_v52 = vmul.f32 1.9841873e-09, %v6430_v34 }
 0x4f2   : > { %v2846_v9 = vadd.f32 -0.0001981069, %v2830_v4  ;;  %v2848_v1 = vadd.f32 -0.0001981069, %v2832_v59  ;;  %v2690_v42 = vadd.f32 0.5, %v2674_v50  ;;  %v2691_v15 = vadd.f32 0.5, %v2675_v62 }
 0x4f3   : > { %v2922_v60 = vmul.f32 %v2906_v38, %v2810_v11  ;;  %v2769_v14 = vsub.f32 %v2737_v3, %v2753_v16  ;;  %v2571_v41 = vadd.f32 %v6310_v2, %v7739_v19  ;;  %v6450_v0 = vadd.f32 %v2936_v57, %v6324_v56 }
 0x4f4   : > { %v2862_v25 = vmul.f32 %v2846_v9, %v2814_v5  ;;  %v2864_v51 = vmul.f32 %v2848_v1, %v2816_v26  ;;  %v6452_v29 = vfloor.f32 %v2690_v42  ;;  %v6454_v28 = vfloor.f32 %v2691_v15 }
 0x4f5   : > { %v6458_v4 = vmul.f32 %v6442_v22, %v6442_v22  ;;  %v6460_v50 = vsub.f32 %v2769_v14, %v2785_v52  ;;  %v2676_v11 = vmul.f32 0.31830987, %v2571_v41  ;;  %v6463_v62 = vadd.f32 %v2940_v47, %v6354_v44 }
 0x4f6   : > { %v2878_v32 = vadd.f32 0.008333079, %v2862_v25  ;;  %v2880_v2 = vadd.f32 0.008333079, %v2864_v51  ;;  %v2722_v56 = vmul.f32 3.1414795, %v6452_v29  ;;  %v2573_v57 = vadd.f32 %v6315_v43, %v7739_v19 }
 0x4f7   : > { %v2938_v13 = vmul.f32 %v2922_v60, %v6383_v27  ;;  %v2754_v38 = vmul.f32 0.00011315942, %v6452_v29  ;;  %v2755_v9 = vmul.f32 0.00011315942, %v6454_v28  ;;  %v6473_v16 = vmul.f32 %v6460_v50, %v6460_v50 }
 0x4f8   : > { %v2894_v59 = vmul.f32 %v2878_v32, %v2814_v5  ;;  %v2896_v3 = vmul.f32 %v2880_v2, %v2816_v26  ;;  %v2738_v44 = vsub.f32 %v2654_v36, %v2722_v56  ;;  %v2723_v47 = vmul.f32 3.1414795, %v6454_v28 }
 0x4f9   : > { %v2786_v52 = vmul.f32 1.9841873e-09, %v6452_v29  ;;  %v2692_v42 = vadd.f32 0.5, %v2676_v11  ;;  %v2660_v43 = vadd.f32 %v6373_v23, %v7739_v19  ;;  %v2677_v14 = vmul.f32 0.31830987, %v2573_v57 }
 0x4fa   : > { %v2910_v1 = vadd.f32 -0.1666666, %v2894_v59  ;;  %v2912_v15 = vadd.f32 -0.1666666, %v2896_v3  ;;  %v2770_v60 = vsub.f32 %v2738_v44, %v2754_v38  ;;  %v2739_v25 = vsub.f32 %v6426_v35, %v2723_v47 }
 0x4fb   : > { %v2787_v51 = vmul.f32 1.9841873e-09, %v6454_v28  ;;  %v6481_v32 = vfloor.f32 %v2692_v42  ;;  %v2678_v2 = vmul.f32 0.31830987, %v2660_v43  ;;  %v2662_v36 = vadd.f32 %v6379_v24, %v7739_v19 }
 0x4fc   : > { %v2926_v56 = vmul.f32 %v2910_v1, %v2814_v5  ;;  %v6485_v59 = vsub.f32 %v2770_v60, %v2786_v52  ;;  %v2771_v11 = vsub.f32 %v2739_v25, %v2755_v9  ;;  %v2693_v31 = vadd.f32 0.5, %v2677_v14 }
 0x4fd   : > { %v6488_v23 = vadd.f32 %v2938_v13, %v6383_v27  ;;  %v6491_v38 = vmul.f32 2.608316e-06, %v6458_v4  ;;  %v2928_v35 = vmul.f32 %v2912_v15, %v2816_v26  ;;  %v2724_v3 = vmul.f32 3.1414795, %v6481_v32 }
 0x4fe   : > { %v6495_v44 = vmul.f32 2.608316e-06, %v6473_v16  ;;  %v6499_v24 = vmul.f32 %v6485_v59, %v6485_v59  ;;  %v6501_v5 = vsub.f32 %v2771_v11, %v2787_v51  ;;  %v6503_v19 = vfloor.f32 %v2693_v31 }
 0x4ff   : > { %v2740_v9 = vsub.f32 %v2571_v41, %v2724_v3  ;;  %v2756_v27 = vmul.f32 0.00011315942, %v6481_v32  ;;  %v2694_v13 = vadd.f32 0.5, %v2678_v2  ;;  %v2679_v47 = vmul.f32 0.31830987, %v2662_v36 }
 0x500   : > { %7740 = vst [vmem:[#allocation24_spill] sm:$0xff] %v6501_v5  ;;  %v2942_v26 = vmul.f32 %v2926_v56, %v6419_v40  ;;  %v2834_v1 = vmul.f32 2.608316e-06, %v6499_v24  ;;  %v6510_v52 = vmul.f32 %v6501_v5, %v6501_v5  ;;  %v2725_v42 = vmul.f32 3.1414795, %v6503_v19 }
 0x501   : > { %v2944_v15 = vmul.f32 %v2928_v35, %v6421_v49  ;;  %v2772_v60 = vsub.f32 %v2740_v9, %v2756_v27  ;;  %v2788_v31 = vmul.f32 1.9841873e-09, %v6481_v32  ;;  %v6515_v41 = vfloor.f32 %v2694_v13 }
 0x502   : > { %v2850_v25 = vadd.f32 -0.0001981069, %v2834_v1  ;;  %v2741_v14 = vsub.f32 %v2573_v57, %v2725_v42  ;;  %v2757_v51 = vmul.f32 0.00011315942, %v6503_v19  ;;  %v2695_v2 = vadd.f32 0.5, %v2679_v47 }
 0x503   : > { %7741 = vst [vmem:[#allocation25_spill] sm:$0xff] %v6515_v41  ;;  %v6519_v56 = vmul.f32 2.608316e-06, %v6510_v52  ;;  %v6521_v11 = vsub.f32 %v2772_v60, %v2788_v31  ;;  %v2789_v3 = vmul.f32 1.9841873e-09, %v6503_v19  ;;  %v2758_v1 = vmul.f32 0.00011315942, %v6515_v41 }
 0x504   : > { %v2726_v20 = vmul.f32 3.1414795, %v6515_v41  ;;  %v2866_v35 = vmul.f32 %v2850_v25, %v6499_v24  ;;  %v2773_v9 = vsub.f32 %v2741_v14, %v2757_v51  ;;  %v6526_v27 = vfloor.f32 %v2695_v2 }
 0x505   : > { %v2841_v13 = vadd.f32 -0.0001981069, %v6400_v12  ;;  %v2820_v57 = vmul.f32 %v6521_v11, %v6521_v11  ;;  %v2845_v42 = vadd.f32 -0.0001981069, %v6403_v53  ;;  %v2790_v6 = vmul.f32 1.9841873e-09, %v6515_v41 }
 0x506   : > { %v2742_v47 = vsub.f32 %v2660_v43, %v2726_v20  ;;  %v2882_v60 = vadd.f32 0.008333079, %v2866_v35  ;;  %v6533_v31 = vsub.f32 %v2773_v9, %v2789_v3  ;;  %v2727_v25 = vmul.f32 3.1414795, %v6526_v27 }
 0x507   : > { %v2836_v14 = vmul.f32 2.608316e-06, %v2820_v57  ;;  %v2857_v2 = vmul.f32 %v2841_v13, %v6345_v39  ;;  %v2973_v12 = vmul.f32 0.5, %v6319_v18  ;;  %v2759_v43 = vmul.f32 0.00011315942, %v6526_v27 }
 0x508   : > { %v2774_v51 = vsub.f32 %v2742_v47, %v2758_v1  ;;  %v2898_v17 = vmul.f32 %v2882_v60, %v6499_v24  ;;  %v2743_v20 = vsub.f32 %v2662_v36, %v2727_v25  ;;  %v2861_v53 = vmul.f32 %v2845_v42, %v6377_v54 }
 0x509   : > { %v2852_v35 = vadd.f32 -0.0001981069, %v2836_v14  ;;  %v2873_v9 = vadd.f32 0.008333079, %v2857_v2  ;;  %v2985_v5 = vfloor.f32 %v6388_v48  ;;  %v6547_v47 = vmul.f32 %v6533_v31, %v6533_v31 }
 0x50a   : > { %v6542_v3 = vsub.f32 %v2774_v51, %v2790_v6  ;;  %v2775_v13 = vsub.f32 %v2743_v20, %v2759_v43  ;;  %v2791_v1 = vmul.f32 1.9841873e-09, %v6526_v27  ;;  %v2877_v41 = vadd.f32 0.008333079, %v2861_v53 }
 0x50b   : > { %v2868_v60 = vmul.f32 %v2852_v35, %v2820_v57  ;;  %v2889_v42 = vmul.f32 %v2873_v9, %v6345_v39  ;;  %v2989_v6 = vfloor.f32 %v2973_v12  ;;  %v2914_v25 = vadd.f32 -0.1666666, %v2898_v17 }
 0x50c   : > { %7742 = vst [vmem:[#allocation15_spill] sm:$0xff] %v6542_v3  ;;  %v6552_v36 = vmul.f32 %v6542_v3, %v6542_v3  ;;  %v6555_v14 = vsub.f32 %v2775_v13, %v2791_v1  ;;  %v2893_v48 = vmul.f32 %v2877_v41, %v6377_v54  ;;  %v3001_v51 = vmul.f32 2.0, %v2985_v5 }
 0x50d   : > { %v6559_v2 = vadd.f32 %v2942_v26, %v6419_v40  ;;  %v2884_v20 = vadd.f32 0.008333079, %v2868_v60  ;;  %v2905_v53 = vadd.f32 -0.1666666, %v2889_v42  ;;  %v6563_v35 = vadd.f32 %v2944_v15, %v6421_v49 }
 0x50e   : > { %v2838_v43 = vmul.f32 2.608316e-06, %v6552_v36  ;;  %v6566_v3 = vmul.f32 2.608316e-06, %v6547_v47  ;;  %v2909_v12 = vadd.f32 -0.1666666, %v2893_v48  ;;  %v3017_v5 = vsub.f32 %v6294_v33, %v3001_v51 }
 0x50f   : > { %v3005_v17 = vmul.f32 2.0, %v2989_v6  ;;  %v2900_v9 = vmul.f32 %v2884_v20, %v2820_v57  ;;  %v2921_v41 = vmul.f32 %v2905_v53, %v6345_v39  ;;  %v2930_v40 = vmul.f32 %v2914_v25, %v6499_v24 }
 0x510   : > { %v2854_v13 = vadd.f32 -0.0001981069, %v2838_v43  ;;  %v6573_v26 = vmul.f32 %v6555_v14, %v6555_v14  ;;  %v2925_v49 = vmul.f32 %v2909_v12, %v6377_v54  ;;  %v3033_v6 = vmul.f32 2.0, %v3017_v5 }
 0x511   : > { %v3021_v15 = vsub.f32 %v6319_v18, %v3005_v17  ;;  %v2916_v1 = vadd.f32 -0.1666666, %v2900_v9  ;;  %v2937_v42 = vmul.f32 %v2921_v41, %v6328_v8  ;;  %v2968_v33 = vmul.f32 0.5, %v6289_v7 }
 0x512   : > { %v2870_v60 = vmul.f32 %v2854_v13, %v6552_v36  ;;  %v2941_v39 = vmul.f32 %v2925_v49, %v6368_v63  ;;  %v2972_v24 = vmul.f32 0.5, %v6313_v45  ;;  %v3049_v54 = vsub.f32 1.0, %v3033_v6 }
 0x513   : > { %v3037_v48 = vmul.f32 2.0, %v3021_v15  ;;  %v2932_v25 = vmul.f32 %v2916_v1, %v2820_v57  ;;  %v2953_v20 = vadd.f32 %v2937_v42, %v6328_v8  ;;  %v2984_v53 = vfloor.f32 %v2968_v33 }
 0x514   : > { %v2886_v51 = vadd.f32 0.008333079, %v2870_v60  ;;  %v2957_v18 = vadd.f32 %v2941_v39, %v6368_v63  ;;  %v2988_v12 = vfloor.f32 %v2972_v24  ;;  %v6585_v17 = vmul.f32 %v2930_v40, %v6485_v59 }
 0x515   : > { %v3053_v43 = vsub.f32 1.0, %v3037_v48  ;;  %v3065_v13 = vmul.f32 %v3049_v54, %v2953_v20  ;;  %v2843_v41 = vadd.f32 -0.0001981069, %v6439_v21  ;;  %v3000_v49 = vmul.f32 2.0, %v2984_v53 }
 0x516   : > { %v2902_v9 = vmul.f32 %v2886_v51, %v6552_v36  ;;  %v3004_v57 = vmul.f32 2.0, %v2988_v12  ;;  %v2847_v15 = vadd.f32 -0.0001981069, %v6491_v38  ;;  %v2948_v8 = vmul.f32 %v2932_v25, %v6521_v11 }
 0x517   : > { %v3069_v5 = vmul.f32 %v3053_v43, %v2957_v18  ;;  %v6592_v63 = vmul.f32 2.608316e-06, %v6573_v26  ;;  %v2859_v1 = vmul.f32 %v2843_v41, %v6412_v61  ;;  %v2971_v40 = vmul.f32 0.5, %v6352_v10 }
 0x518   : > { %v3016_v42 = vsub.f32 %v6289_v7, %v3000_v49  ;;  %v3020_v6 = vsub.f32 %v6313_v45, %v3004_v57  ;;  %v2863_v21 = vmul.f32 %v2847_v15, %v6458_v4  ;;  %v2918_v39 = vadd.f32 -0.1666666, %v2902_v9 }
 0x519   : > { %v4638_v60 = vpack.c.bf16 %v3069_v5, %v3065_v13  ;;  %v2875_v48 = vadd.f32 0.008333079, %v2859_v1  ;;  %v2975_v38 = vmul.f32 0.5, %v6405_v58  ;;  %v2987_v33 = vfloor.f32 %v2971_v40 }
 0x51a   : > { %v3032_v24 = vmul.f32 2.0, %v3016_v42  ;;  %v3036_v25 = vmul.f32 2.0, %v3020_v6  ;;  %v2879_v51 = vadd.f32 0.008333079, %v2863_v21  ;;  %v2970_v20 = vmul.f32 0.5, %v6347_v37 }
 0x51b   : > { %4639 = vmatprep.subr.bf16.mxu0 %v4638_v60  ;;  %v6602_v54 = vadd.f32 %v2948_v8, %v6521_v11  ;;  %v2891_v7 = vmul.f32 %v2875_v48, %v6412_v61  ;;  %v2991_v18 = vfloor.f32 %v2975_v38  ;;  %v3003_v45 = vmul.f32 2.0, %v2987_v33 }
 0x51c   : > { %v3048_v43 = vsub.f32 1.0, %v3032_v24  ;;  %v3052_v53 = vsub.f32 1.0, %v3036_v25  ;;  %v2895_v12 = vmul.f32 %v2879_v51, %v6458_v4  ;;  %v2974_v9 = vmul.f32 0.5, %v6385_v55 }
 0x51d   : > { %v6608_v13 = vmul.f32 %v2918_v39, %v6552_v36  ;;  %v2907_v41 = vadd.f32 -0.1666666, %v2891_v7  ;;  %v3007_v5 = vmul.f32 2.0, %v2991_v18  ;;  %v3019_v49 = vsub.f32 %v6352_v10, %v3003_v45 }
 0x51e   : > { %v3064_v11 = vmul.f32 %v3048_v43, %v6450_v0  ;;  %v3068_v57 = vmul.f32 %v3052_v53, %v6463_v62  ;;  %v2911_v15 = vadd.f32 -0.1666666, %v2895_v12  ;;  %v2986_v8 = vfloor.f32 %v2970_v20 }
 0x51f   : > { %v2923_v1 = vmul.f32 %v2907_v41, %v6412_v61  ;;  %v3023_v40 = vsub.f32 %v6405_v58, %v3007_v5  ;;  %v3035_v60 = vmul.f32 2.0, %v3019_v49  ;;  %v2990_v42 = vfloor.f32 %v2974_v9 }
 0x520   : > { %v4640_v6 = vpack.c.bf16 %v3068_v57, %v3064_v11  ;;  %v2927_v36 = vmul.f32 %v2911_v15, %v6458_v4  ;;  %v3002_v21 = vmul.f32 2.0, %v2986_v8  ;;  %v2849_v39 = vadd.f32 -0.0001981069, %v6495_v44 }
 0x521   : > { %v2939_v10 = vmul.f32 %v2923_v1, %v6390_v46  ;;  %v3039_v48 = vmul.f32 2.0, %v3023_v40  ;;  %v3051_v0 = vsub.f32 1.0, %v3035_v60  ;;  %v3006_v38 = vmul.f32 2.0, %v2990_v42 }
 0x522   : > { %4641 = vmatpush1.bf16.msra.mxu0 %v4640_v6  ;;  %v2943_v62 = vmul.f32 %v2927_v36, %v6442_v22  ;;  %v3018_v61 = vsub.f32 %v6347_v37, %v3002_v21  ;;  %v2853_v58 = vadd.f32 -0.0001981069, %v6566_v3  ;;  %v2865_v33 = vmul.f32 %v2849_v39, %v6473_v16 }
 0x523   : > { %v2955_v24 = vadd.f32 %v2939_v10, %v6390_v46  ;;  %v3055_v4 = vsub.f32 1.0, %v3039_v48  ;;  %v3022_v25 = vsub.f32 %v6385_v55, %v3006_v38  ;;  %v2977_v44 = vmul.f32 0.5, %v6430_v34 }
 0x524   : > { %v2959_v51 = vadd.f32 %v2943_v62, %v6442_v22  ;;  %v3034_v20 = vmul.f32 2.0, %v3018_v61  ;;  %v2869_v7 = vmul.f32 %v2853_v58, %v6547_v47  ;;  %v2881_v18 = vadd.f32 0.008333079, %v2865_v33 }
 0x525   : > { %v3067_v45 = vmul.f32 %v3051_v0, %v2955_v24  ;;  %v3038_v43 = vmul.f32 2.0, %v3022_v25  ;;  %v2981_v37 = vmul.f32 0.5, %v6503_v19  ;;  %v2993_v3 = vfloor.f32 %v2977_v44 }
 0x526   : > { %v3071_v53 = vmul.f32 %v3055_v4, %v2959_v51  ;;  %v3050_v12 = vsub.f32 1.0, %v3034_v20  ;;  %v2885_v9 = vadd.f32 0.008333079, %v2869_v7  ;;  %v2897_v46 = vmul.f32 %v2881_v18, %v6473_v16 }
 0x527   : > { %v3054_v41 = vsub.f32 1.0, %v3038_v43  ;;  %v2997_v55 = vfloor.f32 %v2981_v37  ;;  %v3009_v5 = vmul.f32 2.0, %v2993_v3  ;;  %v2976_v49 = vmul.f32 0.5, %v6371_v30 }
 0x528   : > { %v4646_v22 = vpack.c.bf16 %v3071_v53, %v3067_v45  ;;  %v3066_v11 = vmul.f32 %v3050_v12, %v6488_v23  ;;  %v2901_v57 = vmul.f32 %v2885_v9, %v6547_v47  ;;  %v2913_v15 = vadd.f32 -0.1666666, %v2897_v46 }
 0x529   : > { %v3070_v8 = vmul.f32 %v3054_v41, %v6559_v2  ;;  %v3013_v1 = vmul.f32 2.0, %v2997_v55  ;;  %v3025_v40 = vsub.f32 %v6430_v34, %v3009_v5  ;;  %v2980_v60 = vmul.f32 0.5, %v6481_v32  ;;  %v7743_v5 = vld [vmem:[#allocation25_spill] sm:$0xff] }
 0x52a   : > { %4647 = vmatprep.subr.bf16.mxu1 %v4646_v22  ;;  %v2917_v42 = vadd.f32 -0.1666666, %v2901_v57  ;;  %v2929_v6 = vmul.f32 %v2913_v15, %v6473_v16  ;;  %v2992_v36 = vfloor.f32 %v2976_v49  ;;  %v2851_v21 = vadd.f32 -0.0001981069, %v6519_v56 }
 0x52b   : > { %v4648_v39 = vpack.c.bf16 %v3070_v8, %v3066_v11  ;;  %v3029_v23 = vsub.f32 %v6503_v19, %v3013_v1  ;;  %v3041_v10 = vmul.f32 2.0, %v3025_v40  ;;  %v2996_v48 = vfloor.f32 %v2980_v60 }
 0x52c   : > { %v2933_v2 = vmul.f32 %v2917_v42, %v6547_v47  ;;  %v2945_v0 = vmul.f32 %v2929_v6, %v6460_v50  ;;  %v3008_v34 = vmul.f32 2.0, %v2992_v36  ;;  %v2855_v38 = vadd.f32 -0.0001981069, %v6592_v63  ;;  %v7748_v6 = vld [vmem:[#allocation24_spill] sm:$0xff] }
 0x52d   : > { %4649 = vmatpush1.bf16.msra.mxu1 %v4648_v39  ;;  %v3045_v62 = vmul.f32 2.0, %v3029_v23  ;;  %v3057_v61 = vsub.f32 1.0, %v3041_v10  ;;  %v3012_v16 = vmul.f32 2.0, %v2996_v48  ;;  %v2867_v58 = vmul.f32 %v2851_v21, %v6510_v52 }
 0x52e   : > { %v2949_v56 = vmul.f32 %v2933_v2, %v6533_v31  ;;  %v2961_v19 = vadd.f32 %v2945_v0, %v6460_v50  ;;  %v3024_v33 = vsub.f32 %v6371_v30, %v3008_v34  ;;  %v2871_v47 = vmul.f32 %v2855_v38, %v6573_v26 }
 0x52f   : > { %v3061_v24 = vsub.f32 1.0, %v3045_v62  ;;  %v3028_v4 = vsub.f32 %v6481_v32, %v3012_v16  ;;  %v2883_v63 = vadd.f32 0.008333079, %v2867_v58  ;;  %v2979_v25 = vmul.f32 0.5, %v6454_v28 }
 0x530   : > { %v2965_v44 = vadd.f32 %v2949_v56, %v6533_v31  ;;  %v3073_v51 = vmul.f32 %v3057_v61, %v2961_v19  ;;  %v3040_v20 = vmul.f32 2.0, %v3024_v33  ;;  %v2887_v7 = vadd.f32 0.008333079, %v2871_v47  ;;  %v4737_v56 = vld [vmem:[%s7566_s3] sm:$0xff] }
 0x531   : > { %v3044_v18 = vmul.f32 2.0, %v3028_v4  ;;  %v2899_v50 = vmul.f32 %v2883_v63, %v6510_v52  ;;  %v2983_v45 = vmul.f32 0.5, %v6526_v27  ;;  %v2995_v30 = vfloor.f32 %v2979_v25  ;;  %v4739_v25 = vld [vmem:[%s7566_s3 + $0x10] sm:$0xff] }
 0x532   : > { %v3077_v43 = vmul.f32 %v3061_v24, %v2965_v44  ;;  %v3056_v37 = vsub.f32 1.0, %v3040_v20  ;;  %v2903_v32 = vmul.f32 %v2887_v7, %v6573_v26  ;;  %v2978_v3 = vmul.f32 0.5, %v6452_v29  ;;  %v4740_v44 = vld [vmem:[%s7566_s3 + $0x18] sm:$0xff]  ;;  %v7752_v20 = vld [vmem:[#allocation16_spill] sm:$0xff] }
 0x533   : > { %v3060_v53 = vsub.f32 1.0, %v3044_v18  ;;  %v2915_v12 = vadd.f32 -0.1666666, %v2899_v50  ;;  %v2999_v31 = vfloor.f32 %v2983_v45  ;;  %v3011_v9 = vmul.f32 2.0, %v2995_v30 }
 0x534   : > { %v4642_v46 = vpack.c.bf16 %v3077_v43, %v3073_v51  ;;  %v3072_v41 = vmul.f32 %v3056_v37, %v6563_v35  ;;  %v2919_v55 = vadd.f32 -0.1666666, %v2903_v32  ;;  %v2982_v49 = vmul.f32 0.5, %v7743_v5  ;;  %v7753_v32 = vld [vmem:[#allocation14_spill] sm:$0xff] }
 0x535   : > { %v3076_v22 = vmul.f32 %v3060_v53, %v6602_v54  ;;  %v2931_v11 = vmul.f32 %v2915_v12, %v6510_v52  ;;  %v3015_v57 = vmul.f32 2.0, %v2999_v31  ;;  %v3027_v15 = vsub.f32 %v6454_v28, %v3011_v9  ;;  %v7749_v52 = vld [vmem:[#allocation26_spill] sm:$0xff]  ;;  %v7750_v28 = vld [vmem:[#allocation15_spill] sm:$0xff] }
 0x536   : > { %4643 = vmatprep.subr.bf16.mxu0 %v4642_v46  ;;  %v2935_v8 = vmul.f32 %v2919_v55, %v6573_v26  ;;  %v2994_v1 = vfloor.f32 %v2978_v3  ;;  %v2998_v40 = vfloor.f32 %v2982_v49  ;;  %v7744_v60 = vlaneseq }
 0x537   : > { %v7745_v42 = vmov 0  ;;  %v4644_v35 = vpack.c.bf16 %v3076_v22, %v3072_v41  ;;  %v2947_v36 = vmul.f32 %v2931_v11, %v7748_v6  ;;  %v3031_v54 = vsub.f32 %v6526_v27, %v3015_v57 }
 0x538   : > { %vm6663_vm3 = vcmp.lt.s32.totalorder %v7744_v60, 512  ;;  %v3043_v21 = vmul.f32 2.0, %v3027_v15  ;;  %v2950_v26 = vmul.f32 %v6608_v13, %v7750_v28  ;;  %v2951_v39 = vmul.f32 %v2935_v8, %v6555_v14 }
 0x539   : > { %v7746_v42 = vsel %vm6663_vm3, 4294967295, %v7745_v42  ;;  %2457 = vst.msk [vmem:[%s6669_s25] sm:$0xf] %vm6663_vm3, %v7749_v52  ;;  %v3010_v23 = vmul.f32 2.0, %v2994_v1  ;;  %v3014_v10 = vmul.f32 2.0, %v2998_v40  ;;  %4645 = vmatpush1.bf16.msra.mxu0 %v4644_v35  ;;  %v2963_v48 = vadd.f32 %v2947_v36, %v7748_v6 }
 0x53a   : > { %7747 = vst [vmem:[#allocation17_spill] sm:$0xff] %v7746_v42  ;;  %v3047_v2 = vmul.f32 2.0, %v3031_v54  ;;  %v2967_v27 = vadd.f32 %v2951_v39, %v6555_v14  ;;  %v3059_v38 = vsub.f32 1.0, %v3043_v21  ;;  %v2962_v61 = vadd.f32 %v6585_v17, %v6485_v59  ;;  %v4738_v59 = vld [vmem:[%s7566_s3 + $0x8] sm:$0xff] }
 0x53b   : > { %v3026_v0 = vsub.f32 %v6452_v29, %v3010_v23  ;;  %v3030_v34 = vsub.f32 %v7743_v5, %v3014_v10  ;;  %v2966_v13 = vadd.f32 %v2950_v26, %v7750_v28  ;;  %v7751_v29 = vmov 0.0  }
 0x53c   : > { %v3063_v62 = vsub.f32 1.0, %v3047_v2  ;;  %4565 = vmatmul.mubr.msk.f32.vlgmr.msra.gmra.mrb[34].mxu0 %vm1037_vm2, %v4737_v56  ;;  %v3075_v14 = vmul.f32 %v3059_v38, %v2963_v48 }
 0x53d   : > { %v3042_v16 = vmul.f32 2.0, %v3026_v0  ;;  %v3046_v58 = vmul.f32 2.0, %v3030_v34  ;;  %3150 = vmatprep.mubr.f32.mxu0 %v7751_v29 }
 0x53e   : > { %v3079_v19 = vmul.f32 %v3063_v62, %v2967_v27 }
 0x53f   : > { %v3058_v33 = vsub.f32 1.0, %v3042_v16  ;;  %v3062_v47 = vsub.f32 1.0, %v3046_v58 }
 0x540   : > { %v4650_v24 = vpack.c.bf16 %v3079_v19, %v3075_v14  ;;  %4566 = vmatmul.mubr.msk.f32.gmra.mrb[36].mxu0 %vm1037_vm2, %v4738_v59 }
 0x541   : > { %v3074_v4 = vmul.f32 %v3058_v33, %v2962_v61  ;;  %v3078_v63 = vmul.f32 %v3062_v47, %v2966_v13  ;;  %3156 = vmatprep.mubr.f32.mxu0 %v7751_v29 }
 0x542   : > { %4651 = vmatprep.subr.bf16.mxu1 %v4650_v24 }
 0x543   : > { %v4652_v17 = vpack.c.bf16 %v3078_v63, %v3074_v4 }
 0x544   : > { %4567 = vmatmul.mubr.msk.f32.gmra.mrb[38].mxu0 %vm1037_vm2, %v4739_v25 }
 0x545   : > { %4653 = vmatpush1.bf16.msra.mxu1 %v4652_v17  ;;  %3162 = vmatprep.mubr.f32.mxu0 %v7751_v29 }
 0x548   : > { %4569 = vmatmul.mubr.msk.f32.vlgmr.msra.gmra.mrb[34].mxu1 %vm1037_vm2, %v4737_v56  ;;  %4568 = vmatmul.mubr.msk.f32.gmra.mrb[40].mxu0 %vm1037_vm2, %v4740_v44 }
 0x549   : > { %3239 = vmatprep.mubr.f32.mxu1 %v7751_v29  ;;  %3738 = vmatprep.mubr.f32.mxu0 %v7751_v29 }
 0x54c   : > { %4570 = vmatmul.mubr.msk.f32.gmra.mrb[36].mxu1 %vm1037_vm2, %v4738_v59 }
 0x54d   : > { %3245 = vmatprep.mubr.f32.mxu1 %v7751_v29 }
 0x550   : > { %4571 = vmatmul.mubr.msk.f32.gmra.mrb[38].mxu1 %vm1037_vm2, %v4739_v25  ;;  %v7754_v25 = vld [vmem:[#allocation12_spill] sm:$0xff] }
 0x551   : > { %3251 = vmatprep.mubr.f32.mxu1 %v7751_v29 }
 0x554   : > { %4572 = vmatmul.mubr.msk.f32.gmra.mrb[40].mxu1 %vm1037_vm2, %v4740_v44 }
 0x555   : > { %3827 = vmatprep.mubr.f32.mxu1 %v7751_v29 }
 0x60f   : > { %v3146_v51 = vpop.f32.mrb[34].mxu0 }
 0x610   : > { %v3147_v7 = vadd.f32 %v3146_v51, %v7752_v20  ;;  %v3148_v18 = vpop.f32.mrb[35].mxu0 }
 0x611   : > { %v3149_v50 = vadd.f32 %v3148_v18, %v7752_v20 }
 0x612   : > { %v3258_v45 = vmul.f32 0.31830987, %v3147_v7 }
 0x613   : > { %v3259_v30 = vmul.f32 0.31830987, %v3149_v50  ;;  %v3152_v43 = vpop.f32.mrb[36].mxu0 }
 0x614   : > { %v3274_v37 = vadd.f32 0.5, %v3258_v45  ;;  %v3153_v3 = vadd.f32 %v3152_v43, %v7753_v32  ;;  %v3154_v53 = vpop.f32.mrb[37].mxu0 }
 0x615   : > { %v3275_v12 = vadd.f32 0.5, %v3259_v30  ;;  %v3155_v31 = vadd.f32 %v3154_v53, %v7753_v32 }
 0x616   : > { %v6717_v9 = vfloor.f32 %v3274_v37  ;;  %v3262_v46 = vmul.f32 0.31830987, %v3153_v3 }
 0x617   : > { %v6719_v41 = vfloor.f32 %v3275_v12  ;;  %v3263_v55 = vmul.f32 0.31830987, %v3155_v31  ;;  %v3158_v5 = vpop.f32.mrb[38].mxu0 }
 0x618   : > { %v3306_v49 = vmul.f32 3.1414795, %v6717_v9  ;;  %v3278_v22 = vadd.f32 0.5, %v3262_v46  ;;  %v3338_v8 = vmul.f32 0.00011315942, %v6717_v9  ;;  %v3370_v1 = vmul.f32 1.9841873e-09, %v6717_v9 }
 0x619   : > { %v3307_v11 = vmul.f32 3.1414795, %v6719_v41  ;;  %v3279_v57 = vadd.f32 0.5, %v3263_v55  ;;  %v6727_v35 = vpop.f32.mrb[39].mxu0  ;;  %v3339_v36 = vmul.f32 0.00011315942, %v6719_v41  ;;  %v6756_v44 = vadd.f32 %v3158_v5, %v7754_v25 }
 0x61a   : > { %v3322_v15 = vsub.f32 %v3147_v7, %v3306_v49  ;;  %v6725_v60 = vfloor.f32 %v3278_v22  ;;  %v3371_v39 = vmul.f32 1.9841873e-09, %v6719_v41  ;;  %v6759_v51 = vmul.f32 0.5, %v6719_v41 }
 0x61b   : > { %v3235_v40 = vpop.f32.mrb[34].mxu1  ;;  %v3323_v6 = vsub.f32 %v3149_v50, %v3307_v11  ;;  %v6731_v52 = vfloor.f32 %v3279_v57  ;;  %v6733_v28 = vpop.f32.mrb[40].mxu0 }
 0x61c   : > { %v3236_v54 = vadd.f32 %v3235_v40, %v7752_v20  ;;  %v3237_v21 = vpop.f32.mrb[35].mxu1  ;;  %v3354_v26 = vsub.f32 %v3322_v15, %v3338_v8  ;;  %v3310_v10 = vmul.f32 3.1414795, %v6725_v60  ;;  %v6738_v48 = vpop.f32.mrb[41].mxu0  ;;  %v3342_v0 = vmul.f32 0.00011315942, %v6725_v60 }
 0x61d   : > { %v3238_v23 = vadd.f32 %v3237_v21, %v7752_v20  ;;  %v3355_v2 = vsub.f32 %v3323_v6, %v3339_v36  ;;  %v3311_v34 = vmul.f32 3.1414795, %v6731_v52  ;;  %v3374_v13 = vmul.f32 1.9841873e-09, %v6725_v60 }
 0x61e   : > { %v3260_v27 = vmul.f32 0.31830987, %v3236_v54  ;;  %v6742_v38 = vsub.f32 %v3354_v26, %v3370_v1  ;;  %v3326_v61 = vsub.f32 %v3153_v3, %v3310_v10  ;;  %v3343_v19 = vmul.f32 0.00011315942, %v6731_v52 }
 0x61f   : > { %v3261_v62 = vmul.f32 0.31830987, %v3238_v23  ;;  %v3241_v16 = vpop.f32.mrb[36].mxu1  ;;  %v6745_v58 = vsub.f32 %v3355_v2, %v3371_v39  ;;  %v3327_v14 = vsub.f32 %v3155_v31, %v3311_v34  ;;  %v3375_v37 = vmul.f32 1.9841873e-09, %v6731_v52 }
 0x620   : > { %v3276_v56 = vadd.f32 0.5, %v3260_v27  ;;  %v3243_v33 = vpop.f32.mrb[37].mxu1  ;;  %v6750_v47 = vmul.f32 %v6742_v38, %v6742_v38  ;;  %v3358_v4 = vsub.f32 %v3326_v61, %v3342_v0  ;;  %v3242_v63 = vadd.f32 %v3241_v16, %v7753_v32 }
 0x621   : > { %v3277_v24 = vadd.f32 0.5, %v3261_v62  ;;  %v3359_v17 = vsub.f32 %v3327_v14, %v3343_v19  ;;  %v6770_v30 = vmul.f32 %v6745_v58, %v6745_v58  ;;  %v3244_v3 = vadd.f32 %v3243_v33, %v7753_v32 }
 0x622   : > { %v6753_v59 = vfloor.f32 %v3276_v56  ;;  %v3418_v20 = vmul.f32 2.608316e-06, %v6750_v47  ;;  %v6764_v18 = vsub.f32 %v3358_v4, %v3374_v13  ;;  %v3264_v50 = vmul.f32 0.31830987, %v3242_v63 }
 0x623   : > { %v6762_v7 = vfloor.f32 %v3277_v24  ;;  %v6766_v45 = vpop.f32.mrb[38].mxu1  ;;  %v6785_v11 = vsub.f32 %v3359_v17, %v3375_v37  ;;  %v3265_v36 = vmul.f32 0.31830987, %v3244_v3  ;;  %v6808_v16 = vadd.f32 %v6727_v35, %v7754_v25 }
 0x624   : > { %v3308_v43 = vmul.f32 3.1414795, %v6753_v59  ;;  %v6775_v53 = vpop.f32.mrb[39].mxu1  ;;  %v3434_v12 = vadd.f32 -0.0001981069, %v3418_v20  ;;  %v3340_v31 = vmul.f32 0.00011315942, %v6753_v59  ;;  %v6781_v55 = vmul.f32 %v6764_v18, %v6764_v18 }
 0x625   : > { %v3309_v46 = vmul.f32 3.1414795, %v6762_v7  ;;  %v3372_v49 = vmul.f32 1.9841873e-09, %v6753_v59  ;;  %v3341_v22 = vmul.f32 0.00011315942, %v6762_v7  ;;  %v3280_v8 = vadd.f32 0.5, %v3264_v50 }
 0x626   : > { %v3324_v5 = vsub.f32 %v3236_v54, %v3308_v43  ;;  %v3450_v32 = vmul.f32 %v3434_v12, %v6750_v47  ;;  %v3422_v15 = vmul.f32 2.608316e-06, %v6781_v55  ;;  %v3373_v6 = vmul.f32 1.9841873e-09, %v6762_v7 }
 0x627   : > { %v3325_v57 = vsub.f32 %v3238_v23, %v3309_v46  ;;  %v6789_v1 = vpop.f32.mrb[40].mxu1  ;;  %v3266_v54 = vmul.f32 0.31830987, %v6756_v44  ;;  %v6793_v10 = vfloor.f32 %v3280_v8  ;;  %v6801_v23 = vmul.f32 %v6785_v11, %v6785_v11 }
 0x628   : > { %v3356_v40 = vsub.f32 %v3324_v5, %v3340_v31  ;;  %v3466_v21 = vadd.f32 0.008333079, %v3450_v32  ;;  %v3438_v39 = vadd.f32 -0.0001981069, %v3422_v15  ;;  %v6795_v2 = vpop.f32.mrb[41].mxu1  ;;  %v3281_v0 = vadd.f32 0.5, %v3265_v36 }
 0x629   : > { %v3357_v26 = vsub.f32 %v3325_v57, %v3341_v22  ;;  %v3282_v34 = vadd.f32 0.5, %v3266_v54  ;;  %v3312_v13 = vmul.f32 3.1414795, %v6793_v10  ;;  %v6811_v56 = vmul.f32 2.608316e-06, %v6770_v30 }
 0x62a   : > { %v6797_v27 = vsub.f32 %v3356_v40, %v3372_v49  ;;  %v3482_v62 = vmul.f32 %v3466_v21, %v6750_v47  ;;  %v3454_v61 = vmul.f32 %v3438_v39, %v6781_v55  ;;  %v6817_v33 = vfloor.f32 %v3281_v0 }
 0x62b   : > { %v6815_v19 = vsub.f32 %v3357_v26, %v3373_v6  ;;  %v3328_v17 = vsub.f32 %v3242_v63, %v3312_v13  ;;  %v3344_v20 = vmul.f32 0.00011315942, %v6793_v10  ;;  %v6821_v43 = vmul.f32 2.608316e-06, %v6801_v23 }
 0x62c   : > { %v3404_v14 = vmul.f32 %v6797_v27, %v6797_v27  ;;  %v3498_v24 = vadd.f32 -0.1666666, %v3482_v62  ;;  %v3470_v4 = vadd.f32 0.008333079, %v3454_v61  ;;  %v3313_v35 = vmul.f32 3.1414795, %v6817_v33 }
 0x62d   : > { %v6824_v37 = vfloor.f32 %v3282_v34  ;;  %v3360_v31 = vsub.f32 %v3328_v17, %v3344_v20  ;;  %v3376_v46 = vmul.f32 1.9841873e-09, %v6793_v10  ;;  %v3267_v5 = vmul.f32 0.31830987, %v6808_v16 }
 0x62e   : > { %v3420_v50 = vmul.f32 2.608316e-06, %v3404_v14  ;;  %v3486_v12 = vmul.f32 %v3470_v4, %v6781_v55  ;;  %v3329_v22 = vsub.f32 %v3244_v3, %v3313_v35  ;;  %v3345_v63 = vmul.f32 0.00011315942, %v6817_v33 }
 0x62f   : > { %v3314_v32 = vmul.f32 3.1414795, %v6824_v37  ;;  %v3514_v57 = vmul.f32 %v3498_v24, %v6750_v47  ;;  %v6834_v15 = vmul.f32 %v6815_v19, %v6815_v19  ;;  %v6836_v8 = vsub.f32 %v3360_v31, %v3376_v46 }
 0x630   : > { %v3436_v49 = vadd.f32 -0.0001981069, %v3420_v50  ;;  %v3377_v40 = vmul.f32 1.9841873e-09, %v6817_v33  ;;  %v3361_v36 = vsub.f32 %v3329_v22, %v3345_v63  ;;  %v3346_v3 = vmul.f32 0.00011315942, %v6824_v37 }
 0x631   : > { %v3330_v54 = vsub.f32 %v6756_v44, %v3314_v32  ;;  %v3502_v21 = vadd.f32 -0.1666666, %v3486_v12  ;;  %v3408_v26 = vmul.f32 %v6836_v8, %v6836_v8  ;;  %v3378_v47 = vmul.f32 1.9841873e-09, %v6824_v37 }
 0x632   : > { %v3452_v6 = vmul.f32 %v3436_v49, %v3404_v14  ;;  %v3283_v39 = vadd.f32 0.5, %v3267_v5  ;;  %v6844_v34 = vsub.f32 %v3361_v36, %v3377_v40  ;;  %v3248_v61 = vadd.f32 %v6766_v45, %v7754_v25 }
 0x633   : > { %v3362_v62 = vsub.f32 %v3330_v54, %v3346_v3  ;;  %v6849_v13 = vmul.f32 2.608316e-06, %v6834_v15  ;;  %v3424_v44 = vmul.f32 2.608316e-06, %v3408_v26  ;;  %v3250_v4 = vadd.f32 %v6775_v53, %v7754_v25 }
 0x634   : > { %v3468_v0 = vadd.f32 0.008333079, %v3452_v6  ;;  %v6851_v24 = vfloor.f32 %v3283_v39  ;;  %v3530_v17 = vmul.f32 %v3514_v57, %v6742_v38  ;;  %v3268_v35 = vmul.f32 0.31830987, %v3248_v61  ;;  %v7755_v6 = vld [vmem:[#allocation13_spill] sm:$0xff] }
 0x635   : > { %v6856_v50 = vsub.f32 %v3362_v62, %v3378_v47  ;;  %v3518_v12 = vmul.f32 %v3502_v21, %v6781_v55  ;;  %v3440_v31 = vadd.f32 -0.0001981069, %v3424_v44  ;;  %v6861_v45 = vmul.f32 %v6844_v34, %v6844_v34 }
 0x636   : > { %v3484_v20 = vmul.f32 %v3468_v0, %v3404_v14  ;;  %v3315_v46 = vmul.f32 3.1414795, %v6851_v24  ;;  %v3347_v25 = vmul.f32 0.00011315942, %v6851_v24  ;;  %v3379_v53 = vmul.f32 1.9841873e-09, %v6851_v24 }
 0x637   : > { %v3410_v49 = vmul.f32 %v6856_v50, %v6856_v50  ;;  %v3456_v22 = vmul.f32 %v3440_v31, %v3408_v26  ;;  %v3284_v32 = vadd.f32 0.5, %v3268_v35  ;;  %v3269_v55 = vmul.f32 0.31830987, %v3250_v4 }
 0x638   : > { %v3500_v5 = vadd.f32 -0.1666666, %v3484_v20  ;;  %v3331_v63 = vsub.f32 %v6808_v16, %v3315_v46  ;;  %v3165_v36 = vadd.f32 %v6733_v28, %v7755_v6  ;;  %v3167_v54 = vadd.f32 %v6738_v48, %v7755_v6 }
 0x639   : > { %v3426_v40 = vmul.f32 2.608316e-06, %v3410_v49  ;;  %v3472_v3 = vadd.f32 0.008333079, %v3456_v22  ;;  %v6873_v47 = vfloor.f32 %v3284_v32  ;;  %v3285_v39 = vadd.f32 0.5, %v3269_v55 }
 0x63a   : > { %v3516_v57 = vmul.f32 %v3500_v5, %v3404_v14  ;;  %v3363_v21 = vsub.f32 %v3331_v63, %v3347_v25  ;;  %v3534_v0 = vmul.f32 %v3518_v12, %v6764_v18  ;;  %v3270_v44 = vmul.f32 0.31830987, %v3165_v36 }
 0x63b   : > { %7756 = vst [vmem:[#allocation7_spill] sm:$0xff] %v6873_v47  ;;  %v3442_v62 = vadd.f32 -0.0001981069, %v3426_v40  ;;  %v3271_v16 = vmul.f32 0.31830987, %v3167_v54  ;;  %v6877_v20 = vadd.f32 %v3530_v17, %v6742_v38  ;;  %v3488_v14 = vmul.f32 %v3472_v3, %v3408_v26 }
 0x63c   : > { %v6880_v35 = vmul.f32 2.608316e-06, %v6861_v45  ;;  %v3316_v28 = vmul.f32 3.1414795, %v6873_v47  ;;  %v3532_v48 = vmul.f32 %v3516_v57, %v6797_v27  ;;  %v6884_v46 = vsub.f32 %v3363_v21, %v3379_v53 }
 0x63d   : > { %v3458_v31 = vmul.f32 %v3442_v62, %v3410_v49  ;;  %v6886_v5 = vfloor.f32 %v3285_v39  ;;  %v3504_v12 = vadd.f32 -0.1666666, %v3488_v14  ;;  %v3348_v22 = vmul.f32 0.00011315942, %v6873_v47 }
 0x63e   : > { %v3332_v25 = vsub.f32 %v3248_v61, %v3316_v28  ;;  %v3286_v63 = vadd.f32 0.5, %v3270_v44  ;;  %v6890_v38 = vadd.f32 %v3534_v0, %v6764_v18  ;;  %v3287_v55 = vadd.f32 0.5, %v3271_v16 }
 0x63f   : > { %7757 = vst [vmem:[#allocation6_spill] sm:$0xff] %v6886_v5  ;;  %v3474_v17 = vadd.f32 0.008333079, %v3458_v31  ;;  %v3317_v32 = vmul.f32 3.1414795, %v6886_v5  ;;  %v3520_v40 = vmul.f32 %v3504_v12, %v3408_v26  ;;  %v3349_v53 = vmul.f32 0.00011315942, %v6886_v5 }
 0x640   : > { %v3364_v3 = vsub.f32 %v3332_v25, %v3348_v22  ;;  %v3380_v57 = vmul.f32 1.9841873e-09, %v6873_v47  ;;  %v6895_v62 = vfloor.f32 %v3286_v63  ;;  %v6897_v61 = vfloor.f32 %v3287_v55 }
 0x641   : > { %v3490_v21 = vmul.f32 %v3474_v17, %v3410_v49  ;;  %v3333_v39 = vsub.f32 %v3250_v4, %v3317_v32  ;;  %v6900_v44 = vadd.f32 %v3532_v48, %v6797_v27  ;;  %v6904_v18 = vmul.f32 %v6884_v46, %v6884_v46 }
 0x642   : > { %v6906_v0 = vsub.f32 %v3364_v3, %v3380_v57  ;;  %v3254_v26 = vadd.f32 %v6789_v1, %v7755_v6  ;;  %v3318_v4 = vmul.f32 3.1414795, %v6895_v62  ;;  %v3256_v28 = vadd.f32 %v6795_v2, %v7755_v6 }
 0x643   : > { %v3506_v16 = vadd.f32 -0.1666666, %v3490_v21  ;;  %v3365_v14 = vsub.f32 %v3333_v39, %v3349_v53  ;;  %v3536_v31 = vmul.f32 %v3520_v40, %v6836_v8  ;;  %v3381_v48 = vmul.f32 1.9841873e-09, %v6886_v5 }
 0x644   : > { %7758 = vst [vmem:[#allocation8_spill] sm:$0xff] %v6906_v0  ;;  %v6916_v27 = vmul.f32 %v6906_v0, %v6906_v0  ;;  %v3319_v12 = vmul.f32 3.1414795, %v6897_v61  ;;  %v3334_v22 = vsub.f32 %v3165_v36, %v3318_v4  ;;  %v3350_v1 = vmul.f32 0.00011315942, %v6895_v62 }
 0x645   : > { %v3522_v25 = vmul.f32 %v3506_v16, %v3410_v49  ;;  %v3382_v63 = vmul.f32 1.9841873e-09, %v6895_v62  ;;  %v3351_v2 = vmul.f32 0.00011315942, %v6897_v61  ;;  %v3272_v6 = vmul.f32 0.31830987, %v3254_v26 }
 0x646   : > { %v3428_v17 = vmul.f32 2.608316e-06, %v6916_v27  ;;  %v3335_v32 = vsub.f32 %v3167_v54, %v3319_v12  ;;  %v6924_v55 = vsub.f32 %v3365_v14, %v3381_v48  ;;  %v3366_v40 = vsub.f32 %v3334_v22, %v3350_v1 }
 0x647   : > { %v3383_v3 = vmul.f32 1.9841873e-09, %v6897_v61  ;;  %v3273_v57 = vmul.f32 0.31830987, %v3256_v28  ;;  %v3288_v49 = vadd.f32 0.5, %v3272_v6  ;;  %v6929_v39 = vadd.f32 %v3536_v31, %v6836_v8 }
 0x648   : > { %7759 = vst [vmem:[#allocation9_spill] sm:$0xff] %v6924_v55  ;;  %v3444_v53 = vadd.f32 -0.0001981069, %v3428_v17  ;;  %v3367_v21 = vsub.f32 %v3335_v32, %v3351_v2  ;;  %v3435_v36 = vadd.f32 -0.0001981069, %v6811_v56  ;;  %v6934_v54 = vsub.f32 %v3366_v40, %v3382_v63 }
 0x649   : > { %v6932_v16 = vmul.f32 2.608316e-06, %v6904_v18  ;;  %v3289_v4 = vadd.f32 0.5, %v3273_v57  ;;  %v6939_v12 = vfloor.f32 %v3288_v49  ;;  %v3439_v22 = vadd.f32 -0.0001981069, %v6821_v43 }
 0x64a   : > { %v3460_v14 = vmul.f32 %v3444_v53, %v6916_v27  ;;  %v6937_v48 = vsub.f32 %v3367_v21, %v3383_v3  ;;  %v3538_v1 = vmul.f32 %v3522_v25, %v6856_v50  ;;  %v6945_v56 = vmul.f32 %v6934_v54, %v6934_v54 }
 0x64b   : > { %v6947_v8 = vfloor.f32 %v3289_v4  ;;  %v3451_v31 = vmul.f32 %v3435_v36, %v6770_v30  ;;  %v6952_v17 = vmul.f32 %v6924_v55, %v6924_v55  ;;  %v3320_v32 = vmul.f32 3.1414795, %v6939_v12 }
 0x64c   : > { %v3476_v63 = vadd.f32 0.008333079, %v3460_v14  ;;  %v3567_v2 = vmul.f32 0.5, %v6731_v52  ;;  %v3430_v43 = vmul.f32 2.608316e-06, %v6945_v56  ;;  %v6959_v25 = vmul.f32 %v6937_v48, %v6937_v48 }
 0x64d   : > { %v3321_v6 = vmul.f32 3.1414795, %v6947_v8  ;;  %v3455_v40 = vmul.f32 %v3439_v22, %v6801_v23  ;;  %v3336_v57 = vsub.f32 %v3254_v26, %v3320_v32  ;;  %v3352_v53 = vmul.f32 0.00011315942, %v6939_v12 }
 0x64e   : > { %v3492_v3 = vmul.f32 %v3476_v63, %v6916_v27  ;;  %v3384_v21 = vmul.f32 1.9841873e-09, %v6939_v12  ;;  %v3446_v49 = vadd.f32 -0.0001981069, %v3430_v43  ;;  %v3353_v4 = vmul.f32 0.00011315942, %v6947_v8 }
 0x64f   : > { %v3337_v36 = vsub.f32 %v3256_v28, %v3321_v6  ;;  %v3467_v14 = vadd.f32 0.008333079, %v3451_v31  ;;  %v3368_v42 = vsub.f32 %v3336_v57, %v3352_v53  ;;  %v3385_v29 = vmul.f32 1.9841873e-09, %v6947_v8 }
 0x650   : > { %v3471_v55 = vadd.f32 0.008333079, %v3455_v40  ;;  %v3579_v0 = vfloor.f32 %v6759_v51  ;;  %v3462_v22 = vmul.f32 %v3446_v49, %v6945_v56  ;;  %v3583_v63 = vfloor.f32 %v3567_v2 }
 0x651   : > { %v3369_v47 = vsub.f32 %v3337_v36, %v3353_v4  ;;  %v3483_v26 = vmul.f32 %v3467_v14, %v6770_v30  ;;  %v3508_v32 = vadd.f32 -0.1666666, %v3492_v3  ;;  %v6971_v5 = vsub.f32 %v3368_v42, %v3384_v21 }
 0x652   : > { %v3487_v28 = vmul.f32 %v3471_v55, %v6801_v23  ;;  %v3595_v43 = vmul.f32 2.0, %v3579_v0  ;;  %v6975_v31 = vadd.f32 %v3538_v1, %v6856_v50  ;;  %v3478_v6 = vadd.f32 0.008333079, %v3462_v22 }
 0x653   : > { %v3499_v57 = vadd.f32 -0.1666666, %v3483_v26  ;;  %v3599_v40 = vmul.f32 2.0, %v3583_v63  ;;  %v6979_v51 = vmul.f32 %v6971_v5, %v6971_v5  ;;  %v6981_v53 = vsub.f32 %v3369_v47, %v3385_v29 }
 0x654   : > { %v3503_v49 = vadd.f32 -0.1666666, %v3487_v28  ;;  %v3611_v2 = vsub.f32 %v6719_v41, %v3595_v43  ;;  %v6985_v42 = vmul.f32 2.608316e-06, %v6952_v17  ;;  %v3494_v0 = vmul.f32 %v3478_v6, %v6945_v56 }
 0x655   : > { %v3515_v50 = vmul.f32 %v3499_v57, %v6770_v30  ;;  %v3615_v55 = vsub.f32 %v6731_v52, %v3599_v40  ;;  %v6991_v1 = vmul.f32 2.608316e-06, %v6959_v25  ;;  %v3432_v3 = vmul.f32 2.608316e-06, %v6979_v51 }
 0x656   : > { %v3519_v29 = vmul.f32 %v3503_v49, %v6801_v23  ;;  %v3627_v47 = vmul.f32 2.0, %v3611_v2  ;;  %v6996_v21 = vmul.f32 %v3508_v32, %v6916_v27  ;;  %v3510_v41 = vadd.f32 -0.1666666, %v3494_v0 }
 0x657   : > { %v3531_v36 = vmul.f32 %v3515_v50, %v6745_v58  ;;  %v3631_v4 = vmul.f32 2.0, %v3615_v55  ;;  %v3448_v14 = vadd.f32 -0.0001981069, %v3432_v3  ;;  %v7001_v30 = vmul.f32 %v6981_v53, %v6981_v53 }
 0x658   : > { %v3535_v52 = vmul.f32 %v3519_v29, %v6785_v11  ;;  %v3562_v22 = vmul.f32 0.5, %v6717_v9  ;;  %v3643_v23 = vsub.f32 1.0, %v3627_v47  ;;  %v3566_v27 = vmul.f32 0.5, %v6725_v60 }
 0x659   : > { %v3547_v26 = vadd.f32 %v3531_v36, %v6745_v58  ;;  %v3647_v63 = vsub.f32 1.0, %v3631_v4  ;;  %v3464_v32 = vmul.f32 %v3448_v14, %v6979_v51  ;;  %v3437_v6 = vadd.f32 -0.0001981069, %v6849_v13 }
 0x65a   : > { %v3551_v28 = vadd.f32 %v3535_v52, %v6785_v11  ;;  %v3578_v43 = vfloor.f32 %v3562_v22  ;;  %v3526_v57 = vmul.f32 %v3510_v41, %v6945_v56  ;;  %v3582_v49 = vfloor.f32 %v3566_v27 }
 0x65b   : > { %v3659_v40 = vmul.f32 %v3643_v23, %v3547_v26  ;;  %v3441_v2 = vadd.f32 -0.0001981069, %v6880_v35  ;;  %v3480_v0 = vadd.f32 0.008333079, %v3464_v32  ;;  %v3453_v55 = vmul.f32 %v3437_v6, %v6834_v15 }
 0x65c   : > { %v3663_v50 = vmul.f32 %v3647_v63, %v3551_v28  ;;  %v3594_v58 = vmul.f32 2.0, %v3578_v43  ;;  %v7014_v3 = vmul.f32 2.608316e-06, %v7001_v30  ;;  %v3598_v29 = vmul.f32 2.0, %v3582_v49 }
 0x65d   : > { %v3457_v11 = vmul.f32 %v3441_v2, %v6861_v45  ;;  %v3565_v47 = vmul.f32 0.5, %v6762_v7  ;;  %v3496_v13 = vmul.f32 %v3480_v0, %v6979_v51  ;;  %v3469_v36 = vadd.f32 0.008333079, %v3453_v55 }
 0x65e   : > { %v4654_v56 = vpack.c.bf16 %v3663_v50, %v3659_v40  ;;  %v3610_v41 = vsub.f32 %v6717_v9, %v3594_v58  ;;  %v3614_v35 = vsub.f32 %v6725_v60, %v3598_v29  ;;  %v3569_v14 = vmul.f32 0.5, %v6817_v33 }
 0x65f   : > { %v3473_v4 = vadd.f32 0.008333079, %v3457_v11  ;;  %v3581_v52 = vfloor.f32 %v3565_v47  ;;  %v3542_v22 = vmul.f32 %v3526_v57, %v6934_v54  ;;  %v3485_v23 = vmul.f32 %v3469_v36, %v6834_v15 }
 0x660   : > { %4655 = vmatprep.subr.bf16.mxu0 %v4654_v56  ;;  %v3626_v26 = vmul.f32 2.0, %v3610_v41  ;;  %v3564_v63 = vmul.f32 0.5, %v6753_v59  ;;  %v3630_v27 = vmul.f32 2.0, %v3614_v35  ;;  %v3585_v28 = vfloor.f32 %v3569_v14 }
 0x661   : > { %v3489_v32 = vmul.f32 %v3473_v4, %v6861_v45  ;;  %v3597_v9 = vmul.f32 2.0, %v3581_v52  ;;  %v3512_v43 = vadd.f32 -0.1666666, %v3496_v13  ;;  %v3501_v60 = vadd.f32 -0.1666666, %v3485_v23 }
 0x662   : > { %v3642_v6 = vsub.f32 1.0, %v3626_v26  ;;  %v3568_v40 = vmul.f32 0.5, %v6793_v10  ;;  %v3646_v49 = vsub.f32 1.0, %v3630_v27  ;;  %v3601_v0 = vmul.f32 2.0, %v3585_v28 }
 0x663   : > { %v3505_v2 = vadd.f32 -0.1666666, %v3489_v32  ;;  %v3613_v57 = vsub.f32 %v6762_v7, %v3597_v9  ;;  %v7029_v50 = vadd.f32 %v3542_v22, %v6934_v54  ;;  %v3517_v55 = vmul.f32 %v3501_v60, %v6834_v15 }
 0x664   : > { %v3658_v58 = vmul.f32 %v3642_v6, %v6877_v20  ;;  %v3580_v29 = vfloor.f32 %v3564_v63  ;;  %v3662_v11 = vmul.f32 %v3646_v49, %v6890_v38  ;;  %v3617_v13 = vsub.f32 %v6817_v33, %v3601_v0 }
 0x665   : > { %v3521_v47 = vmul.f32 %v3505_v2, %v6861_v45  ;;  %v3629_v56 = vmul.f32 2.0, %v3613_v57  ;;  %v7037_v41 = vmul.f32 %v3512_v43, %v6979_v51  ;;  %v3533_v7 = vmul.f32 %v3517_v55, %v6815_v19 }
 0x666   : > { %v3584_v36 = vfloor.f32 %v3568_v40  ;;  %v3596_v54 = vmul.f32 2.0, %v3580_v29  ;;  %v4656_v35 = vpack.c.bf16 %v3662_v11, %v3658_v58  ;;  %v3633_v4 = vmul.f32 2.0, %v3617_v13 }
 0x667   : > { %v3537_v20 = vmul.f32 %v3521_v47, %v6844_v34  ;;  %v3645_v15 = vsub.f32 1.0, %v3629_v56  ;;  %v3549_v14 = vadd.f32 %v3533_v7, %v6815_v19  ;;  %v3443_v33 = vadd.f32 -0.0001981069, %v6932_v16 }
 0x668   : > { %v3600_v38 = vmul.f32 2.0, %v3584_v36  ;;  %v3612_v45 = vsub.f32 %v6753_v59, %v3596_v54  ;;  %4657 = vmatpush1.bf16.msra.mxu0 %v4656_v35  ;;  %v3649_v52 = vsub.f32 1.0, %v3633_v4  ;;  %v3447_v22 = vadd.f32 -0.0001981069, %v6991_v1 }
 0x669   : > { %v3553_v51 = vadd.f32 %v3537_v20, %v6844_v34  ;;  %v3571_v26 = vmul.f32 0.5, %v6851_v24  ;;  %v3661_v23 = vmul.f32 %v3645_v15, %v3549_v14  ;;  %v3459_v32 = vmul.f32 %v3443_v33, %v6904_v18 }
 0x66a   : > { %v3616_v63 = vsub.f32 %v6793_v10, %v3600_v38  ;;  %v3628_v27 = vmul.f32 2.0, %v3612_v45  ;;  %v3463_v28 = vmul.f32 %v3447_v22, %v6959_v25  ;;  %v3575_v59 = vmul.f32 0.5, %v6897_v61 }
 0x66b   : > { %v3665_v19 = vmul.f32 %v3649_v52, %v3553_v51  ;;  %v3587_v16 = vfloor.f32 %v3571_v26  ;;  %v3475_v34 = vadd.f32 0.008333079, %v3459_v32  ;;  %v3570_v6 = vmul.f32 0.5, %v6824_v37 }
 0x66c   : > { %v3632_v9 = vmul.f32 2.0, %v3616_v63  ;;  %v3644_v43 = vsub.f32 1.0, %v3628_v27  ;;  %v3479_v60 = vadd.f32 0.008333079, %v3463_v28  ;;  %v3591_v40 = vfloor.f32 %v3575_v59 }
 0x66d   : > { %v4662_v1 = vpack.c.bf16 %v3665_v19, %v3661_v23  ;;  %v3603_v49 = vmul.f32 2.0, %v3587_v16  ;;  %v3491_v0 = vmul.f32 %v3475_v34, %v6904_v18  ;;  %v3574_v57 = vmul.f32 0.5, %v6895_v62 }
 0x66e   : > { %v3648_v2 = vsub.f32 1.0, %v3632_v9  ;;  %v3660_v10 = vmul.f32 %v3644_v43, %v6900_v44  ;;  %v3495_v58 = vmul.f32 %v3479_v60, %v6959_v25  ;;  %v3607_v55 = vmul.f32 2.0, %v3591_v40 }
 0x66f   : > { %4663 = vmatprep.subr.bf16.mxu1 %v4662_v1  ;;  %v3619_v29 = vsub.f32 %v6851_v24, %v3603_v49  ;;  %v3586_v11 = vfloor.f32 %v3570_v6  ;;  %v3507_v13 = vadd.f32 -0.1666666, %v3491_v0  ;;  %v3590_v56 = vfloor.f32 %v3574_v57 }
 0x670   : > { %v3664_v47 = vmul.f32 %v3648_v2, %v6929_v39  ;;  %v3445_v7 = vadd.f32 -0.0001981069, %v6985_v42  ;;  %v3511_v36 = vadd.f32 -0.1666666, %v3495_v58  ;;  %v3623_v44 = vsub.f32 %v6897_v61, %v3607_v55 }
 0x671   : > { %v3635_v54 = vmul.f32 2.0, %v3619_v29  ;;  %v3602_v35 = vmul.f32 2.0, %v3586_v11  ;;  %v3523_v4 = vmul.f32 %v3507_v13, %v6904_v18  ;;  %v3606_v15 = vmul.f32 2.0, %v3590_v56  ;;  %v7762_v13 = vld [vmem:[#allocation8_spill] sm:$0xff] }
 0x672   : > { %v4664_v20 = vpack.c.bf16 %v3664_v47, %v3660_v10  ;;  %v3449_v14 = vadd.f32 -0.0001981069, %v7014_v3  ;;  %v3527_v24 = vmul.f32 %v3511_v36, %v6959_v25  ;;  %v3639_v38 = vmul.f32 2.0, %v3623_v44  ;;  %v7760_v3 = vld [vmem:[#allocation6_spill] sm:$0xff] }
 0x673   : > { %v3651_v45 = vsub.f32 1.0, %v3635_v54  ;;  %v3618_v39 = vsub.f32 %v6824_v37, %v3602_v35  ;;  %v3539_v42 = vmul.f32 %v3523_v4, %v6884_v46  ;;  %v3622_v33 = vsub.f32 %v6895_v62, %v3606_v15 }
 0x674   : > { %4665 = vmatpush1.bf16.msra.mxu1 %v4664_v20  ;;  %v3461_v61 = vmul.f32 %v3445_v7, %v6952_v17  ;;  %v3465_v51 = vmul.f32 %v3449_v14, %v7001_v30  ;;  %v3543_v18 = vmul.f32 %v3527_v24, %v6937_v48  ;;  %v3655_v52 = vsub.f32 1.0, %v3639_v38  ;;  %v7763_v7 = vld [vmem:[#allocation9_spill] sm:$0xff]  ;;  %v4741_v24 = vld [vmem:[%s7568_s5] sm:$0xff] }
 0x675   : > { %v3634_v22 = vmul.f32 2.0, %v3618_v39  ;;  %v3573_v26 = vmul.f32 0.5, %v7760_v3  ;;  %v3555_v25 = vadd.f32 %v3539_v42, %v6884_v46  ;;  %v3638_v23 = vmul.f32 2.0, %v3622_v33 }
 0x676   : > { %v3477_v63 = vadd.f32 0.008333079, %v3461_v61  ;;  %v3481_v37 = vadd.f32 0.008333079, %v3465_v51  ;;  %v3559_v27 = vadd.f32 %v3543_v18, %v6937_v48  ;;  %v3577_v62 = vmul.f32 0.5, %v6947_v8  ;;  %v7761_v48 = vld [vmem:[#allocation7_spill] sm:$0xff] }
 0x677   : > { %v3650_v32 = vsub.f32 1.0, %v3634_v22  ;;  %v3589_v19 = vfloor.f32 %v3573_v26  ;;  %v3667_v28 = vmul.f32 %v3651_v45, %v3555_v25  ;;  %v3654_v59 = vsub.f32 1.0, %v3638_v23  ;;  %v4744_v26 = vld [vmem:[%s7568_s5 + $0x18] sm:$0xff] }
 0x678   : > { %v3493_v16 = vmul.f32 %v3477_v63, %v6952_v17  ;;  %v3497_v9 = vmul.f32 %v3481_v37, %v7001_v30  ;;  %v3671_v43 = vmul.f32 %v3655_v52, %v3559_v27  ;;  %v3593_v6 = vfloor.f32 %v3577_v62  ;;  %v7765_v23 = vld [vmem:[#allocation18_spill] sm:$0xff] }
 0x679   : > { %v3666_v34 = vmul.f32 %v3650_v32, %v6975_v31  ;;  %v3605_v46 = vmul.f32 2.0, %v3589_v19  ;;  %v3670_v1 = vmul.f32 %v3654_v59, %v7029_v50  ;;  %v3572_v49 = vmul.f32 0.5, %v7761_v48  ;;  %v7766_v59 = vld [vmem:[#allocation21_spill] sm:$0xff] }
 0x67a   : > { %v3509_v60 = vadd.f32 -0.1666666, %v3493_v16  ;;  %v3513_v40 = vadd.f32 -0.1666666, %v3497_v9  ;;  %v4658_v2 = vpack.c.bf16 %v3671_v43, %v3667_v28  ;;  %v3609_v10 = vmul.f32 2.0, %v3593_v6 }
 0x67b   : > { %v3621_v0 = vsub.f32 %v7760_v3, %v3605_v46  ;;  %v3576_v57 = vmul.f32 0.5, %v6939_v12  ;;  %v4660_v58 = vpack.c.bf16 %v3670_v1, %v3666_v34  ;;  %v3588_v31 = vfloor.f32 %v3572_v49 }
 0x67c   : > { %v3525_v55 = vmul.f32 %v3509_v60, %v6952_v17  ;;  %v3529_v29 = vmul.f32 %v3513_v40, %v7001_v30  ;;  %4659 = vmatprep.subr.bf16.mxu0 %v4658_v2  ;;  %v3625_v11 = vsub.f32 %v6947_v8, %v3609_v10  ;;  %v3540_v56 = vmul.f32 %v6996_v21, %v7762_v13 }
 0x67d   : > { %v3637_v50 = vmul.f32 2.0, %v3621_v0  ;;  %v3592_v47 = vfloor.f32 %v3576_v57  ;;  %4661 = vmatpush1.bf16.msra.mxu0 %v4660_v58  ;;  %v3604_v54 = vmul.f32 2.0, %v3588_v31  ;;  %v3544_v17 = vmul.f32 %v7037_v41, %v6971_v5 }
 0x67e   : > { %v3541_v36 = vmul.f32 %v3525_v55, %v7763_v7  ;;  %v3545_v44 = vmul.f32 %v3529_v29, %v6981_v53  ;;  %v3641_v35 = vmul.f32 2.0, %v3625_v11  ;;  %v3556_v41 = vadd.f32 %v3540_v56, %v7762_v13  ;;  %v7767_v13 = vld [vmem:[#allocation22_spill] sm:$0xff] }
 0x67f   : > { %v3608_v30 = vmul.f32 2.0, %v3592_v47  ;;  %v3620_v4 = vsub.f32 %v7761_v48, %v3604_v54  ;;  %v3653_v15 = vsub.f32 1.0, %v3637_v50  ;;  %v7764_v45 = vmov 0.0  }
 0x680   : > { %v3557_v20 = vadd.f32 %v3541_v36, %v7763_v7  ;;  %v3561_v8 = vadd.f32 %v3545_v44, %v6981_v53  ;;  %v3657_v14 = vsub.f32 1.0, %v3641_v35  ;;  %4573 = vmatmul.mubr.msk.f32.vlgmr.msra.gmra.mrb[42].mxu0 %vm1037_vm2, %v4741_v24  ;;  %v3560_v39 = vadd.f32 %v3544_v17, %v6971_v5  ;;  %v4743_v5 = vld [vmem:[%s7568_s5 + $0x10] sm:$0xff] }
 0x681   : > { %v3624_v21 = vsub.f32 %v6939_v12, %v3608_v30  ;;  %v3636_v38 = vmul.f32 2.0, %v3620_v4  ;;  %3744 = vmatprep.mubr.f32.mxu0 %v7764_v45  ;;  %v4742_v12 = vld [vmem:[%s7568_s5 + $0x8] sm:$0xff] }
 0x682   : > { %v3669_v53 = vmul.f32 %v3653_v15, %v3557_v20  ;;  %v3673_v42 = vmul.f32 %v3657_v14, %v3561_v8 }
 0x683   : > { %v3640_v33 = vmul.f32 2.0, %v3624_v21  ;;  %v3652_v51 = vsub.f32 1.0, %v3636_v38 }
 0x684   : > { %v4666_v61 = vpack.c.bf16 %v3673_v42, %v3669_v53  ;;  %4574 = vmatmul.mubr.msk.f32.gmra.mrb[44].mxu0 %vm1037_vm2, %v4742_v12 }
 0x685   : > { %v3656_v18 = vsub.f32 1.0, %v3640_v33  ;;  %3750 = vmatprep.mubr.f32.mxu0 %v7764_v45  ;;  %v3668_v52 = vmul.f32 %v3652_v51, %v3556_v41 }
 0x686   : > { %4667 = vmatprep.subr.bf16.mxu1 %v4666_v61 }
 0x687   : > { %v3672_v22 = vmul.f32 %v3656_v18, %v3560_v39 }
 0x688   : > { %4575 = vmatmul.mubr.msk.f32.gmra.mrb[46].mxu0 %vm1037_vm2, %v4743_v5 }
 0x689   : > { %v4668_v3 = vpack.c.bf16 %v3672_v22, %v3668_v52  ;;  %3756 = vmatprep.mubr.f32.mxu0 %v7764_v45 }
 0x68b   : > { %4669 = vmatpush1.bf16.msra.mxu1 %v4668_v3 }
 0x68c   : > { %4576 = vmatmul.mubr.msk.f32.gmra.mrb[48].mxu0 %vm1037_vm2, %v4744_v26 }
 0x68d   : > { %4332 = vmatprep.mubr.f32.mxu0 %v7764_v45 }
 0x68e   : > { %4577 = vmatmul.mubr.msk.f32.vlgmr.msra.gmra.mrb[42].mxu1 %vm1037_vm2, %v4741_v24 }
 0x68f   : > { %3833 = vmatprep.mubr.f32.mxu1 %v7764_v45 }
 0x692   : > { %4578 = vmatmul.mubr.msk.f32.gmra.mrb[44].mxu1 %vm1037_vm2, %v4742_v12 }
 0x693   : > { %3839 = vmatprep.mubr.f32.mxu1 %v7764_v45 }
 0x696   : > { %4579 = vmatmul.mubr.msk.f32.gmra.mrb[46].mxu1 %vm1037_vm2, %v4743_v5 }
 0x697   : > { %3845 = vmatprep.mubr.f32.mxu1 %v7764_v45 }
 0x69a   : > { %4580 = vmatmul.mubr.msk.f32.gmra.mrb[48].mxu1 %vm1037_vm2, %v4744_v26 }
 0x69b   : > { %4403 = vmatprep.mubr.f32.mxu1 %v7764_v45 }
 0x753   : > { %v3740_v25 = vpop.f32.mrb[42].mxu0 }
 0x754   : > { %v3741_v63 = vadd.f32 %v3740_v25, %v7765_v23  ;;  %v3742_v37 = vpop.f32.mrb[43].mxu0 }
 0x755   : > { %v3743_v27 = vadd.f32 %v3742_v37, %v7765_v23 }
 0x756   : > { %v3852_v32 = vmul.f32 0.31830987, %v3741_v63 }
 0x757   : > { %v3853_v62 = vmul.f32 0.31830987, %v3743_v27  ;;  %v3746_v19 = vpop.f32.mrb[44].mxu0 }
 0x758   : > { %v3868_v28 = vadd.f32 0.5, %v3852_v32  ;;  %v3747_v16 = vadd.f32 %v3746_v19, %v7766_v59  ;;  %v3748_v9 = vpop.f32.mrb[45].mxu0 }
 0x759   : > { %v3869_v43 = vadd.f32 0.5, %v3853_v62  ;;  %v3749_v34 = vadd.f32 %v3748_v9, %v7766_v59 }
 0x75a   : > { %v7127_v6 = vfloor.f32 %v3868_v28  ;;  %v3856_v46 = vmul.f32 0.31830987, %v3747_v16 }
 0x75b   : > { %v7129_v1 = vfloor.f32 %v3869_v43  ;;  %v3857_v60 = vmul.f32 0.31830987, %v3749_v34  ;;  %v3752_v40 = vpop.f32.mrb[46].mxu0 }
 0x75c   : > { %v3900_v48 = vmul.f32 3.1414795, %v7127_v6  ;;  %v3872_v49 = vadd.f32 0.5, %v3856_v46  ;;  %v3932_v2 = vmul.f32 0.00011315942, %v7127_v6  ;;  %v3964_v58 = vmul.f32 1.9841873e-09, %v7127_v6 }
 0x75d   : > { %v3901_v10 = vmul.f32 3.1414795, %v7129_v1  ;;  %v3873_v0 = vadd.f32 0.5, %v3857_v60  ;;  %v3933_v55 = vmul.f32 0.00011315942, %v7129_v1  ;;  %v3754_v31 = vpop.f32.mrb[47].mxu0  ;;  %v7142_v56 = vadd.f32 %v3752_v40, %v7767_v13 }
 0x75e   : > { %v3916_v57 = vsub.f32 %v3741_v63, %v3900_v48  ;;  %v7136_v29 = vfloor.f32 %v3872_v49  ;;  %v3965_v50 = vmul.f32 1.9841873e-09, %v7129_v1  ;;  %v7148_v17 = vadd.f32 %v3754_v31, %v7767_v13 }
 0x75f   : > { %v3917_v11 = vsub.f32 %v3743_v27, %v3901_v10  ;;  %v7139_v47 = vfloor.f32 %v3873_v0  ;;  %v7144_v7 = vpop.f32.mrb[48].mxu0  ;;  %v7151_v35 = vmul.f32 0.5, %v7129_v1  ;;  %v3860_v62 = vmul.f32 0.31830987, %v7142_v56 }
 0x760   : > { %v3948_v36 = vsub.f32 %v3916_v57, %v3932_v2  ;;  %v3904_v54 = vmul.f32 3.1414795, %v7136_v29  ;;  %v3936_v4 = vmul.f32 0.00011315942, %v7136_v29  ;;  %v7156_v14 = vpop.f32.mrb[49].mxu0  ;;  %v3968_v38 = vmul.f32 1.9841873e-09, %v7136_v29 }
 0x761   : > { %v3829_v44 = vpop.f32.mrb[42].mxu1  ;;  %v3949_v30 = vsub.f32 %v3917_v11, %v3933_v55  ;;  %v3905_v15 = vmul.f32 3.1414795, %v7139_v47  ;;  %v3937_v42 = vmul.f32 0.00011315942, %v7139_v47  ;;  %v3969_v18 = vmul.f32 1.9841873e-09, %v7139_v47 }
 0x762   : > { %v3830_v20 = vadd.f32 %v3829_v44, %v7765_v23  ;;  %v3831_v8 = vpop.f32.mrb[43].mxu1  ;;  %v7158_v21 = vsub.f32 %v3948_v36, %v3964_v58  ;;  %v3920_v41 = vsub.f32 %v3747_v16, %v3904_v54  ;;  %v3861_v19 = vmul.f32 0.31830987, %v7148_v17 }
 0x763   : > { %v3832_v24 = vadd.f32 %v3831_v8, %v7765_v23  ;;  %v7162_v45 = vsub.f32 %v3949_v30, %v3965_v50  ;;  %v3921_v53 = vsub.f32 %v3749_v34, %v3905_v15  ;;  %v7197_v48 = vmul.f32 0.5, %v7127_v6 }
 0x764   : > { %v3854_v39 = vmul.f32 0.31830987, %v3830_v20  ;;  %v3996_v33 = vmul.f32 %v7158_v21, %v7158_v21  ;;  %v3952_v51 = vsub.f32 %v3920_v41, %v3936_v4  ;;  %v3876_v44 = vadd.f32 0.5, %v3860_v62 }
 0x765   : > { %v3855_v61 = vmul.f32 0.31830987, %v3832_v24  ;;  %v3835_v12 = vpop.f32.mrb[44].mxu1  ;;  %v7170_v52 = vmul.f32 %v7162_v45, %v7162_v45  ;;  %v3953_v3 = vsub.f32 %v3921_v53, %v3937_v42 }
 0x766   : > { %v3870_v22 = vadd.f32 0.5, %v3854_v39  ;;  %v3836_v5 = vadd.f32 %v3835_v12, %v7766_v59  ;;  %v3837_v26 = vpop.f32.mrb[45].mxu1  ;;  %v4012_v25 = vmul.f32 2.608316e-06, %v3996_v33  ;;  %v7173_v63 = vsub.f32 %v3952_v51, %v3968_v38 }
 0x767   : > { %v3871_v23 = vadd.f32 0.5, %v3855_v61  ;;  %v3838_v37 = vadd.f32 %v3837_v26, %v7766_v59  ;;  %v7189_v46 = vmul.f32 2.608316e-06, %v7170_v52  ;;  %v7192_v60 = vsub.f32 %v3953_v3, %v3969_v18 }
 0x768   : > { %v7176_v27 = vfloor.f32 %v3870_v22  ;;  %v3858_v32 = vmul.f32 0.31830987, %v3836_v5  ;;  %v4028_v28 = vadd.f32 -0.0001981069, %v4012_v25  ;;  %v7184_v9 = vmul.f32 %v7173_v63, %v7173_v63 }
 0x769   : > { %v7180_v16 = vfloor.f32 %v3871_v23  ;;  %v3859_v43 = vmul.f32 0.31830987, %v3838_v37  ;;  %v7186_v34 = vpop.f32.mrb[46].mxu1  ;;  %v7208_v4 = vmul.f32 %v7192_v60, %v7192_v60  ;;  %v7221_v51 = vfloor.f32 %v3876_v44 }
 0x76a   : > { %v3902_v59 = vmul.f32 3.1414795, %v7176_v27  ;;  %v7194_v40 = vpop.f32.mrb[47].mxu1  ;;  %v4044_v49 = vmul.f32 %v4028_v28, %v3996_v33  ;;  %v3934_v2 = vmul.f32 0.00011315942, %v7176_v27  ;;  %v3966_v10 = vmul.f32 1.9841873e-09, %v7176_v27 }
 0x76b   : > { %v3903_v0 = vmul.f32 3.1414795, %v7180_v16  ;;  %v3935_v58 = vmul.f32 0.00011315942, %v7180_v16  ;;  %v4016_v55 = vmul.f32 2.608316e-06, %v7184_v9  ;;  %v3874_v31 = vadd.f32 0.5, %v3858_v32 }
 0x76c   : > { %v3918_v57 = vsub.f32 %v3830_v20, %v3902_v59  ;;  %v4060_v11 = vadd.f32 0.008333079, %v4044_v49  ;;  %v3875_v36 = vadd.f32 0.5, %v3859_v43  ;;  %v3967_v39 = vmul.f32 1.9841873e-09, %v7180_v16 }
 0x76d   : > { %v3919_v50 = vsub.f32 %v3832_v24, %v3903_v0  ;;  %v7204_v54 = vpop.f32.mrb[48].mxu1  ;;  %v4032_v8 = vadd.f32 -0.0001981069, %v4016_v55  ;;  %v7210_v15 = vfloor.f32 %v3874_v31  ;;  %v3877_v3 = vadd.f32 0.5, %v3861_v19 }
 0x76e   : > { %v3950_v30 = vsub.f32 %v3918_v57, %v3934_v2  ;;  %v7212_v20 = vpop.f32.mrb[49].mxu1  ;;  %v4076_v41 = vmul.f32 %v4060_v11, %v3996_v33  ;;  %v7215_v53 = vfloor.f32 %v3875_v36  ;;  %v3908_v19 = vmul.f32 3.1414795, %v7221_v51 }
 0x76f   : > { %v3951_v38 = vsub.f32 %v3919_v50, %v3935_v58  ;;  %v4048_v42 = vmul.f32 %v4032_v8, %v7184_v9  ;;  %v3906_v61 = vmul.f32 3.1414795, %v7210_v15  ;;  %v3938_v32 = vmul.f32 0.00011315942, %v7210_v15 }
 0x770   : > { %v7217_v24 = vsub.f32 %v3950_v30, %v3966_v10  ;;  %v4092_v18 = vadd.f32 -0.1666666, %v4076_v41  ;;  %v3907_v22 = vmul.f32 3.1414795, %v7215_v53  ;;  %v3970_v28 = vmul.f32 1.9841873e-09, %v7210_v15 }
 0x771   : > { %v7223_v12 = vsub.f32 %v3951_v38, %v3967_v39  ;;  %v4064_v25 = vadd.f32 0.008333079, %v4048_v42  ;;  %v3922_v23 = vsub.f32 %v3836_v5, %v3906_v61  ;;  %v3939_v59 = vmul.f32 0.00011315942, %v7215_v53 }
 0x772   : > { %v7228_v26 = vmul.f32 %v7217_v24, %v7217_v24  ;;  %v4108_v62 = vmul.f32 %v4092_v18, %v3996_v33  ;;  %v3923_v43 = vsub.f32 %v3838_v37, %v3907_v22  ;;  %v3971_v57 = vmul.f32 1.9841873e-09, %v7215_v53 }
 0x773   : > { %v4080_v2 = vmul.f32 %v4064_v25, %v7184_v9  ;;  %v3954_v10 = vsub.f32 %v3922_v23, %v3938_v32  ;;  %v7238_v0 = vmul.f32 %v7223_v12, %v7223_v12  ;;  %v3940_v33 = vmul.f32 0.00011315942, %v7221_v51 }
 0x774   : > { %v4014_v49 = vmul.f32 2.608316e-06, %v7228_v26  ;;  %v3955_v5 = vsub.f32 %v3923_v43, %v3939_v59  ;;  %v3924_v31 = vsub.f32 %v7142_v56, %v3908_v19  ;;  %v7246_v11 = vmul.f32 2.608316e-06, %v7208_v4 }
 0x775   : > { %v4096_v37 = vadd.f32 -0.1666666, %v4080_v2  ;;  %v7242_v55 = vsub.f32 %v3954_v10, %v3970_v28  ;;  %v3972_v36 = vmul.f32 1.9841873e-09, %v7221_v51  ;;  %v7251_v44 = vfloor.f32 %v3877_v3 }
 0x776   : > { %v4030_v58 = vadd.f32 -0.0001981069, %v4014_v49  ;;  %v7248_v50 = vsub.f32 %v3955_v5, %v3971_v57  ;;  %v3956_v38 = vsub.f32 %v3924_v31, %v3940_v33  ;;  %v4124_v39 = vmul.f32 %v4108_v62, %v7158_v21 }
 0x777   : > { %v4112_v8 = vmul.f32 %v4096_v37, %v7184_v9  ;;  %v4002_v41 = vmul.f32 %v7242_v55, %v7242_v55  ;;  %v7259_v56 = vmul.f32 2.608316e-06, %v7238_v0  ;;  %v3909_v61 = vmul.f32 3.1414795, %v7251_v44 }
 0x778   : > { %v4046_v30 = vmul.f32 %v4030_v58, %v7228_v26  ;;  %v7263_v42 = vmul.f32 %v7248_v50, %v7248_v50  ;;  %v7266_v3 = vsub.f32 %v3956_v38, %v3972_v36  ;;  %v3941_v9 = vmul.f32 0.00011315942, %v7251_v44 }
 0x779   : > { %v4018_v22 = vmul.f32 2.608316e-06, %v4002_v41  ;;  %v3925_v25 = vsub.f32 %v7148_v17, %v3909_v61  ;;  %v3973_v23 = vmul.f32 1.9841873e-09, %v7251_v44  ;;  %v3842_v32 = vadd.f32 %v7186_v34, %v7767_v13  ;;  %v7768_v17 = vld [vmem:[#allocation20_spill] sm:$0xff] }
 0x77a   : > { %v4062_v18 = vadd.f32 0.008333079, %v4046_v30  ;;  %v3844_v62 = vadd.f32 %v7194_v40, %v7767_v13  ;;  %v4128_v43 = vmul.f32 %v4112_v8, %v7173_v63  ;;  %v4004_v49 = vmul.f32 %v7266_v3, %v7266_v3 }
 0x77b   : > { %v4034_v59 = vadd.f32 -0.0001981069, %v4018_v22  ;;  %v3957_v2 = vsub.f32 %v3925_v25, %v3941_v9  ;;  %v3862_v10 = vmul.f32 0.31830987, %v3842_v32  ;;  %v3759_v5 = vadd.f32 %v7144_v7, %v7768_v17 }
 0x77c   : > { %v4078_v28 = vmul.f32 %v4062_v18, %v7228_v26  ;;  %v3863_v19 = vmul.f32 0.31830987, %v3844_v62  ;;  %v4020_v34 = vmul.f32 2.608316e-06, %v4004_v49  ;;  %v3761_v13 = vadd.f32 %v7156_v14, %v7768_v17 }
 0x77d   : > { %v4050_v33 = vmul.f32 %v4034_v59, %v4002_v41  ;;  %v7283_v40 = vsub.f32 %v3957_v2, %v3973_v23  ;;  %v3878_v58 = vadd.f32 0.5, %v3862_v10  ;;  %v3864_v31 = vmul.f32 0.31830987, %v3759_v5 }
 0x77e   : > { %v4094_v57 = vadd.f32 -0.1666666, %v4078_v28  ;;  %v3879_v37 = vadd.f32 0.5, %v3863_v19  ;;  %v4036_v30 = vadd.f32 -0.0001981069, %v4020_v34  ;;  %v7294_v22 = vadd.f32 %v4124_v39, %v7158_v21 }
 0x77f   : > { %v4066_v36 = vadd.f32 0.008333079, %v4050_v33  ;;  %v3865_v8 = vmul.f32 0.31830987, %v3761_v13  ;;  %v7287_v38 = vmul.f32 %v7283_v40, %v7283_v40  ;;  %v7289_v61 = vfloor.f32 %v3878_v58 }
 0x780   : > { %v7291_v7 = vfloor.f32 %v3879_v37  ;;  %v3880_v18 = vadd.f32 0.5, %v3864_v31  ;;  %v4052_v9 = vmul.f32 %v4036_v30, %v4004_v49  ;;  %v7297_v23 = vadd.f32 %v4128_v43, %v7173_v63 }
 0x781   : > { %7769 = vst [vmem:[#allocation10_spill] sm:$0xff] %v7289_v61  ;;  %v4082_v14 = vmul.f32 %v4066_v36, %v4002_v41  ;;  %v3881_v25 = vadd.f32 0.5, %v3865_v8  ;;  %v7300_v28 = vmul.f32 2.608316e-06, %v7263_v42  ;;  %v7303_v59 = vmul.f32 2.608316e-06, %v7287_v38 }
 0x782   : > { %7770 = vst [vmem:[#allocation11_spill] sm:$0xff] %v7291_v7  ;;  %v3910_v2 = vmul.f32 3.1414795, %v7289_v61  ;;  %v4110_v10 = vmul.f32 %v4094_v57, %v7228_v26  ;;  %v4068_v33 = vadd.f32 0.008333079, %v4052_v9  ;;  %v3942_v21 = vmul.f32 0.00011315942, %v7289_v61 }
 0x783   : > { %v4098_v19 = vadd.f32 -0.1666666, %v4082_v14  ;;  %v3911_v34 = vmul.f32 3.1414795, %v7291_v7  ;;  %v3943_v63 = vmul.f32 0.00011315942, %v7291_v7  ;;  %v7310_v43 = vfloor.f32 %v3880_v18 }
 0x784   : > { %v3926_v39 = vsub.f32 %v3842_v32, %v3910_v2  ;;  %v4084_v37 = vmul.f32 %v4068_v33, %v4004_v49  ;;  %v3974_v31 = vmul.f32 1.9841873e-09, %v7289_v61  ;;  %v7313_v36 = vfloor.f32 %v3881_v25 }
 0x785   : > { %v4114_v58 = vmul.f32 %v4098_v19, %v4002_v41  ;;  %v3927_v8 = vsub.f32 %v3844_v62, %v3911_v34  ;;  %v3912_v26 = vmul.f32 3.1414795, %v7310_v43  ;;  %v3848_v57 = vadd.f32 %v7204_v54, %v7768_v17 }
 0x786   : > { %v3958_v30 = vsub.f32 %v3926_v39, %v3942_v21  ;;  %v4126_v32 = vmul.f32 %v4110_v10, %v7217_v24  ;;  %v4100_v14 = vadd.f32 -0.1666666, %v4084_v37  ;;  %v3975_v9 = vmul.f32 1.9841873e-09, %v7291_v7 }
 0x787   : > { %v3913_v18 = vmul.f32 3.1414795, %v7313_v36  ;;  %v3959_v2 = vsub.f32 %v3927_v8, %v3943_v63  ;;  %v3928_v19 = vsub.f32 %v3759_v5, %v3912_v26  ;;  %v3944_v25 = vmul.f32 0.00011315942, %v7310_v43 }
 0x788   : > { %v7321_v41 = vsub.f32 %v3958_v30, %v3974_v31  ;;  %v4130_v62 = vmul.f32 %v4114_v58, %v7242_v55  ;;  %v3976_v33 = vmul.f32 1.9841873e-09, %v7310_v43  ;;  %v3945_v54 = vmul.f32 0.00011315942, %v7313_v36 }
 0x789   : > { %v3929_v21 = vsub.f32 %v3761_v13, %v3913_v18  ;;  %v4116_v39 = vmul.f32 %v4100_v14, %v4004_v49  ;;  %v3960_v34 = vsub.f32 %v3928_v19, %v3944_v25  ;;  %v3866_v37 = vmul.f32 0.31830987, %v3848_v57 }
 0x78a   : > { %7771 = vst [vmem:[#allocation25_spill] sm:$0xff] %v7321_v41  ;;  %v7329_v10 = vmul.f32 %v7321_v41, %v7321_v41  ;;  %v3977_v63 = vmul.f32 1.9841873e-09, %v7313_v36  ;;  %v3850_v5 = vadd.f32 %v7212_v20, %v7768_v17  ;;  %v4029_v58 = vadd.f32 -0.0001981069, %v7189_v46 }
 0x78b   : > { %v3961_v31 = vsub.f32 %v3929_v21, %v3945_v54  ;;  %v7336_v13 = vsub.f32 %v3959_v2, %v3975_v9  ;;  %v7338_v8 = vsub.f32 %v3960_v34, %v3976_v33  ;;  %v3882_v49 = vadd.f32 0.5, %v3866_v37 }
 0x78c   : > { %v4022_v30 = vmul.f32 2.608316e-06, %v7329_v10  ;;  %v7341_v26 = vadd.f32 %v4126_v32, %v7217_v24  ;;  %v3867_v18 = vmul.f32 0.31830987, %v3850_v5  ;;  %v4033_v19 = vadd.f32 -0.0001981069, %v7246_v11 }
 0x78d   : > { %7772 = vst [vmem:[#allocation24_spill] sm:$0xff] %v7336_v13  ;;  %v7343_v14 = vsub.f32 %v3961_v31, %v3977_v63  ;;  %v7347_v25 = vadd.f32 %v4130_v62, %v7242_v55  ;;  %v4008_v46 = vmul.f32 %v7338_v8, %v7338_v8  ;;  %v7351_v17 = vfloor.f32 %v3882_v49 }
 0x78e   : > { %v4038_v20 = vadd.f32 -0.0001981069, %v4022_v30  ;;  %v4132_v9 = vmul.f32 %v4116_v39, %v7266_v3  ;;  %v3883_v2 = vadd.f32 0.5, %v3867_v18  ;;  %v4045_v24 = vmul.f32 %v4029_v58, %v7170_v52 }
 0x78f   : > { %7773 = vst [vmem:[#allocation26_spill] sm:$0xff] %v7351_v17  ;;  %v4049_v32 = vmul.f32 %v4033_v19, %v7208_v4  ;;  %v7359_v11 = vmul.f32 %v7336_v13, %v7336_v13  ;;  %v4024_v55 = vmul.f32 2.608316e-06, %v4008_v46  ;;  %v3914_v62 = vmul.f32 3.1414795, %v7351_v17 }
 0x790   : > { %v4054_v33 = vmul.f32 %v4038_v20, %v7329_v10  ;;  %v7364_v21 = vmul.f32 %v7343_v14, %v7343_v14  ;;  %v3946_v54 = vmul.f32 0.00011315942, %v7351_v17  ;;  %v7367_v39 = vfloor.f32 %v3883_v2 }
 0x791   : > { %v4061_v34 = vadd.f32 0.008333079, %v4045_v24  ;;  %v4040_v31 = vadd.f32 -0.0001981069, %v4024_v55  ;;  %v3930_v63 = vsub.f32 %v3848_v57, %v3914_v62  ;;  %v4065_v58 = vadd.f32 0.008333079, %v4049_v32 }
 0x792   : > { %v4070_v37 = vadd.f32 0.008333079, %v4054_v33  ;;  %v3978_v30 = vmul.f32 1.9841873e-09, %v7351_v17  ;;  %v3915_v49 = vmul.f32 3.1414795, %v7367_v39  ;;  %v4173_v57 = vfloor.f32 %v7151_v35 }
 0x793   : > { %v3947_v18 = vmul.f32 0.00011315942, %v7367_v39  ;;  %v4077_v19 = vmul.f32 %v4061_v34, %v7170_v52  ;;  %v4056_v13 = vmul.f32 %v4040_v31, %v4008_v46  ;;  %v3962_v41 = vsub.f32 %v3930_v63, %v3946_v54 }
 0x794   : > { %v4086_v20 = vmul.f32 %v4070_v37, %v7329_v10  ;;  %v4081_v2 = vmul.f32 %v4065_v58, %v7208_v4  ;;  %v3931_v61 = vsub.f32 %v3850_v5, %v3915_v49  ;;  %v4161_v33 = vmul.f32 0.5, %v7139_v47 }
 0x795   : > { %v4093_v24 = vadd.f32 -0.1666666, %v4077_v19  ;;  %v4072_v32 = vadd.f32 0.008333079, %v4056_v13  ;;  %v7377_v55 = vsub.f32 %v3962_v41, %v3978_v30  ;;  %v3979_v62 = vmul.f32 1.9841873e-09, %v7367_v39 }
 0x796   : > { %v4097_v17 = vadd.f32 -0.1666666, %v4081_v2  ;;  %v3963_v7 = vsub.f32 %v3931_v61, %v3947_v18  ;;  %v4177_v37 = vfloor.f32 %v4161_v33  ;;  %v4189_v31 = vmul.f32 2.0, %v4173_v57 }
 0x797   : > { %v4109_v34 = vmul.f32 %v4093_v24, %v7170_v52  ;;  %v4102_v54 = vadd.f32 -0.1666666, %v4086_v20  ;;  %v4088_v63 = vmul.f32 %v4072_v32, %v4008_v46  ;;  %v7383_v5 = vmul.f32 %v7377_v55, %v7377_v55 }
 0x798   : > { %v4113_v58 = vmul.f32 %v4097_v17, %v7208_v4  ;;  %v7386_v35 = vsub.f32 %v3963_v7, %v3979_v62  ;;  %v4193_v13 = vmul.f32 2.0, %v4177_v37  ;;  %v4205_v30 = vsub.f32 %v7129_v1, %v4189_v31 }
 0x799   : > { %v4125_v41 = vmul.f32 %v4109_v34, %v7162_v45  ;;  %v7391_v61 = vadd.f32 %v4132_v9, %v7266_v3  ;;  %v4104_v52 = vadd.f32 -0.1666666, %v4088_v63  ;;  %v4026_v49 = vmul.f32 2.608316e-06, %v7383_v5 }
 0x79a   : > { %v4129_v18 = vmul.f32 %v4113_v58, %v7192_v60  ;;  %v7396_v19 = vmul.f32 2.608316e-06, %v7359_v11  ;;  %v7400_v4 = vmul.f32 %v7386_v35, %v7386_v35  ;;  %v4209_v7 = vsub.f32 %v7139_v47, %v4193_v13 }
 0x79b   : > { %v4221_v17 = vmul.f32 2.0, %v4205_v30  ;;  %v7404_v1 = vmul.f32 %v4102_v54, %v7329_v10  ;;  %v7407_v3 = vmul.f32 2.608316e-06, %v7364_v21  ;;  %v4042_v9 = vadd.f32 -0.0001981069, %v4026_v49 }
 0x79c   : > { %v4141_v20 = vadd.f32 %v4125_v41, %v7162_v45  ;;  %v4120_v2 = vmul.f32 %v4104_v52, %v4008_v46  ;;  %v4145_v24 = vadd.f32 %v4129_v18, %v7192_v60  ;;  %v4225_v33 = vmul.f32 2.0, %v4209_v7 }
 0x79d   : > { %v4160_v57 = vmul.f32 0.5, %v7136_v29  ;;  %v4058_v32 = vmul.f32 %v4042_v9, %v7383_v5  ;;  %v4237_v62 = vsub.f32 1.0, %v4221_v17  ;;  %v4172_v47 = vfloor.f32 %v7197_v48 }
 0x79e   : > { %v4031_v10 = vadd.f32 -0.0001981069, %v7259_v56  ;;  %v7416_v34 = vmul.f32 2.608316e-06, %v7400_v4  ;;  %v4241_v37 = vsub.f32 1.0, %v4225_v33  ;;  %v4159_v48 = vmul.f32 0.5, %v7180_v16 }
 0x79f   : > { %v4176_v31 = vfloor.f32 %v4160_v57  ;;  %v4035_v45 = vadd.f32 -0.0001981069, %v7300_v28  ;;  %v4074_v46 = vadd.f32 0.008333079, %v4058_v32  ;;  %v4253_v54 = vmul.f32 %v4237_v62, %v4141_v20 }
 0x7a0   : > { %v4188_v60 = vmul.f32 2.0, %v4172_v47  ;;  %v4047_v63 = vmul.f32 %v4031_v10, %v7238_v0  ;;  %v4257_v58 = vmul.f32 %v4241_v37, %v4145_v24  ;;  %v4163_v49 = vmul.f32 0.5, %v7215_v53 }
 0x7a1   : > { %v4192_v41 = vmul.f32 2.0, %v4176_v31  ;;  %v4051_v13 = vmul.f32 %v4035_v45, %v7263_v42  ;;  %v4090_v56 = vmul.f32 %v4074_v46, %v7383_v5  ;;  %v4175_v17 = vfloor.f32 %v4159_v48 }
 0x7a2   : > { %v4204_v30 = vsub.f32 %v7127_v6, %v4188_v60  ;;  %v4063_v52 = vadd.f32 0.008333079, %v4047_v63  ;;  %v4670_v18 = vpack.c.bf16 %v4257_v58, %v4253_v54  ;;  %v4136_v9 = vmul.f32 %v4120_v2, %v7338_v8 }
 0x7a3   : > { %v4208_v28 = vsub.f32 %v7136_v29, %v4192_v41  ;;  %v4067_v7 = vadd.f32 0.008333079, %v4051_v13  ;;  %v4179_v33 = vfloor.f32 %v4163_v49  ;;  %v4191_v62 = vmul.f32 2.0, %v4175_v17 }
 0x7a4   : > { %v4220_v20 = vmul.f32 2.0, %v4204_v30  ;;  %v4079_v24 = vmul.f32 %v4063_v52, %v7238_v0  ;;  %4671 = vmatprep.subr.bf16.mxu0 %v4670_v18  ;;  %v4158_v6 = vmul.f32 0.5, %v7176_v27  ;;  %v4106_v47 = vadd.f32 -0.1666666, %v4090_v56 }
 0x7a5   : > { %v4224_v57 = vmul.f32 2.0, %v4208_v28  ;;  %v4083_v32 = vmul.f32 %v4067_v7, %v7263_v42  ;;  %v4195_v31 = vmul.f32 2.0, %v4179_v33  ;;  %v4207_v46 = vsub.f32 %v7180_v16, %v4191_v62 }
 0x7a6   : > { %v4236_v10 = vsub.f32 1.0, %v4220_v20  ;;  %v4095_v37 = vadd.f32 -0.1666666, %v4079_v24  ;;  %v4162_v2 = vmul.f32 0.5, %v7210_v15  ;;  %v7433_v54 = vadd.f32 %v4136_v9, %v7338_v8 }
 0x7a7   : > { %v4240_v29 = vsub.f32 1.0, %v4224_v57  ;;  %v4099_v45 = vadd.f32 -0.1666666, %v4083_v32  ;;  %v4211_v58 = vsub.f32 %v7215_v53, %v4195_v31  ;;  %v4223_v48 = vmul.f32 2.0, %v4207_v46 }
 0x7a8   : > { %v4252_v60 = vmul.f32 %v4236_v10, %v7294_v22  ;;  %v4111_v63 = vmul.f32 %v4095_v37, %v7238_v0  ;;  %v4174_v56 = vfloor.f32 %v4158_v6  ;;  %v7441_v30 = vmul.f32 %v4106_v47, %v7383_v5 }
 0x7a9   : > { %v4256_v41 = vmul.f32 %v4240_v29, %v7297_v23  ;;  %v4115_v13 = vmul.f32 %v4099_v45, %v7263_v42  ;;  %v4227_v52 = vmul.f32 2.0, %v4211_v58  ;;  %v4178_v8 = vfloor.f32 %v4162_v2 }
 0x7aa   : > { %v4127_v16 = vmul.f32 %v4111_v63, %v7223_v12  ;;  %v4239_v18 = vsub.f32 1.0, %v4223_v48  ;;  %v4190_v0 = vmul.f32 2.0, %v4174_v56  ;;  %v4037_v42 = vadd.f32 -0.0001981069, %v7303_v59 }
 0x7ab   : > { %v4672_v49 = vpack.c.bf16 %v4256_v41, %v4252_v60  ;;  %v4131_v22 = vmul.f32 %v4115_v13, %v7248_v50  ;;  %v4243_v28 = vsub.f32 1.0, %v4227_v52  ;;  %v4194_v23 = vmul.f32 2.0, %v4178_v8 }
 0x7ac   : > { %v4143_v53 = vadd.f32 %v4127_v16, %v7223_v12  ;;  %v4206_v5 = vsub.f32 %v7176_v27, %v4190_v0  ;;  %v4041_v17 = vadd.f32 -0.0001981069, %v7407_v3  ;;  %v4165_v9 = vmul.f32 0.5, %v7251_v44 }
 0x7ad   : > { %4673 = vmatpush1.bf16.msra.mxu0 %v4672_v49  ;;  %v4147_v7 = vadd.f32 %v4131_v22, %v7248_v50  ;;  %v4210_v24 = vsub.f32 %v7210_v15, %v4194_v23  ;;  %v4053_v33 = vmul.f32 %v4037_v42, %v7287_v38  ;;  %v4169_v12 = vmul.f32 0.5, %v7313_v36 }
 0x7ae   : > { %v4255_v20 = vmul.f32 %v4239_v18, %v4143_v53  ;;  %v4222_v32 = vmul.f32 2.0, %v4206_v5  ;;  %v4057_v59 = vmul.f32 %v4041_v17, %v7364_v21  ;;  %v4181_v62 = vfloor.f32 %v4165_v9  ;;  %v7774_v17 = vld [vmem:[#allocation11_spill] sm:$0xff] }
 0x7af   : > { %v4259_v57 = vmul.f32 %v4243_v28, %v4147_v7  ;;  %v4226_v6 = vmul.f32 2.0, %v4210_v24  ;;  %v4069_v50 = vadd.f32 0.008333079, %v4053_v33  ;;  %v4185_v47 = vfloor.f32 %v4169_v12 }
 0x7b0   : > { %v4164_v27 = vmul.f32 0.5, %v7221_v51  ;;  %v4238_v10 = vsub.f32 1.0, %v4222_v32  ;;  %v4073_v37 = vadd.f32 0.008333079, %v4057_v59  ;;  %v4197_v31 = vmul.f32 2.0, %v4181_v62 }
 0x7b1   : > { %v4678_v3 = vpack.c.bf16 %v4259_v57, %v4255_v20  ;;  %v4242_v29 = vsub.f32 1.0, %v4226_v6  ;;  %v4085_v15 = vmul.f32 %v4069_v50, %v7287_v38  ;;  %v4201_v45 = vmul.f32 2.0, %v4185_v47 }
 0x7b2   : > { %v4168_v46 = vmul.f32 0.5, %v7310_v43  ;;  %v4254_v2 = vmul.f32 %v4238_v10, %v7341_v26  ;;  %v4089_v60 = vmul.f32 %v4073_v37, %v7364_v21  ;;  %v4213_v63 = vsub.f32 %v7251_v44, %v4197_v31  ;;  %v7775_v37 = vld [vmem:[#allocation10_spill] sm:$0xff] }
 0x7b3   : > { %4679 = vmatprep.subr.bf16.mxu1 %v4678_v3  ;;  %v4180_v58 = vfloor.f32 %v4164_v27  ;;  %v4258_v41 = vmul.f32 %v4242_v29, %v7347_v25  ;;  %v4101_v13 = vadd.f32 -0.1666666, %v4085_v15  ;;  %v4217_v48 = vsub.f32 %v7313_v36, %v4201_v45  ;;  %v7776_v45 = vld [vmem:[#allocation26_spill] sm:$0xff] }
 0x7b4   : > { %v4184_v56 = vfloor.f32 %v4168_v46  ;;  %v4105_v16 = vadd.f32 -0.1666666, %v4089_v60  ;;  %v4229_v52 = vmul.f32 2.0, %v4213_v63  ;;  %v4039_v49 = vadd.f32 -0.0001981069, %v7396_v19 }
 0x7b5   : > { %v4196_v8 = vmul.f32 2.0, %v4180_v58  ;;  %v4680_v22 = vpack.c.bf16 %v4258_v41, %v4254_v2  ;;  %v4117_v18 = vmul.f32 %v4101_v13, %v7287_v38  ;;  %v4233_v26 = vmul.f32 2.0, %v4217_v48  ;;  %v7777_v13 = vld [vmem:[#allocation25_spill] sm:$0xff] }
 0x7b6   : > { %v4200_v0 = vmul.f32 2.0, %v4184_v56  ;;  %v4121_v53 = vmul.f32 %v4105_v16, %v7364_v21  ;;  %v4245_v44 = vsub.f32 1.0, %v4229_v52  ;;  %v4043_v25 = vadd.f32 -0.0001981069, %v7416_v34  ;;  %v7778_v56 = vld [vmem:[#allocation24_spill] sm:$0xff] }
 0x7b7   : > { %v4212_v28 = vsub.f32 %v7221_v51, %v4196_v8  ;;  %4681 = vmatpush1.bf16.msra.mxu1 %v4680_v22  ;;  %v4133_v36 = vmul.f32 %v4117_v18, %v7283_v40  ;;  %v4249_v23 = vsub.f32 1.0, %v4233_v26  ;;  %v4055_v19 = vmul.f32 %v4039_v49, %v7359_v11 }
 0x7b8   : > { %v4216_v42 = vsub.f32 %v7310_v43, %v4200_v0  ;;  %v4137_v7 = vmul.f32 %v4121_v53, %v7343_v14  ;;  %v4059_v5 = vmul.f32 %v4043_v25, %v7400_v4  ;;  %v4167_v21 = vmul.f32 0.5, %v7774_v17  ;;  %v4745_v53 = vld [vmem:[%s7570_s7] sm:$0x1] }
 0x7b9   : > { %v4228_v38 = vmul.f32 2.0, %v4212_v28  ;;  %v4149_v9 = vadd.f32 %v4133_v36, %v7283_v40  ;;  %v4071_v20 = vadd.f32 0.008333079, %v4055_v19  ;;  %v4171_v34 = vmul.f32 0.5, %v7367_v39 }
 0x7ba   : > { %v4232_v51 = vmul.f32 2.0, %v4216_v42  ;;  %v4153_v24 = vadd.f32 %v4137_v7, %v7343_v14  ;;  %v4075_v12 = vadd.f32 0.008333079, %v4059_v5  ;;  %v4183_v43 = vfloor.f32 %v4167_v21  ;;  %v7779_v21 = vld [vmem:[#allocation23_spill] sm:$0xff] }
 0x7bb   : > { %v4244_v33 = vsub.f32 1.0, %v4228_v38  ;;  %v4261_v57 = vmul.f32 %v4245_v44, %v4149_v9  ;;  %v4087_v59 = vmul.f32 %v4071_v20, %v7359_v11  ;;  %v4187_v62 = vfloor.f32 %v4171_v34 }
 0x7bc   : > { %v4248_v32 = vsub.f32 1.0, %v4232_v51  ;;  %v4265_v6 = vmul.f32 %v4249_v23, %v4153_v24  ;;  %v4091_v47 = vmul.f32 %v4075_v12, %v7400_v4  ;;  %v4199_v40 = vmul.f32 2.0, %v4183_v43 }
 0x7bd   : > { %v4260_v50 = vmul.f32 %v4244_v33, %v7391_v61  ;;  %v4103_v3 = vadd.f32 -0.1666666, %v4087_v59  ;;  %v4203_v10 = vmul.f32 2.0, %v4187_v62  ;;  %v4166_v14 = vmul.f32 0.5, %v7775_v37 }
 0x7be   : > { %v4264_v27 = vmul.f32 %v4248_v32, %v7433_v54  ;;  %v4674_v31 = vpack.c.bf16 %v4265_v6, %v4261_v57  ;;  %v4107_v29 = vadd.f32 -0.1666666, %v4091_v47  ;;  %v4215_v15 = vsub.f32 %v7774_v17, %v4199_v40  ;;  %v7780_v57 = vld [vmem:[#allocation19_spill] sm:$0xff] }
 0x7bf   : > { %v4170_v46 = vmul.f32 0.5, %v7776_v45  ;;  %v4119_v60 = vmul.f32 %v4103_v3, %v7359_v11  ;;  %v4219_v61 = vsub.f32 %v7367_v39, %v4203_v10  ;;  %v4182_v63 = vfloor.f32 %v4166_v14 }
 0x7c0   : > { %v4676_v2 = vpack.c.bf16 %v4264_v27, %v4260_v50  ;;  %4675 = vmatprep.subr.bf16.mxu0 %v4674_v31  ;;  %v4123_v58 = vmul.f32 %v4107_v29, %v7400_v4  ;;  %v4231_v54 = vmul.f32 2.0, %v4215_v15  ;;  %v4134_v48 = vmul.f32 %v7404_v1, %v7777_v13 }
 0x7c1   : > { %v4186_v41 = vfloor.f32 %v4170_v46  ;;  %v4135_v16 = vmul.f32 %v4119_v60, %v7778_v56  ;;  %v4235_v52 = vmul.f32 2.0, %v4219_v61  ;;  %v4198_v8 = vmul.f32 2.0, %v4182_v63 }
 0x7c2   : > { %4677 = vmatpush1.bf16.msra.mxu0 %v4676_v2  ;;  %v4138_v49 = vmul.f32 %v7441_v30, %v7377_v55  ;;  %v4139_v11 = vmul.f32 %v4123_v58, %v7386_v35  ;;  %v4247_v26 = vsub.f32 1.0, %v4231_v54  ;;  %v4150_v30 = vadd.f32 %v4134_v48, %v7777_v13 }
 0x7c3   : > { %v4202_v39 = vmul.f32 2.0, %v4186_v41  ;;  %v4151_v22 = vadd.f32 %v4135_v16, %v7778_v56  ;;  %v4214_v4 = vsub.f32 %v7775_v37, %v4198_v8  ;;  %v4251_v0 = vsub.f32 1.0, %v4235_v52 }
 0x7c4   : > { %v4155_v18 = vadd.f32 %v4139_v11, %v7386_v35  ;;  %v4154_v28 = vadd.f32 %v4138_v49, %v7377_v55 }
 0x7c5   : > { %v4218_v1 = vsub.f32 %v7776_v45, %v4202_v39  ;;  %4581 = vmatmul.mubr.msk.f32.vlgmr.msra.gmra.mrb[50].mxu0 %vm1037_vm2, %v4745_v53  ;;  %v4230_v44 = vmul.f32 2.0, %v4214_v4  ;;  %v4263_v25 = vmul.f32 %v4247_v26, %v4151_v22 }
 0x7c6   : > { %v4267_v36 = vmul.f32 %v4251_v0, %v4155_v18 }
 0x7c7   : > { %v4234_v23 = vmul.f32 2.0, %v4218_v1  ;;  %v4246_v35 = vsub.f32 1.0, %v4230_v44 }
 0x7c8   : > { %v4682_v42 = vpack.c.bf16 %v4267_v36, %v4263_v25 }
 0x7c9   : > { %v4250_v19 = vsub.f32 1.0, %v4234_v23  ;;  %v4262_v7 = vmul.f32 %v4246_v35, %v4150_v30 }
 0x7ca   : > { %4683 = vmatprep.subr.bf16.mxu1 %v4682_v42 }
 0x7cb   : > { %v4266_v38 = vmul.f32 %v4250_v19, %v4154_v28 }
 0x7cd   : > { %v4684_v5 = vpack.c.bf16 %v4266_v38, %v4262_v7 }
 0x7cf   : > { %4685 = vmatpush1.bf16.msra.mxu1 %v4684_v5 }
 0x7d2   : > { %4582 = vmatmul.mubr.msk.f32.vlgmr.msra.gmra.mrb[50].mxu1 %vm1037_vm2, %v4745_v53 }
 0x898   : > { %v4334_v17 = vpop.f32.mrb[50].mxu0 }
 0x899   : > { %v4335_v9 = vadd.f32 %v4334_v17, %v7779_v21  ;;  %v4336_v51 = vpop.f32.mrb[51].mxu0 }
 0x89a   : > { %v4337_v55 = vadd.f32 %v4336_v51, %v7779_v21 }
 0x89c   : > { %v4414_v20 = vcombine.low %v4335_v9, %v4337_v55 }
 0x89e   : > { %v4422_v32 = vrot.slane %v4414_v20, %v7780_v57 }
 0x8a5   : > { %v4405_v34 = vpop.f32.mrb[50].mxu1 }
 0x8a6   : > { %v4406_v24 = vadd.f32 %v4405_v34, %v7779_v21  ;;  %v4407_v33 = vpop.f32.mrb[51].mxu1 }
 0x8a7   : > { %v4408_v12 = vadd.f32 %v4407_v33, %v7779_v21 }
 0x8a9   : > { %v4415_v43 = vcombine.low %v4406_v24, %v4408_v12 }
 0x8ab   : > { %v4429_v59 = vrot.slane %v4415_v43, %v7780_v57 }
 0x8ad   : > { %v4430_v62 = vcombine.low %v4422_v32, %v4429_v59 }
 0x8af   : > { %v4437_v6 = vrot.slane %v4430_v62, %v7780_v57 }
 0x8b1   : > { %4583 = vst.msk [vmem:[%s6669_s25 + $0x4] sm:$0xf] %vm6663_vm3, %v4437_v6 }
 0x8b2   : > { %4759 = shalt.err (!%p4756_p3)
}
 0x8b3   : > { %s4760_s23 = scalar_lea.hbm %s7516_s15, 128  ;;  %s4764_s10 = scalar_lea.hbm %s7572_s9, 256 }
 0x8b4   : > { %p4761_p4 = scmp.ne.s32.totalorder %s7516_s15, %s4760_s23  ;;  %p4765_p9 = scmp.lt.u32.totalorder %s7516_s15, %s7572_s9 }
 0x8b5   : > { %p4766_p10 = scmp.lt.u32.totalorder %s4764_s10, %s4760_s23  ;;  %p4768_p12 = scmp.lt.u32.totalorder %s4760_s23, %s7516_s15 }
 0x8b6   : > { %p4762_p7 = pnand %p4761_p4, %p4906_p5 }
 0x8b7   : > { %p4767_p11 = por %p4766_p10, %p4765_p9 }
 0x8b8   : > { %p4763_p8 = pneg %p4762_p7 }
 0x8b9   : > { %p4769_p13 = por %p4768_p12, %p4767_p11 }
 0x8bb   : > { %p4770_p0 = pnand %p4769_p13, %p4763_p8 }
 0x8bd   : > { %4773 = shalt.err (!%p4770_p0)
}
 0x8be   : > { %4686 = dma.vmem_to_hbm [thread:$0]  (%p4906_p5), %s7518_s18, 128, %s7516_s15, %s4442_s26  }
 0x8bf PF: > { %p4692_p1 = scmp.ge.s32.totalorder %s4808_s14, 2  ;;  %s4468_s24 = sand.u32 1, %s4796_s11  }
 0x8c0   : > { %s4469_s8 = scalar_lea.sflag [#allocation4], %s4468_s24 }
 0x8c1   : > { %p4689_p2 = pnand %p4692_p1, %p4910_p6 }
 0x8c3   : > { %4791 = dma.done.wait (!%p4689_p2), %s4469_s8, 128  }
 0x8c4   : > { %4793 = vsyncadd (!%p4689_p2), %s4469_s8, 4294967168  ;;  %p21_p3 = scmp.ge.s32.totalorder %s4893_s16, 4   ;;  %s7782_s11 = smov %s4800_s12 }
 0x8c5   : > { %s7783_s12 = smov %s4804_s13  ;;  %s7784_s13 = smov %s4904_s19 }
 0x8c6   : > { %s7785_s14 = smov %s4893_s16  ;;  %23 = sbr.rel (!%p21_p3) target bundleno = 6 (0x6), region = 93 }
 0x8cd   :  { %4474 = vsyncpa [#allocation4], 1 }
 0x8ce   :  { %4476 = vsyncpa [#allocation4 + $0x1], 1 }

</bundles_post_ra>
